<compile_context>
chip_gen: v7x
topology: tpu7x:2x2x1
jax: 0.10.0
libtpu: 0.0.40
codegen_flags: <defaults>
</compile_context>

<pallas_src>
import functools

import jax
import jax.numpy as jnp
from jax.experimental import pallas as pl
from jax.experimental.pallas import tpu as pltpu


def _vmem():
    # whole-array-resident-in-VMEM spec (every operand here is tiny)
    return pl.BlockSpec(memory_space=pltpu.MemorySpace.VMEM)


# ---------------------------------------------------------------------------
# Pallas kernels
# ---------------------------------------------------------------------------

def _make_conv_bn_act_kernel(groups, taps_per_group, fuse_bn, act):
    """Fused (sum-of-tap matmuls) + bias [+ BatchNorm2d(train)] + activation.

    Refs:
      x_ref : (groups*taps_per_group, M, Cin)  bf16  -- one 2-D patch slab per tap
      w_ref : (groups*taps_per_group, Cin, Cout) bf16 -- per-tap weight matrix
      b_ref : (1, Cout) f32 bias
      g_ref / beta_ref : (1, Cout) f32 BN affine params (only when fuse_bn)
      o_ref : (groups, M, Cout) f32
    """

    def kernel(*refs):
        if fuse_bn:
            x_ref, w_ref, b_ref, g_ref, beta_ref, o_ref = refs
        else:
            x_ref, w_ref, b_ref, o_ref = refs
        _, m, _ = x_ref.shape
        cout = w_ref.shape[-1]
        bias = b_ref[...]

        # matmul phase: accumulate taps on the MXU (bf16 in, f32 accumulation),
        # one register accumulator per group, single store per group.
        for g in range(groups):
            acc = jnp.zeros((m, cout), jnp.float32)
            for t in range(taps_per_group):
                i = g * taps_per_group + t
                acc = acc + jnp.dot(x_ref[i], w_ref[i],
                                    preferred_element_type=jnp.float32)
            y = acc + bias
            if not fuse_bn:
                if act == "relu":
                    y = jnp.maximum(y, 0.0)
                elif act == "sigmoid":
                    y = jax.nn.sigmoid(y)
            o_ref[g, :, :] = y

        # epilogue phase: BatchNorm over all groups*M positions (biased batch
        # stats, like nn.BatchNorm2d in training mode) + ReLU, in the same kernel.
        if fuse_bn:
            yall = o_ref[...]                                   # (groups, M, Cout)
            inv_n = 1.0 / float(groups * m)
            mean = jnp.sum(jnp.sum(yall, axis=0), axis=0, keepdims=True) * inv_n
            yc = yall - mean
            var = jnp.sum(jnp.sum(yc * yc, axis=0), axis=0, keepdims=True) * inv_n
            yn = yc * jax.lax.rsqrt(var + 1e-5) * g_ref[...] + beta_ref[...]
            if act == "relu":
                yn = jnp.maximum(yn, 0.0)
            o_ref[...] = yn

    return kernel


def _latent_kernel(h_ref, wq_ref, bq_ref, wp_ref, bp_ref, eps_ref,
                   mean_ref, logvar_ref, proj_ref, *, z_size):
    # one matmul for both heads (q_mean|q_logvar concatenated), reparameterize,
    # then the z -> feature_volume projection -- all in one kernel.
    y = jnp.dot(h_ref[...], wq_ref[...],
                preferred_element_type=jnp.float32) + bq_ref[...]
    mean = y[:, :z_size]
    logvar = y[:, z_size:]
    z = mean + eps_ref[...] * jnp.exp(0.5 * logvar)
    proj = jnp.dot(z.astype(jnp.bfloat16), wp_ref[...],
                   preferred_element_type=jnp.float32) + bp_ref[...]
    mean_ref[...] = mean
    logvar_ref[...] = logvar
    proj_ref[...] = proj


# ---------------------------------------------------------------------------
# Layer wrappers (XLA layout glue + one pallas_call per layer)
# ---------------------------------------------------------------------------

def conv2d_s2_fused(x, w, b, gamma=None, beta=None, act="none"):
    """Conv2d(kernel=4, stride=2, pad=1) [+ BatchNorm2d + ReLU] in ONE pallas_call.

    x: (B, H, W, Cin) NHWC.  w: (4, 4, Cin, Cout)."""
    B, H, W, Cin = x.shape
    Cout = w.shape[-1]
    Hout, Wout = H // 2, W // 2
    M = B * Hout * Wout

    xp = jnp.pad(x, ((0, 0), (1, 1), (1, 1), (0, 0)))
    pats = []
    for kh in range(4):
        for kw in range(4):
            pats.append(
                xp[:, kh:kh + 2 * Hout:2, kw:kw + 2 * Wout:2, :].reshape(M, Cin))
    xs = jnp.stack(pats, 0).astype(jnp.bfloat16)          # (16, M, Cin)
    ws = w.reshape(16, Cin, Cout).astype(jnp.bfloat16)    # (16, Cin, Cout)

    fuse_bn = gamma is not None
    args = [xs, ws, b.reshape(1, Cout).astype(jnp.float32)]
    if fuse_bn:
        args += [gamma.reshape(1, Cout).astype(jnp.float32),
                 beta.reshape(1, Cout).astype(jnp.float32)]

    y = pl.pallas_call(
        _make_conv_bn_act_kernel(groups=1, taps_per_group=16,
                                 fuse_bn=fuse_bn, act=act),
        out_shape=jax.ShapeDtypeStruct((1, M, Cout), jnp.float32),
        in_specs=[_vmem() for _ in args],
        out_specs=_vmem(),
    )(*args)
    return y.reshape(B, Hout, Wout, Cout)


def deconv2d_s2_fused(x, w, b, gamma=None, beta=None, act="none"):
    """ConvTranspose2d(kernel=4, stride=2, pad=1) [+ BatchNorm2d + ReLU/Sigmoid]
    in ONE pallas_call via sub-pixel decomposition: output parity (r, s) is a
    stride-1 2x2 conv of the (pad-1) input with the weight sub-grid
    w[3-2a-r, 3-2c-s].  w layout: (kh, kw, Cin, Cout) == torch weight[ci,co,kh,kw]."""
    B, H, W, Cin = x.shape
    Cout = w.shape[-1]
    M = B * H * W

    xp = jnp.pad(x, ((0, 0), (1, 1), (1, 1), (0, 0)))
    pats, wts = [], []
    for r in range(2):
        for s in range(2):
            for a in range(2):
                for c in range(2):
                    pats.append(
                        xp[:, r + a:r + a + H, s + c:s + c + W, :].reshape(M, Cin))
                    wts.append(w[3 - 2 * a - r, 3 - 2 * c - s])
    xs = jnp.stack(pats, 0).astype(jnp.bfloat16)           # (16, M, Cin)
    ws = jnp.stack(wts, 0).astype(jnp.bfloat16)            # (16, Cin, Cout)

    fuse_bn = gamma is not None
    args = [xs, ws, b.reshape(1, Cout).astype(jnp.float32)]
    if fuse_bn:
        args += [gamma.reshape(1, Cout).astype(jnp.float32),
                 beta.reshape(1, Cout).astype(jnp.float32)]

    y = pl.pallas_call(
        _make_conv_bn_act_kernel(groups=4, taps_per_group=4,
                                 fuse_bn=fuse_bn, act=act),
        out_shape=jax.ShapeDtypeStruct((4, M, Cout), jnp.float32),
        in_specs=[_vmem() for _ in args],
        out_specs=_vmem(),
    )(*args)

    # interleave the 4 parities back to (B, 2H, 2W, Cout) -- pure layout glue
    y = y.reshape(2, 2, B, H, W, Cout)
    y = jnp.transpose(y, (2, 3, 0, 4, 1, 5))
    return y.reshape(B, 2 * H, 2 * W, Cout)


def latent_fused(h_flat, wq, bq, wp, bp, eps):
    """q_mean + q_logvar (one matmul) + reparameterize + project, one pallas_call."""
    B, fv = h_flat.shape
    z = eps.shape[1]
    return pl.pallas_call(
        functools.partial(_latent_kernel, z_size=z),
        out_shape=(jax.ShapeDtypeStruct((B, z), jnp.float32),
                   jax.ShapeDtypeStruct((B, z), jnp.float32),
                   jax.ShapeDtypeStruct((B, fv), jnp.float32)),
        in_specs=[_vmem() for _ in range(6)],
        out_specs=(_vmem(), _vmem(), _vmem()),
    )(h_flat.astype(jnp.bfloat16), wq.astype(jnp.bfloat16),
      bq.reshape(1, 2 * z).astype(jnp.float32),
      wp.astype(jnp.bfloat16), bp.reshape(1, fv).astype(jnp.float32),
      eps.astype(jnp.float32))


# ---------------------------------------------------------------------------
# Parameters (deterministic synthetic init) and forward pass
# ---------------------------------------------------------------------------

def init_params(key, channel_num, kernel_num, z_size, image_size):
    fs = image_size // 8                      # enc_layer_num = 3
    fv = kernel_num * fs * fs
    c1, c2, c3 = kernel_num // 4, kernel_num // 2, kernel_num
    keys = iter(jax.random.split(key, 24))

    def w(shape, scale=0.05):
        return (scale * jax.random.normal(next(keys), shape)).astype(jnp.float32)

    p = {}
    # encoder (conv weights stored as (kh, kw, Cin, Cout))
    p["enc1_w"], p["enc1_b"] = w((4, 4, channel_num, c1)), w((c1,))
    p["enc1_g"], p["enc1_beta"] = jnp.ones((c1,), jnp.float32), jnp.zeros((c1,), jnp.float32)
    p["enc2_w"], p["enc2_b"] = w((4, 4, c1, c2)), w((c2,))
    p["enc2_g"], p["enc2_beta"] = jnp.ones((c2,), jnp.float32), jnp.zeros((c2,), jnp.float32)
    p["enc3_w"], p["enc3_b"] = w((4, 4, c2, c3)), w((c3,))
    # latent heads
    p["qm_w"], p["qm_b"] = w((fv, z_size)), w((z_size,))
    p["ql_w"], p["ql_b"] = w((fv, z_size)), w((z_size,))
    p["proj_w"], p["proj_b"] = w((z_size, fv)), w((fv,))
    # decoder (ConvTranspose weights stored as (kh, kw, Cin, Cout))
    p["dec1_w"], p["dec1_b"] = w((4, 4, c3, c2)), w((c2,))
    p["dec1_g"], p["dec1_beta"] = jnp.ones((c2,), jnp.float32), jnp.zeros((c2,), jnp.float32)
    p["dec2_w"], p["dec2_b"] = w((4, 4, c2, c1)), w((c1,))
    p["dec2_g"], p["dec2_beta"] = jnp.ones((c1,), jnp.float32), jnp.zeros((c1,), jnp.float32)
    p["dec3_w"], p["dec3_b"] = w((4, 4, c1, channel_num)), w((channel_num,))
    return p


def vae_forward(params, x_nchw, eps_key):
    # NCHW in (PyTorch) -> NHWC internal -> NCHW out
    x = jnp.transpose(x_nchw, (0, 2, 3, 1)).astype(jnp.float32)

    # ---- encoder (each layer = one fused pallas_call) ----
    h = conv2d_s2_fused(x, params["enc1_w"], params["enc1_b"],
                        params["enc1_g"], params["enc1_beta"], act="relu")
    h = conv2d_s2_fused(h, params["enc2_w"], params["enc2_b"],
                        params["enc2_g"], params["enc2_beta"], act="relu")
    h = conv2d_s2_fused(h, params["enc3_w"], params["enc3_b"])       # last: conv only

    B, fs, _, kn = h.shape
    # PyTorch .view(-1, feature_volume) flattens NCHW (C, H, W) order:
    h_flat = jnp.transpose(h, (0, 3, 1, 2)).reshape(B, kn * fs * fs)

    # ---- latent: fused q_mean|q_logvar matmul + reparam + projection ----
    wq = jnp.concatenate([params["qm_w"], params["ql_w"]], axis=1)
    bq = jnp.concatenate([params["qm_b"], params["ql_b"]], axis=0)
    z_size = params["qm_w"].shape[1]
    # TODO(synk): torch.randn_like draws fresh noise each call; here the noise is
    # generated with an explicit JAX key outside the kernel (same distribution).
    eps = jax.random.normal(eps_key, (B, z_size), jnp.float32)
    mean, logvar, zp = latent_fused(h_flat, wq, bq,
                                    params["proj_w"], params["proj_b"], eps)

    zp = jnp.transpose(zp.reshape(B, kn, fs, fs), (0, 2, 3, 1))       # NCHW view -> NHWC

    # ---- decoder (sub-pixel deconv, each layer = one fused pallas_call) ----
    d = deconv2d_s2_fused(zp, params["dec1_w"], params["dec1_b"],
                          params["dec1_g"], params["dec1_beta"], act="relu")
    d = deconv2d_s2_fused(d, params["dec2_w"], params["dec2_b"],
                          params["dec2_g"], params["dec2_beta"], act="relu")
    d = deconv2d_s2_fused(d, params["dec3_w"], params["dec3_b"], act="sigmoid")

    x_reconstructed = jnp.transpose(d, (0, 3, 1, 2))                  # back to NCHW
    return (mean, logvar), x_reconstructed


if __name__ == "__main__":
    # small shapes consistent with the module: batch=2, channels=4, image=16,
    # kernel_num=32, z_size=8  (feature_size = 16 // 2**3 = 2, feature_volume = 128)
    B, C, H = 2, 4, 16
    KERNEL_NUM, Z_SIZE = 32, 8

    key = jax.random.PRNGKey(0)
    k_params, k_x, k_eps = jax.random.split(key, 3)

    params = init_params(k_params, channel_num=C, kernel_num=KERNEL_NUM,
                         z_size=Z_SIZE, image_size=H)
    x = jax.random.uniform(k_x, (B, C, H, H), jnp.float32)

    fwd = jax.jit(vae_forward)
    (mean, logvar), x_rec = fwd(params, x, k_eps)
    jax.block_until_ready((mean, logvar, x_rec))

    assert mean.shape == (B, Z_SIZE) and logvar.shape == (B, Z_SIZE)
    assert x_rec.shape == (B, C, H, H)
    assert bool(jnp.all(jnp.isfinite(x_rec)))
    assert bool(jnp.all((x_rec >= 0.0) & (x_rec <= 1.0)))

    print("KERNEL_OK")
</pallas_src>

<mosaic_0001>
module attributes {stable_mosaic.version = 11 : i64} {
  func.func @kernel(%arg0: memref<16x128x4xbf16, #tpu.memory_space<vmem>>, %arg1: memref<16x4x8xbf16, #tpu.memory_space<vmem>>, %arg2: memref<1x8xf32, #tpu.memory_space<vmem>>, %arg3: memref<1x8xf32, #tpu.memory_space<vmem>>, %arg4: memref<1x8xf32, #tpu.memory_space<vmem>>, %arg5: memref<1x128x8xf32, #tpu.memory_space<vmem>>) attributes {dimension_semantics = [], scalar_prefetch = 0 : i64, scratch_operands = 0 : i64, tpu.core_type = #tpu.core_type<tc>} {
    %c0 = arith.constant 0 : index
    %c0_0 = arith.constant 0 : index
    %0 = vector.load %arg2[%c0, %c0_0] : memref<1x8xf32, #tpu.memory_space<vmem>>, vector<1x8xf32>
    %cst = arith.constant 0.000000e+00 : f32
    %1 = vector.broadcast %cst : f32 to vector<128x8xf32>
    %c0_1 = arith.constant 0 : index
    %c0_2 = arith.constant 0 : index
    %c0_3 = arith.constant 0 : index
    %2 = vector.load %arg0[%c0_1, %c0_2, %c0_3] : memref<16x128x4xbf16, #tpu.memory_space<vmem>>, vector<1x128x4xbf16>
    %3 = vector.shape_cast %2 : vector<1x128x4xbf16> to vector<128x4xbf16>
    %c0_4 = arith.constant 0 : index
    %c0_5 = arith.constant 0 : index
    %c0_6 = arith.constant 0 : index
    %4 = vector.load %arg1[%c0_4, %c0_5, %c0_6] : memref<16x4x8xbf16, #tpu.memory_space<vmem>>, vector<1x4x8xbf16>
    %5 = vector.shape_cast %4 : vector<1x4x8xbf16> to vector<4x8xbf16>
    %cst_7 = arith.constant dense<0.000000e+00> : vector<128x8xf32>
    %6 = tpu.matmul %3, %5, %cst_7 {dimension_numbers = #tpu.dot_dimension_numbers<[1], [0], [0], [1], [0, 0, 1, 1], [], []>} : vector<128x4xbf16>, vector<4x8xbf16>, vector<128x8xf32> -> vector<128x8xf32>
    %7 = arith.addf %1, %6 : vector<128x8xf32>
    %c1 = arith.constant 1 : index
    %c0_8 = arith.constant 0 : index
    %c0_9 = arith.constant 0 : index
    %8 = vector.load %arg0[%c1, %c0_8, %c0_9] : memref<16x128x4xbf16, #tpu.memory_space<vmem>>, vector<1x128x4xbf16>
    %9 = vector.shape_cast %8 : vector<1x128x4xbf16> to vector<128x4xbf16>
    %c1_10 = arith.constant 1 : index
    %c0_11 = arith.constant 0 : index
    %c0_12 = arith.constant 0 : index
    %10 = vector.load %arg1[%c1_10, %c0_11, %c0_12] : memref<16x4x8xbf16, #tpu.memory_space<vmem>>, vector<1x4x8xbf16>
    %11 = vector.shape_cast %10 : vector<1x4x8xbf16> to vector<4x8xbf16>
    %cst_13 = arith.constant dense<0.000000e+00> : vector<128x8xf32>
    %12 = tpu.matmul %9, %11, %cst_13 {dimension_numbers = #tpu.dot_dimension_numbers<[1], [0], [0], [1], [0, 0, 1, 1], [], []>} : vector<128x4xbf16>, vector<4x8xbf16>, vector<128x8xf32> -> vector<128x8xf32>
    %13 = arith.addf %7, %12 : vector<128x8xf32>
    %c2 = arith.constant 2 : index
    %c0_14 = arith.constant 0 : index
    %c0_15 = arith.constant 0 : index
    %14 = vector.load %arg0[%c2, %c0_14, %c0_15] : memref<16x128x4xbf16, #tpu.memory_space<vmem>>, vector<1x128x4xbf16>
    %15 = vector.shape_cast %14 : vector<1x128x4xbf16> to vector<128x4xbf16>
    %c2_16 = arith.constant 2 : index
    %c0_17 = arith.constant 0 : index
    %c0_18 = arith.constant 0 : index
    %16 = vector.load %arg1[%c2_16, %c0_17, %c0_18] : memref<16x4x8xbf16, #tpu.memory_space<vmem>>, vector<1x4x8xbf16>
    %17 = vector.shape_cast %16 : vector<1x4x8xbf16> to vector<4x8xbf16>
    %cst_19 = arith.constant dense<0.000000e+00> : vector<128x8xf32>
    %18 = tpu.matmul %15, %17, %cst_19 {dimension_numbers = #tpu.dot_dimension_numbers<[1], [0], [0], [1], [0, 0, 1, 1], [], []>} : vector<128x4xbf16>, vector<4x8xbf16>, vector<128x8xf32> -> vector<128x8xf32>
    %19 = arith.addf %13, %18 : vector<128x8xf32>
    %c3 = arith.constant 3 : index
    %c0_20 = arith.constant 0 : index
    %c0_21 = arith.constant 0 : index
    %20 = vector.load %arg0[%c3, %c0_20, %c0_21] : memref<16x128x4xbf16, #tpu.memory_space<vmem>>, vector<1x128x4xbf16>
    %21 = vector.shape_cast %20 : vector<1x128x4xbf16> to vector<128x4xbf16>
    %c3_22 = arith.constant 3 : index
    %c0_23 = arith.constant 0 : index
    %c0_24 = arith.constant 0 : index
    %22 = vector.load %arg1[%c3_22, %c0_23, %c0_24] : memref<16x4x8xbf16, #tpu.memory_space<vmem>>, vector<1x4x8xbf16>
    %23 = vector.shape_cast %22 : vector<1x4x8xbf16> to vector<4x8xbf16>
    %cst_25 = arith.constant dense<0.000000e+00> : vector<128x8xf32>
    %24 = tpu.matmul %21, %23, %cst_25 {dimension_numbers = #tpu.dot_dimension_numbers<[1], [0], [0], [1], [0, 0, 1, 1], [], []>} : vector<128x4xbf16>, vector<4x8xbf16>, vector<128x8xf32> -> vector<128x8xf32>
    %25 = arith.addf %19, %24 : vector<128x8xf32>
    %c4 = arith.constant 4 : index
    %c0_26 = arith.constant 0 : index
    %c0_27 = arith.constant 0 : index
    %26 = vector.load %arg0[%c4, %c0_26, %c0_27] : memref<16x128x4xbf16, #tpu.memory_space<vmem>>, vector<1x128x4xbf16>
    %27 = vector.shape_cast %26 : vector<1x128x4xbf16> to vector<128x4xbf16>
    %c4_28 = arith.constant 4 : index
    %c0_29 = arith.constant 0 : index
    %c0_30 = arith.constant 0 : index
    %28 = vector.load %arg1[%c4_28, %c0_29, %c0_30] : memref<16x4x8xbf16, #tpu.memory_space<vmem>>, vector<1x4x8xbf16>
    %29 = vector.shape_cast %28 : vector<1x4x8xbf16> to vector<4x8xbf16>
    %cst_31 = arith.constant dense<0.000000e+00> : vector<128x8xf32>
    %30 = tpu.matmul %27, %29, %cst_31 {dimension_numbers = #tpu.dot_dimension_numbers<[1], [0], [0], [1], [0, 0, 1, 1], [], []>} : vector<128x4xbf16>, vector<4x8xbf16>, vector<128x8xf32> -> vector<128x8xf32>
    %31 = arith.addf %25, %30 : vector<128x8xf32>
    %c5 = arith.constant 5 : index
    %c0_32 = arith.constant 0 : index
    %c0_33 = arith.constant 0 : index
    %32 = vector.load %arg0[%c5, %c0_32, %c0_33] : memref<16x128x4xbf16, #tpu.memory_space<vmem>>, vector<1x128x4xbf16>
    %33 = vector.shape_cast %32 : vector<1x128x4xbf16> to vector<128x4xbf16>
    %c5_34 = arith.constant 5 : index
    %c0_35 = arith.constant 0 : index
    %c0_36 = arith.constant 0 : index
    %34 = vector.load %arg1[%c5_34, %c0_35, %c0_36] : memref<16x4x8xbf16, #tpu.memory_space<vmem>>, vector<1x4x8xbf16>
    %35 = vector.shape_cast %34 : vector<1x4x8xbf16> to vector<4x8xbf16>
    %cst_37 = arith.constant dense<0.000000e+00> : vector<128x8xf32>
    %36 = tpu.matmul %33, %35, %cst_37 {dimension_numbers = #tpu.dot_dimension_numbers<[1], [0], [0], [1], [0, 0, 1, 1], [], []>} : vector<128x4xbf16>, vector<4x8xbf16>, vector<128x8xf32> -> vector<128x8xf32>
    %37 = arith.addf %31, %36 : vector<128x8xf32>
    %c6 = arith.constant 6 : index
    %c0_38 = arith.constant 0 : index
    %c0_39 = arith.constant 0 : index
    %38 = vector.load %arg0[%c6, %c0_38, %c0_39] : memref<16x128x4xbf16, #tpu.memory_space<vmem>>, vector<1x128x4xbf16>
    %39 = vector.shape_cast %38 : vector<1x128x4xbf16> to vector<128x4xbf16>
    %c6_40 = arith.constant 6 : index
    %c0_41 = arith.constant 0 : index
    %c0_42 = arith.constant 0 : index
    %40 = vector.load %arg1[%c6_40, %c0_41, %c0_42] : memref<16x4x8xbf16, #tpu.memory_space<vmem>>, vector<1x4x8xbf16>
    %41 = vector.shape_cast %40 : vector<1x4x8xbf16> to vector<4x8xbf16>
    %cst_43 = arith.constant dense<0.000000e+00> : vector<128x8xf32>
    %42 = tpu.matmul %39, %41, %cst_43 {dimension_numbers = #tpu.dot_dimension_numbers<[1], [0], [0], [1], [0, 0, 1, 1], [], []>} : vector<128x4xbf16>, vector<4x8xbf16>, vector<128x8xf32> -> vector<128x8xf32>
    %43 = arith.addf %37, %42 : vector<128x8xf32>
    %c7 = arith.constant 7 : index
    %c0_44 = arith.constant 0 : index
    %c0_45 = arith.constant 0 : index
    %44 = vector.load %arg0[%c7, %c0_44, %c0_45] : memref<16x128x4xbf16, #tpu.memory_space<vmem>>, vector<1x128x4xbf16>
    %45 = vector.shape_cast %44 : vector<1x128x4xbf16> to vector<128x4xbf16>
    %c7_46 = arith.constant 7 : index
    %c0_47 = arith.constant 0 : index
    %c0_48 = arith.constant 0 : index
    %46 = vector.load %arg1[%c7_46, %c0_47, %c0_48] : memref<16x4x8xbf16, #tpu.memory_space<vmem>>, vector<1x4x8xbf16>
    %47 = vector.shape_cast %46 : vector<1x4x8xbf16> to vector<4x8xbf16>
    %cst_49 = arith.constant dense<0.000000e+00> : vector<128x8xf32>
    %48 = tpu.matmul %45, %47, %cst_49 {dimension_numbers = #tpu.dot_dimension_numbers<[1], [0], [0], [1], [0, 0, 1, 1], [], []>} : vector<128x4xbf16>, vector<4x8xbf16>, vector<128x8xf32> -> vector<128x8xf32>
    %49 = arith.addf %43, %48 : vector<128x8xf32>
    %c8 = arith.constant 8 : index
    %c0_50 = arith.constant 0 : index
    %c0_51 = arith.constant 0 : index
    %50 = vector.load %arg0[%c8, %c0_50, %c0_51] : memref<16x128x4xbf16, #tpu.memory_space<vmem>>, vector<1x128x4xbf16>
    %51 = vector.shape_cast %50 : vector<1x128x4xbf16> to vector<128x4xbf16>
    %c8_52 = arith.constant 8 : index
    %c0_53 = arith.constant 0 : index
    %c0_54 = arith.constant 0 : index
    %52 = vector.load %arg1[%c8_52, %c0_53, %c0_54] : memref<16x4x8xbf16, #tpu.memory_space<vmem>>, vector<1x4x8xbf16>
    %53 = vector.shape_cast %52 : vector<1x4x8xbf16> to vector<4x8xbf16>
    %cst_55 = arith.constant dense<0.000000e+00> : vector<128x8xf32>
    %54 = tpu.matmul %51, %53, %cst_55 {dimension_numbers = #tpu.dot_dimension_numbers<[1], [0], [0], [1], [0, 0, 1, 1], [], []>} : vector<128x4xbf16>, vector<4x8xbf16>, vector<128x8xf32> -> vector<128x8xf32>
    %55 = arith.addf %49, %54 : vector<128x8xf32>
    %c9 = arith.constant 9 : index
    %c0_56 = arith.constant 0 : index
    %c0_57 = arith.constant 0 : index
    %56 = vector.load %arg0[%c9, %c0_56, %c0_57] : memref<16x128x4xbf16, #tpu.memory_space<vmem>>, vector<1x128x4xbf16>
    %57 = vector.shape_cast %56 : vector<1x128x4xbf16> to vector<128x4xbf16>
    %c9_58 = arith.constant 9 : index
    %c0_59 = arith.constant 0 : index
    %c0_60 = arith.constant 0 : index
    %58 = vector.load %arg1[%c9_58, %c0_59, %c0_60] : memref<16x4x8xbf16, #tpu.memory_space<vmem>>, vector<1x4x8xbf16>
    %59 = vector.shape_cast %58 : vector<1x4x8xbf16> to vector<4x8xbf16>
    %cst_61 = arith.constant dense<0.000000e+00> : vector<128x8xf32>
    %60 = tpu.matmul %57, %59, %cst_61 {dimension_numbers = #tpu.dot_dimension_numbers<[1], [0], [0], [1], [0, 0, 1, 1], [], []>} : vector<128x4xbf16>, vector<4x8xbf16>, vector<128x8xf32> -> vector<128x8xf32>
    %61 = arith.addf %55, %60 : vector<128x8xf32>
    %c10 = arith.constant 10 : index
    %c0_62 = arith.constant 0 : index
    %c0_63 = arith.constant 0 : index
    %62 = vector.load %arg0[%c10, %c0_62, %c0_63] : memref<16x128x4xbf16, #tpu.memory_space<vmem>>, vector<1x128x4xbf16>
    %63 = vector.shape_cast %62 : vector<1x128x4xbf16> to vector<128x4xbf16>
    %c10_64 = arith.constant 10 : index
    %c0_65 = arith.constant 0 : index
    %c0_66 = arith.constant 0 : index
    %64 = vector.load %arg1[%c10_64, %c0_65, %c0_66] : memref<16x4x8xbf16, #tpu.memory_space<vmem>>, vector<1x4x8xbf16>
    %65 = vector.shape_cast %64 : vector<1x4x8xbf16> to vector<4x8xbf16>
    %cst_67 = arith.constant dense<0.000000e+00> : vector<128x8xf32>
    %66 = tpu.matmul %63, %65, %cst_67 {dimension_numbers = #tpu.dot_dimension_numbers<[1], [0], [0], [1], [0, 0, 1, 1], [], []>} : vector<128x4xbf16>, vector<4x8xbf16>, vector<128x8xf32> -> vector<128x8xf32>
    %67 = arith.addf %61, %66 : vector<128x8xf32>
    %c11 = arith.constant 11 : index
    %c0_68 = arith.constant 0 : index
    %c0_69 = arith.constant 0 : index
    %68 = vector.load %arg0[%c11, %c0_68, %c0_69] : memref<16x128x4xbf16, #tpu.memory_space<vmem>>, vector<1x128x4xbf16>
    %69 = vector.shape_cast %68 : vector<1x128x4xbf16> to vector<128x4xbf16>
    %c11_70 = arith.constant 11 : index
    %c0_71 = arith.constant 0 : index
    %c0_72 = arith.constant 0 : index
    %70 = vector.load %arg1[%c11_70, %c0_71, %c0_72] : memref<16x4x8xbf16, #tpu.memory_space<vmem>>, vector<1x4x8xbf16>
    %71 = vector.shape_cast %70 : vector<1x4x8xbf16> to vector<4x8xbf16>
    %cst_73 = arith.constant dense<0.000000e+00> : vector<128x8xf32>
    %72 = tpu.matmul %69, %71, %cst_73 {dimension_numbers = #tpu.dot_dimension_numbers<[1], [0], [0], [1], [0, 0, 1, 1], [], []>} : vector<128x4xbf16>, vector<4x8xbf16>, vector<128x8xf32> -> vector<128x8xf32>
    %73 = arith.addf %67, %72 : vector<128x8xf32>
    %c12 = arith.constant 12 : index
    %c0_74 = arith.constant 0 : index
    %c0_75 = arith.constant 0 : index
    %74 = vector.load %arg0[%c12, %c0_74, %c0_75] : memref<16x128x4xbf16, #tpu.memory_space<vmem>>, vector<1x128x4xbf16>
    %75 = vector.shape_cast %74 : vector<1x128x4xbf16> to vector<128x4xbf16>
    %c12_76 = arith.constant 12 : index
    %c0_77 = arith.constant 0 : index
    %c0_78 = arith.constant 0 : index
    %76 = vector.load %arg1[%c12_76, %c0_77, %c0_78] : memref<16x4x8xbf16, #tpu.memory_space<vmem>>, vector<1x4x8xbf16>
    %77 = vector.shape_cast %76 : vector<1x4x8xbf16> to vector<4x8xbf16>
    %cst_79 = arith.constant dense<0.000000e+00> : vector<128x8xf32>
    %78 = tpu.matmul %75, %77, %cst_79 {dimension_numbers = #tpu.dot_dimension_numbers<[1], [0], [0], [1], [0, 0, 1, 1], [], []>} : vector<128x4xbf16>, vector<4x8xbf16>, vector<128x8xf32> -> vector<128x8xf32>
    %79 = arith.addf %73, %78 : vector<128x8xf32>
    %c13 = arith.constant 13 : index
    %c0_80 = arith.constant 0 : index
    %c0_81 = arith.constant 0 : index
    %80 = vector.load %arg0[%c13, %c0_80, %c0_81] : memref<16x128x4xbf16, #tpu.memory_space<vmem>>, vector<1x128x4xbf16>
    %81 = vector.shape_cast %80 : vector<1x128x4xbf16> to vector<128x4xbf16>
    %c13_82 = arith.constant 13 : index
    %c0_83 = arith.constant 0 : index
    %c0_84 = arith.constant 0 : index
    %82 = vector.load %arg1[%c13_82, %c0_83, %c0_84] : memref<16x4x8xbf16, #tpu.memory_space<vmem>>, vector<1x4x8xbf16>
    %83 = vector.shape_cast %82 : vector<1x4x8xbf16> to vector<4x8xbf16>
    %cst_85 = arith.constant dense<0.000000e+00> : vector<128x8xf32>
    %84 = tpu.matmul %81, %83, %cst_85 {dimension_numbers = #tpu.dot_dimension_numbers<[1], [0], [0], [1], [0, 0, 1, 1], [], []>} : vector<128x4xbf16>, vector<4x8xbf16>, vector<128x8xf32> -> vector<128x8xf32>
    %85 = arith.addf %79, %84 : vector<128x8xf32>
    %c14 = arith.constant 14 : index
    %c0_86 = arith.constant 0 : index
    %c0_87 = arith.constant 0 : index
    %86 = vector.load %arg0[%c14, %c0_86, %c0_87] : memref<16x128x4xbf16, #tpu.memory_space<vmem>>, vector<1x128x4xbf16>
    %87 = vector.shape_cast %86 : vector<1x128x4xbf16> to vector<128x4xbf16>
    %c14_88 = arith.constant 14 : index
    %c0_89 = arith.constant 0 : index
    %c0_90 = arith.constant 0 : index
    %88 = vector.load %arg1[%c14_88, %c0_89, %c0_90] : memref<16x4x8xbf16, #tpu.memory_space<vmem>>, vector<1x4x8xbf16>
    %89 = vector.shape_cast %88 : vector<1x4x8xbf16> to vector<4x8xbf16>
    %cst_91 = arith.constant dense<0.000000e+00> : vector<128x8xf32>
    %90 = tpu.matmul %87, %89, %cst_91 {dimension_numbers = #tpu.dot_dimension_numbers<[1], [0], [0], [1], [0, 0, 1, 1], [], []>} : vector<128x4xbf16>, vector<4x8xbf16>, vector<128x8xf32> -> vector<128x8xf32>
    %91 = arith.addf %85, %90 : vector<128x8xf32>
    %c15 = arith.constant 15 : index
    %c0_92 = arith.constant 0 : index
    %c0_93 = arith.constant 0 : index
    %92 = vector.load %arg0[%c15, %c0_92, %c0_93] : memref<16x128x4xbf16, #tpu.memory_space<vmem>>, vector<1x128x4xbf16>
    %93 = vector.shape_cast %92 : vector<1x128x4xbf16> to vector<128x4xbf16>
    %c15_94 = arith.constant 15 : index
    %c0_95 = arith.constant 0 : index
    %c0_96 = arith.constant 0 : index
    %94 = vector.load %arg1[%c15_94, %c0_95, %c0_96] : memref<16x4x8xbf16, #tpu.memory_space<vmem>>, vector<1x4x8xbf16>
    %95 = vector.shape_cast %94 : vector<1x4x8xbf16> to vector<4x8xbf16>
    %cst_97 = arith.constant dense<0.000000e+00> : vector<128x8xf32>
    %96 = tpu.matmul %93, %95, %cst_97 {dimension_numbers = #tpu.dot_dimension_numbers<[1], [0], [0], [1], [0, 0, 1, 1], [], []>} : vector<128x4xbf16>, vector<4x8xbf16>, vector<128x8xf32> -> vector<128x8xf32>
    %97 = arith.addf %91, %96 : vector<128x8xf32>
    %98 = vector.broadcast %0 : vector<1x8xf32> to vector<128x8xf32>
    %99 = arith.addf %97, %98 : vector<128x8xf32>
    %c0_98 = arith.constant 0 : index
    %c0_99 = arith.constant 0 : index
    %c0_100 = arith.constant 0 : index
    %100 = vector.load %arg5[%c0_98, %c0_99, %c0_100] : memref<1x128x8xf32, #tpu.memory_space<vmem>>, vector<1x128x8xf32>
    %101 = vector.shape_cast %100 : vector<1x128x8xf32> to vector<128x8xf32>
    %102 = vector.shape_cast %99 : vector<128x8xf32> to vector<1x128x8xf32>
    tpu.vector_store %arg5[%c0_98, %c0_99, %c0_100], %102 {strides = array<i32>} : memref<1x128x8xf32, #tpu.memory_space<vmem>>, vector<1x128x8xf32>,
    %c0_101 = arith.constant 0 : index
    %c0_102 = arith.constant 0 : index
    %c0_103 = arith.constant 0 : index
    %103 = vector.load %arg5[%c0_101, %c0_102, %c0_103] : memref<1x128x8xf32, #tpu.memory_space<vmem>>, vector<1x128x8xf32>
    %cst_104 = arith.constant dense<0.000000e+00> : vector<128x8xf32>
    %104 = vector.multi_reduction <add>, %103, %cst_104 [0] : vector<1x128x8xf32> to vector<128x8xf32>
    %cst_105 = arith.constant dense<0.000000e+00> : vector<8xf32>
    %105 = vector.multi_reduction <add>, %104, %cst_105 [0] : vector<128x8xf32> to vector<8xf32>
    %106 = vector.shape_cast %105 : vector<8xf32> to vector<1x8xf32>
    %cst_106 = arith.constant 7.812500e-03 : f32
    %107 = vector.broadcast %cst_106 : f32 to vector<1x8xf32>
    %108 = arith.mulf %106, %107 : vector<1x8xf32>
    %109 = vector.shape_cast %108 : vector<1x8xf32> to vector<1x1x8xf32>
    %110 = vector.broadcast %109 : vector<1x1x8xf32> to vector<1x128x8xf32>
    %111 = arith.subf %103, %110 : vector<1x128x8xf32>
    %112 = arith.mulf %111, %111 : vector<1x128x8xf32>
    %cst_107 = arith.constant dense<0.000000e+00> : vector<128x8xf32>
    %113 = vector.multi_reduction <add>, %112, %cst_107 [0] : vector<1x128x8xf32> to vector<128x8xf32>
    %cst_108 = arith.constant dense<0.000000e+00> : vector<8xf32>
    %114 = vector.multi_reduction <add>, %113, %cst_108 [0] : vector<128x8xf32> to vector<8xf32>
    %115 = vector.shape_cast %114 : vector<8xf32> to vector<1x8xf32>
    %cst_109 = arith.constant 7.812500e-03 : f32
    %116 = vector.broadcast %cst_109 : f32 to vector<1x8xf32>
    %117 = arith.mulf %115, %116 : vector<1x8xf32>
    %cst_110 = arith.constant 9.99999974E-6 : f32
    %118 = vector.broadcast %cst_110 : f32 to vector<1x8xf32>
    %119 = arith.addf %117, %118 : vector<1x8xf32>
    %120 = math.rsqrt %119 : vector<1x8xf32>
    %121 = vector.shape_cast %120 : vector<1x8xf32> to vector<1x1x8xf32>
    %122 = vector.broadcast %121 : vector<1x1x8xf32> to vector<1x128x8xf32>
    %123 = arith.mulf %111, %122 : vector<1x128x8xf32>
    %c0_111 = arith.constant 0 : index
    %c0_112 = arith.constant 0 : index
    %124 = vector.load %arg3[%c0_111, %c0_112] : memref<1x8xf32, #tpu.memory_space<vmem>>, vector<1x8xf32>
    %125 = vector.shape_cast %124 : vector<1x8xf32> to vector<1x1x8xf32>
    %126 = vector.broadcast %125 : vector<1x1x8xf32> to vector<1x128x8xf32>
    %127 = arith.mulf %123, %126 : vector<1x128x8xf32>
    %c0_113 = arith.constant 0 : index
    %c0_114 = arith.constant 0 : index
    %128 = vector.load %arg4[%c0_113, %c0_114] : memref<1x8xf32, #tpu.memory_space<vmem>>, vector<1x8xf32>
    %129 = vector.shape_cast %128 : vector<1x8xf32> to vector<1x1x8xf32>
    %130 = vector.broadcast %129 : vector<1x1x8xf32> to vector<1x128x8xf32>
    %131 = arith.addf %127, %130 : vector<1x128x8xf32>
    %cst_115 = arith.constant 0.000000e+00 : f32
    %132 = vector.broadcast %cst_115 : f32 to vector<1x128x8xf32>
    %133 = arith.maximumf %131, %132 : vector<1x128x8xf32>
    %c0_116 = arith.constant 0 : index
    %c0_117 = arith.constant 0 : index
    %c0_118 = arith.constant 0 : index
    %134 = vector.load %arg5[%c0_116, %c0_117, %c0_118] : memref<1x128x8xf32, #tpu.memory_space<vmem>>, vector<1x128x8xf32>
    tpu.vector_store %arg5[%c0_116, %c0_117, %c0_118], %133 {strides = array<i32>} : memref<1x128x8xf32, #tpu.memory_space<vmem>>, vector<1x128x8xf32>,
    return
  }
}

module attributes {stable_mosaic.version = 11 : i64} {
  func.func @kernel(%arg0: memref<16x32x8xbf16, #tpu.memory_space<vmem>>, %arg1: memref<16x8x16xbf16, #tpu.memory_space<vmem>>, %arg2: memref<1x16xf32, #tpu.memory_space<vmem>>, %arg3: memref<1x16xf32, #tpu.memory_space<vmem>>, %arg4: memref<1x16xf32, #tpu.memory_space<vmem>>, %arg5: memref<1x32x16xf32, #tpu.memory_space<vmem>>) attributes {dimension_semantics = [], scalar_prefetch = 0 : i64, scratch_operands = 0 : i64, tpu.core_type = #tpu.core_type<tc>} {
    %c0 = arith.constant 0 : index
    %c0_0 = arith.constant 0 : index
    %0 = vector.load %arg2[%c0, %c0_0] : memref<1x16xf32, #tpu.memory_space<vmem>>, vector<1x16xf32>
    %cst = arith.constant 0.000000e+00 : f32
    %1 = vector.broadcast %cst : f32 to vector<32x16xf32>
    %c0_1 = arith.constant 0 : index
    %c0_2 = arith.constant 0 : index
    %c0_3 = arith.constant 0 : index
    %2 = vector.load %arg0[%c0_1, %c0_2, %c0_3] : memref<16x32x8xbf16, #tpu.memory_space<vmem>>, vector<1x32x8xbf16>
    %3 = vector.shape_cast %2 : vector<1x32x8xbf16> to vector<32x8xbf16>
    %c0_4 = arith.constant 0 : index
    %c0_5 = arith.constant 0 : index
    %c0_6 = arith.constant 0 : index
    %4 = vector.load %arg1[%c0_4, %c0_5, %c0_6] : memref<16x8x16xbf16, #tpu.memory_space<vmem>>, vector<1x8x16xbf16>
    %5 = vector.shape_cast %4 : vector<1x8x16xbf16> to vector<8x16xbf16>
    %cst_7 = arith.constant dense<0.000000e+00> : vector<32x16xf32>
    %6 = tpu.matmul %3, %5, %cst_7 {dimension_numbers = #tpu.dot_dimension_numbers<[1], [0], [0], [1], [0, 0, 1, 1], [], []>} : vector<32x8xbf16>, vector<8x16xbf16>, vector<32x16xf32> -> vector<32x16xf32>
    %7 = arith.addf %1, %6 : vector<32x16xf32>
    %c1 = arith.constant 1 : index
    %c0_8 = arith.constant 0 : index
    %c0_9 = arith.constant 0 : index
    %8 = vector.load %arg0[%c1, %c0_8, %c0_9] : memref<16x32x8xbf16, #tpu.memory_space<vmem>>, vector<1x32x8xbf16>
    %9 = vector.shape_cast %8 : vector<1x32x8xbf16> to vector<32x8xbf16>
    %c1_10 = arith.constant 1 : index
    %c0_11 = arith.constant 0 : index
    %c0_12 = arith.constant 0 : index
    %10 = vector.load %arg1[%c1_10, %c0_11, %c0_12] : memref<16x8x16xbf16, #tpu.memory_space<vmem>>, vector<1x8x16xbf16>
    %11 = vector.shape_cast %10 : vector<1x8x16xbf16> to vector<8x16xbf16>
    %cst_13 = arith.constant dense<0.000000e+00> : vector<32x16xf32>
    %12 = tpu.matmul %9, %11, %cst_13 {dimension_numbers = #tpu.dot_dimension_numbers<[1], [0], [0], [1], [0, 0, 1, 1], [], []>} : vector<32x8xbf16>, vector<8x16xbf16>, vector<32x16xf32> -> vector<32x16xf32>
    %13 = arith.addf %7, %12 : vector<32x16xf32>
    %c2 = arith.constant 2 : index
    %c0_14 = arith.constant 0 : index
    %c0_15 = arith.constant 0 : index
    %14 = vector.load %arg0[%c2, %c0_14, %c0_15] : memref<16x32x8xbf16, #tpu.memory_space<vmem>>, vector<1x32x8xbf16>
    %15 = vector.shape_cast %14 : vector<1x32x8xbf16> to vector<32x8xbf16>
    %c2_16 = arith.constant 2 : index
    %c0_17 = arith.constant 0 : index
    %c0_18 = arith.constant 0 : index
    %16 = vector.load %arg1[%c2_16, %c0_17, %c0_18] : memref<16x8x16xbf16, #tpu.memory_space<vmem>>, vector<1x8x16xbf16>
    %17 = vector.shape_cast %16 : vector<1x8x16xbf16> to vector<8x16xbf16>
    %cst_19 = arith.constant dense<0.000000e+00> : vector<32x16xf32>
    %18 = tpu.matmul %15, %17, %cst_19 {dimension_numbers = #tpu.dot_dimension_numbers<[1], [0], [0], [1], [0, 0, 1, 1], [], []>} : vector<32x8xbf16>, vector<8x16xbf16>, vector<32x16xf32> -> vector<32x16xf32>
    %19 = arith.addf %13, %18 : vector<32x16xf32>
    %c3 = arith.constant 3 : index
    %c0_20 = arith.constant 0 : index
    %c0_21 = arith.constant 0 : index
    %20 = vector.load %arg0[%c3, %c0_20, %c0_21] : memref<16x32x8xbf16, #tpu.memory_space<vmem>>, vector<1x32x8xbf16>
    %21 = vector.shape_cast %20 : vector<1x32x8xbf16> to vector<32x8xbf16>
    %c3_22 = arith.constant 3 : index
    %c0_23 = arith.constant 0 : index
    %c0_24 = arith.constant 0 : index
    %22 = vector.load %arg1[%c3_22, %c0_23, %c0_24] : memref<16x8x16xbf16, #tpu.memory_space<vmem>>, vector<1x8x16xbf16>
    %23 = vector.shape_cast %22 : vector<1x8x16xbf16> to vector<8x16xbf16>
    %cst_25 = arith.constant dense<0.000000e+00> : vector<32x16xf32>
    %24 = tpu.matmul %21, %23, %cst_25 {dimension_numbers = #tpu.dot_dimension_numbers<[1], [0], [0], [1], [0, 0, 1, 1], [], []>} : vector<32x8xbf16>, vector<8x16xbf16>, vector<32x16xf32> -> vector<32x16xf32>
    %25 = arith.addf %19, %24 : vector<32x16xf32>
    %c4 = arith.constant 4 : index
    %c0_26 = arith.constant 0 : index
    %c0_27 = arith.constant 0 : index
    %26 = vector.load %arg0[%c4, %c0_26, %c0_27] : memref<16x32x8xbf16, #tpu.memory_space<vmem>>, vector<1x32x8xbf16>
    %27 = vector.shape_cast %26 : vector<1x32x8xbf16> to vector<32x8xbf16>
    %c4_28 = arith.constant 4 : index
    %c0_29 = arith.constant 0 : index
    %c0_30 = arith.constant 0 : index
    %28 = vector.load %arg1[%c4_28, %c0_29, %c0_30] : memref<16x8x16xbf16, #tpu.memory_space<vmem>>, vector<1x8x16xbf16>
    %29 = vector.shape_cast %28 : vector<1x8x16xbf16> to vector<8x16xbf16>
    %cst_31 = arith.constant dense<0.000000e+00> : vector<32x16xf32>
    %30 = tpu.matmul %27, %29, %cst_31 {dimension_numbers = #tpu.dot_dimension_numbers<[1], [0], [0], [1], [0, 0, 1, 1], [], []>} : vector<32x8xbf16>, vector<8x16xbf16>, vector<32x16xf32> -> vector<32x16xf32>
    %31 = arith.addf %25, %30 : vector<32x16xf32>
    %c5 = arith.constant 5 : index
    %c0_32 = arith.constant 0 : index
    %c0_33 = arith.constant 0 : index
    %32 = vector.load %arg0[%c5, %c0_32, %c0_33] : memref<16x32x8xbf16, #tpu.memory_space<vmem>>, vector<1x32x8xbf16>
    %33 = vector.shape_cast %32 : vector<1x32x8xbf16> to vector<32x8xbf16>
    %c5_34 = arith.constant 5 : index
    %c0_35 = arith.constant 0 : index
    %c0_36 = arith.constant 0 : index
    %34 = vector.load %arg1[%c5_34, %c0_35, %c0_36] : memref<16x8x16xbf16, #tpu.memory_space<vmem>>, vector<1x8x16xbf16>
    %35 = vector.shape_cast %34 : vector<1x8x16xbf16> to vector<8x16xbf16>
    %cst_37 = arith.constant dense<0.000000e+00> : vector<32x16xf32>
    %36 = tpu.matmul %33, %35, %cst_37 {dimension_numbers = #tpu.dot_dimension_numbers<[1], [0], [0], [1], [0, 0, 1, 1], [], []>} : vector<32x8xbf16>, vector<8x16xbf16>, vector<32x16xf32> -> vector<32x16xf32>
    %37 = arith.addf %31, %36 : vector<32x16xf32>
    %c6 = arith.constant 6 : index
    %c0_38 = arith.constant 0 : index
    %c0_39 = arith.constant 0 : index
    %38 = vector.load %arg0[%c6, %c0_38, %c0_39] : memref<16x32x8xbf16, #tpu.memory_space<vmem>>, vector<1x32x8xbf16>
    %39 = vector.shape_cast %38 : vector<1x32x8xbf16> to vector<32x8xbf16>
    %c6_40 = arith.constant 6 : index
    %c0_41 = arith.constant 0 : index
    %c0_42 = arith.constant 0 : index
    %40 = vector.load %arg1[%c6_40, %c0_41, %c0_42] : memref<16x8x16xbf16, #tpu.memory_space<vmem>>, vector<1x8x16xbf16>
    %41 = vector.shape_cast %40 : vector<1x8x16xbf16> to vector<8x16xbf16>
    %cst_43 = arith.constant dense<0.000000e+00> : vector<32x16xf32>
    %42 = tpu.matmul %39, %41, %cst_43 {dimension_numbers = #tpu.dot_dimension_numbers<[1], [0], [0], [1], [0, 0, 1, 1], [], []>} : vector<32x8xbf16>, vector<8x16xbf16>, vector<32x16xf32> -> vector<32x16xf32>
    %43 = arith.addf %37, %42 : vector<32x16xf32>
    %c7 = arith.constant 7 : index
    %c0_44 = arith.constant 0 : index
    %c0_45 = arith.constant 0 : index
    %44 = vector.load %arg0[%c7, %c0_44, %c0_45] : memref<16x32x8xbf16, #tpu.memory_space<vmem>>, vector<1x32x8xbf16>
    %45 = vector.shape_cast %44 : vector<1x32x8xbf16> to vector<32x8xbf16>
    %c7_46 = arith.constant 7 : index
    %c0_47 = arith.constant 0 : index
    %c0_48 = arith.constant 0 : index
    %46 = vector.load %arg1[%c7_46, %c0_47, %c0_48] : memref<16x8x16xbf16, #tpu.memory_space<vmem>>, vector<1x8x16xbf16>
    %47 = vector.shape_cast %46 : vector<1x8x16xbf16> to vector<8x16xbf16>
    %cst_49 = arith.constant dense<0.000000e+00> : vector<32x16xf32>
    %48 = tpu.matmul %45, %47, %cst_49 {dimension_numbers = #tpu.dot_dimension_numbers<[1], [0], [0], [1], [0, 0, 1, 1], [], []>} : vector<32x8xbf16>, vector<8x16xbf16>, vector<32x16xf32> -> vector<32x16xf32>
    %49 = arith.addf %43, %48 : vector<32x16xf32>
    %c8 = arith.constant 8 : index
    %c0_50 = arith.constant 0 : index
    %c0_51 = arith.constant 0 : index
    %50 = vector.load %arg0[%c8, %c0_50, %c0_51] : memref<16x32x8xbf16, #tpu.memory_space<vmem>>, vector<1x32x8xbf16>
    %51 = vector.shape_cast %50 : vector<1x32x8xbf16> to vector<32x8xbf16>
    %c8_52 = arith.constant 8 : index
    %c0_53 = arith.constant 0 : index
    %c0_54 = arith.constant 0 : index
    %52 = vector.load %arg1[%c8_52, %c0_53, %c0_54] : memref<16x8x16xbf16, #tpu.memory_space<vmem>>, vector<1x8x16xbf16>
    %53 = vector.shape_cast %52 : vector<1x8x16xbf16> to vector<8x16xbf16>
    %cst_55 = arith.constant dense<0.000000e+00> : vector<32x16xf32>
    %54 = tpu.matmul %51, %53, %cst_55 {dimension_numbers = #tpu.dot_dimension_numbers<[1], [0], [0], [1], [0, 0, 1, 1], [], []>} : vector<32x8xbf16>, vector<8x16xbf16>, vector<32x16xf32> -> vector<32x16xf32>
    %55 = arith.addf %49, %54 : vector<32x16xf32>
    %c9 = arith.constant 9 : index
    %c0_56 = arith.constant 0 : index
    %c0_57 = arith.constant 0 : index
    %56 = vector.load %arg0[%c9, %c0_56, %c0_57] : memref<16x32x8xbf16, #tpu.memory_space<vmem>>, vector<1x32x8xbf16>
    %57 = vector.shape_cast %56 : vector<1x32x8xbf16> to vector<32x8xbf16>
    %c9_58 = arith.constant 9 : index
    %c0_59 = arith.constant 0 : index
    %c0_60 = arith.constant 0 : index
    %58 = vector.load %arg1[%c9_58, %c0_59, %c0_60] : memref<16x8x16xbf16, #tpu.memory_space<vmem>>, vector<1x8x16xbf16>
    %59 = vector.shape_cast %58 : vector<1x8x16xbf16> to vector<8x16xbf16>
    %cst_61 = arith.constant dense<0.000000e+00> : vector<32x16xf32>
    %60 = tpu.matmul %57, %59, %cst_61 {dimension_numbers = #tpu.dot_dimension_numbers<[1], [0], [0], [1], [0, 0, 1, 1], [], []>} : vector<32x8xbf16>, vector<8x16xbf16>, vector<32x16xf32> -> vector<32x16xf32>
    %61 = arith.addf %55, %60 : vector<32x16xf32>
    %c10 = arith.constant 10 : index
    %c0_62 = arith.constant 0 : index
    %c0_63 = arith.constant 0 : index
    %62 = vector.load %arg0[%c10, %c0_62, %c0_63] : memref<16x32x8xbf16, #tpu.memory_space<vmem>>, vector<1x32x8xbf16>
    %63 = vector.shape_cast %62 : vector<1x32x8xbf16> to vector<32x8xbf16>
    %c10_64 = arith.constant 10 : index
    %c0_65 = arith.constant 0 : index
    %c0_66 = arith.constant 0 : index
    %64 = vector.load %arg1[%c10_64, %c0_65, %c0_66] : memref<16x8x16xbf16, #tpu.memory_space<vmem>>, vector<1x8x16xbf16>
    %65 = vector.shape_cast %64 : vector<1x8x16xbf16> to vector<8x16xbf16>
    %cst_67 = arith.constant dense<0.000000e+00> : vector<32x16xf32>
    %66 = tpu.matmul %63, %65, %cst_67 {dimension_numbers = #tpu.dot_dimension_numbers<[1], [0], [0], [1], [0, 0, 1, 1], [], []>} : vector<32x8xbf16>, vector<8x16xbf16>, vector<32x16xf32> -> vector<32x16xf32>
    %67 = arith.addf %61, %66 : vector<32x16xf32>
    %c11 = arith.constant 11 : index
    %c0_68 = arith.constant 0 : index
    %c0_69 = arith.constant 0 : index
    %68 = vector.load %arg0[%c11, %c0_68, %c0_69] : memref<16x32x8xbf16, #tpu.memory_space<vmem>>, vector<1x32x8xbf16>
    %69 = vector.shape_cast %68 : vector<1x32x8xbf16> to vector<32x8xbf16>
    %c11_70 = arith.constant 11 : index
    %c0_71 = arith.constant 0 : index
    %c0_72 = arith.constant 0 : index
    %70 = vector.load %arg1[%c11_70, %c0_71, %c0_72] : memref<16x8x16xbf16, #tpu.memory_space<vmem>>, vector<1x8x16xbf16>
    %71 = vector.shape_cast %70 : vector<1x8x16xbf16> to vector<8x16xbf16>
    %cst_73 = arith.constant dense<0.000000e+00> : vector<32x16xf32>
    %72 = tpu.matmul %69, %71, %cst_73 {dimension_numbers = #tpu.dot_dimension_numbers<[1], [0], [0], [1], [0, 0, 1, 1], [], []>} : vector<32x8xbf16>, vector<8x16xbf16>, vector<32x16xf32> -> vector<32x16xf32>
    %73 = arith.addf %67, %72 : vector<32x16xf32>
    %c12 = arith.constant 12 : index
    %c0_74 = arith.constant 0 : index
    %c0_75 = arith.constant 0 : index
    %74 = vector.load %arg0[%c12, %c0_74, %c0_75] : memref<16x32x8xbf16, #tpu.memory_space<vmem>>, vector<1x32x8xbf16>
    %75 = vector.shape_cast %74 : vector<1x32x8xbf16> to vector<32x8xbf16>
    %c12_76 = arith.constant 12 : index
    %c0_77 = arith.constant 0 : index
    %c0_78 = arith.constant 0 : index
    %76 = vector.load %arg1[%c12_76, %c0_77, %c0_78] : memref<16x8x16xbf16, #tpu.memory_space<vmem>>, vector<1x8x16xbf16>
    %77 = vector.shape_cast %76 : vector<1x8x16xbf16> to vector<8x16xbf16>
    %cst_79 = arith.constant dense<0.000000e+00> : vector<32x16xf32>
    %78 = tpu.matmul %75, %77, %cst_79 {dimension_numbers = #tpu.dot_dimension_numbers<[1], [0], [0], [1], [0, 0, 1, 1], [], []>} : vector<32x8xbf16>, vector<8x16xbf16>, vector<32x16xf32> -> vector<32x16xf32>
    %79 = arith.addf %73, %78 : vector<32x16xf32>
    %c13 = arith.constant 13 : index
    %c0_80 = arith.constant 0 : index
    %c0_81 = arith.constant 0 : index
    %80 = vector.load %arg0[%c13, %c0_80, %c0_81] : memref<16x32x8xbf16, #tpu.memory_space<vmem>>, vector<1x32x8xbf16>
    %81 = vector.shape_cast %80 : vector<1x32x8xbf16> to vector<32x8xbf16>
    %c13_82 = arith.constant 13 : index
    %c0_83 = arith.constant 0 : index
    %c0_84 = arith.constant 0 : index
    %82 = vector.load %arg1[%c13_82, %c0_83, %c0_84] : memref<16x8x16xbf16, #tpu.memory_space<vmem>>, vector<1x8x16xbf16>
    %83 = vector.shape_cast %82 : vector<1x8x16xbf16> to vector<8x16xbf16>
    %cst_85 = arith.constant dense<0.000000e+00> : vector<32x16xf32>
    %84 = tpu.matmul %81, %83, %cst_85 {dimension_numbers = #tpu.dot_dimension_numbers<[1], [0], [0], [1], [0, 0, 1, 1], [], []>} : vector<32x8xbf16>, vector<8x16xbf16>, vector<32x16xf32> -> vector<32x16xf32>
    %85 = arith.addf %79, %84 : vector<32x16xf32>
    %c14 = arith.constant 14 : index
    %c0_86 = arith.constant 0 : index
    %c0_87 = arith.constant 0 : index
    %86 = vector.load %arg0[%c14, %c0_86, %c0_87] : memref<16x32x8xbf16, #tpu.memory_space<vmem>>, vector<1x32x8xbf16>
    %87 = vector.shape_cast %86 : vector<1x32x8xbf16> to vector<32x8xbf16>
    %c14_88 = arith.constant 14 : index
    %c0_89 = arith.constant 0 : index
    %c0_90 = arith.constant 0 : index
    %88 = vector.load %arg1[%c14_88, %c0_89, %c0_90] : memref<16x8x16xbf16, #tpu.memory_space<vmem>>, vector<1x8x16xbf16>
    %89 = vector.shape_cast %88 : vector<1x8x16xbf16> to vector<8x16xbf16>
    %cst_91 = arith.constant dense<0.000000e+00> : vector<32x16xf32>
    %90 = tpu.matmul %87, %89, %cst_91 {dimension_numbers = #tpu.dot_dimension_numbers<[1], [0], [0], [1], [0, 0, 1, 1], [], []>} : vector<32x8xbf16>, vector<8x16xbf16>, vector<32x16xf32> -> vector<32x16xf32>
    %91 = arith.addf %85, %90 : vector<32x16xf32>
    %c15 = arith.constant 15 : index
    %c0_92 = arith.constant 0 : index
    %c0_93 = arith.constant 0 : index
    %92 = vector.load %arg0[%c15, %c0_92, %c0_93] : memref<16x32x8xbf16, #tpu.memory_space<vmem>>, vector<1x32x8xbf16>
    %93 = vector.shape_cast %92 : vector<1x32x8xbf16> to vector<32x8xbf16>
    %c15_94 = arith.constant 15 : index
    %c0_95 = arith.constant 0 : index
    %c0_96 = arith.constant 0 : index
    %94 = vector.load %arg1[%c15_94, %c0_95, %c0_96] : memref<16x8x16xbf16, #tpu.memory_space<vmem>>, vector<1x8x16xbf16>
    %95 = vector.shape_cast %94 : vector<1x8x16xbf16> to vector<8x16xbf16>
    %cst_97 = arith.constant dense<0.000000e+00> : vector<32x16xf32>
    %96 = tpu.matmul %93, %95, %cst_97 {dimension_numbers = #tpu.dot_dimension_numbers<[1], [0], [0], [1], [0, 0, 1, 1], [], []>} : vector<32x8xbf16>, vector<8x16xbf16>, vector<32x16xf32> -> vector<32x16xf32>
    %97 = arith.addf %91, %96 : vector<32x16xf32>
    %98 = vector.broadcast %0 : vector<1x16xf32> to vector<32x16xf32>
    %99 = arith.addf %97, %98 : vector<32x16xf32>
    %c0_98 = arith.constant 0 : index
    %c0_99 = arith.constant 0 : index
    %c0_100 = arith.constant 0 : index
    %100 = vector.load %arg5[%c0_98, %c0_99, %c0_100] : memref<1x32x16xf32, #tpu.memory_space<vmem>>, vector<1x32x16xf32>
    %101 = vector.shape_cast %100 : vector<1x32x16xf32> to vector<32x16xf32>
    %102 = vector.shape_cast %99 : vector<32x16xf32> to vector<1x32x16xf32>
    tpu.vector_store %arg5[%c0_98, %c0_99, %c0_100], %102 {strides = array<i32>} : memref<1x32x16xf32, #tpu.memory_space<vmem>>, vector<1x32x16xf32>,
    %c0_101 = arith.constant 0 : index
    %c0_102 = arith.constant 0 : index
    %c0_103 = arith.constant 0 : index
    %103 = vector.load %arg5[%c0_101, %c0_102, %c0_103] : memref<1x32x16xf32, #tpu.memory_space<vmem>>, vector<1x32x16xf32>
    %cst_104 = arith.constant dense<0.000000e+00> : vector<32x16xf32>
    %104 = vector.multi_reduction <add>, %103, %cst_104 [0] : vector<1x32x16xf32> to vector<32x16xf32>
    %cst_105 = arith.constant dense<0.000000e+00> : vector<16xf32>
    %105 = vector.multi_reduction <add>, %104, %cst_105 [0] : vector<32x16xf32> to vector<16xf32>
    %106 = vector.shape_cast %105 : vector<16xf32> to vector<1x16xf32>
    %cst_106 = arith.constant 3.125000e-02 : f32
    %107 = vector.broadcast %cst_106 : f32 to vector<1x16xf32>
    %108 = arith.mulf %106, %107 : vector<1x16xf32>
    %109 = vector.shape_cast %108 : vector<1x16xf32> to vector<1x1x16xf32>
    %110 = vector.broadcast %109 : vector<1x1x16xf32> to vector<1x32x16xf32>
    %111 = arith.subf %103, %110 : vector<1x32x16xf32>
    %112 = arith.mulf %111, %111 : vector<1x32x16xf32>
    %cst_107 = arith.constant dense<0.000000e+00> : vector<32x16xf32>
    %113 = vector.multi_reduction <add>, %112, %cst_107 [0] : vector<1x32x16xf32> to vector<32x16xf32>
    %cst_108 = arith.constant dense<0.000000e+00> : vector<16xf32>
    %114 = vector.multi_reduction <add>, %113, %cst_108 [0] : vector<32x16xf32> to vector<16xf32>
    %115 = vector.shape_cast %114 : vector<16xf32> to vector<1x16xf32>
    %cst_109 = arith.constant 3.125000e-02 : f32
    %116 = vector.broadcast %cst_109 : f32 to vector<1x16xf32>
    %117 = arith.mulf %115, %116 : vector<1x16xf32>
    %cst_110 = arith.constant 9.99999974E-6 : f32
    %118 = vector.broadcast %cst_110 : f32 to vector<1x16xf32>
    %119 = arith.addf %117, %118 : vector<1x16xf32>
    %120 = math.rsqrt %119 : vector<1x16xf32>
    %121 = vector.shape_cast %120 : vector<1x16xf32> to vector<1x1x16xf32>
    %122 = vector.broadcast %121 : vector<1x1x16xf32> to vector<1x32x16xf32>
    %123 = arith.mulf %111, %122 : vector<1x32x16xf32>
    %c0_111 = arith.constant 0 : index
    %c0_112 = arith.constant 0 : index
    %124 = vector.load %arg3[%c0_111, %c0_112] : memref<1x16xf32, #tpu.memory_space<vmem>>, vector<1x16xf32>
    %125 = vector.shape_cast %124 : vector<1x16xf32> to vector<1x1x16xf32>
    %126 = vector.broadcast %125 : vector<1x1x16xf32> to vector<1x32x16xf32>
    %127 = arith.mulf %123, %126 : vector<1x32x16xf32>
    %c0_113 = arith.constant 0 : index
    %c0_114 = arith.constant 0 : index
    %128 = vector.load %arg4[%c0_113, %c0_114] : memref<1x16xf32, #tpu.memory_space<vmem>>, vector<1x16xf32>
    %129 = vector.shape_cast %128 : vector<1x16xf32> to vector<1x1x16xf32>
    %130 = vector.broadcast %129 : vector<1x1x16xf32> to vector<1x32x16xf32>
    %131 = arith.addf %127, %130 : vector<1x32x16xf32>
    %cst_115 = arith.constant 0.000000e+00 : f32
    %132 = vector.broadcast %cst_115 : f32 to vector<1x32x16xf32>
    %133 = arith.maximumf %131, %132 : vector<1x32x16xf32>
    %c0_116 = arith.constant 0 : index
    %c0_117 = arith.constant 0 : index
    %c0_118 = arith.constant 0 : index
    %134 = vector.load %arg5[%c0_116, %c0_117, %c0_118] : memref<1x32x16xf32, #tpu.memory_space<vmem>>, vector<1x32x16xf32>
    tpu.vector_store %arg5[%c0_116, %c0_117, %c0_118], %133 {strides = array<i32>} : memref<1x32x16xf32, #tpu.memory_space<vmem>>, vector<1x32x16xf32>,
    return
  }
}

module attributes {stable_mosaic.version = 11 : i64} {
  func.func @kernel(%arg0: memref<16x8x16xbf16, #tpu.memory_space<vmem>>, %arg1: memref<16x16x32xbf16, #tpu.memory_space<vmem>>, %arg2: memref<1x32xf32, #tpu.memory_space<vmem>>, %arg3: memref<1x8x32xf32, #tpu.memory_space<vmem>>) attributes {dimension_semantics = [], scalar_prefetch = 0 : i64, scratch_operands = 0 : i64, tpu.core_type = #tpu.core_type<tc>} {
    %c0 = arith.constant 0 : index
    %c0_0 = arith.constant 0 : index
    %0 = vector.load %arg2[%c0, %c0_0] : memref<1x32xf32, #tpu.memory_space<vmem>>, vector<1x32xf32>
    %cst = arith.constant 0.000000e+00 : f32
    %1 = vector.broadcast %cst : f32 to vector<8x32xf32>
    %c0_1 = arith.constant 0 : index
    %c0_2 = arith.constant 0 : index
    %c0_3 = arith.constant 0 : index
    %2 = vector.load %arg0[%c0_1, %c0_2, %c0_3] : memref<16x8x16xbf16, #tpu.memory_space<vmem>>, vector<1x8x16xbf16>
    %3 = vector.shape_cast %2 : vector<1x8x16xbf16> to vector<8x16xbf16>
    %c0_4 = arith.constant 0 : index
    %c0_5 = arith.constant 0 : index
    %c0_6 = arith.constant 0 : index
    %4 = vector.load %arg1[%c0_4, %c0_5, %c0_6] : memref<16x16x32xbf16, #tpu.memory_space<vmem>>, vector<1x16x32xbf16>
    %5 = vector.shape_cast %4 : vector<1x16x32xbf16> to vector<16x32xbf16>
    %cst_7 = arith.constant dense<0.000000e+00> : vector<8x32xf32>
    %6 = tpu.matmul %3, %5, %cst_7 {dimension_numbers = #tpu.dot_dimension_numbers<[1], [0], [0], [1], [0, 0, 1, 1], [], []>} : vector<8x16xbf16>, vector<16x32xbf16>, vector<8x32xf32> -> vector<8x32xf32>
    %7 = arith.addf %1, %6 : vector<8x32xf32>
    %c1 = arith.constant 1 : index
    %c0_8 = arith.constant 0 : index
    %c0_9 = arith.constant 0 : index
    %8 = vector.load %arg0[%c1, %c0_8, %c0_9] : memref<16x8x16xbf16, #tpu.memory_space<vmem>>, vector<1x8x16xbf16>
    %9 = vector.shape_cast %8 : vector<1x8x16xbf16> to vector<8x16xbf16>
    %c1_10 = arith.constant 1 : index
    %c0_11 = arith.constant 0 : index
    %c0_12 = arith.constant 0 : index
    %10 = vector.load %arg1[%c1_10, %c0_11, %c0_12] : memref<16x16x32xbf16, #tpu.memory_space<vmem>>, vector<1x16x32xbf16>
    %11 = vector.shape_cast %10 : vector<1x16x32xbf16> to vector<16x32xbf16>
    %cst_13 = arith.constant dense<0.000000e+00> : vector<8x32xf32>
    %12 = tpu.matmul %9, %11, %cst_13 {dimension_numbers = #tpu.dot_dimension_numbers<[1], [0], [0], [1], [0, 0, 1, 1], [], []>} : vector<8x16xbf16>, vector<16x32xbf16>, vector<8x32xf32> -> vector<8x32xf32>
    %13 = arith.addf %7, %12 : vector<8x32xf32>
    %c2 = arith.constant 2 : index
    %c0_14 = arith.constant 0 : index
    %c0_15 = arith.constant 0 : index
    %14 = vector.load %arg0[%c2, %c0_14, %c0_15] : memref<16x8x16xbf16, #tpu.memory_space<vmem>>, vector<1x8x16xbf16>
    %15 = vector.shape_cast %14 : vector<1x8x16xbf16> to vector<8x16xbf16>
    %c2_16 = arith.constant 2 : index
    %c0_17 = arith.constant 0 : index
    %c0_18 = arith.constant 0 : index
    %16 = vector.load %arg1[%c2_16, %c0_17, %c0_18] : memref<16x16x32xbf16, #tpu.memory_space<vmem>>, vector<1x16x32xbf16>
    %17 = vector.shape_cast %16 : vector<1x16x32xbf16> to vector<16x32xbf16>
    %cst_19 = arith.constant dense<0.000000e+00> : vector<8x32xf32>
    %18 = tpu.matmul %15, %17, %cst_19 {dimension_numbers = #tpu.dot_dimension_numbers<[1], [0], [0], [1], [0, 0, 1, 1], [], []>} : vector<8x16xbf16>, vector<16x32xbf16>, vector<8x32xf32> -> vector<8x32xf32>
    %19 = arith.addf %13, %18 : vector<8x32xf32>
    %c3 = arith.constant 3 : index
    %c0_20 = arith.constant 0 : index
    %c0_21 = arith.constant 0 : index
    %20 = vector.load %arg0[%c3, %c0_20, %c0_21] : memref<16x8x16xbf16, #tpu.memory_space<vmem>>, vector<1x8x16xbf16>
    %21 = vector.shape_cast %20 : vector<1x8x16xbf16> to vector<8x16xbf16>
    %c3_22 = arith.constant 3 : index
    %c0_23 = arith.constant 0 : index
    %c0_24 = arith.constant 0 : index
    %22 = vector.load %arg1[%c3_22, %c0_23, %c0_24] : memref<16x16x32xbf16, #tpu.memory_space<vmem>>, vector<1x16x32xbf16>
    %23 = vector.shape_cast %22 : vector<1x16x32xbf16> to vector<16x32xbf16>
    %cst_25 = arith.constant dense<0.000000e+00> : vector<8x32xf32>
    %24 = tpu.matmul %21, %23, %cst_25 {dimension_numbers = #tpu.dot_dimension_numbers<[1], [0], [0], [1], [0, 0, 1, 1], [], []>} : vector<8x16xbf16>, vector<16x32xbf16>, vector<8x32xf32> -> vector<8x32xf32>
    %25 = arith.addf %19, %24 : vector<8x32xf32>
    %c4 = arith.constant 4 : index
    %c0_26 = arith.constant 0 : index
    %c0_27 = arith.constant 0 : index
    %26 = vector.load %arg0[%c4, %c0_26, %c0_27] : memref<16x8x16xbf16, #tpu.memory_space<vmem>>, vector<1x8x16xbf16>
    %27 = vector.shape_cast %26 : vector<1x8x16xbf16> to vector<8x16xbf16>
    %c4_28 = arith.constant 4 : index
    %c0_29 = arith.constant 0 : index
    %c0_30 = arith.constant 0 : index
    %28 = vector.load %arg1[%c4_28, %c0_29, %c0_30] : memref<16x16x32xbf16, #tpu.memory_space<vmem>>, vector<1x16x32xbf16>
    %29 = vector.shape_cast %28 : vector<1x16x32xbf16> to vector<16x32xbf16>
    %cst_31 = arith.constant dense<0.000000e+00> : vector<8x32xf32>
    %30 = tpu.matmul %27, %29, %cst_31 {dimension_numbers = #tpu.dot_dimension_numbers<[1], [0], [0], [1], [0, 0, 1, 1], [], []>} : vector<8x16xbf16>, vector<16x32xbf16>, vector<8x32xf32> -> vector<8x32xf32>
    %31 = arith.addf %25, %30 : vector<8x32xf32>
    %c5 = arith.constant 5 : index
    %c0_32 = arith.constant 0 : index
    %c0_33 = arith.constant 0 : index
    %32 = vector.load %arg0[%c5, %c0_32, %c0_33] : memref<16x8x16xbf16, #tpu.memory_space<vmem>>, vector<1x8x16xbf16>
    %33 = vector.shape_cast %32 : vector<1x8x16xbf16> to vector<8x16xbf16>
    %c5_34 = arith.constant 5 : index
    %c0_35 = arith.constant 0 : index
    %c0_36 = arith.constant 0 : index
    %34 = vector.load %arg1[%c5_34, %c0_35, %c0_36] : memref<16x16x32xbf16, #tpu.memory_space<vmem>>, vector<1x16x32xbf16>
    %35 = vector.shape_cast %34 : vector<1x16x32xbf16> to vector<16x32xbf16>
    %cst_37 = arith.constant dense<0.000000e+00> : vector<8x32xf32>
    %36 = tpu.matmul %33, %35, %cst_37 {dimension_numbers = #tpu.dot_dimension_numbers<[1], [0], [0], [1], [0, 0, 1, 1], [], []>} : vector<8x16xbf16>, vector<16x32xbf16>, vector<8x32xf32> -> vector<8x32xf32>
    %37 = arith.addf %31, %36 : vector<8x32xf32>
    %c6 = arith.constant 6 : index
    %c0_38 = arith.constant 0 : index
    %c0_39 = arith.constant 0 : index
    %38 = vector.load %arg0[%c6, %c0_38, %c0_39] : memref<16x8x16xbf16, #tpu.memory_space<vmem>>, vector<1x8x16xbf16>
    %39 = vector.shape_cast %38 : vector<1x8x16xbf16> to vector<8x16xbf16>
    %c6_40 = arith.constant 6 : index
    %c0_41 = arith.constant 0 : index
    %c0_42 = arith.constant 0 : index
    %40 = vector.load %arg1[%c6_40, %c0_41, %c0_42] : memref<16x16x32xbf16, #tpu.memory_space<vmem>>, vector<1x16x32xbf16>
    %41 = vector.shape_cast %40 : vector<1x16x32xbf16> to vector<16x32xbf16>
    %cst_43 = arith.constant dense<0.000000e+00> : vector<8x32xf32>
    %42 = tpu.matmul %39, %41, %cst_43 {dimension_numbers = #tpu.dot_dimension_numbers<[1], [0], [0], [1], [0, 0, 1, 1], [], []>} : vector<8x16xbf16>, vector<16x32xbf16>, vector<8x32xf32> -> vector<8x32xf32>
    %43 = arith.addf %37, %42 : vector<8x32xf32>
    %c7 = arith.constant 7 : index
    %c0_44 = arith.constant 0 : index
    %c0_45 = arith.constant 0 : index
    %44 = vector.load %arg0[%c7, %c0_44, %c0_45] : memref<16x8x16xbf16, #tpu.memory_space<vmem>>, vector<1x8x16xbf16>
    %45 = vector.shape_cast %44 : vector<1x8x16xbf16> to vector<8x16xbf16>
    %c7_46 = arith.constant 7 : index
    %c0_47 = arith.constant 0 : index
    %c0_48 = arith.constant 0 : index
    %46 = vector.load %arg1[%c7_46, %c0_47, %c0_48] : memref<16x16x32xbf16, #tpu.memory_space<vmem>>, vector<1x16x32xbf16>
    %47 = vector.shape_cast %46 : vector<1x16x32xbf16> to vector<16x32xbf16>
    %cst_49 = arith.constant dense<0.000000e+00> : vector<8x32xf32>
    %48 = tpu.matmul %45, %47, %cst_49 {dimension_numbers = #tpu.dot_dimension_numbers<[1], [0], [0], [1], [0, 0, 1, 1], [], []>} : vector<8x16xbf16>, vector<16x32xbf16>, vector<8x32xf32> -> vector<8x32xf32>
    %49 = arith.addf %43, %48 : vector<8x32xf32>
    %c8 = arith.constant 8 : index
    %c0_50 = arith.constant 0 : index
    %c0_51 = arith.constant 0 : index
    %50 = vector.load %arg0[%c8, %c0_50, %c0_51] : memref<16x8x16xbf16, #tpu.memory_space<vmem>>, vector<1x8x16xbf16>
    %51 = vector.shape_cast %50 : vector<1x8x16xbf16> to vector<8x16xbf16>
    %c8_52 = arith.constant 8 : index
    %c0_53 = arith.constant 0 : index
    %c0_54 = arith.constant 0 : index
    %52 = vector.load %arg1[%c8_52, %c0_53, %c0_54] : memref<16x16x32xbf16, #tpu.memory_space<vmem>>, vector<1x16x32xbf16>
    %53 = vector.shape_cast %52 : vector<1x16x32xbf16> to vector<16x32xbf16>
    %cst_55 = arith.constant dense<0.000000e+00> : vector<8x32xf32>
    %54 = tpu.matmul %51, %53, %cst_55 {dimension_numbers = #tpu.dot_dimension_numbers<[1], [0], [0], [1], [0, 0, 1, 1], [], []>} : vector<8x16xbf16>, vector<16x32xbf16>, vector<8x32xf32> -> vector<8x32xf32>
    %55 = arith.addf %49, %54 : vector<8x32xf32>
    %c9 = arith.constant 9 : index
    %c0_56 = arith.constant 0 : index
    %c0_57 = arith.constant 0 : index
    %56 = vector.load %arg0[%c9, %c0_56, %c0_57] : memref<16x8x16xbf16, #tpu.memory_space<vmem>>, vector<1x8x16xbf16>
    %57 = vector.shape_cast %56 : vector<1x8x16xbf16> to vector<8x16xbf16>
    %c9_58 = arith.constant 9 : index
    %c0_59 = arith.constant 0 : index
    %c0_60 = arith.constant 0 : index
    %58 = vector.load %arg1[%c9_58, %c0_59, %c0_60] : memref<16x16x32xbf16, #tpu.memory_space<vmem>>, vector<1x16x32xbf16>
    %59 = vector.shape_cast %58 : vector<1x16x32xbf16> to vector<16x32xbf16>
    %cst_61 = arith.constant dense<0.000000e+00> : vector<8x32xf32>
    %60 = tpu.matmul %57, %59, %cst_61 {dimension_numbers = #tpu.dot_dimension_numbers<[1], [0], [0], [1], [0, 0, 1, 1], [], []>} : vector<8x16xbf16>, vector<16x32xbf16>, vector<8x32xf32> -> vector<8x32xf32>
    %61 = arith.addf %55, %60 : vector<8x32xf32>
    %c10 = arith.constant 10 : index
    %c0_62 = arith.constant 0 : index
    %c0_63 = arith.constant 0 : index
    %62 = vector.load %arg0[%c10, %c0_62, %c0_63] : memref<16x8x16xbf16, #tpu.memory_space<vmem>>, vector<1x8x16xbf16>
    %63 = vector.shape_cast %62 : vector<1x8x16xbf16> to vector<8x16xbf16>
    %c10_64 = arith.constant 10 : index
    %c0_65 = arith.constant 0 : index
    %c0_66 = arith.constant 0 : index
    %64 = vector.load %arg1[%c10_64, %c0_65, %c0_66] : memref<16x16x32xbf16, #tpu.memory_space<vmem>>, vector<1x16x32xbf16>
    %65 = vector.shape_cast %64 : vector<1x16x32xbf16> to vector<16x32xbf16>
    %cst_67 = arith.constant dense<0.000000e+00> : vector<8x32xf32>
    %66 = tpu.matmul %63, %65, %cst_67 {dimension_numbers = #tpu.dot_dimension_numbers<[1], [0], [0], [1], [0, 0, 1, 1], [], []>} : vector<8x16xbf16>, vector<16x32xbf16>, vector<8x32xf32> -> vector<8x32xf32>
    %67 = arith.addf %61, %66 : vector<8x32xf32>
    %c11 = arith.constant 11 : index
    %c0_68 = arith.constant 0 : index
    %c0_69 = arith.constant 0 : index
    %68 = vector.load %arg0[%c11, %c0_68, %c0_69] : memref<16x8x16xbf16, #tpu.memory_space<vmem>>, vector<1x8x16xbf16>
    %69 = vector.shape_cast %68 : vector<1x8x16xbf16> to vector<8x16xbf16>
    %c11_70 = arith.constant 11 : index
    %c0_71 = arith.constant 0 : index
    %c0_72 = arith.constant 0 : index
    %70 = vector.load %arg1[%c11_70, %c0_71, %c0_72] : memref<16x16x32xbf16, #tpu.memory_space<vmem>>, vector<1x16x32xbf16>
    %71 = vector.shape_cast %70 : vector<1x16x32xbf16> to vector<16x32xbf16>
    %cst_73 = arith.constant dense<0.000000e+00> : vector<8x32xf32>
    %72 = tpu.matmul %69, %71, %cst_73 {dimension_numbers = #tpu.dot_dimension_numbers<[1], [0], [0], [1], [0, 0, 1, 1], [], []>} : vector<8x16xbf16>, vector<16x32xbf16>, vector<8x32xf32> -> vector<8x32xf32>
    %73 = arith.addf %67, %72 : vector<8x32xf32>
    %c12 = arith.constant 12 : index
    %c0_74 = arith.constant 0 : index
    %c0_75 = arith.constant 0 : index
    %74 = vector.load %arg0[%c12, %c0_74, %c0_75] : memref<16x8x16xbf16, #tpu.memory_space<vmem>>, vector<1x8x16xbf16>
    %75 = vector.shape_cast %74 : vector<1x8x16xbf16> to vector<8x16xbf16>
    %c12_76 = arith.constant 12 : index
    %c0_77 = arith.constant 0 : index
    %c0_78 = arith.constant 0 : index
    %76 = vector.load %arg1[%c12_76, %c0_77, %c0_78] : memref<16x16x32xbf16, #tpu.memory_space<vmem>>, vector<1x16x32xbf16>
    %77 = vector.shape_cast %76 : vector<1x16x32xbf16> to vector<16x32xbf16>
    %cst_79 = arith.constant dense<0.000000e+00> : vector<8x32xf32>
    %78 = tpu.matmul %75, %77, %cst_79 {dimension_numbers = #tpu.dot_dimension_numbers<[1], [0], [0], [1], [0, 0, 1, 1], [], []>} : vector<8x16xbf16>, vector<16x32xbf16>, vector<8x32xf32> -> vector<8x32xf32>
    %79 = arith.addf %73, %78 : vector<8x32xf32>
    %c13 = arith.constant 13 : index
    %c0_80 = arith.constant 0 : index
    %c0_81 = arith.constant 0 : index
    %80 = vector.load %arg0[%c13, %c0_80, %c0_81] : memref<16x8x16xbf16, #tpu.memory_space<vmem>>, vector<1x8x16xbf16>
    %81 = vector.shape_cast %80 : vector<1x8x16xbf16> to vector<8x16xbf16>
    %c13_82 = arith.constant 13 : index
    %c0_83 = arith.constant 0 : index
    %c0_84 = arith.constant 0 : index
    %82 = vector.load %arg1[%c13_82, %c0_83, %c0_84] : memref<16x16x32xbf16, #tpu.memory_space<vmem>>, vector<1x16x32xbf16>
    %83 = vector.shape_cast %82 : vector<1x16x32xbf16> to vector<16x32xbf16>
    %cst_85 = arith.constant dense<0.000000e+00> : vector<8x32xf32>
    %84 = tpu.matmul %81, %83, %cst_85 {dimension_numbers = #tpu.dot_dimension_numbers<[1], [0], [0], [1], [0, 0, 1, 1], [], []>} : vector<8x16xbf16>, vector<16x32xbf16>, vector<8x32xf32> -> vector<8x32xf32>
    %85 = arith.addf %79, %84 : vector<8x32xf32>
    %c14 = arith.constant 14 : index
    %c0_86 = arith.constant 0 : index
    %c0_87 = arith.constant 0 : index
    %86 = vector.load %arg0[%c14, %c0_86, %c0_87] : memref<16x8x16xbf16, #tpu.memory_space<vmem>>, vector<1x8x16xbf16>
    %87 = vector.shape_cast %86 : vector<1x8x16xbf16> to vector<8x16xbf16>
    %c14_88 = arith.constant 14 : index
    %c0_89 = arith.constant 0 : index
    %c0_90 = arith.constant 0 : index
    %88 = vector.load %arg1[%c14_88, %c0_89, %c0_90] : memref<16x16x32xbf16, #tpu.memory_space<vmem>>, vector<1x16x32xbf16>
    %89 = vector.shape_cast %88 : vector<1x16x32xbf16> to vector<16x32xbf16>
    %cst_91 = arith.constant dense<0.000000e+00> : vector<8x32xf32>
    %90 = tpu.matmul %87, %89, %cst_91 {dimension_numbers = #tpu.dot_dimension_numbers<[1], [0], [0], [1], [0, 0, 1, 1], [], []>} : vector<8x16xbf16>, vector<16x32xbf16>, vector<8x32xf32> -> vector<8x32xf32>
    %91 = arith.addf %85, %90 : vector<8x32xf32>
    %c15 = arith.constant 15 : index
    %c0_92 = arith.constant 0 : index
    %c0_93 = arith.constant 0 : index
    %92 = vector.load %arg0[%c15, %c0_92, %c0_93] : memref<16x8x16xbf16, #tpu.memory_space<vmem>>, vector<1x8x16xbf16>
    %93 = vector.shape_cast %92 : vector<1x8x16xbf16> to vector<8x16xbf16>
    %c15_94 = arith.constant 15 : index
    %c0_95 = arith.constant 0 : index
    %c0_96 = arith.constant 0 : index
    %94 = vector.load %arg1[%c15_94, %c0_95, %c0_96] : memref<16x16x32xbf16, #tpu.memory_space<vmem>>, vector<1x16x32xbf16>
    %95 = vector.shape_cast %94 : vector<1x16x32xbf16> to vector<16x32xbf16>
    %cst_97 = arith.constant dense<0.000000e+00> : vector<8x32xf32>
    %96 = tpu.matmul %93, %95, %cst_97 {dimension_numbers = #tpu.dot_dimension_numbers<[1], [0], [0], [1], [0, 0, 1, 1], [], []>} : vector<8x16xbf16>, vector<16x32xbf16>, vector<8x32xf32> -> vector<8x32xf32>
    %97 = arith.addf %91, %96 : vector<8x32xf32>
    %98 = vector.broadcast %0 : vector<1x32xf32> to vector<8x32xf32>
    %99 = arith.addf %97, %98 : vector<8x32xf32>
    %c0_98 = arith.constant 0 : index
    %c0_99 = arith.constant 0 : index
    %c0_100 = arith.constant 0 : index
    %100 = vector.load %arg3[%c0_98, %c0_99, %c0_100] : memref<1x8x32xf32, #tpu.memory_space<vmem>>, vector<1x8x32xf32>
    %101 = vector.shape_cast %100 : vector<1x8x32xf32> to vector<8x32xf32>
    %102 = vector.shape_cast %99 : vector<8x32xf32> to vector<1x8x32xf32>
    tpu.vector_store %arg3[%c0_98, %c0_99, %c0_100], %102 {strides = array<i32>} : memref<1x8x32xf32, #tpu.memory_space<vmem>>, vector<1x8x32xf32>,
    return
  }
}

module attributes {stable_mosaic.version = 11 : i64} {
  func.func @_latent_kernel(%arg0: memref<2x128xbf16, #tpu.memory_space<vmem>>, %arg1: memref<128x16xbf16, #tpu.memory_space<vmem>>, %arg2: memref<1x16xf32, #tpu.memory_space<vmem>>, %arg3: memref<8x128xbf16, #tpu.memory_space<vmem>>, %arg4: memref<1x128xf32, #tpu.memory_space<vmem>>, %arg5: memref<2x8xf32, #tpu.memory_space<vmem>>, %arg6: memref<2x8xf32, #tpu.memory_space<vmem>>, %arg7: memref<2x8xf32, #tpu.memory_space<vmem>>, %arg8: memref<2x128xf32, #tpu.memory_space<vmem>>) attributes {dimension_semantics = [], scalar_prefetch = 0 : i64, scratch_operands = 0 : i64, tpu.core_type = #tpu.core_type<tc>} {
    %c0 = arith.constant 0 : index
    %c0_0 = arith.constant 0 : index
    %0 = vector.load %arg0[%c0, %c0_0] : memref<2x128xbf16, #tpu.memory_space<vmem>>, vector<2x128xbf16>
    %c0_1 = arith.constant 0 : index
    %c0_2 = arith.constant 0 : index
    %1 = vector.load %arg1[%c0_1, %c0_2] : memref<128x16xbf16, #tpu.memory_space<vmem>>, vector<128x16xbf16>
    %cst = arith.constant dense<0.000000e+00> : vector<2x16xf32>
    %2 = tpu.matmul %0, %1, %cst {dimension_numbers = #tpu.dot_dimension_numbers<[1], [0], [0], [1], [0, 0, 1, 1], [], []>} : vector<2x128xbf16>, vector<128x16xbf16>, vector<2x16xf32> -> vector<2x16xf32>
    %c0_3 = arith.constant 0 : index
    %c0_4 = arith.constant 0 : index
    %3 = vector.load %arg2[%c0_3, %c0_4] : memref<1x16xf32, #tpu.memory_space<vmem>>, vector<1x16xf32>
    %4 = vector.broadcast %3 : vector<1x16xf32> to vector<2x16xf32>
    %5 = arith.addf %2, %4 : vector<2x16xf32>
    %6 = vector.extract_strided_slice %5 {offsets = [0, 0], sizes = [2, 8], strides = [1, 1]} : vector<2x16xf32> to vector<2x8xf32>
    %7 = vector.extract_strided_slice %5 {offsets = [0, 8], sizes = [2, 8], strides = [1, 1]} : vector<2x16xf32> to vector<2x8xf32>
    %c0_5 = arith.constant 0 : index
    %c0_6 = arith.constant 0 : index
    %8 = vector.load %arg5[%c0_5, %c0_6] : memref<2x8xf32, #tpu.memory_space<vmem>>, vector<2x8xf32>
    %cst_7 = arith.constant 5.000000e-01 : f32
    %9 = vector.broadcast %cst_7 : f32 to vector<2x8xf32>
    %10 = arith.mulf %9, %7 : vector<2x8xf32>
    %11 = math.exp %10 : vector<2x8xf32>
    %12 = arith.mulf %8, %11 : vector<2x8xf32>
    %13 = arith.addf %6, %12 : vector<2x8xf32>
    %14 = arith.truncf %13 : vector<2x8xf32> to vector<2x8xbf16>
    %c0_8 = arith.constant 0 : index
    %c0_9 = arith.constant 0 : index
    %15 = vector.load %arg3[%c0_8, %c0_9] : memref<8x128xbf16, #tpu.memory_space<vmem>>, vector<8x128xbf16>
    %cst_10 = arith.constant dense<0.000000e+00> : vector<2x128xf32>
    %16 = tpu.matmul %14, %15, %cst_10 {dimension_numbers = #tpu.dot_dimension_numbers<[1], [0], [0], [1], [0, 0, 1, 1], [], []>} : vector<2x8xbf16>, vector<8x128xbf16>, vector<2x128xf32> -> vector<2x128xf32>
    %c0_11 = arith.constant 0 : index
    %c0_12 = arith.constant 0 : index
    %17 = vector.load %arg4[%c0_11, %c0_12] : memref<1x128xf32, #tpu.memory_space<vmem>>, vector<1x128xf32>
    %18 = vector.broadcast %17 : vector<1x128xf32> to vector<2x128xf32>
    %19 = arith.addf %16, %18 : vector<2x128xf32>
    %c0_13 = arith.constant 0 : index
    %c0_14 = arith.constant 0 : index
    %20 = vector.load %arg6[%c0_13, %c0_14] : memref<2x8xf32, #tpu.memory_space<vmem>>, vector<2x8xf32>
    tpu.vector_store %arg6[%c0_13, %c0_14], %6 {strides = array<i32>} : memref<2x8xf32, #tpu.memory_space<vmem>>, vector<2x8xf32>,
    %c0_15 = arith.constant 0 : index
    %c0_16 = arith.constant 0 : index
    %21 = vector.load %arg7[%c0_15, %c0_16] : memref<2x8xf32, #tpu.memory_space<vmem>>, vector<2x8xf32>
    tpu.vector_store %arg7[%c0_15, %c0_16], %7 {strides = array<i32>} : memref<2x8xf32, #tpu.memory_space<vmem>>, vector<2x8xf32>,
    %c0_17 = arith.constant 0 : index
    %c0_18 = arith.constant 0 : index
    %22 = vector.load %arg8[%c0_17, %c0_18] : memref<2x128xf32, #tpu.memory_space<vmem>>, vector<2x128xf32>
    tpu.vector_store %arg8[%c0_17, %c0_18], %19 {strides = array<i32>} : memref<2x128xf32, #tpu.memory_space<vmem>>, vector<2x128xf32>,
    return
  }
}

module attributes {stable_mosaic.version = 11 : i64} {
  func.func @kernel(%arg0: memref<16x8x32xbf16, #tpu.memory_space<vmem>>, %arg1: memref<16x32x16xbf16, #tpu.memory_space<vmem>>, %arg2: memref<1x16xf32, #tpu.memory_space<vmem>>, %arg3: memref<1x16xf32, #tpu.memory_space<vmem>>, %arg4: memref<1x16xf32, #tpu.memory_space<vmem>>, %arg5: memref<4x8x16xf32, #tpu.memory_space<vmem>>) attributes {dimension_semantics = [], scalar_prefetch = 0 : i64, scratch_operands = 0 : i64, tpu.core_type = #tpu.core_type<tc>} {
    %c0 = arith.constant 0 : index
    %c0_0 = arith.constant 0 : index
    %0 = vector.load %arg2[%c0, %c0_0] : memref<1x16xf32, #tpu.memory_space<vmem>>, vector<1x16xf32>
    %cst = arith.constant 0.000000e+00 : f32
    %1 = vector.broadcast %cst : f32 to vector<8x16xf32>
    %c0_1 = arith.constant 0 : index
    %c0_2 = arith.constant 0 : index
    %c0_3 = arith.constant 0 : index
    %2 = vector.load %arg0[%c0_1, %c0_2, %c0_3] : memref<16x8x32xbf16, #tpu.memory_space<vmem>>, vector<1x8x32xbf16>
    %3 = vector.shape_cast %2 : vector<1x8x32xbf16> to vector<8x32xbf16>
    %c0_4 = arith.constant 0 : index
    %c0_5 = arith.constant 0 : index
    %c0_6 = arith.constant 0 : index
    %4 = vector.load %arg1[%c0_4, %c0_5, %c0_6] : memref<16x32x16xbf16, #tpu.memory_space<vmem>>, vector<1x32x16xbf16>
    %5 = vector.shape_cast %4 : vector<1x32x16xbf16> to vector<32x16xbf16>
    %cst_7 = arith.constant dense<0.000000e+00> : vector<8x16xf32>
    %6 = tpu.matmul %3, %5, %cst_7 {dimension_numbers = #tpu.dot_dimension_numbers<[1], [0], [0], [1], [0, 0, 1, 1], [], []>} : vector<8x32xbf16>, vector<32x16xbf16>, vector<8x16xf32> -> vector<8x16xf32>
    %7 = arith.addf %1, %6 : vector<8x16xf32>
    %c1 = arith.constant 1 : index
    %c0_8 = arith.constant 0 : index
    %c0_9 = arith.constant 0 : index
    %8 = vector.load %arg0[%c1, %c0_8, %c0_9] : memref<16x8x32xbf16, #tpu.memory_space<vmem>>, vector<1x8x32xbf16>
    %9 = vector.shape_cast %8 : vector<1x8x32xbf16> to vector<8x32xbf16>
    %c1_10 = arith.constant 1 : index
    %c0_11 = arith.constant 0 : index
    %c0_12 = arith.constant 0 : index
    %10 = vector.load %arg1[%c1_10, %c0_11, %c0_12] : memref<16x32x16xbf16, #tpu.memory_space<vmem>>, vector<1x32x16xbf16>
    %11 = vector.shape_cast %10 : vector<1x32x16xbf16> to vector<32x16xbf16>
    %cst_13 = arith.constant dense<0.000000e+00> : vector<8x16xf32>
    %12 = tpu.matmul %9, %11, %cst_13 {dimension_numbers = #tpu.dot_dimension_numbers<[1], [0], [0], [1], [0, 0, 1, 1], [], []>} : vector<8x32xbf16>, vector<32x16xbf16>, vector<8x16xf32> -> vector<8x16xf32>
    %13 = arith.addf %7, %12 : vector<8x16xf32>
    %c2 = arith.constant 2 : index
    %c0_14 = arith.constant 0 : index
    %c0_15 = arith.constant 0 : index
    %14 = vector.load %arg0[%c2, %c0_14, %c0_15] : memref<16x8x32xbf16, #tpu.memory_space<vmem>>, vector<1x8x32xbf16>
    %15 = vector.shape_cast %14 : vector<1x8x32xbf16> to vector<8x32xbf16>
    %c2_16 = arith.constant 2 : index
    %c0_17 = arith.constant 0 : index
    %c0_18 = arith.constant 0 : index
    %16 = vector.load %arg1[%c2_16, %c0_17, %c0_18] : memref<16x32x16xbf16, #tpu.memory_space<vmem>>, vector<1x32x16xbf16>
    %17 = vector.shape_cast %16 : vector<1x32x16xbf16> to vector<32x16xbf16>
    %cst_19 = arith.constant dense<0.000000e+00> : vector<8x16xf32>
    %18 = tpu.matmul %15, %17, %cst_19 {dimension_numbers = #tpu.dot_dimension_numbers<[1], [0], [0], [1], [0, 0, 1, 1], [], []>} : vector<8x32xbf16>, vector<32x16xbf16>, vector<8x16xf32> -> vector<8x16xf32>
    %19 = arith.addf %13, %18 : vector<8x16xf32>
    %c3 = arith.constant 3 : index
    %c0_20 = arith.constant 0 : index
    %c0_21 = arith.constant 0 : index
    %20 = vector.load %arg0[%c3, %c0_20, %c0_21] : memref<16x8x32xbf16, #tpu.memory_space<vmem>>, vector<1x8x32xbf16>
    %21 = vector.shape_cast %20 : vector<1x8x32xbf16> to vector<8x32xbf16>
    %c3_22 = arith.constant 3 : index
    %c0_23 = arith.constant 0 : index
    %c0_24 = arith.constant 0 : index
    %22 = vector.load %arg1[%c3_22, %c0_23, %c0_24] : memref<16x32x16xbf16, #tpu.memory_space<vmem>>, vector<1x32x16xbf16>
    %23 = vector.shape_cast %22 : vector<1x32x16xbf16> to vector<32x16xbf16>
    %cst_25 = arith.constant dense<0.000000e+00> : vector<8x16xf32>
    %24 = tpu.matmul %21, %23, %cst_25 {dimension_numbers = #tpu.dot_dimension_numbers<[1], [0], [0], [1], [0, 0, 1, 1], [], []>} : vector<8x32xbf16>, vector<32x16xbf16>, vector<8x16xf32> -> vector<8x16xf32>
    %25 = arith.addf %19, %24 : vector<8x16xf32>
    %26 = vector.broadcast %0 : vector<1x16xf32> to vector<8x16xf32>
    %27 = arith.addf %25, %26 : vector<8x16xf32>
    %c0_26 = arith.constant 0 : index
    %c0_27 = arith.constant 0 : index
    %c0_28 = arith.constant 0 : index
    %28 = vector.load %arg5[%c0_26, %c0_27, %c0_28] : memref<4x8x16xf32, #tpu.memory_space<vmem>>, vector<1x8x16xf32>
    %29 = vector.shape_cast %28 : vector<1x8x16xf32> to vector<8x16xf32>
    %30 = vector.shape_cast %27 : vector<8x16xf32> to vector<1x8x16xf32>
    tpu.vector_store %arg5[%c0_26, %c0_27, %c0_28], %30 {strides = array<i32>} : memref<4x8x16xf32, #tpu.memory_space<vmem>>, vector<1x8x16xf32>,
    %cst_29 = arith.constant 0.000000e+00 : f32
    %31 = vector.broadcast %cst_29 : f32 to vector<8x16xf32>
    %c4 = arith.constant 4 : index
    %c0_30 = arith.constant 0 : index
    %c0_31 = arith.constant 0 : index
    %32 = vector.load %arg0[%c4, %c0_30, %c0_31] : memref<16x8x32xbf16, #tpu.memory_space<vmem>>, vector<1x8x32xbf16>
    %33 = vector.shape_cast %32 : vector<1x8x32xbf16> to vector<8x32xbf16>
    %c4_32 = arith.constant 4 : index
    %c0_33 = arith.constant 0 : index
    %c0_34 = arith.constant 0 : index
    %34 = vector.load %arg1[%c4_32, %c0_33, %c0_34] : memref<16x32x16xbf16, #tpu.memory_space<vmem>>, vector<1x32x16xbf16>
    %35 = vector.shape_cast %34 : vector<1x32x16xbf16> to vector<32x16xbf16>
    %cst_35 = arith.constant dense<0.000000e+00> : vector<8x16xf32>
    %36 = tpu.matmul %33, %35, %cst_35 {dimension_numbers = #tpu.dot_dimension_numbers<[1], [0], [0], [1], [0, 0, 1, 1], [], []>} : vector<8x32xbf16>, vector<32x16xbf16>, vector<8x16xf32> -> vector<8x16xf32>
    %37 = arith.addf %31, %36 : vector<8x16xf32>
    %c5 = arith.constant 5 : index
    %c0_36 = arith.constant 0 : index
    %c0_37 = arith.constant 0 : index
    %38 = vector.load %arg0[%c5, %c0_36, %c0_37] : memref<16x8x32xbf16, #tpu.memory_space<vmem>>, vector<1x8x32xbf16>
    %39 = vector.shape_cast %38 : vector<1x8x32xbf16> to vector<8x32xbf16>
    %c5_38 = arith.constant 5 : index
    %c0_39 = arith.constant 0 : index
    %c0_40 = arith.constant 0 : index
    %40 = vector.load %arg1[%c5_38, %c0_39, %c0_40] : memref<16x32x16xbf16, #tpu.memory_space<vmem>>, vector<1x32x16xbf16>
    %41 = vector.shape_cast %40 : vector<1x32x16xbf16> to vector<32x16xbf16>
    %cst_41 = arith.constant dense<0.000000e+00> : vector<8x16xf32>
    %42 = tpu.matmul %39, %41, %cst_41 {dimension_numbers = #tpu.dot_dimension_numbers<[1], [0], [0], [1], [0, 0, 1, 1], [], []>} : vector<8x32xbf16>, vector<32x16xbf16>, vector<8x16xf32> -> vector<8x16xf32>
    %43 = arith.addf %37, %42 : vector<8x16xf32>
    %c6 = arith.constant 6 : index
    %c0_42 = arith.constant 0 : index
    %c0_43 = arith.constant 0 : index
    %44 = vector.load %arg0[%c6, %c0_42, %c0_43] : memref<16x8x32xbf16, #tpu.memory_space<vmem>>, vector<1x8x32xbf16>
    %45 = vector.shape_cast %44 : vector<1x8x32xbf16> to vector<8x32xbf16>
    %c6_44 = arith.constant 6 : index
    %c0_45 = arith.constant 0 : index
    %c0_46 = arith.constant 0 : index
    %46 = vector.load %arg1[%c6_44, %c0_45, %c0_46] : memref<16x32x16xbf16, #tpu.memory_space<vmem>>, vector<1x32x16xbf16>
    %47 = vector.shape_cast %46 : vector<1x32x16xbf16> to vector<32x16xbf16>
    %cst_47 = arith.constant dense<0.000000e+00> : vector<8x16xf32>
    %48 = tpu.matmul %45, %47, %cst_47 {dimension_numbers = #tpu.dot_dimension_numbers<[1], [0], [0], [1], [0, 0, 1, 1], [], []>} : vector<8x32xbf16>, vector<32x16xbf16>, vector<8x16xf32> -> vector<8x16xf32>
    %49 = arith.addf %43, %48 : vector<8x16xf32>
    %c7 = arith.constant 7 : index
    %c0_48 = arith.constant 0 : index
    %c0_49 = arith.constant 0 : index
    %50 = vector.load %arg0[%c7, %c0_48, %c0_49] : memref<16x8x32xbf16, #tpu.memory_space<vmem>>, vector<1x8x32xbf16>
    %51 = vector.shape_cast %50 : vector<1x8x32xbf16> to vector<8x32xbf16>
    %c7_50 = arith.constant 7 : index
    %c0_51 = arith.constant 0 : index
    %c0_52 = arith.constant 0 : index
    %52 = vector.load %arg1[%c7_50, %c0_51, %c0_52] : memref<16x32x16xbf16, #tpu.memory_space<vmem>>, vector<1x32x16xbf16>
    %53 = vector.shape_cast %52 : vector<1x32x16xbf16> to vector<32x16xbf16>
    %cst_53 = arith.constant dense<0.000000e+00> : vector<8x16xf32>
    %54 = tpu.matmul %51, %53, %cst_53 {dimension_numbers = #tpu.dot_dimension_numbers<[1], [0], [0], [1], [0, 0, 1, 1], [], []>} : vector<8x32xbf16>, vector<32x16xbf16>, vector<8x16xf32> -> vector<8x16xf32>
    %55 = arith.addf %49, %54 : vector<8x16xf32>
    %56 = vector.broadcast %0 : vector<1x16xf32> to vector<8x16xf32>
    %57 = arith.addf %55, %56 : vector<8x16xf32>
    %c1_54 = arith.constant 1 : index
    %c0_55 = arith.constant 0 : index
    %c0_56 = arith.constant 0 : index
    %58 = vector.load %arg5[%c1_54, %c0_55, %c0_56] : memref<4x8x16xf32, #tpu.memory_space<vmem>>, vector<1x8x16xf32>
    %59 = vector.shape_cast %58 : vector<1x8x16xf32> to vector<8x16xf32>
    %60 = vector.shape_cast %57 : vector<8x16xf32> to vector<1x8x16xf32>
    tpu.vector_store %arg5[%c1_54, %c0_55, %c0_56], %60 {strides = array<i32>} : memref<4x8x16xf32, #tpu.memory_space<vmem>>, vector<1x8x16xf32>,
    %cst_57 = arith.constant 0.000000e+00 : f32
    %61 = vector.broadcast %cst_57 : f32 to vector<8x16xf32>
    %c8 = arith.constant 8 : index
    %c0_58 = arith.constant 0 : index
    %c0_59 = arith.constant 0 : index
    %62 = vector.load %arg0[%c8, %c0_58, %c0_59] : memref<16x8x32xbf16, #tpu.memory_space<vmem>>, vector<1x8x32xbf16>
    %63 = vector.shape_cast %62 : vector<1x8x32xbf16> to vector<8x32xbf16>
    %c8_60 = arith.constant 8 : index
    %c0_61 = arith.constant 0 : index
    %c0_62 = arith.constant 0 : index
    %64 = vector.load %arg1[%c8_60, %c0_61, %c0_62] : memref<16x32x16xbf16, #tpu.memory_space<vmem>>, vector<1x32x16xbf16>
    %65 = vector.shape_cast %64 : vector<1x32x16xbf16> to vector<32x16xbf16>
    %cst_63 = arith.constant dense<0.000000e+00> : vector<8x16xf32>
    %66 = tpu.matmul %63, %65, %cst_63 {dimension_numbers = #tpu.dot_dimension_numbers<[1], [0], [0], [1], [0, 0, 1, 1], [], []>} : vector<8x32xbf16>, vector<32x16xbf16>, vector<8x16xf32> -> vector<8x16xf32>
    %67 = arith.addf %61, %66 : vector<8x16xf32>
    %c9 = arith.constant 9 : index
    %c0_64 = arith.constant 0 : index
    %c0_65 = arith.constant 0 : index
    %68 = vector.load %arg0[%c9, %c0_64, %c0_65] : memref<16x8x32xbf16, #tpu.memory_space<vmem>>, vector<1x8x32xbf16>
    %69 = vector.shape_cast %68 : vector<1x8x32xbf16> to vector<8x32xbf16>
    %c9_66 = arith.constant 9 : index
    %c0_67 = arith.constant 0 : index
    %c0_68 = arith.constant 0 : index
    %70 = vector.load %arg1[%c9_66, %c0_67, %c0_68] : memref<16x32x16xbf16, #tpu.memory_space<vmem>>, vector<1x32x16xbf16>
    %71 = vector.shape_cast %70 : vector<1x32x16xbf16> to vector<32x16xbf16>
    %cst_69 = arith.constant dense<0.000000e+00> : vector<8x16xf32>
    %72 = tpu.matmul %69, %71, %cst_69 {dimension_numbers = #tpu.dot_dimension_numbers<[1], [0], [0], [1], [0, 0, 1, 1], [], []>} : vector<8x32xbf16>, vector<32x16xbf16>, vector<8x16xf32> -> vector<8x16xf32>
    %73 = arith.addf %67, %72 : vector<8x16xf32>
    %c10 = arith.constant 10 : index
    %c0_70 = arith.constant 0 : index
    %c0_71 = arith.constant 0 : index
    %74 = vector.load %arg0[%c10, %c0_70, %c0_71] : memref<16x8x32xbf16, #tpu.memory_space<vmem>>, vector<1x8x32xbf16>
    %75 = vector.shape_cast %74 : vector<1x8x32xbf16> to vector<8x32xbf16>
    %c10_72 = arith.constant 10 : index
    %c0_73 = arith.constant 0 : index
    %c0_74 = arith.constant 0 : index
    %76 = vector.load %arg1[%c10_72, %c0_73, %c0_74] : memref<16x32x16xbf16, #tpu.memory_space<vmem>>, vector<1x32x16xbf16>
    %77 = vector.shape_cast %76 : vector<1x32x16xbf16> to vector<32x16xbf16>
    %cst_75 = arith.constant dense<0.000000e+00> : vector<8x16xf32>
    %78 = tpu.matmul %75, %77, %cst_75 {dimension_numbers = #tpu.dot_dimension_numbers<[1], [0], [0], [1], [0, 0, 1, 1], [], []>} : vector<8x32xbf16>, vector<32x16xbf16>, vector<8x16xf32> -> vector<8x16xf32>
    %79 = arith.addf %73, %78 : vector<8x16xf32>
    %c11 = arith.constant 11 : index
    %c0_76 = arith.constant 0 : index
    %c0_77 = arith.constant 0 : index
    %80 = vector.load %arg0[%c11, %c0_76, %c0_77] : memref<16x8x32xbf16, #tpu.memory_space<vmem>>, vector<1x8x32xbf16>
    %81 = vector.shape_cast %80 : vector<1x8x32xbf16> to vector<8x32xbf16>
    %c11_78 = arith.constant 11 : index
    %c0_79 = arith.constant 0 : index
    %c0_80 = arith.constant 0 : index
    %82 = vector.load %arg1[%c11_78, %c0_79, %c0_80] : memref<16x32x16xbf16, #tpu.memory_space<vmem>>, vector<1x32x16xbf16>
    %83 = vector.shape_cast %82 : vector<1x32x16xbf16> to vector<32x16xbf16>
    %cst_81 = arith.constant dense<0.000000e+00> : vector<8x16xf32>
    %84 = tpu.matmul %81, %83, %cst_81 {dimension_numbers = #tpu.dot_dimension_numbers<[1], [0], [0], [1], [0, 0, 1, 1], [], []>} : vector<8x32xbf16>, vector<32x16xbf16>, vector<8x16xf32> -> vector<8x16xf32>
    %85 = arith.addf %79, %84 : vector<8x16xf32>
    %86 = vector.broadcast %0 : vector<1x16xf32> to vector<8x16xf32>
    %87 = arith.addf %85, %86 : vector<8x16xf32>
    %c2_82 = arith.constant 2 : index
    %c0_83 = arith.constant 0 : index
    %c0_84 = arith.constant 0 : index
    %88 = vector.load %arg5[%c2_82, %c0_83, %c0_84] : memref<4x8x16xf32, #tpu.memory_space<vmem>>, vector<1x8x16xf32>
    %89 = vector.shape_cast %88 : vector<1x8x16xf32> to vector<8x16xf32>
    %90 = vector.shape_cast %87 : vector<8x16xf32> to vector<1x8x16xf32>
    tpu.vector_store %arg5[%c2_82, %c0_83, %c0_84], %90 {strides = array<i32>} : memref<4x8x16xf32, #tpu.memory_space<vmem>>, vector<1x8x16xf32>,
    %cst_85 = arith.constant 0.000000e+00 : f32
    %91 = vector.broadcast %cst_85 : f32 to vector<8x16xf32>
    %c12 = arith.constant 12 : index
    %c0_86 = arith.constant 0 : index
    %c0_87 = arith.constant 0 : index
    %92 = vector.load %arg0[%c12, %c0_86, %c0_87] : memref<16x8x32xbf16, #tpu.memory_space<vmem>>, vector<1x8x32xbf16>
    %93 = vector.shape_cast %92 : vector<1x8x32xbf16> to vector<8x32xbf16>
    %c12_88 = arith.constant 12 : index
    %c0_89 = arith.constant 0 : index
    %c0_90 = arith.constant 0 : index
    %94 = vector.load %arg1[%c12_88, %c0_89, %c0_90] : memref<16x32x16xbf16, #tpu.memory_space<vmem>>, vector<1x32x16xbf16>
    %95 = vector.shape_cast %94 : vector<1x32x16xbf16> to vector<32x16xbf16>
    %cst_91 = arith.constant dense<0.000000e+00> : vector<8x16xf32>
    %96 = tpu.matmul %93, %95, %cst_91 {dimension_numbers = #tpu.dot_dimension_numbers<[1], [0], [0], [1], [0, 0, 1, 1], [], []>} : vector<8x32xbf16>, vector<32x16xbf16>, vector<8x16xf32> -> vector<8x16xf32>
    %97 = arith.addf %91, %96 : vector<8x16xf32>
    %c13 = arith.constant 13 : index
    %c0_92 = arith.constant 0 : index
    %c0_93 = arith.constant 0 : index
    %98 = vector.load %arg0[%c13, %c0_92, %c0_93] : memref<16x8x32xbf16, #tpu.memory_space<vmem>>, vector<1x8x32xbf16>
    %99 = vector.shape_cast %98 : vector<1x8x32xbf16> to vector<8x32xbf16>
    %c13_94 = arith.constant 13 : index
    %c0_95 = arith.constant 0 : index
    %c0_96 = arith.constant 0 : index
    %100 = vector.load %arg1[%c13_94, %c0_95, %c0_96] : memref<16x32x16xbf16, #tpu.memory_space<vmem>>, vector<1x32x16xbf16>
    %101 = vector.shape_cast %100 : vector<1x32x16xbf16> to vector<32x16xbf16>
    %cst_97 = arith.constant dense<0.000000e+00> : vector<8x16xf32>
    %102 = tpu.matmul %99, %101, %cst_97 {dimension_numbers = #tpu.dot_dimension_numbers<[1], [0], [0], [1], [0, 0, 1, 1], [], []>} : vector<8x32xbf16>, vector<32x16xbf16>, vector<8x16xf32> -> vector<8x16xf32>
    %103 = arith.addf %97, %102 : vector<8x16xf32>
    %c14 = arith.constant 14 : index
    %c0_98 = arith.constant 0 : index
    %c0_99 = arith.constant 0 : index
    %104 = vector.load %arg0[%c14, %c0_98, %c0_99] : memref<16x8x32xbf16, #tpu.memory_space<vmem>>, vector<1x8x32xbf16>
    %105 = vector.shape_cast %104 : vector<1x8x32xbf16> to vector<8x32xbf16>
    %c14_100 = arith.constant 14 : index
    %c0_101 = arith.constant 0 : index
    %c0_102 = arith.constant 0 : index
    %106 = vector.load %arg1[%c14_100, %c0_101, %c0_102] : memref<16x32x16xbf16, #tpu.memory_space<vmem>>, vector<1x32x16xbf16>
    %107 = vector.shape_cast %106 : vector<1x32x16xbf16> to vector<32x16xbf16>
    %cst_103 = arith.constant dense<0.000000e+00> : vector<8x16xf32>
    %108 = tpu.matmul %105, %107, %cst_103 {dimension_numbers = #tpu.dot_dimension_numbers<[1], [0], [0], [1], [0, 0, 1, 1], [], []>} : vector<8x32xbf16>, vector<32x16xbf16>, vector<8x16xf32> -> vector<8x16xf32>
    %109 = arith.addf %103, %108 : vector<8x16xf32>
    %c15 = arith.constant 15 : index
    %c0_104 = arith.constant 0 : index
    %c0_105 = arith.constant 0 : index
    %110 = vector.load %arg0[%c15, %c0_104, %c0_105] : memref<16x8x32xbf16, #tpu.memory_space<vmem>>, vector<1x8x32xbf16>
    %111 = vector.shape_cast %110 : vector<1x8x32xbf16> to vector<8x32xbf16>
    %c15_106 = arith.constant 15 : index
    %c0_107 = arith.constant 0 : index
    %c0_108 = arith.constant 0 : index
    %112 = vector.load %arg1[%c15_106, %c0_107, %c0_108] : memref<16x32x16xbf16, #tpu.memory_space<vmem>>, vector<1x32x16xbf16>
    %113 = vector.shape_cast %112 : vector<1x32x16xbf16> to vector<32x16xbf16>
    %cst_109 = arith.constant dense<0.000000e+00> : vector<8x16xf32>
    %114 = tpu.matmul %111, %113, %cst_109 {dimension_numbers = #tpu.dot_dimension_numbers<[1], [0], [0], [1], [0, 0, 1, 1], [], []>} : vector<8x32xbf16>, vector<32x16xbf16>, vector<8x16xf32> -> vector<8x16xf32>
    %115 = arith.addf %109, %114 : vector<8x16xf32>
    %116 = vector.broadcast %0 : vector<1x16xf32> to vector<8x16xf32>
    %117 = arith.addf %115, %116 : vector<8x16xf32>
    %c3_110 = arith.constant 3 : index
    %c0_111 = arith.constant 0 : index
    %c0_112 = arith.constant 0 : index
    %118 = vector.load %arg5[%c3_110, %c0_111, %c0_112] : memref<4x8x16xf32, #tpu.memory_space<vmem>>, vector<1x8x16xf32>
    %119 = vector.shape_cast %118 : vector<1x8x16xf32> to vector<8x16xf32>
    %120 = vector.shape_cast %117 : vector<8x16xf32> to vector<1x8x16xf32>
    tpu.vector_store %arg5[%c3_110, %c0_111, %c0_112], %120 {strides = array<i32>} : memref<4x8x16xf32, #tpu.memory_space<vmem>>, vector<1x8x16xf32>,
    %c0_113 = arith.constant 0 : index
    %c0_114 = arith.constant 0 : index
    %c0_115 = arith.constant 0 : index
    %121 = vector.load %arg5[%c0_113, %c0_114, %c0_115] : memref<4x8x16xf32, #tpu.memory_space<vmem>>, vector<4x8x16xf32>
    %cst_116 = arith.constant dense<0.000000e+00> : vector<8x16xf32>
    %122 = vector.multi_reduction <add>, %121, %cst_116 [0] : vector<4x8x16xf32> to vector<8x16xf32>
    %cst_117 = arith.constant dense<0.000000e+00> : vector<16xf32>
    %123 = vector.multi_reduction <add>, %122, %cst_117 [0] : vector<8x16xf32> to vector<16xf32>
    %124 = vector.shape_cast %123 : vector<16xf32> to vector<1x16xf32>
    %cst_118 = arith.constant 3.125000e-02 : f32
    %125 = vector.broadcast %cst_118 : f32 to vector<1x16xf32>
    %126 = arith.mulf %124, %125 : vector<1x16xf32>
    %127 = vector.shape_cast %126 : vector<1x16xf32> to vector<1x1x16xf32>
    %128 = vector.broadcast %127 : vector<1x1x16xf32> to vector<4x8x16xf32>
    %129 = arith.subf %121, %128 : vector<4x8x16xf32>
    %130 = arith.mulf %129, %129 : vector<4x8x16xf32>
    %cst_119 = arith.constant dense<0.000000e+00> : vector<8x16xf32>
    %131 = vector.multi_reduction <add>, %130, %cst_119 [0] : vector<4x8x16xf32> to vector<8x16xf32>
    %cst_120 = arith.constant dense<0.000000e+00> : vector<16xf32>
    %132 = vector.multi_reduction <add>, %131, %cst_120 [0] : vector<8x16xf32> to vector<16xf32>
    %133 = vector.shape_cast %132 : vector<16xf32> to vector<1x16xf32>
    %cst_121 = arith.constant 3.125000e-02 : f32
    %134 = vector.broadcast %cst_121 : f32 to vector<1x16xf32>
    %135 = arith.mulf %133, %134 : vector<1x16xf32>
    %cst_122 = arith.constant 9.99999974E-6 : f32
    %136 = vector.broadcast %cst_122 : f32 to vector<1x16xf32>
    %137 = arith.addf %135, %136 : vector<1x16xf32>
    %138 = math.rsqrt %137 : vector<1x16xf32>
    %139 = vector.shape_cast %138 : vector<1x16xf32> to vector<1x1x16xf32>
    %140 = vector.broadcast %139 : vector<1x1x16xf32> to vector<4x8x16xf32>
    %141 = arith.mulf %129, %140 : vector<4x8x16xf32>
    %c0_123 = arith.constant 0 : index
    %c0_124 = arith.constant 0 : index
    %142 = vector.load %arg3[%c0_123, %c0_124] : memref<1x16xf32, #tpu.memory_space<vmem>>, vector<1x16xf32>
    %143 = vector.shape_cast %142 : vector<1x16xf32> to vector<1x1x16xf32>
    %144 = vector.broadcast %143 : vector<1x1x16xf32> to vector<4x8x16xf32>
    %145 = arith.mulf %141, %144 : vector<4x8x16xf32>
    %c0_125 = arith.constant 0 : index
    %c0_126 = arith.constant 0 : index
    %146 = vector.load %arg4[%c0_125, %c0_126] : memref<1x16xf32, #tpu.memory_space<vmem>>, vector<1x16xf32>
    %147 = vector.shape_cast %146 : vector<1x16xf32> to vector<1x1x16xf32>
    %148 = vector.broadcast %147 : vector<1x1x16xf32> to vector<4x8x16xf32>
    %149 = arith.addf %145, %148 : vector<4x8x16xf32>
    %cst_127 = arith.constant 0.000000e+00 : f32
    %150 = vector.broadcast %cst_127 : f32 to vector<4x8x16xf32>
    %151 = arith.maximumf %149, %150 : vector<4x8x16xf32>
    %c0_128 = arith.constant 0 : index
    %c0_129 = arith.constant 0 : index
    %c0_130 = arith.constant 0 : index
    %152 = vector.load %arg5[%c0_128, %c0_129, %c0_130] : memref<4x8x16xf32, #tpu.memory_space<vmem>>, vector<4x8x16xf32>
    tpu.vector_store %arg5[%c0_128, %c0_129, %c0_130], %151 {strides = array<i32>} : memref<4x8x16xf32, #tpu.memory_space<vmem>>, vector<4x8x16xf32>,
    return
  }
}

module attributes {stable_mosaic.version = 11 : i64} {
  func.func @kernel(%arg0: memref<16x32x16xbf16, #tpu.memory_space<vmem>>, %arg1: memref<16x16x8xbf16, #tpu.memory_space<vmem>>, %arg2: memref<1x8xf32, #tpu.memory_space<vmem>>, %arg3: memref<1x8xf32, #tpu.memory_space<vmem>>, %arg4: memref<1x8xf32, #tpu.memory_space<vmem>>, %arg5: memref<4x32x8xf32, #tpu.memory_space<vmem>>) attributes {dimension_semantics = [], scalar_prefetch = 0 : i64, scratch_operands = 0 : i64, tpu.core_type = #tpu.core_type<tc>} {
    %c0 = arith.constant 0 : index
    %c0_0 = arith.constant 0 : index
    %0 = vector.load %arg2[%c0, %c0_0] : memref<1x8xf32, #tpu.memory_space<vmem>>, vector<1x8xf32>
    %cst = arith.constant 0.000000e+00 : f32
    %1 = vector.broadcast %cst : f32 to vector<32x8xf32>
    %c0_1 = arith.constant 0 : index
    %c0_2 = arith.constant 0 : index
    %c0_3 = arith.constant 0 : index
    %2 = vector.load %arg0[%c0_1, %c0_2, %c0_3] : memref<16x32x16xbf16, #tpu.memory_space<vmem>>, vector<1x32x16xbf16>
    %3 = vector.shape_cast %2 : vector<1x32x16xbf16> to vector<32x16xbf16>
    %c0_4 = arith.constant 0 : index
    %c0_5 = arith.constant 0 : index
    %c0_6 = arith.constant 0 : index
    %4 = vector.load %arg1[%c0_4, %c0_5, %c0_6] : memref<16x16x8xbf16, #tpu.memory_space<vmem>>, vector<1x16x8xbf16>
    %5 = vector.shape_cast %4 : vector<1x16x8xbf16> to vector<16x8xbf16>
    %cst_7 = arith.constant dense<0.000000e+00> : vector<32x8xf32>
    %6 = tpu.matmul %3, %5, %cst_7 {dimension_numbers = #tpu.dot_dimension_numbers<[1], [0], [0], [1], [0, 0, 1, 1], [], []>} : vector<32x16xbf16>, vector<16x8xbf16>, vector<32x8xf32> -> vector<32x8xf32>
    %7 = arith.addf %1, %6 : vector<32x8xf32>
    %c1 = arith.constant 1 : index
    %c0_8 = arith.constant 0 : index
    %c0_9 = arith.constant 0 : index
    %8 = vector.load %arg0[%c1, %c0_8, %c0_9] : memref<16x32x16xbf16, #tpu.memory_space<vmem>>, vector<1x32x16xbf16>
    %9 = vector.shape_cast %8 : vector<1x32x16xbf16> to vector<32x16xbf16>
    %c1_10 = arith.constant 1 : index
    %c0_11 = arith.constant 0 : index
    %c0_12 = arith.constant 0 : index
    %10 = vector.load %arg1[%c1_10, %c0_11, %c0_12] : memref<16x16x8xbf16, #tpu.memory_space<vmem>>, vector<1x16x8xbf16>
    %11 = vector.shape_cast %10 : vector<1x16x8xbf16> to vector<16x8xbf16>
    %cst_13 = arith.constant dense<0.000000e+00> : vector<32x8xf32>
    %12 = tpu.matmul %9, %11, %cst_13 {dimension_numbers = #tpu.dot_dimension_numbers<[1], [0], [0], [1], [0, 0, 1, 1], [], []>} : vector<32x16xbf16>, vector<16x8xbf16>, vector<32x8xf32> -> vector<32x8xf32>
    %13 = arith.addf %7, %12 : vector<32x8xf32>
    %c2 = arith.constant 2 : index
    %c0_14 = arith.constant 0 : index
    %c0_15 = arith.constant 0 : index
    %14 = vector.load %arg0[%c2, %c0_14, %c0_15] : memref<16x32x16xbf16, #tpu.memory_space<vmem>>, vector<1x32x16xbf16>
    %15 = vector.shape_cast %14 : vector<1x32x16xbf16> to vector<32x16xbf16>
    %c2_16 = arith.constant 2 : index
    %c0_17 = arith.constant 0 : index
    %c0_18 = arith.constant 0 : index
    %16 = vector.load %arg1[%c2_16, %c0_17, %c0_18] : memref<16x16x8xbf16, #tpu.memory_space<vmem>>, vector<1x16x8xbf16>
    %17 = vector.shape_cast %16 : vector<1x16x8xbf16> to vector<16x8xbf16>
    %cst_19 = arith.constant dense<0.000000e+00> : vector<32x8xf32>
    %18 = tpu.matmul %15, %17, %cst_19 {dimension_numbers = #tpu.dot_dimension_numbers<[1], [0], [0], [1], [0, 0, 1, 1], [], []>} : vector<32x16xbf16>, vector<16x8xbf16>, vector<32x8xf32> -> vector<32x8xf32>
    %19 = arith.addf %13, %18 : vector<32x8xf32>
    %c3 = arith.constant 3 : index
    %c0_20 = arith.constant 0 : index
    %c0_21 = arith.constant 0 : index
    %20 = vector.load %arg0[%c3, %c0_20, %c0_21] : memref<16x32x16xbf16, #tpu.memory_space<vmem>>, vector<1x32x16xbf16>
    %21 = vector.shape_cast %20 : vector<1x32x16xbf16> to vector<32x16xbf16>
    %c3_22 = arith.constant 3 : index
    %c0_23 = arith.constant 0 : index
    %c0_24 = arith.constant 0 : index
    %22 = vector.load %arg1[%c3_22, %c0_23, %c0_24] : memref<16x16x8xbf16, #tpu.memory_space<vmem>>, vector<1x16x8xbf16>
    %23 = vector.shape_cast %22 : vector<1x16x8xbf16> to vector<16x8xbf16>
    %cst_25 = arith.constant dense<0.000000e+00> : vector<32x8xf32>
    %24 = tpu.matmul %21, %23, %cst_25 {dimension_numbers = #tpu.dot_dimension_numbers<[1], [0], [0], [1], [0, 0, 1, 1], [], []>} : vector<32x16xbf16>, vector<16x8xbf16>, vector<32x8xf32> -> vector<32x8xf32>
    %25 = arith.addf %19, %24 : vector<32x8xf32>
    %26 = vector.broadcast %0 : vector<1x8xf32> to vector<32x8xf32>
    %27 = arith.addf %25, %26 : vector<32x8xf32>
    %c0_26 = arith.constant 0 : index
    %c0_27 = arith.constant 0 : index
    %c0_28 = arith.constant 0 : index
    %28 = vector.load %arg5[%c0_26, %c0_27, %c0_28] : memref<4x32x8xf32, #tpu.memory_space<vmem>>, vector<1x32x8xf32>
    %29 = vector.shape_cast %28 : vector<1x32x8xf32> to vector<32x8xf32>
    %30 = vector.shape_cast %27 : vector<32x8xf32> to vector<1x32x8xf32>
    tpu.vector_store %arg5[%c0_26, %c0_27, %c0_28], %30 {strides = array<i32>} : memref<4x32x8xf32, #tpu.memory_space<vmem>>, vector<1x32x8xf32>,
    %cst_29 = arith.constant 0.000000e+00 : f32
    %31 = vector.broadcast %cst_29 : f32 to vector<32x8xf32>
    %c4 = arith.constant 4 : index
    %c0_30 = arith.constant 0 : index
    %c0_31 = arith.constant 0 : index
    %32 = vector.load %arg0[%c4, %c0_30, %c0_31] : memref<16x32x16xbf16, #tpu.memory_space<vmem>>, vector<1x32x16xbf16>
    %33 = vector.shape_cast %32 : vector<1x32x16xbf16> to vector<32x16xbf16>
    %c4_32 = arith.constant 4 : index
    %c0_33 = arith.constant 0 : index
    %c0_34 = arith.constant 0 : index
    %34 = vector.load %arg1[%c4_32, %c0_33, %c0_34] : memref<16x16x8xbf16, #tpu.memory_space<vmem>>, vector<1x16x8xbf16>
    %35 = vector.shape_cast %34 : vector<1x16x8xbf16> to vector<16x8xbf16>
    %cst_35 = arith.constant dense<0.000000e+00> : vector<32x8xf32>
    %36 = tpu.matmul %33, %35, %cst_35 {dimension_numbers = #tpu.dot_dimension_numbers<[1], [0], [0], [1], [0, 0, 1, 1], [], []>} : vector<32x16xbf16>, vector<16x8xbf16>, vector<32x8xf32> -> vector<32x8xf32>
    %37 = arith.addf %31, %36 : vector<32x8xf32>
    %c5 = arith.constant 5 : index
    %c0_36 = arith.constant 0 : index
    %c0_37 = arith.constant 0 : index
    %38 = vector.load %arg0[%c5, %c0_36, %c0_37] : memref<16x32x16xbf16, #tpu.memory_space<vmem>>, vector<1x32x16xbf16>
    %39 = vector.shape_cast %38 : vector<1x32x16xbf16> to vector<32x16xbf16>
    %c5_38 = arith.constant 5 : index
    %c0_39 = arith.constant 0 : index
    %c0_40 = arith.constant 0 : index
    %40 = vector.load %arg1[%c5_38, %c0_39, %c0_40] : memref<16x16x8xbf16, #tpu.memory_space<vmem>>, vector<1x16x8xbf16>
    %41 = vector.shape_cast %40 : vector<1x16x8xbf16> to vector<16x8xbf16>
    %cst_41 = arith.constant dense<0.000000e+00> : vector<32x8xf32>
    %42 = tpu.matmul %39, %41, %cst_41 {dimension_numbers = #tpu.dot_dimension_numbers<[1], [0], [0], [1], [0, 0, 1, 1], [], []>} : vector<32x16xbf16>, vector<16x8xbf16>, vector<32x8xf32> -> vector<32x8xf32>
    %43 = arith.addf %37, %42 : vector<32x8xf32>
    %c6 = arith.constant 6 : index
    %c0_42 = arith.constant 0 : index
    %c0_43 = arith.constant 0 : index
    %44 = vector.load %arg0[%c6, %c0_42, %c0_43] : memref<16x32x16xbf16, #tpu.memory_space<vmem>>, vector<1x32x16xbf16>
    %45 = vector.shape_cast %44 : vector<1x32x16xbf16> to vector<32x16xbf16>
    %c6_44 = arith.constant 6 : index
    %c0_45 = arith.constant 0 : index
    %c0_46 = arith.constant 0 : index
    %46 = vector.load %arg1[%c6_44, %c0_45, %c0_46] : memref<16x16x8xbf16, #tpu.memory_space<vmem>>, vector<1x16x8xbf16>
    %47 = vector.shape_cast %46 : vector<1x16x8xbf16> to vector<16x8xbf16>
    %cst_47 = arith.constant dense<0.000000e+00> : vector<32x8xf32>
    %48 = tpu.matmul %45, %47, %cst_47 {dimension_numbers = #tpu.dot_dimension_numbers<[1], [0], [0], [1], [0, 0, 1, 1], [], []>} : vector<32x16xbf16>, vector<16x8xbf16>, vector<32x8xf32> -> vector<32x8xf32>
    %49 = arith.addf %43, %48 : vector<32x8xf32>
    %c7 = arith.constant 7 : index
    %c0_48 = arith.constant 0 : index
    %c0_49 = arith.constant 0 : index
    %50 = vector.load %arg0[%c7, %c0_48, %c0_49] : memref<16x32x16xbf16, #tpu.memory_space<vmem>>, vector<1x32x16xbf16>
    %51 = vector.shape_cast %50 : vector<1x32x16xbf16> to vector<32x16xbf16>
    %c7_50 = arith.constant 7 : index
    %c0_51 = arith.constant 0 : index
    %c0_52 = arith.constant 0 : index
    %52 = vector.load %arg1[%c7_50, %c0_51, %c0_52] : memref<16x16x8xbf16, #tpu.memory_space<vmem>>, vector<1x16x8xbf16>
    %53 = vector.shape_cast %52 : vector<1x16x8xbf16> to vector<16x8xbf16>
    %cst_53 = arith.constant dense<0.000000e+00> : vector<32x8xf32>
    %54 = tpu.matmul %51, %53, %cst_53 {dimension_numbers = #tpu.dot_dimension_numbers<[1], [0], [0], [1], [0, 0, 1, 1], [], []>} : vector<32x16xbf16>, vector<16x8xbf16>, vector<32x8xf32> -> vector<32x8xf32>
    %55 = arith.addf %49, %54 : vector<32x8xf32>
    %56 = vector.broadcast %0 : vector<1x8xf32> to vector<32x8xf32>
    %57 = arith.addf %55, %56 : vector<32x8xf32>
    %c1_54 = arith.constant 1 : index
    %c0_55 = arith.constant 0 : index
    %c0_56 = arith.constant 0 : index
    %58 = vector.load %arg5[%c1_54, %c0_55, %c0_56] : memref<4x32x8xf32, #tpu.memory_space<vmem>>, vector<1x32x8xf32>
    %59 = vector.shape_cast %58 : vector<1x32x8xf32> to vector<32x8xf32>
    %60 = vector.shape_cast %57 : vector<32x8xf32> to vector<1x32x8xf32>
    tpu.vector_store %arg5[%c1_54, %c0_55, %c0_56], %60 {strides = array<i32>} : memref<4x32x8xf32, #tpu.memory_space<vmem>>, vector<1x32x8xf32>,
    %cst_57 = arith.constant 0.000000e+00 : f32
    %61 = vector.broadcast %cst_57 : f32 to vector<32x8xf32>
    %c8 = arith.constant 8 : index
    %c0_58 = arith.constant 0 : index
    %c0_59 = arith.constant 0 : index
    %62 = vector.load %arg0[%c8, %c0_58, %c0_59] : memref<16x32x16xbf16, #tpu.memory_space<vmem>>, vector<1x32x16xbf16>
    %63 = vector.shape_cast %62 : vector<1x32x16xbf16> to vector<32x16xbf16>
    %c8_60 = arith.constant 8 : index
    %c0_61 = arith.constant 0 : index
    %c0_62 = arith.constant 0 : index
    %64 = vector.load %arg1[%c8_60, %c0_61, %c0_62] : memref<16x16x8xbf16, #tpu.memory_space<vmem>>, vector<1x16x8xbf16>
    %65 = vector.shape_cast %64 : vector<1x16x8xbf16> to vector<16x8xbf16>
    %cst_63 = arith.constant dense<0.000000e+00> : vector<32x8xf32>
    %66 = tpu.matmul %63, %65, %cst_63 {dimension_numbers = #tpu.dot_dimension_numbers<[1], [0], [0], [1], [0, 0, 1, 1], [], []>} : vector<32x16xbf16>, vector<16x8xbf16>, vector<32x8xf32> -> vector<32x8xf32>
    %67 = arith.addf %61, %66 : vector<32x8xf32>
    %c9 = arith.constant 9 : index
    %c0_64 = arith.constant 0 : index
    %c0_65 = arith.constant 0 : index
    %68 = vector.load %arg0[%c9, %c0_64, %c0_65] : memref<16x32x16xbf16, #tpu.memory_space<vmem>>, vector<1x32x16xbf16>
    %69 = vector.shape_cast %68 : vector<1x32x16xbf16> to vector<32x16xbf16>
    %c9_66 = arith.constant 9 : index
    %c0_67 = arith.constant 0 : index
    %c0_68 = arith.constant 0 : index
    %70 = vector.load %arg1[%c9_66, %c0_67, %c0_68] : memref<16x16x8xbf16, #tpu.memory_space<vmem>>, vector<1x16x8xbf16>
    %71 = vector.shape_cast %70 : vector<1x16x8xbf16> to vector<16x8xbf16>
    %cst_69 = arith.constant dense<0.000000e+00> : vector<32x8xf32>
    %72 = tpu.matmul %69, %71, %cst_69 {dimension_numbers = #tpu.dot_dimension_numbers<[1], [0], [0], [1], [0, 0, 1, 1], [], []>} : vector<32x16xbf16>, vector<16x8xbf16>, vector<32x8xf32> -> vector<32x8xf32>
    %73 = arith.addf %67, %72 : vector<32x8xf32>
    %c10 = arith.constant 10 : index
    %c0_70 = arith.constant 0 : index
    %c0_71 = arith.constant 0 : index
    %74 = vector.load %arg0[%c10, %c0_70, %c0_71] : memref<16x32x16xbf16, #tpu.memory_space<vmem>>, vector<1x32x16xbf16>
    %75 = vector.shape_cast %74 : vector<1x32x16xbf16> to vector<32x16xbf16>
    %c10_72 = arith.constant 10 : index
    %c0_73 = arith.constant 0 : index
    %c0_74 = arith.constant 0 : index
    %76 = vector.load %arg1[%c10_72, %c0_73, %c0_74] : memref<16x16x8xbf16, #tpu.memory_space<vmem>>, vector<1x16x8xbf16>
    %77 = vector.shape_cast %76 : vector<1x16x8xbf16> to vector<16x8xbf16>
    %cst_75 = arith.constant dense<0.000000e+00> : vector<32x8xf32>
    %78 = tpu.matmul %75, %77, %cst_75 {dimension_numbers = #tpu.dot_dimension_numbers<[1], [0], [0], [1], [0, 0, 1, 1], [], []>} : vector<32x16xbf16>, vector<16x8xbf16>, vector<32x8xf32> -> vector<32x8xf32>
    %79 = arith.addf %73, %78 : vector<32x8xf32>
    %c11 = arith.constant 11 : index
    %c0_76 = arith.constant 0 : index
    %c0_77 = arith.constant 0 : index
    %80 = vector.load %arg0[%c11, %c0_76, %c0_77] : memref<16x32x16xbf16, #tpu.memory_space<vmem>>, vector<1x32x16xbf16>
    %81 = vector.shape_cast %80 : vector<1x32x16xbf16> to vector<32x16xbf16>
    %c11_78 = arith.constant 11 : index
    %c0_79 = arith.constant 0 : index
    %c0_80 = arith.constant 0 : index
    %82 = vector.load %arg1[%c11_78, %c0_79, %c0_80] : memref<16x16x8xbf16, #tpu.memory_space<vmem>>, vector<1x16x8xbf16>
    %83 = vector.shape_cast %82 : vector<1x16x8xbf16> to vector<16x8xbf16>
    %cst_81 = arith.constant dense<0.000000e+00> : vector<32x8xf32>
    %84 = tpu.matmul %81, %83, %cst_81 {dimension_numbers = #tpu.dot_dimension_numbers<[1], [0], [0], [1], [0, 0, 1, 1], [], []>} : vector<32x16xbf16>, vector<16x8xbf16>, vector<32x8xf32> -> vector<32x8xf32>
    %85 = arith.addf %79, %84 : vector<32x8xf32>
    %86 = vector.broadcast %0 : vector<1x8xf32> to vector<32x8xf32>
    %87 = arith.addf %85, %86 : vector<32x8xf32>
    %c2_82 = arith.constant 2 : index
    %c0_83 = arith.constant 0 : index
    %c0_84 = arith.constant 0 : index
    %88 = vector.load %arg5[%c2_82, %c0_83, %c0_84] : memref<4x32x8xf32, #tpu.memory_space<vmem>>, vector<1x32x8xf32>
    %89 = vector.shape_cast %88 : vector<1x32x8xf32> to vector<32x8xf32>
    %90 = vector.shape_cast %87 : vector<32x8xf32> to vector<1x32x8xf32>
    tpu.vector_store %arg5[%c2_82, %c0_83, %c0_84], %90 {strides = array<i32>} : memref<4x32x8xf32, #tpu.memory_space<vmem>>, vector<1x32x8xf32>,
    %cst_85 = arith.constant 0.000000e+00 : f32
    %91 = vector.broadcast %cst_85 : f32 to vector<32x8xf32>
    %c12 = arith.constant 12 : index
    %c0_86 = arith.constant 0 : index
    %c0_87 = arith.constant 0 : index
    %92 = vector.load %arg0[%c12, %c0_86, %c0_87] : memref<16x32x16xbf16, #tpu.memory_space<vmem>>, vector<1x32x16xbf16>
    %93 = vector.shape_cast %92 : vector<1x32x16xbf16> to vector<32x16xbf16>
    %c12_88 = arith.constant 12 : index
    %c0_89 = arith.constant 0 : index
    %c0_90 = arith.constant 0 : index
    %94 = vector.load %arg1[%c12_88, %c0_89, %c0_90] : memref<16x16x8xbf16, #tpu.memory_space<vmem>>, vector<1x16x8xbf16>
    %95 = vector.shape_cast %94 : vector<1x16x8xbf16> to vector<16x8xbf16>
    %cst_91 = arith.constant dense<0.000000e+00> : vector<32x8xf32>
    %96 = tpu.matmul %93, %95, %cst_91 {dimension_numbers = #tpu.dot_dimension_numbers<[1], [0], [0], [1], [0, 0, 1, 1], [], []>} : vector<32x16xbf16>, vector<16x8xbf16>, vector<32x8xf32> -> vector<32x8xf32>
    %97 = arith.addf %91, %96 : vector<32x8xf32>
    %c13 = arith.constant 13 : index
    %c0_92 = arith.constant 0 : index
    %c0_93 = arith.constant 0 : index
    %98 = vector.load %arg0[%c13, %c0_92, %c0_93] : memref<16x32x16xbf16, #tpu.memory_space<vmem>>, vector<1x32x16xbf16>
    %99 = vector.shape_cast %98 : vector<1x32x16xbf16> to vector<32x16xbf16>
    %c13_94 = arith.constant 13 : index
    %c0_95 = arith.constant 0 : index
    %c0_96 = arith.constant 0 : index
    %100 = vector.load %arg1[%c13_94, %c0_95, %c0_96] : memref<16x16x8xbf16, #tpu.memory_space<vmem>>, vector<1x16x8xbf16>
    %101 = vector.shape_cast %100 : vector<1x16x8xbf16> to vector<16x8xbf16>
    %cst_97 = arith.constant dense<0.000000e+00> : vector<32x8xf32>
    %102 = tpu.matmul %99, %101, %cst_97 {dimension_numbers = #tpu.dot_dimension_numbers<[1], [0], [0], [1], [0, 0, 1, 1], [], []>} : vector<32x16xbf16>, vector<16x8xbf16>, vector<32x8xf32> -> vector<32x8xf32>
    %103 = arith.addf %97, %102 : vector<32x8xf32>
    %c14 = arith.constant 14 : index
    %c0_98 = arith.constant 0 : index
    %c0_99 = arith.constant 0 : index
    %104 = vector.load %arg0[%c14, %c0_98, %c0_99] : memref<16x32x16xbf16, #tpu.memory_space<vmem>>, vector<1x32x16xbf16>
    %105 = vector.shape_cast %104 : vector<1x32x16xbf16> to vector<32x16xbf16>
    %c14_100 = arith.constant 14 : index
    %c0_101 = arith.constant 0 : index
    %c0_102 = arith.constant 0 : index
    %106 = vector.load %arg1[%c14_100, %c0_101, %c0_102] : memref<16x16x8xbf16, #tpu.memory_space<vmem>>, vector<1x16x8xbf16>
    %107 = vector.shape_cast %106 : vector<1x16x8xbf16> to vector<16x8xbf16>
    %cst_103 = arith.constant dense<0.000000e+00> : vector<32x8xf32>
    %108 = tpu.matmul %105, %107, %cst_103 {dimension_numbers = #tpu.dot_dimension_numbers<[1], [0], [0], [1], [0, 0, 1, 1], [], []>} : vector<32x16xbf16>, vector<16x8xbf16>, vector<32x8xf32> -> vector<32x8xf32>
    %109 = arith.addf %103, %108 : vector<32x8xf32>
    %c15 = arith.constant 15 : index
    %c0_104 = arith.constant 0 : index
    %c0_105 = arith.constant 0 : index
    %110 = vector.load %arg0[%c15, %c0_104, %c0_105] : memref<16x32x16xbf16, #tpu.memory_space<vmem>>, vector<1x32x16xbf16>
    %111 = vector.shape_cast %110 : vector<1x32x16xbf16> to vector<32x16xbf16>
    %c15_106 = arith.constant 15 : index
    %c0_107 = arith.constant 0 : index
    %c0_108 = arith.constant 0 : index
    %112 = vector.load %arg1[%c15_106, %c0_107, %c0_108] : memref<16x16x8xbf16, #tpu.memory_space<vmem>>, vector<1x16x8xbf16>
    %113 = vector.shape_cast %112 : vector<1x16x8xbf16> to vector<16x8xbf16>
    %cst_109 = arith.constant dense<0.000000e+00> : vector<32x8xf32>
    %114 = tpu.matmul %111, %113, %cst_109 {dimension_numbers = #tpu.dot_dimension_numbers<[1], [0], [0], [1], [0, 0, 1, 1], [], []>} : vector<32x16xbf16>, vector<16x8xbf16>, vector<32x8xf32> -> vector<32x8xf32>
    %115 = arith.addf %109, %114 : vector<32x8xf32>
    %116 = vector.broadcast %0 : vector<1x8xf32> to vector<32x8xf32>
    %117 = arith.addf %115, %116 : vector<32x8xf32>
    %c3_110 = arith.constant 3 : index
    %c0_111 = arith.constant 0 : index
    %c0_112 = arith.constant 0 : index
    %118 = vector.load %arg5[%c3_110, %c0_111, %c0_112] : memref<4x32x8xf32, #tpu.memory_space<vmem>>, vector<1x32x8xf32>
    %119 = vector.shape_cast %118 : vector<1x32x8xf32> to vector<32x8xf32>
    %120 = vector.shape_cast %117 : vector<32x8xf32> to vector<1x32x8xf32>
    tpu.vector_store %arg5[%c3_110, %c0_111, %c0_112], %120 {strides = array<i32>} : memref<4x32x8xf32, #tpu.memory_space<vmem>>, vector<1x32x8xf32>,
    %c0_113 = arith.constant 0 : index
    %c0_114 = arith.constant 0 : index
    %c0_115 = arith.constant 0 : index
    %121 = vector.load %arg5[%c0_113, %c0_114, %c0_115] : memref<4x32x8xf32, #tpu.memory_space<vmem>>, vector<4x32x8xf32>
    %cst_116 = arith.constant dense<0.000000e+00> : vector<32x8xf32>
    %122 = vector.multi_reduction <add>, %121, %cst_116 [0] : vector<4x32x8xf32> to vector<32x8xf32>
    %cst_117 = arith.constant dense<0.000000e+00> : vector<8xf32>
    %123 = vector.multi_reduction <add>, %122, %cst_117 [0] : vector<32x8xf32> to vector<8xf32>
    %124 = vector.shape_cast %123 : vector<8xf32> to vector<1x8xf32>
    %cst_118 = arith.constant 7.812500e-03 : f32
    %125 = vector.broadcast %cst_118 : f32 to vector<1x8xf32>
    %126 = arith.mulf %124, %125 : vector<1x8xf32>
    %127 = vector.shape_cast %126 : vector<1x8xf32> to vector<1x1x8xf32>
    %128 = vector.broadcast %127 : vector<1x1x8xf32> to vector<4x32x8xf32>
    %129 = arith.subf %121, %128 : vector<4x32x8xf32>
    %130 = arith.mulf %129, %129 : vector<4x32x8xf32>
    %cst_119 = arith.constant dense<0.000000e+00> : vector<32x8xf32>
    %131 = vector.multi_reduction <add>, %130, %cst_119 [0] : vector<4x32x8xf32> to vector<32x8xf32>
    %cst_120 = arith.constant dense<0.000000e+00> : vector<8xf32>
    %132 = vector.multi_reduction <add>, %131, %cst_120 [0] : vector<32x8xf32> to vector<8xf32>
    %133 = vector.shape_cast %132 : vector<8xf32> to vector<1x8xf32>
    %cst_121 = arith.constant 7.812500e-03 : f32
    %134 = vector.broadcast %cst_121 : f32 to vector<1x8xf32>
    %135 = arith.mulf %133, %134 : vector<1x8xf32>
    %cst_122 = arith.constant 9.99999974E-6 : f32
    %136 = vector.broadcast %cst_122 : f32 to vector<1x8xf32>
    %137 = arith.addf %135, %136 : vector<1x8xf32>
    %138 = math.rsqrt %137 : vector<1x8xf32>
    %139 = vector.shape_cast %138 : vector<1x8xf32> to vector<1x1x8xf32>
    %140 = vector.broadcast %139 : vector<1x1x8xf32> to vector<4x32x8xf32>
    %141 = arith.mulf %129, %140 : vector<4x32x8xf32>
    %c0_123 = arith.constant 0 : index
    %c0_124 = arith.constant 0 : index
    %142 = vector.load %arg3[%c0_123, %c0_124] : memref<1x8xf32, #tpu.memory_space<vmem>>, vector<1x8xf32>
    %143 = vector.shape_cast %142 : vector<1x8xf32> to vector<1x1x8xf32>
    %144 = vector.broadcast %143 : vector<1x1x8xf32> to vector<4x32x8xf32>
    %145 = arith.mulf %141, %144 : vector<4x32x8xf32>
    %c0_125 = arith.constant 0 : index
    %c0_126 = arith.constant 0 : index
    %146 = vector.load %arg4[%c0_125, %c0_126] : memref<1x8xf32, #tpu.memory_space<vmem>>, vector<1x8xf32>
    %147 = vector.shape_cast %146 : vector<1x8xf32> to vector<1x1x8xf32>
    %148 = vector.broadcast %147 : vector<1x1x8xf32> to vector<4x32x8xf32>
    %149 = arith.addf %145, %148 : vector<4x32x8xf32>
    %cst_127 = arith.constant 0.000000e+00 : f32
    %150 = vector.broadcast %cst_127 : f32 to vector<4x32x8xf32>
    %151 = arith.maximumf %149, %150 : vector<4x32x8xf32>
    %c0_128 = arith.constant 0 : index
    %c0_129 = arith.constant 0 : index
    %c0_130 = arith.constant 0 : index
    %152 = vector.load %arg5[%c0_128, %c0_129, %c0_130] : memref<4x32x8xf32, #tpu.memory_space<vmem>>, vector<4x32x8xf32>
    tpu.vector_store %arg5[%c0_128, %c0_129, %c0_130], %151 {strides = array<i32>} : memref<4x32x8xf32, #tpu.memory_space<vmem>>, vector<4x32x8xf32>,
    return
  }
}

module attributes {stable_mosaic.version = 11 : i64} {
  func.func @kernel(%arg0: memref<16x128x8xbf16, #tpu.memory_space<vmem>>, %arg1: memref<16x8x4xbf16, #tpu.memory_space<vmem>>, %arg2: memref<1x4xf32, #tpu.memory_space<vmem>>, %arg3: memref<4x128x4xf32, #tpu.memory_space<vmem>>) attributes {dimension_semantics = [], scalar_prefetch = 0 : i64, scratch_operands = 0 : i64, tpu.core_type = #tpu.core_type<tc>} {
    %c0 = arith.constant 0 : index
    %c0_0 = arith.constant 0 : index
    %0 = vector.load %arg2[%c0, %c0_0] : memref<1x4xf32, #tpu.memory_space<vmem>>, vector<1x4xf32>
    %cst = arith.constant 0.000000e+00 : f32
    %1 = vector.broadcast %cst : f32 to vector<128x4xf32>
    %c0_1 = arith.constant 0 : index
    %c0_2 = arith.constant 0 : index
    %c0_3 = arith.constant 0 : index
    %2 = vector.load %arg0[%c0_1, %c0_2, %c0_3] : memref<16x128x8xbf16, #tpu.memory_space<vmem>>, vector<1x128x8xbf16>
    %3 = vector.shape_cast %2 : vector<1x128x8xbf16> to vector<128x8xbf16>
    %c0_4 = arith.constant 0 : index
    %c0_5 = arith.constant 0 : index
    %c0_6 = arith.constant 0 : index
    %4 = vector.load %arg1[%c0_4, %c0_5, %c0_6] : memref<16x8x4xbf16, #tpu.memory_space<vmem>>, vector<1x8x4xbf16>
    %5 = vector.shape_cast %4 : vector<1x8x4xbf16> to vector<8x4xbf16>
    %cst_7 = arith.constant dense<0.000000e+00> : vector<128x4xf32>
    %6 = tpu.matmul %3, %5, %cst_7 {dimension_numbers = #tpu.dot_dimension_numbers<[1], [0], [0], [1], [0, 0, 1, 1], [], []>} : vector<128x8xbf16>, vector<8x4xbf16>, vector<128x4xf32> -> vector<128x4xf32>
    %7 = arith.addf %1, %6 : vector<128x4xf32>
    %c1 = arith.constant 1 : index
    %c0_8 = arith.constant 0 : index
    %c0_9 = arith.constant 0 : index
    %8 = vector.load %arg0[%c1, %c0_8, %c0_9] : memref<16x128x8xbf16, #tpu.memory_space<vmem>>, vector<1x128x8xbf16>
    %9 = vector.shape_cast %8 : vector<1x128x8xbf16> to vector<128x8xbf16>
    %c1_10 = arith.constant 1 : index
    %c0_11 = arith.constant 0 : index
    %c0_12 = arith.constant 0 : index
    %10 = vector.load %arg1[%c1_10, %c0_11, %c0_12] : memref<16x8x4xbf16, #tpu.memory_space<vmem>>, vector<1x8x4xbf16>
    %11 = vector.shape_cast %10 : vector<1x8x4xbf16> to vector<8x4xbf16>
    %cst_13 = arith.constant dense<0.000000e+00> : vector<128x4xf32>
    %12 = tpu.matmul %9, %11, %cst_13 {dimension_numbers = #tpu.dot_dimension_numbers<[1], [0], [0], [1], [0, 0, 1, 1], [], []>} : vector<128x8xbf16>, vector<8x4xbf16>, vector<128x4xf32> -> vector<128x4xf32>
    %13 = arith.addf %7, %12 : vector<128x4xf32>
    %c2 = arith.constant 2 : index
    %c0_14 = arith.constant 0 : index
    %c0_15 = arith.constant 0 : index
    %14 = vector.load %arg0[%c2, %c0_14, %c0_15] : memref<16x128x8xbf16, #tpu.memory_space<vmem>>, vector<1x128x8xbf16>
    %15 = vector.shape_cast %14 : vector<1x128x8xbf16> to vector<128x8xbf16>
    %c2_16 = arith.constant 2 : index
    %c0_17 = arith.constant 0 : index
    %c0_18 = arith.constant 0 : index
    %16 = vector.load %arg1[%c2_16, %c0_17, %c0_18] : memref<16x8x4xbf16, #tpu.memory_space<vmem>>, vector<1x8x4xbf16>
    %17 = vector.shape_cast %16 : vector<1x8x4xbf16> to vector<8x4xbf16>
    %cst_19 = arith.constant dense<0.000000e+00> : vector<128x4xf32>
    %18 = tpu.matmul %15, %17, %cst_19 {dimension_numbers = #tpu.dot_dimension_numbers<[1], [0], [0], [1], [0, 0, 1, 1], [], []>} : vector<128x8xbf16>, vector<8x4xbf16>, vector<128x4xf32> -> vector<128x4xf32>
    %19 = arith.addf %13, %18 : vector<128x4xf32>
    %c3 = arith.constant 3 : index
    %c0_20 = arith.constant 0 : index
    %c0_21 = arith.constant 0 : index
    %20 = vector.load %arg0[%c3, %c0_20, %c0_21] : memref<16x128x8xbf16, #tpu.memory_space<vmem>>, vector<1x128x8xbf16>
    %21 = vector.shape_cast %20 : vector<1x128x8xbf16> to vector<128x8xbf16>
    %c3_22 = arith.constant 3 : index
    %c0_23 = arith.constant 0 : index
    %c0_24 = arith.constant 0 : index
    %22 = vector.load %arg1[%c3_22, %c0_23, %c0_24] : memref<16x8x4xbf16, #tpu.memory_space<vmem>>, vector<1x8x4xbf16>
    %23 = vector.shape_cast %22 : vector<1x8x4xbf16> to vector<8x4xbf16>
    %cst_25 = arith.constant dense<0.000000e+00> : vector<128x4xf32>
    %24 = tpu.matmul %21, %23, %cst_25 {dimension_numbers = #tpu.dot_dimension_numbers<[1], [0], [0], [1], [0, 0, 1, 1], [], []>} : vector<128x8xbf16>, vector<8x4xbf16>, vector<128x4xf32> -> vector<128x4xf32>
    %25 = arith.addf %19, %24 : vector<128x4xf32>
    %26 = vector.broadcast %0 : vector<1x4xf32> to vector<128x4xf32>
    %27 = arith.addf %25, %26 : vector<128x4xf32>
    %28 = arith.negf %27 : vector<128x4xf32>
    %29 = math.exp %28 : vector<128x4xf32>
    %cst_26 = arith.constant 1.000000e+00 : f32
    %30 = vector.broadcast %cst_26 : f32 to vector<128x4xf32>
    %31 = arith.addf %30, %29 : vector<128x4xf32>
    %32 = arith.divf %30, %31 : vector<128x4xf32>
    %c0_27 = arith.constant 0 : index
    %c0_28 = arith.constant 0 : index
    %c0_29 = arith.constant 0 : index
    %33 = vector.load %arg3[%c0_27, %c0_28, %c0_29] : memref<4x128x4xf32, #tpu.memory_space<vmem>>, vector<1x128x4xf32>
    %34 = vector.shape_cast %33 : vector<1x128x4xf32> to vector<128x4xf32>
    %35 = vector.shape_cast %32 : vector<128x4xf32> to vector<1x128x4xf32>
    tpu.vector_store %arg3[%c0_27, %c0_28, %c0_29], %35 {strides = array<i32>} : memref<4x128x4xf32, #tpu.memory_space<vmem>>, vector<1x128x4xf32>,
    %cst_30 = arith.constant 0.000000e+00 : f32
    %36 = vector.broadcast %cst_30 : f32 to vector<128x4xf32>
    %c4 = arith.constant 4 : index
    %c0_31 = arith.constant 0 : index
    %c0_32 = arith.constant 0 : index
    %37 = vector.load %arg0[%c4, %c0_31, %c0_32] : memref<16x128x8xbf16, #tpu.memory_space<vmem>>, vector<1x128x8xbf16>
    %38 = vector.shape_cast %37 : vector<1x128x8xbf16> to vector<128x8xbf16>
    %c4_33 = arith.constant 4 : index
    %c0_34 = arith.constant 0 : index
    %c0_35 = arith.constant 0 : index
    %39 = vector.load %arg1[%c4_33, %c0_34, %c0_35] : memref<16x8x4xbf16, #tpu.memory_space<vmem>>, vector<1x8x4xbf16>
    %40 = vector.shape_cast %39 : vector<1x8x4xbf16> to vector<8x4xbf16>
    %cst_36 = arith.constant dense<0.000000e+00> : vector<128x4xf32>
    %41 = tpu.matmul %38, %40, %cst_36 {dimension_numbers = #tpu.dot_dimension_numbers<[1], [0], [0], [1], [0, 0, 1, 1], [], []>} : vector<128x8xbf16>, vector<8x4xbf16>, vector<128x4xf32> -> vector<128x4xf32>
    %42 = arith.addf %36, %41 : vector<128x4xf32>
    %c5 = arith.constant 5 : index
    %c0_37 = arith.constant 0 : index
    %c0_38 = arith.constant 0 : index
    %43 = vector.load %arg0[%c5, %c0_37, %c0_38] : memref<16x128x8xbf16, #tpu.memory_space<vmem>>, vector<1x128x8xbf16>
    %44 = vector.shape_cast %43 : vector<1x128x8xbf16> to vector<128x8xbf16>
    %c5_39 = arith.constant 5 : index
    %c0_40 = arith.constant 0 : index
    %c0_41 = arith.constant 0 : index
    %45 = vector.load %arg1[%c5_39, %c0_40, %c0_41] : memref<16x8x4xbf16, #tpu.memory_space<vmem>>, vector<1x8x4xbf16>
    %46 = vector.shape_cast %45 : vector<1x8x4xbf16> to vector<8x4xbf16>
    %cst_42 = arith.constant dense<0.000000e+00> : vector<128x4xf32>
    %47 = tpu.matmul %44, %46, %cst_42 {dimension_numbers = #tpu.dot_dimension_numbers<[1], [0], [0], [1], [0, 0, 1, 1], [], []>} : vector<128x8xbf16>, vector<8x4xbf16>, vector<128x4xf32> -> vector<128x4xf32>
    %48 = arith.addf %42, %47 : vector<128x4xf32>
    %c6 = arith.constant 6 : index
    %c0_43 = arith.constant 0 : index
    %c0_44 = arith.constant 0 : index
    %49 = vector.load %arg0[%c6, %c0_43, %c0_44] : memref<16x128x8xbf16, #tpu.memory_space<vmem>>, vector<1x128x8xbf16>
    %50 = vector.shape_cast %49 : vector<1x128x8xbf16> to vector<128x8xbf16>
    %c6_45 = arith.constant 6 : index
    %c0_46 = arith.constant 0 : index
    %c0_47 = arith.constant 0 : index
    %51 = vector.load %arg1[%c6_45, %c0_46, %c0_47] : memref<16x8x4xbf16, #tpu.memory_space<vmem>>, vector<1x8x4xbf16>
    %52 = vector.shape_cast %51 : vector<1x8x4xbf16> to vector<8x4xbf16>
    %cst_48 = arith.constant dense<0.000000e+00> : vector<128x4xf32>
    %53 = tpu.matmul %50, %52, %cst_48 {dimension_numbers = #tpu.dot_dimension_numbers<[1], [0], [0], [1], [0, 0, 1, 1], [], []>} : vector<128x8xbf16>, vector<8x4xbf16>, vector<128x4xf32> -> vector<128x4xf32>
    %54 = arith.addf %48, %53 : vector<128x4xf32>
    %c7 = arith.constant 7 : index
    %c0_49 = arith.constant 0 : index
    %c0_50 = arith.constant 0 : index
    %55 = vector.load %arg0[%c7, %c0_49, %c0_50] : memref<16x128x8xbf16, #tpu.memory_space<vmem>>, vector<1x128x8xbf16>
    %56 = vector.shape_cast %55 : vector<1x128x8xbf16> to vector<128x8xbf16>
    %c7_51 = arith.constant 7 : index
    %c0_52 = arith.constant 0 : index
    %c0_53 = arith.constant 0 : index
    %57 = vector.load %arg1[%c7_51, %c0_52, %c0_53] : memref<16x8x4xbf16, #tpu.memory_space<vmem>>, vector<1x8x4xbf16>
    %58 = vector.shape_cast %57 : vector<1x8x4xbf16> to vector<8x4xbf16>
    %cst_54 = arith.constant dense<0.000000e+00> : vector<128x4xf32>
    %59 = tpu.matmul %56, %58, %cst_54 {dimension_numbers = #tpu.dot_dimension_numbers<[1], [0], [0], [1], [0, 0, 1, 1], [], []>} : vector<128x8xbf16>, vector<8x4xbf16>, vector<128x4xf32> -> vector<128x4xf32>
    %60 = arith.addf %54, %59 : vector<128x4xf32>
    %61 = vector.broadcast %0 : vector<1x4xf32> to vector<128x4xf32>
    %62 = arith.addf %60, %61 : vector<128x4xf32>
    %63 = arith.negf %62 : vector<128x4xf32>
    %64 = math.exp %63 : vector<128x4xf32>
    %cst_55 = arith.constant 1.000000e+00 : f32
    %65 = vector.broadcast %cst_55 : f32 to vector<128x4xf32>
    %66 = arith.addf %65, %64 : vector<128x4xf32>
    %67 = arith.divf %65, %66 : vector<128x4xf32>
    %c1_56 = arith.constant 1 : index
    %c0_57 = arith.constant 0 : index
    %c0_58 = arith.constant 0 : index
    %68 = vector.load %arg3[%c1_56, %c0_57, %c0_58] : memref<4x128x4xf32, #tpu.memory_space<vmem>>, vector<1x128x4xf32>
    %69 = vector.shape_cast %68 : vector<1x128x4xf32> to vector<128x4xf32>
    %70 = vector.shape_cast %67 : vector<128x4xf32> to vector<1x128x4xf32>
    tpu.vector_store %arg3[%c1_56, %c0_57, %c0_58], %70 {strides = array<i32>} : memref<4x128x4xf32, #tpu.memory_space<vmem>>, vector<1x128x4xf32>,
    %cst_59 = arith.constant 0.000000e+00 : f32
    %71 = vector.broadcast %cst_59 : f32 to vector<128x4xf32>
    %c8 = arith.constant 8 : index
    %c0_60 = arith.constant 0 : index
    %c0_61 = arith.constant 0 : index
    %72 = vector.load %arg0[%c8, %c0_60, %c0_61] : memref<16x128x8xbf16, #tpu.memory_space<vmem>>, vector<1x128x8xbf16>
    %73 = vector.shape_cast %72 : vector<1x128x8xbf16> to vector<128x8xbf16>
    %c8_62 = arith.constant 8 : index
    %c0_63 = arith.constant 0 : index
    %c0_64 = arith.constant 0 : index
    %74 = vector.load %arg1[%c8_62, %c0_63, %c0_64] : memref<16x8x4xbf16, #tpu.memory_space<vmem>>, vector<1x8x4xbf16>
    %75 = vector.shape_cast %74 : vector<1x8x4xbf16> to vector<8x4xbf16>
    %cst_65 = arith.constant dense<0.000000e+00> : vector<128x4xf32>
    %76 = tpu.matmul %73, %75, %cst_65 {dimension_numbers = #tpu.dot_dimension_numbers<[1], [0], [0], [1], [0, 0, 1, 1], [], []>} : vector<128x8xbf16>, vector<8x4xbf16>, vector<128x4xf32> -> vector<128x4xf32>
    %77 = arith.addf %71, %76 : vector<128x4xf32>
    %c9 = arith.constant 9 : index
    %c0_66 = arith.constant 0 : index
    %c0_67 = arith.constant 0 : index
    %78 = vector.load %arg0[%c9, %c0_66, %c0_67] : memref<16x128x8xbf16, #tpu.memory_space<vmem>>, vector<1x128x8xbf16>
    %79 = vector.shape_cast %78 : vector<1x128x8xbf16> to vector<128x8xbf16>
    %c9_68 = arith.constant 9 : index
    %c0_69 = arith.constant 0 : index
    %c0_70 = arith.constant 0 : index
    %80 = vector.load %arg1[%c9_68, %c0_69, %c0_70] : memref<16x8x4xbf16, #tpu.memory_space<vmem>>, vector<1x8x4xbf16>
    %81 = vector.shape_cast %80 : vector<1x8x4xbf16> to vector<8x4xbf16>
    %cst_71 = arith.constant dense<0.000000e+00> : vector<128x4xf32>
    %82 = tpu.matmul %79, %81, %cst_71 {dimension_numbers = #tpu.dot_dimension_numbers<[1], [0], [0], [1], [0, 0, 1, 1], [], []>} : vector<128x8xbf16>, vector<8x4xbf16>, vector<128x4xf32> -> vector<128x4xf32>
    %83 = arith.addf %77, %82 : vector<128x4xf32>
    %c10 = arith.constant 10 : index
    %c0_72 = arith.constant 0 : index
    %c0_73 = arith.constant 0 : index
    %84 = vector.load %arg0[%c10, %c0_72, %c0_73] : memref<16x128x8xbf16, #tpu.memory_space<vmem>>, vector<1x128x8xbf16>
    %85 = vector.shape_cast %84 : vector<1x128x8xbf16> to vector<128x8xbf16>
    %c10_74 = arith.constant 10 : index
    %c0_75 = arith.constant 0 : index
    %c0_76 = arith.constant 0 : index
    %86 = vector.load %arg1[%c10_74, %c0_75, %c0_76] : memref<16x8x4xbf16, #tpu.memory_space<vmem>>, vector<1x8x4xbf16>
    %87 = vector.shape_cast %86 : vector<1x8x4xbf16> to vector<8x4xbf16>
    %cst_77 = arith.constant dense<0.000000e+00> : vector<128x4xf32>
    %88 = tpu.matmul %85, %87, %cst_77 {dimension_numbers = #tpu.dot_dimension_numbers<[1], [0], [0], [1], [0, 0, 1, 1], [], []>} : vector<128x8xbf16>, vector<8x4xbf16>, vector<128x4xf32> -> vector<128x4xf32>
    %89 = arith.addf %83, %88 : vector<128x4xf32>
    %c11 = arith.constant 11 : index
    %c0_78 = arith.constant 0 : index
    %c0_79 = arith.constant 0 : index
    %90 = vector.load %arg0[%c11, %c0_78, %c0_79] : memref<16x128x8xbf16, #tpu.memory_space<vmem>>, vector<1x128x8xbf16>
    %91 = vector.shape_cast %90 : vector<1x128x8xbf16> to vector<128x8xbf16>
    %c11_80 = arith.constant 11 : index
    %c0_81 = arith.constant 0 : index
    %c0_82 = arith.constant 0 : index
    %92 = vector.load %arg1[%c11_80, %c0_81, %c0_82] : memref<16x8x4xbf16, #tpu.memory_space<vmem>>, vector<1x8x4xbf16>
    %93 = vector.shape_cast %92 : vector<1x8x4xbf16> to vector<8x4xbf16>
    %cst_83 = arith.constant dense<0.000000e+00> : vector<128x4xf32>
    %94 = tpu.matmul %91, %93, %cst_83 {dimension_numbers = #tpu.dot_dimension_numbers<[1], [0], [0], [1], [0, 0, 1, 1], [], []>} : vector<128x8xbf16>, vector<8x4xbf16>, vector<128x4xf32> -> vector<128x4xf32>
    %95 = arith.addf %89, %94 : vector<128x4xf32>
    %96 = vector.broadcast %0 : vector<1x4xf32> to vector<128x4xf32>
    %97 = arith.addf %95, %96 : vector<128x4xf32>
    %98 = arith.negf %97 : vector<128x4xf32>
    %99 = math.exp %98 : vector<128x4xf32>
    %cst_84 = arith.constant 1.000000e+00 : f32
    %100 = vector.broadcast %cst_84 : f32 to vector<128x4xf32>
    %101 = arith.addf %100, %99 : vector<128x4xf32>
    %102 = arith.divf %100, %101 : vector<128x4xf32>
    %c2_85 = arith.constant 2 : index
    %c0_86 = arith.constant 0 : index
    %c0_87 = arith.constant 0 : index
    %103 = vector.load %arg3[%c2_85, %c0_86, %c0_87] : memref<4x128x4xf32, #tpu.memory_space<vmem>>, vector<1x128x4xf32>
    %104 = vector.shape_cast %103 : vector<1x128x4xf32> to vector<128x4xf32>
    %105 = vector.shape_cast %102 : vector<128x4xf32> to vector<1x128x4xf32>
    tpu.vector_store %arg3[%c2_85, %c0_86, %c0_87], %105 {strides = array<i32>} : memref<4x128x4xf32, #tpu.memory_space<vmem>>, vector<1x128x4xf32>,
    %cst_88 = arith.constant 0.000000e+00 : f32
    %106 = vector.broadcast %cst_88 : f32 to vector<128x4xf32>
    %c12 = arith.constant 12 : index
    %c0_89 = arith.constant 0 : index
    %c0_90 = arith.constant 0 : index
    %107 = vector.load %arg0[%c12, %c0_89, %c0_90] : memref<16x128x8xbf16, #tpu.memory_space<vmem>>, vector<1x128x8xbf16>
    %108 = vector.shape_cast %107 : vector<1x128x8xbf16> to vector<128x8xbf16>
    %c12_91 = arith.constant 12 : index
    %c0_92 = arith.constant 0 : index
    %c0_93 = arith.constant 0 : index
    %109 = vector.load %arg1[%c12_91, %c0_92, %c0_93] : memref<16x8x4xbf16, #tpu.memory_space<vmem>>, vector<1x8x4xbf16>
    %110 = vector.shape_cast %109 : vector<1x8x4xbf16> to vector<8x4xbf16>
    %cst_94 = arith.constant dense<0.000000e+00> : vector<128x4xf32>
    %111 = tpu.matmul %108, %110, %cst_94 {dimension_numbers = #tpu.dot_dimension_numbers<[1], [0], [0], [1], [0, 0, 1, 1], [], []>} : vector<128x8xbf16>, vector<8x4xbf16>, vector<128x4xf32> -> vector<128x4xf32>
    %112 = arith.addf %106, %111 : vector<128x4xf32>
    %c13 = arith.constant 13 : index
    %c0_95 = arith.constant 0 : index
    %c0_96 = arith.constant 0 : index
    %113 = vector.load %arg0[%c13, %c0_95, %c0_96] : memref<16x128x8xbf16, #tpu.memory_space<vmem>>, vector<1x128x8xbf16>
    %114 = vector.shape_cast %113 : vector<1x128x8xbf16> to vector<128x8xbf16>
    %c13_97 = arith.constant 13 : index
    %c0_98 = arith.constant 0 : index
    %c0_99 = arith.constant 0 : index
    %115 = vector.load %arg1[%c13_97, %c0_98, %c0_99] : memref<16x8x4xbf16, #tpu.memory_space<vmem>>, vector<1x8x4xbf16>
    %116 = vector.shape_cast %115 : vector<1x8x4xbf16> to vector<8x4xbf16>
    %cst_100 = arith.constant dense<0.000000e+00> : vector<128x4xf32>
    %117 = tpu.matmul %114, %116, %cst_100 {dimension_numbers = #tpu.dot_dimension_numbers<[1], [0], [0], [1], [0, 0, 1, 1], [], []>} : vector<128x8xbf16>, vector<8x4xbf16>, vector<128x4xf32> -> vector<128x4xf32>
    %118 = arith.addf %112, %117 : vector<128x4xf32>
    %c14 = arith.constant 14 : index
    %c0_101 = arith.constant 0 : index
    %c0_102 = arith.constant 0 : index
    %119 = vector.load %arg0[%c14, %c0_101, %c0_102] : memref<16x128x8xbf16, #tpu.memory_space<vmem>>, vector<1x128x8xbf16>
    %120 = vector.shape_cast %119 : vector<1x128x8xbf16> to vector<128x8xbf16>
    %c14_103 = arith.constant 14 : index
    %c0_104 = arith.constant 0 : index
    %c0_105 = arith.constant 0 : index
    %121 = vector.load %arg1[%c14_103, %c0_104, %c0_105] : memref<16x8x4xbf16, #tpu.memory_space<vmem>>, vector<1x8x4xbf16>
    %122 = vector.shape_cast %121 : vector<1x8x4xbf16> to vector<8x4xbf16>
    %cst_106 = arith.constant dense<0.000000e+00> : vector<128x4xf32>
    %123 = tpu.matmul %120, %122, %cst_106 {dimension_numbers = #tpu.dot_dimension_numbers<[1], [0], [0], [1], [0, 0, 1, 1], [], []>} : vector<128x8xbf16>, vector<8x4xbf16>, vector<128x4xf32> -> vector<128x4xf32>
    %124 = arith.addf %118, %123 : vector<128x4xf32>
    %c15 = arith.constant 15 : index
    %c0_107 = arith.constant 0 : index
    %c0_108 = arith.constant 0 : index
    %125 = vector.load %arg0[%c15, %c0_107, %c0_108] : memref<16x128x8xbf16, #tpu.memory_space<vmem>>, vector<1x128x8xbf16>
    %126 = vector.shape_cast %125 : vector<1x128x8xbf16> to vector<128x8xbf16>
    %c15_109 = arith.constant 15 : index
    %c0_110 = arith.constant 0 : index
    %c0_111 = arith.constant 0 : index
    %127 = vector.load %arg1[%c15_109, %c0_110, %c0_111] : memref<16x8x4xbf16, #tpu.memory_space<vmem>>, vector<1x8x4xbf16>
    %128 = vector.shape_cast %127 : vector<1x8x4xbf16> to vector<8x4xbf16>
    %cst_112 = arith.constant dense<0.000000e+00> : vector<128x4xf32>
    %129 = tpu.matmul %126, %128, %cst_112 {dimension_numbers = #tpu.dot_dimension_numbers<[1], [0], [0], [1], [0, 0, 1, 1], [], []>} : vector<128x8xbf16>, vector<8x4xbf16>, vector<128x4xf32> -> vector<128x4xf32>
    %130 = arith.addf %124, %129 : vector<128x4xf32>
    %131 = vector.broadcast %0 : vector<1x4xf32> to vector<128x4xf32>
    %132 = arith.addf %130, %131 : vector<128x4xf32>
    %133 = arith.negf %132 : vector<128x4xf32>
    %134 = math.exp %133 : vector<128x4xf32>
    %cst_113 = arith.constant 1.000000e+00 : f32
    %135 = vector.broadcast %cst_113 : f32 to vector<128x4xf32>
    %136 = arith.addf %135, %134 : vector<128x4xf32>
    %137 = arith.divf %135, %136 : vector<128x4xf32>
    %c3_114 = arith.constant 3 : index
    %c0_115 = arith.constant 0 : index
    %c0_116 = arith.constant 0 : index
    %138 = vector.load %arg3[%c3_114, %c0_115, %c0_116] : memref<4x128x4xf32, #tpu.memory_space<vmem>>, vector<1x128x4xf32>
    %139 = vector.shape_cast %138 : vector<1x128x4xf32> to vector<128x4xf32>
    %140 = vector.shape_cast %137 : vector<128x4xf32> to vector<1x128x4xf32>
    tpu.vector_store %arg3[%c3_114, %c0_115, %c0_116], %140 {strides = array<i32>} : memref<4x128x4xf32, #tpu.memory_space<vmem>>, vector<1x128x4xf32>,
    return
  }
}

</mosaic_0001>

<bundles_post_ra>
// kernel: vae_forward.8
= control target key start
LH: loop header
LB: loop body
LE: loop exit
PB: predicated region body
PF: predicated region fallthrough
CT: control target
= control target key end

     0   :  { %vm51_vm0 = vcmask 1043456   ;;  %vm44_vm1 = vcmask 64512   ;;  %vm1288_vm2 = vcmask 130048   ;;  %s2076_s1 = inlined_call_operand.vmem [shape: bf16[16,8,16], index: 1, kind: input, shape index: {}]   ;;  %s2077_s0 = inlined_call_operand.vmem [shape: bf16[16,32,8], index: 0, kind: input, shape index: {}]   ;;  %s2078_s2 = inlined_call_operand.vmem [shape: f32[1,16], index: 2, kind: input, shape index: {}]   ;;  %s2079_s5 = inlined_call_operand.vmem [shape: f32[1,32,16], index: 5, kind: output, shape index: {}]   ;;  %s2080_s3 = inlined_call_operand.vmem [shape: f32[1,16], index: 3, kind: input, shape index: {}]   ;;  %s2081_s4 = inlined_call_operand.vmem [shape: f32[1,16], index: 4, kind: input, shape index: {}]  }
   0x1   :  { %v1385_v0 = vld [vmem:[%s2076_s1 + $0x4] sm:$0xf]  ;;  %v1452_v1 = vld [vmem:[%s2076_s1 + $0x20] sm:$0xf]  ;;  %v1743_v4 = vld [vmem:[%s2077_s0 + $0x10] sm:$0xff]  }
   0x2   :  { %1727 = vmatprep.subr.msk.bf16.mxu1 %vm51_vm0, %v1385_v0  ;;  %1735 = vmatprep.subr.msk.bf16.mxu0 %vm51_vm0, %v1452_v1  ;;  %v53_v2 = vsel %vm51_vm0, %v1385_v0, 0  ;;  %v670_v3 = vsel %vm51_vm0, %v1452_v1, 0  ;;  %v1744_v5 = vld [vmem:[%s2077_s0 + $0x80] sm:$0xff]   ;;  %v1745_v6 = vld [vmem:[%s2077_s0 + $0x18] sm:$0xff]   ;;  %v1746_v8 = vld [vmem:[%s2077_s0 + $0x88] sm:$0xff]  }
   0x3   :  { %1572 = vmatpush3.bf16.msra.mxu1 %v53_v2  ;;  %1620 = vmatpush3.bf16.msra.mxu0 %v670_v3  ;;  %v26_v7 = vld [vmem:[%s2076_s1] sm:$0xf]  ;;  %v1461_v10 = vld [vmem:[%s2076_s1 + $0x24] sm:$0xf]  ;;  %v1748_v13 = vld [vmem:[%s2077_s0 + $0x90] sm:$0xff]  }
   0x4   :  { %1573 = vmatprep.mubr.msk.bf16.mxu1 %vm44_vm1, %v1743_v4  ;;  %1621 = vmatprep.mubr.msk.bf16.mxu0 %vm44_vm1, %v1744_v5  ;;  %v121_v9 = vsel %vm51_vm0, %v26_v7, 0  ;;  %v749_v11 = vsel %vm51_vm0, %v1461_v10, 0  ;;  %v1747_v12 = vld [vmem:[%s2077_s0] sm:$0xff]   ;;  %v1398_v14 = vld [vmem:[%s2076_s1 + $0x8] sm:$0xf]  ;;  %v1750_v17 = vld [vmem:[%s2077_s0 + $0x98] sm:$0xff]  }
   0x5   :  { %1728 = vmatprep.subr.msk.bf16.mxu1 %vm51_vm0, %v26_v7  ;;  %1736 = vmatprep.subr.msk.bf16.mxu0 %vm51_vm0, %v1461_v10  ;;  %v1470_v15 = vld [vmem:[%s2076_s1 + $0x28] sm:$0xf]  ;;  %v196_v18 = vsel %vm51_vm0, %v1398_v14, 0  ;;  %v1751_v19 = vld [vmem:[%s2077_s0 + $0x20] sm:$0xff]   ;;  %v1407_v22 = vld [vmem:[%s2076_s1 + $0xc] sm:$0xf] }
   0x6   :  { %1574 = vmatmul.mubr.msk.bf16.vlgmr.msra.gmra.mrb[0].mxu1 %vm44_vm1, %v1745_v6  ;;  %1622 = vmatmul.mubr.msk.bf16.vlgmr.msra.gmra.mrb[0].mxu0 %vm44_vm1, %v1746_v8  ;;  %v1749_v16 = vld [vmem:[%s2077_s0 + $0x8] sm:$0xff]   ;;  %v828_v20 = vsel %vm51_vm0, %v1470_v15, 0  ;;  %v1752_v21 = vld [vmem:[%s2077_s0 + $0xa0] sm:$0xff]   ;;  %v275_v26 = vsel %vm51_vm0, %v1407_v22, 0  ;;  %v1755_v27 = vld [vmem:[%s2077_s0 + $0x30] sm:$0xff]  }
   0x7   :  { %1578 = vmatpush3.bf16.msra.mxu1 %v121_v9  ;;  %1626 = vmatpush3.bf16.msra.mxu0 %v749_v11  ;;  %v1479_v23 = vld [vmem:[%s2076_s1 + $0x2c] sm:$0xf]  ;;  %v1756_v29 = vld [vmem:[%s2077_s0 + $0xb0] sm:$0xff]   ;;  %v1757_v32 = vld [vmem:[%s2077_s0 + $0x38] sm:$0xff]  }
   0x8   :  { %1579 = vmatprep.mubr.msk.bf16.mxu1 %vm44_vm1, %v1747_v12  ;;  %1627 = vmatprep.mubr.msk.bf16.mxu0 %vm44_vm1, %v1748_v13  ;;  %v1753_v24 = vld [vmem:[%s2077_s0 + $0x28] sm:$0xff]   ;;  %v907_v28 = vsel %vm51_vm0, %v1479_v23, 0  ;;  %v1416_v30 = vld [vmem:[%s2076_s1 + $0x10] sm:$0xf]  ;;  %v1758_v33 = vld [vmem:[%s2077_s0 + $0xb8] sm:$0xff]  }
   0x9   :  { %1729 = vmatprep.subr.msk.bf16.mxu1 %vm51_vm0, %v1398_v14  ;;  %1737 = vmatprep.subr.msk.bf16.mxu0 %vm51_vm0, %v1470_v15  ;;  %v1754_v25 = vld [vmem:[%s2077_s0 + $0xa8] sm:$0xff]   ;;  %v1488_v31 = vld [vmem:[%s2076_s1 + $0x30] sm:$0xf]  ;;  %v354_v34 = vsel %vm51_vm0, %v1416_v30, 0  ;;  %v1759_v35 = vld [vmem:[%s2077_s0 + $0x40] sm:$0xff]  }
   0xa   :  { %v986_v36 = vsel %vm51_vm0, %v1488_v31, 0  ;;  %v1760_v37 = vld [vmem:[%s2077_s0 + $0xc0] sm:$0xff]   ;;  %v1425_v38 = vld [vmem:[%s2076_s1 + $0x14] sm:$0xf]  ;;  %v1761_v40 = vld [vmem:[%s2077_s0 + $0x48] sm:$0xff]  }
   0xb   :  { %v1497_v39 = vld [vmem:[%s2076_s1 + $0x34] sm:$0xf]  ;;  %v1762_v41 = vld [vmem:[%s2077_s0 + $0xc8] sm:$0xff]   ;;  %v433_v42 = vsel %vm51_vm0, %v1425_v38, 0  ;;  %v1434_v46 = vld [vmem:[%s2076_s1 + $0x18] sm:$0xf] }
   0xc   :  { %v1763_v43 = vld [vmem:[%s2077_s0 + $0x50] sm:$0xff]   ;;  %v1065_v44 = vsel %vm51_vm0, %v1497_v39, 0  ;;  %v1506_v47 = vld [vmem:[%s2076_s1 + $0x38] sm:$0xf]  ;;  %v512_v50 = vsel %vm51_vm0, %v1434_v46, 0  ;;  %v1767_v51 = vld [vmem:[%s2077_s0 + $0x60] sm:$0xff]  }
   0xd   :  { %v1764_v45 = vld [vmem:[%s2077_s0 + $0xd0] sm:$0xff]   ;;  %v1765_v48 = vld [vmem:[%s2077_s0 + $0x58] sm:$0xff]   ;;  %v1144_v52 = vsel %vm51_vm0, %v1506_v47, 0  ;;  %v1768_v53 = vld [vmem:[%s2077_s0 + $0xe0] sm:$0xff]  }
   0xe   :  { %v1766_v49 = vld [vmem:[%s2077_s0 + $0xd8] sm:$0xff]   ;;  %v1769_v56 = vld [vmem:[%s2077_s0 + $0x68] sm:$0xff]   ;;  %v1771_v59 = vld [vmem:[%s2077_s0 + $0x70] sm:$0xff]  }
   0xf   :  { %v1443_v54 = vld [vmem:[%s2076_s1 + $0x1c] sm:$0xf]  ;;  %v1770_v57 = vld [vmem:[%s2077_s0 + $0xe8] sm:$0xff]   ;;  %v1772_v61 = vld [vmem:[%s2077_s0 + $0xf0] sm:$0xff]  }
  0x10   :  { %v1515_v55 = vld [vmem:[%s2076_s1 + $0x3c] sm:$0xf]  ;;  %v591_v58 = vsel %vm51_vm0, %v1443_v54, 0  ;;  %v1520_v1 = vld [vmem:[%s2078_s2] ss:$0 sm:$0xff] }
  0x11   :  { %v1223_v60 = vsel %vm51_vm0, %v1515_v55, 0  ;;  %v1773_v62 = vld [vmem:[%s2077_s0 + $0x78] sm:$0xff]  }
  0x12   :  { %1580 = vmatmul.mubr.msk.bf16.vlgmr.msra.gmra.mrb[0].mxu1 %vm44_vm1, %v1749_v16  ;;  %1628 = vmatmul.mubr.msk.bf16.vlgmr.msra.gmra.mrb[0].mxu0 %vm44_vm1, %v1750_v17  ;;  %v1774_v63 = vld [vmem:[%s2077_s0 + $0xf8] sm:$0xff]  }
  0x13   :  { %1584 = vmatpush3.bf16.msra.mxu1 %v196_v18  ;;  %1632 = vmatpush3.bf16.msra.mxu0 %v828_v20 }
  0x14   :  { %1585 = vmatprep.mubr.msk.bf16.mxu1 %vm44_vm1, %v1751_v19  ;;  %1633 = vmatprep.mubr.msk.bf16.mxu0 %vm44_vm1, %v1752_v21 }
  0x15   :  { %1730 = vmatprep.subr.msk.bf16.mxu1 %vm51_vm0, %v1407_v22  ;;  %1738 = vmatprep.subr.msk.bf16.mxu0 %vm51_vm0, %v1479_v23 }
  0x1e   :  { %1586 = vmatmul.mubr.msk.bf16.vlgmr.msra.gmra.mrb[0].mxu1 %vm44_vm1, %v1753_v24  ;;  %1634 = vmatmul.mubr.msk.bf16.vlgmr.msra.gmra.mrb[0].mxu0 %vm44_vm1, %v1754_v25 }
  0x1f   :  { %1590 = vmatpush3.bf16.msra.mxu1 %v275_v26  ;;  %1638 = vmatpush3.bf16.msra.mxu0 %v907_v28 }
  0x20   :  { %1591 = vmatprep.mubr.msk.bf16.mxu1 %vm44_vm1, %v1755_v27  ;;  %1639 = vmatprep.mubr.msk.bf16.mxu0 %vm44_vm1, %v1756_v29 }
  0x21   :  { %1731 = vmatprep.subr.msk.bf16.mxu1 %vm51_vm0, %v1416_v30  ;;  %1739 = vmatprep.subr.msk.bf16.mxu0 %vm51_vm0, %v1488_v31 }
  0x2a   :  { %1592 = vmatmul.mubr.msk.bf16.vlgmr.msra.gmra.mrb[0].mxu1 %vm44_vm1, %v1757_v32  ;;  %1640 = vmatmul.mubr.msk.bf16.vlgmr.msra.gmra.mrb[0].mxu0 %vm44_vm1, %v1758_v33 }
  0x2b   :  { %1596 = vmatpush3.bf16.msra.mxu1 %v354_v34  ;;  %1644 = vmatpush3.bf16.msra.mxu0 %v986_v36 }
  0x2c   :  { %1597 = vmatprep.mubr.msk.bf16.mxu1 %vm44_vm1, %v1759_v35  ;;  %1645 = vmatprep.mubr.msk.bf16.mxu0 %vm44_vm1, %v1760_v37 }
  0x2d   :  { %1732 = vmatprep.subr.msk.bf16.mxu1 %vm51_vm0, %v1425_v38  ;;  %1740 = vmatprep.subr.msk.bf16.mxu0 %vm51_vm0, %v1497_v39 }
  0x36   :  { %1598 = vmatmul.mubr.msk.bf16.vlgmr.msra.gmra.mrb[0].mxu1 %vm44_vm1, %v1761_v40  ;;  %1646 = vmatmul.mubr.msk.bf16.vlgmr.msra.gmra.mrb[0].mxu0 %vm44_vm1, %v1762_v41 }
  0x37   :  { %1602 = vmatpush3.bf16.msra.mxu1 %v433_v42  ;;  %1650 = vmatpush3.bf16.msra.mxu0 %v1065_v44 }
  0x38   :  { %1603 = vmatprep.mubr.msk.bf16.mxu1 %vm44_vm1, %v1763_v43  ;;  %1651 = vmatprep.mubr.msk.bf16.mxu0 %vm44_vm1, %v1764_v45 }
  0x39   :  { %1733 = vmatprep.subr.msk.bf16.mxu1 %vm51_vm0, %v1434_v46  ;;  %1741 = vmatprep.subr.msk.bf16.mxu0 %vm51_vm0, %v1506_v47 }
  0x42   :  { %1604 = vmatmul.mubr.msk.bf16.vlgmr.msra.gmra.mrb[0].mxu1 %vm44_vm1, %v1765_v48  ;;  %1652 = vmatmul.mubr.msk.bf16.vlgmr.msra.gmra.mrb[0].mxu0 %vm44_vm1, %v1766_v49 }
  0x43   :  { %1608 = vmatpush3.bf16.msra.mxu1 %v512_v50  ;;  %1656 = vmatpush3.bf16.msra.mxu0 %v1144_v52 }
  0x44   :  { %1609 = vmatprep.mubr.msk.bf16.mxu1 %vm44_vm1, %v1767_v51  ;;  %1657 = vmatprep.mubr.msk.bf16.mxu0 %vm44_vm1, %v1768_v53 }
  0x45   :  { %1734 = vmatprep.subr.msk.bf16.mxu1 %vm51_vm0, %v1443_v54  ;;  %1742 = vmatprep.subr.msk.bf16.mxu0 %vm51_vm0, %v1515_v55 }
  0x4e   :  { %1610 = vmatmul.mubr.msk.bf16.vlgmr.msra.gmra.mrb[0].mxu1 %vm44_vm1, %v1769_v56  ;;  %1658 = vmatmul.mubr.msk.bf16.vlgmr.msra.gmra.mrb[0].mxu0 %vm44_vm1, %v1770_v57 }
  0x4f   :  { %1614 = vmatpush3.bf16.msra.mxu1 %v591_v58  ;;  %1662 = vmatpush3.bf16.msra.mxu0 %v1223_v60 }
  0x50   :  { %1615 = vmatprep.mubr.msk.bf16.mxu1 %vm44_vm1, %v1771_v59  ;;  %1663 = vmatprep.mubr.msk.bf16.mxu0 %vm44_vm1, %v1772_v61  ;;  %v1521_v59 = vld [vmem:[%s2080_s3] ss:$0 sm:$0xff] }
  0x5a   :  { %1616 = vmatmul.mubr.msk.bf16.vlgmr.msra.gmra.mrb[0].mxu1 %vm44_vm1, %v1773_v62  ;;  %1664 = vmatmul.mubr.msk.bf16.vlgmr.msra.gmra.mrb[0].mxu0 %vm44_vm1, %v1774_v63 }
 0x12d   :  { %v1617_v0 = vpop.f32.mrb[0].mxu1  ;;  %v1665_v2 = vpop.f32.mrb[0].mxu0 }
 0x12e   :  { %v627_v3 = vpop.f32.mrb[1].mxu1  ;;  %v1667_v4 = vadd.f32 %v1665_v2, %v1617_v0  ;;  %v1259_v5 = vpop.f32.mrb[1].mxu0  ;;  %v1522_v0 = vld [vmem:[%s2081_s4] ss:$0 sm:$0xff] }
 0x12f   :  { %v1618_v6 = vpop.f32.mrb[2].mxu1  ;;  %v1668_v7 = vadd.f32 %v1259_v5, %v627_v3  ;;  %v1666_v8 = vpop.f32.mrb[2].mxu0 }
 0x130   :  { %v630_v9 = vpop.f32.mrb[3].mxu1  ;;  %v1286_v10 = vadd.f32 %v1667_v4, %v1520_v1  ;;  %v1669_v11 = vadd.f32 %v1666_v8, %v1618_v6  ;;  %v1262_v12 = vpop.f32.mrb[3].mxu0 }
 0x131   :  { %v1284_v13 = vadd.f32 %v1668_v7, %v1520_v1  ;;  %v1670_v14 = vadd.f32 %v1262_v12, %v630_v9 }
 0x132   :  { %1291 = vst.msk [vmem:[%s2079_s5 + $0x10] sm:$0xff] %vm1288_vm2, %v1286_v10  ;;  %v1287_v15 = vadd.f32 %v1669_v11, %v1520_v1 }
 0x133   :  { %1289 = vst.msk [vmem:[%s2079_s5] sm:$0xff] %vm1288_vm2, %v1284_v13  ;;  %v1285_v16 = vadd.f32 %v1670_v14, %v1520_v1 }
 0x134   :  { %1292 = vst.msk [vmem:[%s2079_s5 + $0x18] sm:$0xff] %vm1288_vm2, %v1287_v15 }
 0x135   :  { %1290 = vst.msk [vmem:[%s2079_s5 + $0x8] sm:$0xff] %vm1288_vm2, %v1285_v16 }
 0x139   :  { %v1295_v19 = vld [vmem:[%s2079_s5 + $0x10] sm:$0xff] }
 0x13a   :  { %v1293_v17 = vld [vmem:[%s2079_s5] sm:$0xff]  ;;  %v1304_v24 = vsel %vm1288_vm2, %v1295_v19, 0.0 }
 0x13b   :  { %v1301_v20 = vsel %vm1288_vm2, %v1293_v17, 0.0  ;;  %v1296_v22 = vld [vmem:[%s2079_s5 + $0x18] sm:$0xff] }
 0x13c   :  { %v1294_v18 = vld [vmem:[%s2079_s5 + $0x8] sm:$0xff]  ;;  %v1306_v26 = vsel %vm1288_vm2, %v1296_v22, 0.0 }
 0x13d   :  { %v1302_v21 = vsel %vm1288_vm2, %v1294_v18, 0.0 }
 0x13e   :  { %v1303_v23 = vadd.f32 %v1302_v21, %v1301_v20 }
 0x140   :  { %v1305_v25 = vadd.f32 %v1304_v24, %v1303_v23 }
 0x142   :  { %v1307_v27 = vadd.f32 %v1306_v26, %v1305_v25 }
 0x144   :  { %v1308_v28 = vrot.slane %v1307_v27, 4 }
 0x146   :  { %v1309_v29 = vadd.f32 %v1308_v28, %v1307_v27 }
 0x148   :  { %v1310_v30 = vrot.slane %v1309_v29, 2 }
 0x14a   :  { %v1311_v31 = vadd.f32 %v1310_v30, %v1309_v29 }
 0x14c   :  { %v1312_v32 = vrot.slane %v1311_v31, 1 }
 0x14e   :  { %v1313_v33 = vadd.f32 %v1312_v32, %v1311_v31 }
 0x150   :  { %v1314_v34 = vmul.f32 0.03125, %v1313_v33 }
 0x152   :  { %v1315_v35 = vsub.f32 %v1293_v17, %v1314_v34  ;;  %v1316_v36 = vsub.f32 %v1294_v18, %v1314_v34  ;;  %v1317_v37 = vsub.f32 %v1295_v19, %v1314_v34  ;;  %v1318_v38 = vsub.f32 %v1296_v22, %v1314_v34 }
 0x154   :  { %v1319_v39 = vmul.f32 %v1315_v35, %v1315_v35  ;;  %v1320_v40 = vmul.f32 %v1316_v36, %v1316_v36  ;;  %v1321_v41 = vmul.f32 %v1317_v37, %v1317_v37  ;;  %v1322_v42 = vmul.f32 %v1318_v38, %v1318_v38 }
 0x156   :  { %v1327_v43 = vsel %vm1288_vm2, %v1319_v39, 0.0  ;;  %v1328_v44 = vsel %vm1288_vm2, %v1320_v40, 0.0  ;;  %v1330_v46 = vsel %vm1288_vm2, %v1321_v41, 0.0  ;;  %v1332_v48 = vsel %vm1288_vm2, %v1322_v42, 0.0 }
 0x157   :  { %v1329_v45 = vadd.f32 %v1328_v44, %v1327_v43 }
 0x159   :  { %v1331_v47 = vadd.f32 %v1330_v46, %v1329_v45 }
 0x15b   :  { %v1333_v49 = vadd.f32 %v1332_v48, %v1331_v47 }
 0x15d   :  { %v1334_v50 = vrot.slane %v1333_v49, 4 }
 0x15f   :  { %v1335_v51 = vadd.f32 %v1334_v50, %v1333_v49 }
 0x161   :  { %v1336_v52 = vrot.slane %v1335_v51, 2 }
 0x163   :  { %v1337_v53 = vadd.f32 %v1336_v52, %v1335_v51 }
 0x165   :  { %v1338_v54 = vrot.slane %v1337_v53, 1 }
 0x167   :  { %v1339_v55 = vadd.f32 %v1338_v54, %v1337_v53 }
 0x169   :  { %v1340_v56 = vmul.f32 0.03125, %v1339_v55 }
 0x16b   :  { %v1341_v57 = vadd.f32 1e-05, %v1340_v56 }
 0x16d   :  { %1775 = vrsqrt.f32 %v1341_v57 }
 0x177   :  { %v1776_v58 = vpop.eup %1775 }
 0x178   :  { %v1343_v60 = vmul.f32 %v1776_v58, %v1315_v35  ;;  %v1344_v61 = vmul.f32 %v1776_v58, %v1316_v36  ;;  %v1345_v62 = vmul.f32 %v1776_v58, %v1317_v37  ;;  %v1346_v63 = vmul.f32 %v1776_v58, %v1318_v38 }
 0x17a   :  { %v1354_v1 = vmul.f32 %v1521_v59, %v1343_v60  ;;  %v1355_v2 = vmul.f32 %v1521_v59, %v1344_v61  ;;  %v1356_v3 = vmul.f32 %v1521_v59, %v1345_v62  ;;  %v1357_v4 = vmul.f32 %v1521_v59, %v1346_v63 }
 0x17c   :  { %v1365_v5 = vadd.f32 %v1522_v0, %v1354_v1  ;;  %v1366_v6 = vadd.f32 %v1522_v0, %v1355_v2  ;;  %v1367_v7 = vadd.f32 %v1522_v0, %v1356_v3  ;;  %v1368_v8 = vadd.f32 %v1522_v0, %v1357_v4 }
 0x17e   :  { %v1369_v9 = vmax.f32 %v1365_v5, 0.0  ;;  %v1370_v10 = vmax.f32 %v1366_v6, 0.0  ;;  %v1371_v11 = vmax.f32 %v1367_v7, 0.0  ;;  %v1372_v12 = vmax.f32 %v1368_v8, 0.0 }
 0x180   :  { %1373 = vst.msk [vmem:[%s2079_s5] sm:$0xff] %vm1288_vm2, %v1369_v9  ;;  %1374 = vst.msk [vmem:[%s2079_s5 + $0x8] sm:$0xff] %vm1288_vm2, %v1370_v10 }
 0x181   :  { %1375 = vst.msk [vmem:[%s2079_s5 + $0x10] sm:$0xff] %vm1288_vm2, %v1371_v11  ;;  %1376 = vst.msk [vmem:[%s2079_s5 + $0x18] sm:$0xff] %vm1288_vm2, %v1372_v12 }

// kernel: vae_forward.9
= control target key start
LH: loop header
LB: loop body
LE: loop exit
PB: predicated region body
PF: predicated region fallthrough
CT: control target
= control target key end

     0   :  { %v1130_v0 = vmov 0.0   ;;  %vm1131_vm0 = vmmov 0   ;;  %vm30_vm1 = vcmask 130048   ;;  %vm900_vm2 = vcmask 261120   ;;  %s1318_s1 = inlined_call_operand.vmem [shape: bf16[16,16,32], index: 1, kind: input, shape index: {}]   ;;  %s1319_s0 = inlined_call_operand.vmem [shape: bf16[16,8,16], index: 0, kind: input, shape index: {}]   ;;  %s1320_s2 = inlined_call_operand.vmem [shape: f32[1,32], index: 2, kind: input, shape index: {}]   ;;  %s1321_s3 = inlined_call_operand.vmem [shape: f32[1,8,32], index: 3, kind: output, shape index: {}]  }
   0x1   :  { %1016 = vmatprep.subr.bf16.mxu0 %v1130_v0  ;;  %1022 = vmatprep.subr.bf16.mxu1 %v1130_v0  ;;  %v1114_v1 = vld [vmem:[%s1318_s1 + $0x8] sm:$0xff]   ;;  %v1115_v2 = vld [vmem:[%s1318_s1] sm:$0xff]   ;;  %v1116_v5 = vld [vmem:[%s1318_s1 + $0x10] sm:$0xff]  }
   0x2   :  { %1018 = vmatprep.mubr.msk.bf16.mxu0 %vm1131_vm0, %v1130_v0  ;;  %1024 = vmatprep.mubr.msk.bf16.mxu1 %vm1131_vm0, %v1130_v0  ;;  %v906_v3 = vld [vmem:[%s1319_s0 + $0x4] sm:$0xf]  ;;  %v16_v4 = vld [vmem:[%s1319_s0] sm:$0xf]  ;;  %v1117_v6 = vld [vmem:[%s1318_s1 + $0x18] sm:$0xff]  }
   0x3   :  { %1017 = vmatpush3.bf16.msra.mxu0 %v1114_v1  ;;  %1023 = vmatpush3.bf16.msra.mxu1 %v1115_v2  ;;  %v913_v7 = vld [vmem:[%s1319_s0 + $0x8] sm:$0xf]  ;;  %v918_v8 = vld [vmem:[%s1319_s0 + $0xc] sm:$0xf]  ;;  %v1118_v9 = vld [vmem:[%s1318_s1 + $0x20] sm:$0xff]  }
   0x4   :  { %1028 = vmatprep.subr.bf16.mxu0 %v1130_v0  ;;  %1034 = vmatprep.subr.bf16.mxu1 %v1130_v0  ;;  %v1119_v10 = vld [vmem:[%s1318_s1 + $0x28] sm:$0xff]   ;;  %v923_v11 = vld [vmem:[%s1319_s0 + $0x10] sm:$0xf]  ;;  %v928_v12 = vld [vmem:[%s1319_s0 + $0x14] sm:$0xf] }
   0x5   :  { %v1120_v13 = vld [vmem:[%s1318_s1 + $0x30] sm:$0xff]   ;;  %v1121_v14 = vld [vmem:[%s1318_s1 + $0x38] sm:$0xff]   ;;  %v1122_v16 = vld [vmem:[%s1318_s1 + $0x40] sm:$0xff]  }
   0x6   :  { %1019 = vmatmul.mubr.msk.bf16.vlgmr.msra.gmra.mrb[0].mxu0 %vm30_vm1, %v906_v3  ;;  %1025 = vmatmul.mubr.msk.bf16.vlgmr.msra.gmra.mrb[0].mxu1 %vm30_vm1, %v16_v4  ;;  %v933_v15 = vld [vmem:[%s1319_s0 + $0x18] sm:$0xf]  ;;  %v938_v17 = vld [vmem:[%s1319_s0 + $0x1c] sm:$0xf]  ;;  %v1123_v18 = vld [vmem:[%s1318_s1 + $0x48] sm:$0xff]  }
   0x7   :  { %1029 = vmatpush3.bf16.msra.mxu0 %v1116_v5  ;;  %1035 = vmatpush3.bf16.msra.mxu1 %v1117_v6  ;;  %v943_v19 = vld [vmem:[%s1319_s0 + $0x20] sm:$0xf]  ;;  %v1124_v20 = vld [vmem:[%s1318_s1 + $0x50] sm:$0xff]   ;;  %v948_v21 = vld [vmem:[%s1319_s0 + $0x24] sm:$0xf] }
   0x8   :  { %1030 = vmatprep.mubr.msk.bf16.mxu0 %vm1131_vm0, %v1130_v0  ;;  %1036 = vmatprep.mubr.msk.bf16.mxu1 %vm1131_vm0, %v1130_v0  ;;  %v1125_v22 = vld [vmem:[%s1318_s1 + $0x58] sm:$0xff]   ;;  %v953_v23 = vld [vmem:[%s1319_s0 + $0x28] sm:$0xf]  ;;  %v1126_v24 = vld [vmem:[%s1318_s1 + $0x60] sm:$0xff]  }
   0x9   :  { %1040 = vmatprep.subr.bf16.mxu0 %v1130_v0  ;;  %1046 = vmatprep.subr.bf16.mxu1 %v1130_v0  ;;  %v958_v25 = vld [vmem:[%s1319_s0 + $0x2c] sm:$0xf]  ;;  %v963_v27 = vld [vmem:[%s1319_s0 + $0x30] sm:$0xf]  ;;  %v968_v29 = vld [vmem:[%s1319_s0 + $0x34] sm:$0xf] }
   0xa   :  { %v1127_v26 = vld [vmem:[%s1318_s1 + $0x68] sm:$0xff]   ;;  %v1128_v28 = vld [vmem:[%s1318_s1 + $0x70] sm:$0xff]   ;;  %v1129_v30 = vld [vmem:[%s1318_s1 + $0x78] sm:$0xff]  }
   0xb   :  { %v973_v31 = vld [vmem:[%s1319_s0 + $0x38] sm:$0xf]  ;;  %v978_v32 = vld [vmem:[%s1319_s0 + $0x3c] sm:$0xf] }
   0xe   :  { %1031 = vmatmul.mubr.msk.bf16.vlgmr.msra.gmra.mrb[4].mxu0 %vm30_vm1, %v913_v7  ;;  %1037 = vmatmul.mubr.msk.bf16.vlgmr.msra.gmra.mrb[4].mxu1 %vm30_vm1, %v918_v8 }
   0xf   :  { %1041 = vmatpush3.bf16.msra.mxu0 %v1118_v9  ;;  %1047 = vmatpush3.bf16.msra.mxu1 %v1119_v10 }
  0x10   :  { %1042 = vmatprep.mubr.msk.bf16.mxu0 %vm1131_vm0, %v1130_v0  ;;  %1048 = vmatprep.mubr.msk.bf16.mxu1 %vm1131_vm0, %v1130_v0 }
  0x11   :  { %1052 = vmatprep.subr.bf16.mxu0 %v1130_v0  ;;  %1058 = vmatprep.subr.bf16.mxu1 %v1130_v0 }
  0x16   :  { %1043 = vmatmul.mubr.msk.bf16.vlgmr.msra.gmra.mrb[8].mxu0 %vm30_vm1, %v923_v11  ;;  %1049 = vmatmul.mubr.msk.bf16.vlgmr.msra.gmra.mrb[8].mxu1 %vm30_vm1, %v928_v12 }
  0x17   :  { %1053 = vmatpush3.bf16.msra.mxu0 %v1120_v13  ;;  %1059 = vmatpush3.bf16.msra.mxu1 %v1121_v14 }
  0x18   :  { %1054 = vmatprep.mubr.msk.bf16.mxu0 %vm1131_vm0, %v1130_v0  ;;  %1060 = vmatprep.mubr.msk.bf16.mxu1 %vm1131_vm0, %v1130_v0 }
  0x19   :  { %1064 = vmatprep.subr.bf16.mxu0 %v1130_v0  ;;  %1070 = vmatprep.subr.bf16.mxu1 %v1130_v0 }
  0x1e   :  { %1055 = vmatmul.mubr.msk.bf16.vlgmr.msra.gmra.mrb[12].mxu0 %vm30_vm1, %v933_v15  ;;  %1061 = vmatmul.mubr.msk.bf16.vlgmr.msra.gmra.mrb[12].mxu1 %vm30_vm1, %v938_v17 }
  0x1f   :  { %1065 = vmatpush3.bf16.msra.mxu0 %v1122_v16  ;;  %1071 = vmatpush3.bf16.msra.mxu1 %v1123_v18 }
  0x20   :  { %1066 = vmatprep.mubr.msk.bf16.mxu0 %vm1131_vm0, %v1130_v0  ;;  %1072 = vmatprep.mubr.msk.bf16.mxu1 %vm1131_vm0, %v1130_v0 }
  0x21   :  { %1076 = vmatprep.subr.bf16.mxu0 %v1130_v0  ;;  %1082 = vmatprep.subr.bf16.mxu1 %v1130_v0 }
  0x26   :  { %1067 = vmatmul.mubr.msk.bf16.vlgmr.msra.gmra.mrb[16].mxu0 %vm30_vm1, %v943_v19  ;;  %1073 = vmatmul.mubr.msk.bf16.vlgmr.msra.gmra.mrb[16].mxu1 %vm30_vm1, %v948_v21 }
  0x27   :  { %1077 = vmatpush3.bf16.msra.mxu0 %v1124_v20  ;;  %1083 = vmatpush3.bf16.msra.mxu1 %v1125_v22 }
  0x28   :  { %1078 = vmatprep.mubr.msk.bf16.mxu0 %vm1131_vm0, %v1130_v0  ;;  %1084 = vmatprep.mubr.msk.bf16.mxu1 %vm1131_vm0, %v1130_v0 }
  0x29   :  { %1088 = vmatprep.subr.bf16.mxu0 %v1130_v0  ;;  %1094 = vmatprep.subr.bf16.mxu1 %v1130_v0 }
  0x2e   :  { %1079 = vmatmul.mubr.msk.bf16.vlgmr.msra.gmra.mrb[20].mxu0 %vm30_vm1, %v953_v23  ;;  %1085 = vmatmul.mubr.msk.bf16.vlgmr.msra.gmra.mrb[20].mxu1 %vm30_vm1, %v958_v25 }
  0x2f   :  { %1089 = vmatpush3.bf16.msra.mxu0 %v1126_v24  ;;  %1095 = vmatpush3.bf16.msra.mxu1 %v1127_v26 }
  0x30   :  { %1090 = vmatprep.mubr.msk.bf16.mxu0 %vm1131_vm0, %v1130_v0  ;;  %1096 = vmatprep.mubr.msk.bf16.mxu1 %vm1131_vm0, %v1130_v0 }
  0x31   :  { %1100 = vmatprep.subr.bf16.mxu0 %v1130_v0  ;;  %1106 = vmatprep.subr.bf16.mxu1 %v1130_v0 }
  0x36   :  { %1091 = vmatmul.mubr.msk.bf16.vlgmr.msra.gmra.mrb[24].mxu0 %vm30_vm1, %v963_v27  ;;  %1097 = vmatmul.mubr.msk.bf16.vlgmr.msra.gmra.mrb[24].mxu1 %vm30_vm1, %v968_v29 }
  0x37   :  { %1101 = vmatpush3.bf16.msra.mxu0 %v1128_v28  ;;  %1107 = vmatpush3.bf16.msra.mxu1 %v1129_v30 }
  0x38   :  { %1102 = vmatprep.mubr.msk.bf16.mxu0 %vm1131_vm0, %v1130_v0  ;;  %1108 = vmatprep.mubr.msk.bf16.mxu1 %vm1131_vm0, %v1130_v0 }
  0x3e   :  { %1103 = vmatmul.mubr.msk.bf16.vlgmr.msra.gmra.mrb[28].mxu0 %vm30_vm1, %v973_v31  ;;  %1109 = vmatmul.mubr.msk.bf16.vlgmr.msra.gmra.mrb[28].mxu1 %vm30_vm1, %v978_v32 }
  0xd9   :  { %v68_v33 = vpop.f32.mrb[0].mxu0  ;;  %v117_v34 = vpop.f32.mrb[0].mxu1 }
  0xda   :  { %v1020_v35 = vpop.f32.mrb[1].mxu0  ;;  %v118_v36 = vadd.f32 %v117_v34, %v68_v33  ;;  %v1026_v37 = vpop.f32.mrb[1].mxu1 }
  0xdb   :  { %v71_v38 = vpop.f32.mrb[2].mxu0  ;;  %v120_v39 = vpop.f32.mrb[2].mxu1 }
  0xdc   :  { %v1021_v40 = vpop.f32.mrb[3].mxu0  ;;  %v1027_v41 = vpop.f32.mrb[3].mxu1 }
  0xe1   :  { %v171_v42 = vpop.f32.mrb[4].mxu0  ;;  %v226_v44 = vpop.f32.mrb[4].mxu1 }
  0xe2   :  { %v177_v43 = vadd.f32 %v171_v42, %v118_v36  ;;  %v1032_v45 = vpop.f32.mrb[5].mxu0  ;;  %v1038_v46 = vpop.f32.mrb[5].mxu1  ;;  %v983_v42 = vld [vmem:[%s1320_s2] ss:$0 sm:$0xff] }
  0xe3   :  { %v174_v47 = vpop.f32.mrb[6].mxu0  ;;  %v229_v49 = vpop.f32.mrb[6].mxu1 }
  0xe4   :  { %v232_v48 = vadd.f32 %v226_v44, %v177_v43  ;;  %v1033_v50 = vpop.f32.mrb[7].mxu0  ;;  %v1039_v51 = vpop.f32.mrb[7].mxu1 }
  0xe9   :  { %v281_v52 = vpop.f32.mrb[8].mxu0  ;;  %v336_v54 = vpop.f32.mrb[8].mxu1 }
  0xea   :  { %v287_v53 = vadd.f32 %v281_v52, %v232_v48  ;;  %v1044_v55 = vpop.f32.mrb[9].mxu0  ;;  %v1050_v56 = vpop.f32.mrb[9].mxu1 }
  0xeb   :  { %v284_v57 = vpop.f32.mrb[10].mxu0  ;;  %v339_v59 = vpop.f32.mrb[10].mxu1 }
  0xec   :  { %v342_v58 = vadd.f32 %v336_v54, %v287_v53  ;;  %v1045_v60 = vpop.f32.mrb[11].mxu0  ;;  %v1051_v61 = vpop.f32.mrb[11].mxu1 }
  0xf1   :  { %v391_v62 = vpop.f32.mrb[12].mxu0  ;;  %v446_v0 = vpop.f32.mrb[12].mxu1 }
  0xf2   :  { %v397_v63 = vadd.f32 %v391_v62, %v342_v58  ;;  %v1056_v1 = vpop.f32.mrb[13].mxu0  ;;  %v1062_v2 = vpop.f32.mrb[13].mxu1 }
  0xf3   :  { %v394_v3 = vpop.f32.mrb[14].mxu0  ;;  %v449_v5 = vpop.f32.mrb[14].mxu1 }
  0xf4   :  { %v452_v4 = vadd.f32 %v446_v0, %v397_v63  ;;  %v1057_v6 = vpop.f32.mrb[15].mxu0  ;;  %v1063_v7 = vpop.f32.mrb[15].mxu1 }
  0xf9   :  { %v501_v8 = vpop.f32.mrb[16].mxu0  ;;  %v556_v10 = vpop.f32.mrb[16].mxu1 }
  0xfa   :  { %v507_v9 = vadd.f32 %v501_v8, %v452_v4  ;;  %v1068_v11 = vpop.f32.mrb[17].mxu0  ;;  %v1074_v12 = vpop.f32.mrb[17].mxu1 }
  0xfb   :  { %v504_v13 = vpop.f32.mrb[18].mxu0  ;;  %v559_v15 = vpop.f32.mrb[18].mxu1 }
  0xfc   :  { %v562_v14 = vadd.f32 %v556_v10, %v507_v9  ;;  %v1069_v16 = vpop.f32.mrb[19].mxu0  ;;  %v1075_v17 = vpop.f32.mrb[19].mxu1 }
 0x101   :  { %v611_v18 = vpop.f32.mrb[20].mxu0  ;;  %v666_v20 = vpop.f32.mrb[20].mxu1 }
 0x102   :  { %v617_v19 = vadd.f32 %v611_v18, %v562_v14  ;;  %v1080_v21 = vpop.f32.mrb[21].mxu0  ;;  %v1086_v22 = vpop.f32.mrb[21].mxu1 }
 0x103   :  { %v614_v23 = vpop.f32.mrb[22].mxu0  ;;  %v669_v25 = vpop.f32.mrb[22].mxu1 }
 0x104   :  { %v672_v24 = vadd.f32 %v666_v20, %v617_v19  ;;  %v1081_v26 = vpop.f32.mrb[23].mxu0  ;;  %v1087_v27 = vpop.f32.mrb[23].mxu1 }
 0x109   :  { %v721_v28 = vpop.f32.mrb[24].mxu0  ;;  %v776_v30 = vpop.f32.mrb[24].mxu1 }
 0x10a   :  { %v727_v29 = vadd.f32 %v721_v28, %v672_v24  ;;  %v1092_v31 = vpop.f32.mrb[25].mxu0  ;;  %v1098_v32 = vpop.f32.mrb[25].mxu1 }
 0x10b   :  { %v724_v33 = vpop.f32.mrb[26].mxu0  ;;  %v779_v35 = vpop.f32.mrb[26].mxu1 }
 0x10c   :  { %v782_v34 = vadd.f32 %v776_v30, %v727_v29  ;;  %v1093_v36 = vpop.f32.mrb[27].mxu0  ;;  %v1099_v37 = vpop.f32.mrb[27].mxu1 }
 0x111   :  { %v831_v38 = vpop.f32.mrb[28].mxu0  ;;  %v886_v40 = vpop.f32.mrb[28].mxu1 }
 0x112   :  { %v837_v39 = vadd.f32 %v831_v38, %v782_v34  ;;  %v1104_v41 = vpop.f32.mrb[29].mxu0  ;;  %v1110_v43 = vpop.f32.mrb[29].mxu1 }
 0x113   :  { %v834_v44 = vpop.f32.mrb[30].mxu0  ;;  %v889_v46 = vpop.f32.mrb[30].mxu1 }
 0x114   :  { %v892_v45 = vadd.f32 %v886_v40, %v837_v39  ;;  %v1105_v47 = vpop.f32.mrb[31].mxu0  ;;  %v1111_v48 = vpop.f32.mrb[31].mxu1 }
 0x116   :  { %v899_v49 = vadd.f32 %v983_v42, %v892_v45 }
 0x118   :  { %901 = vst.msk [vmem:[%s1321_s3] sm:$0xff] %vm900_vm2, %v899_v49 }

// kernel: vae_forward.7
= control target key start
LH: loop header
LB: loop body
LE: loop exit
PB: predicated region body
PF: predicated region fallthrough
CT: control target
= control target key end

     0   :  { %vm123_vm0 = vcmask 1041408   ;;  %vm98_vm1 = vcmask 31744   ;;  %vm3196_vm2 = vcmask 64512   ;;  %s5735_s1 = inlined_call_operand.vmem [shape: bf16[16,4,8], index: 1, kind: input, shape index: {}]   ;;  %s5736_s0 = inlined_call_operand.vmem [shape: bf16[16,128,4], index: 0, kind: input, shape index: {}]   ;;  %s5737_s2 = inlined_call_operand.vmem [shape: f32[1,8], index: 2, kind: input, shape index: {}]   ;;  %s5738_s5 = inlined_call_operand.vmem [shape: f32[1,128,8], index: 5, kind: output, shape index: {}]   ;;  %s5739_s3 = inlined_call_operand.vmem [shape: f32[1,8], index: 3, kind: input, shape index: {}]   ;;  %s5740_s4 = inlined_call_operand.vmem [shape: f32[1,8], index: 4, kind: input, shape index: {}]  }
   0x1   :  { %v3485_v0 = vld [vmem:[%s5735_s1 + $0x2] sm:$0x3]  ;;  %v3732_v1 = vld [vmem:[%s5735_s1 + $0x10] sm:$0x3]  ;;  %v4673_v6 = vld [vmem:[%s5736_s0 + $0x48] sm:$0xff]  }
   0x2   :  { %4655 = vmatprep.subr.msk.bf16.mxu1 %vm123_vm0, %v3485_v0  ;;  %4663 = vmatprep.subr.msk.bf16.mxu0 %vm123_vm0, %v3732_v1  ;;  %v125_v2 = vsel %vm123_vm0, %v3485_v0, 0  ;;  %v1666_v3 = vsel %vm123_vm0, %v3732_v1, 0  ;;  %v4671_v4 = vld [vmem:[%s5736_s0 + $0x40] sm:$0xff]   ;;  %v4674_v8 = vld [vmem:[%s5736_s0 + $0x208] sm:$0xff]   ;;  %v3765_v10 = vld [vmem:[%s5735_s1 + $0x12] sm:$0x3] }
   0x3   :  { %v4672_v5 = vld [vmem:[%s5736_s0 + $0x200] sm:$0xff]   ;;  %4128 = vmatpush3.bf16.msra.mxu1 %v125_v2  ;;  %4272 = vmatpush3.bf16.msra.mxu0 %v1666_v3  ;;  %v1865_v11 = vsel %vm123_vm0, %v3765_v10, 0  ;;  %v4675_v12 = vld [vmem:[%s5736_s0 + $0x50] sm:$0xff]   ;;  %v4677_v14 = vld [vmem:[%s5736_s0 + $0x58] sm:$0xff]  }
   0x4   :  { %4129 = vmatprep.mubr.msk.bf16.mxu1 %vm98_vm1, %v4671_v4  ;;  %4273 = vmatprep.mubr.msk.bf16.mxu0 %vm98_vm1, %v4672_v5  ;;  %v38_v7 = vld [vmem:[%s5735_s1] sm:$0x3]  ;;  %v4676_v13 = vld [vmem:[%s5736_s0 + $0x210] sm:$0xff]   ;;  %v4678_v15 = vld [vmem:[%s5736_s0 + $0x218] sm:$0xff]  }
   0x5   :  { %4656 = vmatprep.subr.msk.bf16.mxu1 %vm123_vm0, %v38_v7  ;;  %v289_v9 = vsel %vm123_vm0, %v38_v7, 0  ;;  %4664 = vmatprep.subr.msk.bf16.mxu0 %vm123_vm0, %v3765_v10  ;;  %v4679_v16 = vld [vmem:[%s5736_s0 + $0x60] sm:$0xff]   ;;  %v4681_v18 = vld [vmem:[%s5736_s0 + $0x68] sm:$0xff]   ;;  %v4683_v20 = vld [vmem:[%s5736_s0 + $0x70] sm:$0xff]  }
   0x6   :  { %4130 = vmatmul.mubr.msk.bf16.vlgmr.msra.gmra.mrb[0].mxu1 %vm98_vm1, %v4673_v6  ;;  %4274 = vmatmul.mubr.msk.bf16.vlgmr.msra.gmra.mrb[0].mxu0 %vm98_vm1, %v4674_v8  ;;  %v4680_v17 = vld [vmem:[%s5736_s0 + $0x220] sm:$0xff]   ;;  %v4682_v19 = vld [vmem:[%s5736_s0 + $0x228] sm:$0xff]   ;;  %v4684_v21 = vld [vmem:[%s5736_s0 + $0x230] sm:$0xff]  }
   0x7   :  { %4146 = vmatpush3.bf16.msra.mxu1 %v289_v9  ;;  %4290 = vmatpush3.bf16.msra.mxu0 %v1865_v11  ;;  %v3534_v22 = vld [vmem:[%s5735_s1 + $0x4] sm:$0x3]  ;;  %v3798_v23 = vld [vmem:[%s5735_s1 + $0x14] sm:$0x3]  ;;  %v4685_v24 = vld [vmem:[%s5736_s0 + $0x78] sm:$0xff]  }
   0x8   :  { %4133 = vmatprep.mubr.msk.bf16.mxu1 %vm98_vm1, %v4675_v12  ;;  %4277 = vmatprep.mubr.msk.bf16.mxu0 %vm98_vm1, %v4676_v13  ;;  %v4686_v25 = vld [vmem:[%s5736_s0 + $0x238] sm:$0xff]   ;;  %v4687_v26 = vld [vmem:[%s5736_s0] sm:$0xff]   ;;  %v4689_v28 = vld [vmem:[%s5736_s0 + $0x8] sm:$0xff]   ;;  %v472_v30 = vsel %vm123_vm0, %v3534_v22, 0  ;;  %v2064_v32 = vsel %vm123_vm0, %v3798_v23, 0 }
   0x9   :  { %4657 = vmatprep.subr.msk.bf16.mxu1 %vm123_vm0, %v3534_v22  ;;  %4665 = vmatprep.subr.msk.bf16.mxu0 %vm123_vm0, %v3798_v23  ;;  %v4688_v27 = vld [vmem:[%s5736_s0 + $0x240] sm:$0xff]   ;;  %v4690_v29 = vld [vmem:[%s5736_s0 + $0x248] sm:$0xff]   ;;  %v4691_v31 = vld [vmem:[%s5736_s0 + $0x10] sm:$0xff]  }
   0xa   :  { %v4692_v33 = vld [vmem:[%s5736_s0 + $0x250] sm:$0xff]   ;;  %v3567_v34 = vld [vmem:[%s5735_s1 + $0x6] sm:$0x3]  ;;  %v4693_v36 = vld [vmem:[%s5736_s0 + $0x18] sm:$0xff]  }
   0xb   :  { %v3831_v35 = vld [vmem:[%s5735_s1 + $0x16] sm:$0x3]  ;;  %v4694_v37 = vld [vmem:[%s5736_s0 + $0x258] sm:$0xff]   ;;  %v4695_v38 = vld [vmem:[%s5736_s0 + $0x20] sm:$0xff]   ;;  %v671_v50 = vsel %vm123_vm0, %v3567_v34, 0 }
   0xc   :  { %v4696_v39 = vld [vmem:[%s5736_s0 + $0x260] sm:$0xff]   ;;  %v4697_v40 = vld [vmem:[%s5736_s0 + $0x28] sm:$0xff]   ;;  %v4699_v42 = vld [vmem:[%s5736_s0 + $0x30] sm:$0xff]   ;;  %v2263_v52 = vsel %vm123_vm0, %v3831_v35, 0 }
   0xd   :  { %v4698_v41 = vld [vmem:[%s5736_s0 + $0x268] sm:$0xff]   ;;  %v4700_v43 = vld [vmem:[%s5736_s0 + $0x270] sm:$0xff]   ;;  %v4701_v44 = vld [vmem:[%s5736_s0 + $0x38] sm:$0xff]  }
   0xe   :  { %4134 = vmatmul.mubr.msk.bf16.gmra.mrb[4].mxu1 %vm98_vm1, %v4677_v14  ;;  %4278 = vmatmul.mubr.msk.bf16.gmra.mrb[4].mxu0 %vm98_vm1, %v4678_v15  ;;  %v4702_v45 = vld [vmem:[%s5736_s0 + $0x278] sm:$0xff]   ;;  %v4703_v46 = vld [vmem:[%s5736_s0 + $0x80] sm:$0xff]   ;;  %v4705_v48 = vld [vmem:[%s5736_s0 + $0x88] sm:$0xff]  }
   0xf   :  { %4137 = vmatprep.mubr.msk.bf16.mxu1 %vm98_vm1, %v4679_v16  ;;  %4281 = vmatprep.mubr.msk.bf16.mxu0 %vm98_vm1, %v4680_v17  ;;  %v4704_v47 = vld [vmem:[%s5736_s0 + $0x280] sm:$0xff]   ;;  %v4706_v49 = vld [vmem:[%s5736_s0 + $0x288] sm:$0xff]   ;;  %v4707_v51 = vld [vmem:[%s5736_s0 + $0x90] sm:$0xff]  }
  0x10   :  { %v4708_v53 = vld [vmem:[%s5736_s0 + $0x290] sm:$0xff]   ;;  %v3600_v54 = vld [vmem:[%s5735_s1 + $0x8] sm:$0x3]  ;;  %v3864_v55 = vld [vmem:[%s5735_s1 + $0x18] sm:$0x3] }
  0x11   :  { %v4709_v56 = vld [vmem:[%s5736_s0 + $0x98] sm:$0xff]   ;;  %v4711_v58 = vld [vmem:[%s5736_s0 + $0xa0] sm:$0xff]   ;;  %v4713_v60 = vld [vmem:[%s5736_s0 + $0xa8] sm:$0xff]   ;;  %v870_v6 = vsel %vm123_vm0, %v3600_v54, 0  ;;  %v2462_v8 = vsel %vm123_vm0, %v3864_v55, 0 }
  0x12   :  { %v4710_v57 = vld [vmem:[%s5736_s0 + $0x298] sm:$0xff]   ;;  %v4712_v59 = vld [vmem:[%s5736_s0 + $0x2a0] sm:$0xff]   ;;  %v4714_v61 = vld [vmem:[%s5736_s0 + $0x2a8] sm:$0xff]  }
  0x13   :  { %v4715_v62 = vld [vmem:[%s5736_s0 + $0xb0] sm:$0xff]   ;;  %v4717_v0 = vld [vmem:[%s5736_s0 + $0xb8] sm:$0xff]   ;;  %v4719_v2 = vld [vmem:[%s5736_s0 + $0xc0] sm:$0xff]  }
  0x14   :  { %v4716_v63 = vld [vmem:[%s5736_s0 + $0x2b0] sm:$0xff]   ;;  %v4718_v1 = vld [vmem:[%s5736_s0 + $0x2b8] sm:$0xff]   ;;  %v4720_v3 = vld [vmem:[%s5736_s0 + $0x2c0] sm:$0xff]  }
  0x15   :  { %v4721_v4 = vld [vmem:[%s5736_s0 + $0xc8] sm:$0xff]   ;;  %v4723_v7 = vld [vmem:[%s5736_s0 + $0xd0] sm:$0xff]   ;;  %v3897_v11 = vld [vmem:[%s5735_s1 + $0x1a] sm:$0x3] }
  0x16   :  { %4138 = vmatmul.mubr.msk.bf16.gmra.mrb[8].mxu1 %vm98_vm1, %v4681_v18  ;;  %4282 = vmatmul.mubr.msk.bf16.gmra.mrb[8].mxu0 %vm98_vm1, %v4682_v19  ;;  %v4722_v5 = vld [vmem:[%s5736_s0 + $0x2c8] sm:$0xff]   ;;  %v4724_v9 = vld [vmem:[%s5736_s0 + $0x2d0] sm:$0xff]   ;;  %v4725_v12 = vld [vmem:[%s5736_s0 + $0xd8] sm:$0xff]  }
  0x17   :  { %4141 = vmatprep.mubr.msk.bf16.mxu1 %vm98_vm1, %v4683_v20  ;;  %4285 = vmatprep.mubr.msk.bf16.mxu0 %vm98_vm1, %v4684_v21  ;;  %v3633_v10 = vld [vmem:[%s5735_s1 + $0xa] sm:$0x3]  ;;  %v4726_v13 = vld [vmem:[%s5736_s0 + $0x2d8] sm:$0xff]   ;;  %v4727_v14 = vld [vmem:[%s5736_s0 + $0xe0] sm:$0xff]  }
  0x18   :  { %v4728_v15 = vld [vmem:[%s5736_s0 + $0x2e0] sm:$0xff]   ;;  %v4729_v16 = vld [vmem:[%s5736_s0 + $0xe8] sm:$0xff]   ;;  %v4731_v18 = vld [vmem:[%s5736_s0 + $0xf0] sm:$0xff]  }
  0x19   :  { %v4730_v17 = vld [vmem:[%s5736_s0 + $0x2e8] sm:$0xff]   ;;  %v4732_v19 = vld [vmem:[%s5736_s0 + $0x2f0] sm:$0xff]   ;;  %v4733_v20 = vld [vmem:[%s5736_s0 + $0xf8] sm:$0xff]  }
  0x1a   :  { %v4734_v21 = vld [vmem:[%s5736_s0 + $0x2f8] sm:$0xff]   ;;  %v4735_v22 = vld [vmem:[%s5736_s0 + $0x100] sm:$0xff]  }
  0x1b   :  { %v4736_v23 = vld [vmem:[%s5736_s0 + $0x300] sm:$0xff]  }
  0x1e   :  { %4142 = vmatmul.mubr.msk.bf16.gmra.mrb[12].mxu1 %vm98_vm1, %v4685_v24  ;;  %4286 = vmatmul.mubr.msk.bf16.gmra.mrb[12].mxu0 %vm98_vm1, %v4686_v25  ;;  %v4737_v24 = vld [vmem:[%s5736_s0 + $0x108] sm:$0xff]  }
  0x1f   :  { %4147 = vmatprep.mubr.msk.bf16.mxu1 %vm98_vm1, %v4687_v26  ;;  %4291 = vmatprep.mubr.msk.bf16.mxu0 %vm98_vm1, %v4688_v27  ;;  %v4738_v25 = vld [vmem:[%s5736_s0 + $0x308] sm:$0xff]   ;;  %v1069_v26 = vsel %vm123_vm0, %v3633_v10, 0  ;;  %v4739_v27 = vld [vmem:[%s5736_s0 + $0x110] sm:$0xff]  }
  0x26   :  { %4148 = vmatmul.mubr.msk.bf16.vlgmr.msra.gmra.mrb[0].mxu1 %vm98_vm1, %v4689_v28  ;;  %4292 = vmatmul.mubr.msk.bf16.vlgmr.msra.gmra.mrb[0].mxu0 %vm98_vm1, %v4690_v29  ;;  %v2661_v28 = vsel %vm123_vm0, %v3897_v11, 0  ;;  %v4740_v29 = vld [vmem:[%s5736_s0 + $0x310] sm:$0xff]  }
  0x27   :  { %4164 = vmatpush3.bf16.msra.mxu1 %v472_v30  ;;  %4308 = vmatpush3.bf16.msra.mxu0 %v2064_v32  ;;  %v3666_v30 = vld [vmem:[%s5735_s1 + $0xc] sm:$0x3]  ;;  %v4741_v32 = vld [vmem:[%s5736_s0 + $0x118] sm:$0xff]  }
  0x28   :  { %4151 = vmatprep.mubr.msk.bf16.mxu1 %vm98_vm1, %v4691_v31  ;;  %4295 = vmatprep.mubr.msk.bf16.mxu0 %vm98_vm1, %v4692_v33  ;;  %v3930_v31 = vld [vmem:[%s5735_s1 + $0x1c] sm:$0x3] }
  0x29   :  { %4658 = vmatprep.subr.msk.bf16.mxu1 %vm123_vm0, %v3567_v34  ;;  %4666 = vmatprep.subr.msk.bf16.mxu0 %vm123_vm0, %v3831_v35  ;;  %v4742_v33 = vld [vmem:[%s5736_s0 + $0x318] sm:$0xff]   ;;  %v4743_v34 = vld [vmem:[%s5736_s0 + $0x120] sm:$0xff]  }
  0x2a   :  { %v4744_v35 = vld [vmem:[%s5736_s0 + $0x320] sm:$0xff]  }
  0x2e   :  { %4152 = vmatmul.mubr.msk.bf16.gmra.mrb[4].mxu1 %vm98_vm1, %v4693_v36  ;;  %4296 = vmatmul.mubr.msk.bf16.gmra.mrb[4].mxu0 %vm98_vm1, %v4694_v37  ;;  %v4745_v36 = vld [vmem:[%s5736_s0 + $0x128] sm:$0xff]  }
  0x2f   :  { %4155 = vmatprep.mubr.msk.bf16.mxu1 %vm98_vm1, %v4695_v38  ;;  %4299 = vmatprep.mubr.msk.bf16.mxu0 %vm98_vm1, %v4696_v39  ;;  %v4746_v37 = vld [vmem:[%s5736_s0 + $0x328] sm:$0xff]   ;;  %v4747_v38 = vld [vmem:[%s5736_s0 + $0x130] sm:$0xff]  }
  0x30   :  { %v4748_v39 = vld [vmem:[%s5736_s0 + $0x330] sm:$0xff]  }
  0x36   :  { %4156 = vmatmul.mubr.msk.bf16.gmra.mrb[8].mxu1 %vm98_vm1, %v4697_v40  ;;  %4300 = vmatmul.mubr.msk.bf16.gmra.mrb[8].mxu0 %vm98_vm1, %v4698_v41  ;;  %v4749_v40 = vld [vmem:[%s5736_s0 + $0x138] sm:$0xff]  }
  0x37   :  { %4159 = vmatprep.mubr.msk.bf16.mxu1 %vm98_vm1, %v4699_v42  ;;  %4303 = vmatprep.mubr.msk.bf16.mxu0 %vm98_vm1, %v4700_v43  ;;  %v4750_v41 = vld [vmem:[%s5736_s0 + $0x338] sm:$0xff]   ;;  %v4751_v42 = vld [vmem:[%s5736_s0 + $0x140] sm:$0xff]  }
  0x38   :  { %v4752_v43 = vld [vmem:[%s5736_s0 + $0x340] sm:$0xff]  }
  0x3e   :  { %4160 = vmatmul.mubr.msk.bf16.gmra.mrb[12].mxu1 %vm98_vm1, %v4701_v44  ;;  %4304 = vmatmul.mubr.msk.bf16.gmra.mrb[12].mxu0 %vm98_vm1, %v4702_v45  ;;  %v4753_v44 = vld [vmem:[%s5736_s0 + $0x148] sm:$0xff]  }
  0x3f   :  { %4165 = vmatprep.mubr.msk.bf16.mxu1 %vm98_vm1, %v4703_v46  ;;  %4309 = vmatprep.mubr.msk.bf16.mxu0 %vm98_vm1, %v4704_v47  ;;  %v4754_v45 = vld [vmem:[%s5736_s0 + $0x348] sm:$0xff]   ;;  %v1268_v46 = vsel %vm123_vm0, %v3666_v30, 0  ;;  %v4755_v47 = vld [vmem:[%s5736_s0 + $0x150] sm:$0xff]  }
  0x46   :  { %4166 = vmatmul.mubr.msk.bf16.vlgmr.msra.gmra.mrb[0].mxu1 %vm98_vm1, %v4705_v48  ;;  %4310 = vmatmul.mubr.msk.bf16.vlgmr.msra.gmra.mrb[0].mxu0 %vm98_vm1, %v4706_v49  ;;  %v2860_v48 = vsel %vm123_vm0, %v3930_v31, 0  ;;  %v4756_v49 = vld [vmem:[%s5736_s0 + $0x350] sm:$0xff]  }
  0x47   :  { %4182 = vmatpush3.bf16.msra.mxu1 %v671_v50  ;;  %4326 = vmatpush3.bf16.msra.mxu0 %v2263_v52  ;;  %v3699_v50 = vld [vmem:[%s5735_s1 + $0xe] sm:$0x3]  ;;  %v4757_v52 = vld [vmem:[%s5736_s0 + $0x158] sm:$0xff]  }
  0x48   :  { %4169 = vmatprep.mubr.msk.bf16.mxu1 %vm98_vm1, %v4707_v51  ;;  %4313 = vmatprep.mubr.msk.bf16.mxu0 %vm98_vm1, %v4708_v53  ;;  %v3963_v51 = vld [vmem:[%s5735_s1 + $0x1e] sm:$0x3] }
  0x49   :  { %4659 = vmatprep.subr.msk.bf16.mxu1 %vm123_vm0, %v3600_v54  ;;  %4667 = vmatprep.subr.msk.bf16.mxu0 %vm123_vm0, %v3864_v55  ;;  %v4758_v53 = vld [vmem:[%s5736_s0 + $0x358] sm:$0xff]   ;;  %v4759_v54 = vld [vmem:[%s5736_s0 + $0x160] sm:$0xff]  }
  0x4a   :  { %v4760_v55 = vld [vmem:[%s5736_s0 + $0x360] sm:$0xff]  }
  0x4e   :  { %4170 = vmatmul.mubr.msk.bf16.gmra.mrb[4].mxu1 %vm98_vm1, %v4709_v56  ;;  %4314 = vmatmul.mubr.msk.bf16.gmra.mrb[4].mxu0 %vm98_vm1, %v4710_v57  ;;  %v4761_v56 = vld [vmem:[%s5736_s0 + $0x168] sm:$0xff]  }
  0x4f   :  { %4173 = vmatprep.mubr.msk.bf16.mxu1 %vm98_vm1, %v4711_v58  ;;  %4317 = vmatprep.mubr.msk.bf16.mxu0 %vm98_vm1, %v4712_v59  ;;  %v4762_v57 = vld [vmem:[%s5736_s0 + $0x368] sm:$0xff]   ;;  %v4763_v58 = vld [vmem:[%s5736_s0 + $0x170] sm:$0xff]  }
  0x50   :  { %v4764_v59 = vld [vmem:[%s5736_s0 + $0x370] sm:$0xff]  }
  0x56   :  { %4174 = vmatmul.mubr.msk.bf16.gmra.mrb[8].mxu1 %vm98_vm1, %v4713_v60  ;;  %4318 = vmatmul.mubr.msk.bf16.gmra.mrb[8].mxu0 %vm98_vm1, %v4714_v61  ;;  %v4765_v60 = vld [vmem:[%s5736_s0 + $0x178] sm:$0xff]  }
  0x57   :  { %4177 = vmatprep.mubr.msk.bf16.mxu1 %vm98_vm1, %v4715_v62  ;;  %4321 = vmatprep.mubr.msk.bf16.mxu0 %vm98_vm1, %v4716_v63  ;;  %v4766_v61 = vld [vmem:[%s5736_s0 + $0x378] sm:$0xff]   ;;  %v4767_v62 = vld [vmem:[%s5736_s0 + $0x180] sm:$0xff]  }
  0x58   :  { %v4768_v63 = vld [vmem:[%s5736_s0 + $0x380] sm:$0xff]  }
  0x5e   :  { %4178 = vmatmul.mubr.msk.bf16.gmra.mrb[12].mxu1 %vm98_vm1, %v4717_v0  ;;  %4322 = vmatmul.mubr.msk.bf16.gmra.mrb[12].mxu0 %vm98_vm1, %v4718_v1  ;;  %v4769_v0 = vld [vmem:[%s5736_s0 + $0x188] sm:$0xff]  }
  0x5f   :  { %4183 = vmatprep.mubr.msk.bf16.mxu1 %vm98_vm1, %v4719_v2  ;;  %4327 = vmatprep.mubr.msk.bf16.mxu0 %vm98_vm1, %v4720_v3  ;;  %v4770_v1 = vld [vmem:[%s5736_s0 + $0x388] sm:$0xff]   ;;  %v1467_v2 = vsel %vm123_vm0, %v3699_v50, 0  ;;  %v4771_v3 = vld [vmem:[%s5736_s0 + $0x190] sm:$0xff]  }
  0x66   :  { %4184 = vmatmul.mubr.msk.bf16.vlgmr.msra.gmra.mrb[0].mxu1 %vm98_vm1, %v4721_v4  ;;  %4328 = vmatmul.mubr.msk.bf16.vlgmr.msra.gmra.mrb[0].mxu0 %vm98_vm1, %v4722_v5  ;;  %v3059_v4 = vsel %vm123_vm0, %v3963_v51, 0  ;;  %v4772_v5 = vld [vmem:[%s5736_s0 + $0x390] sm:$0xff]  }
  0x67   :  { %4200 = vmatpush3.bf16.msra.mxu1 %v870_v6  ;;  %4344 = vmatpush3.bf16.msra.mxu0 %v2462_v8  ;;  %v4773_v6 = vld [vmem:[%s5736_s0 + $0x198] sm:$0xff]   ;;  %v4775_v8 = vld [vmem:[%s5736_s0 + $0x1a0] sm:$0xff]  }
  0x68   :  { %4187 = vmatprep.mubr.msk.bf16.mxu1 %vm98_vm1, %v4723_v7  ;;  %4331 = vmatprep.mubr.msk.bf16.mxu0 %vm98_vm1, %v4724_v9  ;;  %v4774_v7 = vld [vmem:[%s5736_s0 + $0x398] sm:$0xff]   ;;  %v4776_v9 = vld [vmem:[%s5736_s0 + $0x3a0] sm:$0xff]  }
  0x69   :  { %4660 = vmatprep.subr.msk.bf16.mxu1 %vm123_vm0, %v3633_v10  ;;  %4668 = vmatprep.subr.msk.bf16.mxu0 %vm123_vm0, %v3897_v11  ;;  %v4777_v10 = vld [vmem:[%s5736_s0 + $0x1a8] sm:$0xff]  }
  0x6a   :  { %v4778_v11 = vld [vmem:[%s5736_s0 + $0x3a8] sm:$0xff]  }
  0x6e   :  { %4188 = vmatmul.mubr.msk.bf16.gmra.mrb[4].mxu1 %vm98_vm1, %v4725_v12  ;;  %4332 = vmatmul.mubr.msk.bf16.gmra.mrb[4].mxu0 %vm98_vm1, %v4726_v13  ;;  %v4779_v12 = vld [vmem:[%s5736_s0 + $0x1b0] sm:$0xff]  }
  0x6f   :  { %4191 = vmatprep.mubr.msk.bf16.mxu1 %vm98_vm1, %v4727_v14  ;;  %4335 = vmatprep.mubr.msk.bf16.mxu0 %vm98_vm1, %v4728_v15  ;;  %v4780_v13 = vld [vmem:[%s5736_s0 + $0x3b0] sm:$0xff]   ;;  %v4781_v14 = vld [vmem:[%s5736_s0 + $0x1b8] sm:$0xff]  }
  0x70   :  { %v4782_v15 = vld [vmem:[%s5736_s0 + $0x3b8] sm:$0xff]  }
  0x76   :  { %4192 = vmatmul.mubr.msk.bf16.gmra.mrb[8].mxu1 %vm98_vm1, %v4729_v16  ;;  %4336 = vmatmul.mubr.msk.bf16.gmra.mrb[8].mxu0 %vm98_vm1, %v4730_v17  ;;  %v4783_v16 = vld [vmem:[%s5736_s0 + $0x1c0] sm:$0xff]  }
  0x77   :  { %4195 = vmatprep.mubr.msk.bf16.mxu1 %vm98_vm1, %v4731_v18  ;;  %4339 = vmatprep.mubr.msk.bf16.mxu0 %vm98_vm1, %v4732_v19  ;;  %v4784_v17 = vld [vmem:[%s5736_s0 + $0x3c0] sm:$0xff]   ;;  %v4785_v18 = vld [vmem:[%s5736_s0 + $0x1c8] sm:$0xff]  }
  0x78   :  { %v4786_v19 = vld [vmem:[%s5736_s0 + $0x3c8] sm:$0xff]  }
  0x7e   :  { %4196 = vmatmul.mubr.msk.bf16.gmra.mrb[12].mxu1 %vm98_vm1, %v4733_v20  ;;  %4340 = vmatmul.mubr.msk.bf16.gmra.mrb[12].mxu0 %vm98_vm1, %v4734_v21  ;;  %v4787_v20 = vld [vmem:[%s5736_s0 + $0x1d0] sm:$0xff]  }
  0x7f   :  { %4201 = vmatprep.mubr.msk.bf16.mxu1 %vm98_vm1, %v4735_v22  ;;  %4345 = vmatprep.mubr.msk.bf16.mxu0 %vm98_vm1, %v4736_v23  ;;  %v4788_v21 = vld [vmem:[%s5736_s0 + $0x3d0] sm:$0xff]   ;;  %v4789_v22 = vld [vmem:[%s5736_s0 + $0x1d8] sm:$0xff]  }
  0x80   :  { %v4790_v23 = vld [vmem:[%s5736_s0 + $0x3d8] sm:$0xff]  }
  0x86   :  { %4202 = vmatmul.mubr.msk.bf16.vlgmr.msra.gmra.mrb[0].mxu1 %vm98_vm1, %v4737_v24  ;;  %4346 = vmatmul.mubr.msk.bf16.vlgmr.msra.gmra.mrb[0].mxu0 %vm98_vm1, %v4738_v25  ;;  %v4791_v24 = vld [vmem:[%s5736_s0 + $0x1e0] sm:$0xff]  }
  0x87   :  { %4218 = vmatpush3.bf16.msra.mxu1 %v1069_v26  ;;  %4362 = vmatpush3.bf16.msra.mxu0 %v2661_v28  ;;  %v4792_v25 = vld [vmem:[%s5736_s0 + $0x3e0] sm:$0xff]   ;;  %v4793_v26 = vld [vmem:[%s5736_s0 + $0x1e8] sm:$0xff]   ;;  %v4795_v28 = vld [vmem:[%s5736_s0 + $0x1f0] sm:$0xff]  }
  0x88   :  { %4205 = vmatprep.mubr.msk.bf16.mxu1 %vm98_vm1, %v4739_v27  ;;  %4349 = vmatprep.mubr.msk.bf16.mxu0 %vm98_vm1, %v4740_v29  ;;  %v4794_v27 = vld [vmem:[%s5736_s0 + $0x3e8] sm:$0xff]   ;;  %v4796_v29 = vld [vmem:[%s5736_s0 + $0x3f0] sm:$0xff]  }
  0x89   :  { %4661 = vmatprep.subr.msk.bf16.mxu1 %vm123_vm0, %v3666_v30  ;;  %4669 = vmatprep.subr.msk.bf16.mxu0 %vm123_vm0, %v3930_v31  ;;  %v4797_v30 = vld [vmem:[%s5736_s0 + $0x1f8] sm:$0xff]  }
  0x8a   :  { %v4798_v31 = vld [vmem:[%s5736_s0 + $0x3f8] sm:$0xff]  }
  0x8e   :  { %4206 = vmatmul.mubr.msk.bf16.gmra.mrb[4].mxu1 %vm98_vm1, %v4741_v32  ;;  %4350 = vmatmul.mubr.msk.bf16.gmra.mrb[4].mxu0 %vm98_vm1, %v4742_v33  ;;  %v5426_v33 = vld [vmem:[%s5737_s2] ss:$0 sm:$0xff] }
  0x8f   :  { %4209 = vmatprep.mubr.msk.bf16.mxu1 %vm98_vm1, %v4743_v34  ;;  %4353 = vmatprep.mubr.msk.bf16.mxu0 %vm98_vm1, %v4744_v35 }
  0x96   :  { %4210 = vmatmul.mubr.msk.bf16.gmra.mrb[8].mxu1 %vm98_vm1, %v4745_v36  ;;  %4354 = vmatmul.mubr.msk.bf16.gmra.mrb[8].mxu0 %vm98_vm1, %v4746_v37 }
  0x97   :  { %4213 = vmatprep.mubr.msk.bf16.mxu1 %vm98_vm1, %v4747_v38  ;;  %4357 = vmatprep.mubr.msk.bf16.mxu0 %vm98_vm1, %v4748_v39 }
  0x9e   :  { %4214 = vmatmul.mubr.msk.bf16.gmra.mrb[12].mxu1 %vm98_vm1, %v4749_v40  ;;  %4358 = vmatmul.mubr.msk.bf16.gmra.mrb[12].mxu0 %vm98_vm1, %v4750_v41 }
  0x9f   :  { %4219 = vmatprep.mubr.msk.bf16.mxu1 %vm98_vm1, %v4751_v42  ;;  %4363 = vmatprep.mubr.msk.bf16.mxu0 %vm98_vm1, %v4752_v43 }
  0xa6   :  { %4220 = vmatmul.mubr.msk.bf16.vlgmr.msra.gmra.mrb[0].mxu1 %vm98_vm1, %v4753_v44  ;;  %4364 = vmatmul.mubr.msk.bf16.vlgmr.msra.gmra.mrb[0].mxu0 %vm98_vm1, %v4754_v45 }
  0xa7   :  { %4236 = vmatpush3.bf16.msra.mxu1 %v1268_v46  ;;  %4380 = vmatpush3.bf16.msra.mxu0 %v2860_v48 }
  0xa8   :  { %4223 = vmatprep.mubr.msk.bf16.mxu1 %vm98_vm1, %v4755_v47  ;;  %4367 = vmatprep.mubr.msk.bf16.mxu0 %vm98_vm1, %v4756_v49 }
  0xa9   :  { %4662 = vmatprep.subr.msk.bf16.mxu1 %vm123_vm0, %v3699_v50  ;;  %4670 = vmatprep.subr.msk.bf16.mxu0 %vm123_vm0, %v3963_v51 }
  0xae   :  { %4224 = vmatmul.mubr.msk.bf16.gmra.mrb[4].mxu1 %vm98_vm1, %v4757_v52  ;;  %4368 = vmatmul.mubr.msk.bf16.gmra.mrb[4].mxu0 %vm98_vm1, %v4758_v53 }
  0xaf   :  { %4227 = vmatprep.mubr.msk.bf16.mxu1 %vm98_vm1, %v4759_v54  ;;  %4371 = vmatprep.mubr.msk.bf16.mxu0 %vm98_vm1, %v4760_v55 }
  0xb6   :  { %4228 = vmatmul.mubr.msk.bf16.gmra.mrb[8].mxu1 %vm98_vm1, %v4761_v56  ;;  %4372 = vmatmul.mubr.msk.bf16.gmra.mrb[8].mxu0 %vm98_vm1, %v4762_v57 }
  0xb7   :  { %4231 = vmatprep.mubr.msk.bf16.mxu1 %vm98_vm1, %v4763_v58  ;;  %4375 = vmatprep.mubr.msk.bf16.mxu0 %vm98_vm1, %v4764_v59 }
  0xbe   :  { %4232 = vmatmul.mubr.msk.bf16.gmra.mrb[12].mxu1 %vm98_vm1, %v4765_v60  ;;  %4376 = vmatmul.mubr.msk.bf16.gmra.mrb[12].mxu0 %vm98_vm1, %v4766_v61 }
  0xbf   :  { %4237 = vmatprep.mubr.msk.bf16.mxu1 %vm98_vm1, %v4767_v62  ;;  %4381 = vmatprep.mubr.msk.bf16.mxu0 %vm98_vm1, %v4768_v63 }
  0xc6   :  { %4238 = vmatmul.mubr.msk.bf16.vlgmr.msra.gmra.mrb[0].mxu1 %vm98_vm1, %v4769_v0  ;;  %4382 = vmatmul.mubr.msk.bf16.vlgmr.msra.gmra.mrb[0].mxu0 %vm98_vm1, %v4770_v1 }
  0xc7   :  { %4254 = vmatpush3.bf16.msra.mxu1 %v1467_v2  ;;  %4398 = vmatpush3.bf16.msra.mxu0 %v3059_v4 }
  0xc8   :  { %4241 = vmatprep.mubr.msk.bf16.mxu1 %vm98_vm1, %v4771_v3  ;;  %4385 = vmatprep.mubr.msk.bf16.mxu0 %vm98_vm1, %v4772_v5 }
  0xce   :  { %4242 = vmatmul.mubr.msk.bf16.gmra.mrb[4].mxu1 %vm98_vm1, %v4773_v6  ;;  %4386 = vmatmul.mubr.msk.bf16.gmra.mrb[4].mxu0 %vm98_vm1, %v4774_v7 }
  0xcf   :  { %4245 = vmatprep.mubr.msk.bf16.mxu1 %vm98_vm1, %v4775_v8  ;;  %4389 = vmatprep.mubr.msk.bf16.mxu0 %vm98_vm1, %v4776_v9 }
  0xd6   :  { %4246 = vmatmul.mubr.msk.bf16.gmra.mrb[8].mxu1 %vm98_vm1, %v4777_v10  ;;  %4390 = vmatmul.mubr.msk.bf16.gmra.mrb[8].mxu0 %vm98_vm1, %v4778_v11 }
  0xd7   :  { %4249 = vmatprep.mubr.msk.bf16.mxu1 %vm98_vm1, %v4779_v12  ;;  %4393 = vmatprep.mubr.msk.bf16.mxu0 %vm98_vm1, %v4780_v13 }
  0xde   :  { %4250 = vmatmul.mubr.msk.bf16.gmra.mrb[12].mxu1 %vm98_vm1, %v4781_v14  ;;  %4394 = vmatmul.mubr.msk.bf16.gmra.mrb[12].mxu0 %vm98_vm1, %v4782_v15 }
  0xdf   :  { %4255 = vmatprep.mubr.msk.bf16.mxu1 %vm98_vm1, %v4783_v16  ;;  %4399 = vmatprep.mubr.msk.bf16.mxu0 %vm98_vm1, %v4784_v17 }
  0xe6   :  { %4256 = vmatmul.mubr.msk.bf16.vlgmr.msra.gmra.mrb[0].mxu1 %vm98_vm1, %v4785_v18  ;;  %4400 = vmatmul.mubr.msk.bf16.vlgmr.msra.gmra.mrb[0].mxu0 %vm98_vm1, %v4786_v19 }
  0xe7   :  { %4259 = vmatprep.mubr.msk.bf16.mxu1 %vm98_vm1, %v4787_v20  ;;  %4403 = vmatprep.mubr.msk.bf16.mxu0 %vm98_vm1, %v4788_v21 }
  0xee   :  { %4260 = vmatmul.mubr.msk.bf16.gmra.mrb[4].mxu1 %vm98_vm1, %v4789_v22  ;;  %4404 = vmatmul.mubr.msk.bf16.gmra.mrb[4].mxu0 %vm98_vm1, %v4790_v23 }
  0xef   :  { %4263 = vmatprep.mubr.msk.bf16.mxu1 %vm98_vm1, %v4791_v24  ;;  %4407 = vmatprep.mubr.msk.bf16.mxu0 %vm98_vm1, %v4792_v25 }
  0xf6   :  { %4264 = vmatmul.mubr.msk.bf16.gmra.mrb[8].mxu1 %vm98_vm1, %v4793_v26  ;;  %4408 = vmatmul.mubr.msk.bf16.gmra.mrb[8].mxu0 %vm98_vm1, %v4794_v27 }
  0xf7   :  { %4267 = vmatprep.mubr.msk.bf16.mxu1 %vm98_vm1, %v4795_v28  ;;  %4411 = vmatprep.mubr.msk.bf16.mxu0 %vm98_vm1, %v4796_v29 }
  0xfe   :  { %4268 = vmatmul.mubr.msk.bf16.gmra.mrb[12].mxu1 %vm98_vm1, %v4797_v30  ;;  %4412 = vmatmul.mubr.msk.bf16.gmra.mrb[12].mxu0 %vm98_vm1, %v4798_v31 }
 0x1b9   :  { %v4257_v32 = vpop.f32.mrb[0].mxu1  ;;  %v4401_v34 = vpop.f32.mrb[0].mxu0 }
 0x1ba   :  { %v1503_v35 = vpop.f32.mrb[1].mxu1  ;;  %v4415_v36 = vadd.f32 %v4401_v34, %v4257_v32  ;;  %v3095_v37 = vpop.f32.mrb[1].mxu0 }
 0x1bb   :  { %v4258_v38 = vpop.f32.mrb[2].mxu1  ;;  %v4416_v39 = vadd.f32 %v3095_v37, %v1503_v35  ;;  %v4402_v40 = vpop.f32.mrb[2].mxu0 }
 0x1bc   :  { %v1506_v41 = vpop.f32.mrb[3].mxu1  ;;  %v3182_v42 = vadd.f32 %v4415_v36, %v5426_v33  ;;  %v4417_v43 = vadd.f32 %v4402_v40, %v4258_v38  ;;  %v3098_v44 = vpop.f32.mrb[3].mxu0 }
 0x1bd   :  { %v3180_v45 = vadd.f32 %v4416_v39, %v5426_v33  ;;  %v4418_v46 = vadd.f32 %v3098_v44, %v1506_v41 }
 0x1be   :  { %3199 = vst.msk [vmem:[%s5738_s5 + $0x10] sm:$0xff] %vm3196_vm2, %v3182_v42  ;;  %v3183_v47 = vadd.f32 %v4417_v43, %v5426_v33 }
 0x1bf   :  { %3197 = vst.msk [vmem:[%s5738_s5] sm:$0xff] %vm3196_vm2, %v3180_v45  ;;  %v3181_v48 = vadd.f32 %v4418_v46, %v5426_v33 }
 0x1c0   :  { %3200 = vst.msk [vmem:[%s5738_s5 + $0x18] sm:$0xff] %vm3196_vm2, %v3183_v47 }
 0x1c1   :  { %v4261_v49 = vpop.f32.mrb[4].mxu1  ;;  %3198 = vst.msk [vmem:[%s5738_s5 + $0x8] sm:$0xff] %vm3196_vm2, %v3181_v48  ;;  %v4405_v50 = vpop.f32.mrb[4].mxu0 }
 0x1c2   :  { %v1519_v51 = vpop.f32.mrb[5].mxu1  ;;  %v4419_v52 = vadd.f32 %v4405_v50, %v4261_v49  ;;  %v3111_v53 = vpop.f32.mrb[5].mxu0 }
 0x1c3   :  { %v4262_v54 = vpop.f32.mrb[6].mxu1  ;;  %v4420_v55 = vadd.f32 %v3111_v53, %v1519_v51  ;;  %v4406_v56 = vpop.f32.mrb[6].mxu0 }
 0x1c4   :  { %v1522_v57 = vpop.f32.mrb[7].mxu1  ;;  %v3186_v58 = vadd.f32 %v4419_v52, %v5426_v33  ;;  %v4421_v59 = vadd.f32 %v4406_v56, %v4262_v54  ;;  %v3114_v60 = vpop.f32.mrb[7].mxu0 }
 0x1c5   :  { %v3184_v61 = vadd.f32 %v4420_v55, %v5426_v33  ;;  %v4422_v62 = vadd.f32 %v3114_v60, %v1522_v57  ;;  %v5468_v2 = vld [vmem:[%s5738_s5 + $0x10] sm:$0xff] }
 0x1c6   :  { %v5453_v63 = vld [vmem:[%s5738_s5] sm:$0xff]  ;;  %3203 = vst.msk [vmem:[%s5738_s5 + $0x30] sm:$0xff] %vm3196_vm2, %v3186_v58  ;;  %v3187_v0 = vadd.f32 %v4421_v59, %v5426_v33  ;;  %v3248_v14 = vsel %vm3196_vm2, %v5468_v2, 0.0 }
 0x1c7   :  { %3201 = vst.msk [vmem:[%s5738_s5 + $0x20] sm:$0xff] %vm3196_vm2, %v3184_v61  ;;  %v3185_v1 = vadd.f32 %v4422_v62, %v5426_v33  ;;  %v3245_v5 = vsel %vm3196_vm2, %v5453_v63, 0.0  ;;  %v5490_v9 = vld [vmem:[%s5738_s5 + $0x18] sm:$0xff] }
 0x1c8   :  { %v5473_v3 = vld [vmem:[%s5738_s5 + $0x8] sm:$0xff]  ;;  %3204 = vst.msk [vmem:[%s5738_s5 + $0x38] sm:$0xff] %vm3196_vm2, %v3187_v0  ;;  %v3250_v22 = vsel %vm3196_vm2, %v5490_v9, 0.0 }
 0x1c9   :  { %v4265_v4 = vpop.f32.mrb[8].mxu1  ;;  %v3246_v6 = vsel %vm3196_vm2, %v5473_v3, 0.0  ;;  %3202 = vst.msk [vmem:[%s5738_s5 + $0x28] sm:$0xff] %vm3196_vm2, %v3185_v1  ;;  %v4409_v7 = vpop.f32.mrb[8].mxu0 }
 0x1ca   :  { %v1535_v8 = vpop.f32.mrb[9].mxu1  ;;  %v3247_v10 = vadd.f32 %v3246_v6, %v3245_v5  ;;  %v4423_v11 = vadd.f32 %v4409_v7, %v4265_v4  ;;  %v3127_v12 = vpop.f32.mrb[9].mxu0 }
 0x1cb   :  { %v4266_v13 = vpop.f32.mrb[10].mxu1  ;;  %v4424_v15 = vadd.f32 %v3127_v12, %v1535_v8  ;;  %v4410_v16 = vpop.f32.mrb[10].mxu0 }
 0x1cc   :  { %v1538_v17 = vpop.f32.mrb[11].mxu1  ;;  %v3249_v18 = vadd.f32 %v3248_v14, %v3247_v10  ;;  %v3190_v19 = vadd.f32 %v4423_v11, %v5426_v33  ;;  %v4425_v20 = vadd.f32 %v4410_v16, %v4266_v13  ;;  %v3130_v21 = vpop.f32.mrb[11].mxu0 }
 0x1cd   :  { %v3188_v23 = vadd.f32 %v4424_v15, %v5426_v33  ;;  %v4426_v24 = vadd.f32 %v3130_v21, %v1538_v17  ;;  %v5518_v30 = vld [vmem:[%s5738_s5 + $0x30] sm:$0xff] }
 0x1ce   :  { %v5501_v25 = vld [vmem:[%s5738_s5 + $0x20] sm:$0xff]  ;;  %3207 = vst.msk [vmem:[%s5738_s5 + $0x50] sm:$0xff] %vm3196_vm2, %v3190_v19  ;;  %v3191_v26 = vadd.f32 %v4425_v20, %v5426_v33  ;;  %v3251_v27 = vadd.f32 %v3250_v22, %v3249_v18  ;;  %v3256_v46 = vsel %vm3196_vm2, %v5518_v30, 0.0 }
 0x1cf   :  { %v3252_v28 = vsel %vm3196_vm2, %v5501_v25, 0.0  ;;  %3205 = vst.msk [vmem:[%s5738_s5 + $0x40] sm:$0xff] %vm3196_vm2, %v3188_v23  ;;  %v3189_v29 = vadd.f32 %v4426_v24, %v5426_v33  ;;  %v5538_v41 = vld [vmem:[%s5738_s5 + $0x38] sm:$0xff] }
 0x1d0   :  { %v5523_v31 = vld [vmem:[%s5738_s5 + $0x28] sm:$0xff]  ;;  %3208 = vst.msk [vmem:[%s5738_s5 + $0x58] sm:$0xff] %vm3196_vm2, %v3191_v26  ;;  %v3253_v34 = vadd.f32 %v3252_v28, %v3251_v27  ;;  %v3258_v53 = vsel %vm3196_vm2, %v5538_v41, 0.0 }
 0x1d1   :  { %v4269_v32 = vpop.f32.mrb[12].mxu1  ;;  %3206 = vst.msk [vmem:[%s5738_s5 + $0x48] sm:$0xff] %vm3196_vm2, %v3189_v29  ;;  %v4413_v35 = vpop.f32.mrb[12].mxu0  ;;  %v3254_v37 = vsel %vm3196_vm2, %v5523_v31, 0.0 }
 0x1d2   :  { %v1551_v36 = vpop.f32.mrb[13].mxu1  ;;  %v4427_v38 = vadd.f32 %v4413_v35, %v4269_v32  ;;  %v3143_v39 = vpop.f32.mrb[13].mxu0  ;;  %v3255_v42 = vadd.f32 %v3254_v37, %v3253_v34 }
 0x1d3   :  { %v4270_v40 = vpop.f32.mrb[14].mxu1  ;;  %v4428_v43 = vadd.f32 %v3143_v39, %v1551_v36  ;;  %v4414_v44 = vpop.f32.mrb[14].mxu0 }
 0x1d4   :  { %v1554_v45 = vpop.f32.mrb[15].mxu1  ;;  %v3194_v47 = vadd.f32 %v4427_v38, %v5426_v33  ;;  %v4429_v48 = vadd.f32 %v4414_v44, %v4270_v40  ;;  %v3146_v49 = vpop.f32.mrb[15].mxu0  ;;  %v3257_v50 = vadd.f32 %v3256_v46, %v3255_v42 }
 0x1d5   :  { %v3192_v51 = vadd.f32 %v4428_v43, %v5426_v33  ;;  %v4430_v52 = vadd.f32 %v3146_v49, %v1554_v45  ;;  %v3223_v60 = vld [vmem:[%s5738_s5 + $0x50] sm:$0xff] }
 0x1d6   :  { %3211 = vst.msk [vmem:[%s5738_s5 + $0x70] sm:$0xff] %vm3196_vm2, %v3194_v47  ;;  %v3195_v54 = vadd.f32 %v4429_v48, %v5426_v33  ;;  %v3221_v55 = vld [vmem:[%s5738_s5 + $0x40] sm:$0xff]  ;;  %v3259_v56 = vadd.f32 %v3258_v53, %v3257_v50  ;;  %v3264_v1 = vsel %vm3196_vm2, %v3223_v60, 0.0 }
 0x1d7   :  { %3209 = vst.msk [vmem:[%s5738_s5 + $0x60] sm:$0xff] %vm3196_vm2, %v3192_v51  ;;  %v3193_v57 = vadd.f32 %v4430_v52, %v5426_v33  ;;  %v3260_v58 = vsel %vm3196_vm2, %v3221_v55, 0.0  ;;  %v3224_v62 = vld [vmem:[%s5738_s5 + $0x58] sm:$0xff] }
 0x1d8   :  { %3212 = vst.msk [vmem:[%s5738_s5 + $0x78] sm:$0xff] %vm3196_vm2, %v3195_v54  ;;  %v3222_v59 = vld [vmem:[%s5738_s5 + $0x48] sm:$0xff]  ;;  %v3261_v61 = vadd.f32 %v3260_v58, %v3259_v56  ;;  %v3266_v5 = vsel %vm3196_vm2, %v3224_v62, 0.0 }
 0x1d9   :  { %3210 = vst.msk [vmem:[%s5738_s5 + $0x68] sm:$0xff] %vm3196_vm2, %v3193_v57  ;;  %v3262_v33 = vsel %vm3196_vm2, %v3222_v59, 0.0 }
 0x1da   :  { %v3263_v0 = vadd.f32 %v3262_v33, %v3261_v61 }
 0x1dc   :  { %v3265_v4 = vadd.f32 %v3264_v1, %v3263_v0 }
 0x1dd   :  { %v3227_v11 = vld [vmem:[%s5738_s5 + $0x70] sm:$0xff] }
 0x1de   :  { %v3225_v6 = vld [vmem:[%s5738_s5 + $0x60] sm:$0xff]  ;;  %v3267_v7 = vadd.f32 %v3266_v5, %v3265_v4  ;;  %v3272_v16 = vsel %vm3196_vm2, %v3227_v11, 0.0 }
 0x1df   :  { %v3268_v8 = vsel %vm3196_vm2, %v3225_v6, 0.0  ;;  %v3228_v14 = vld [vmem:[%s5738_s5 + $0x78] sm:$0xff] }
 0x1e0   :  { %v3226_v10 = vld [vmem:[%s5738_s5 + $0x68] sm:$0xff]  ;;  %v3269_v12 = vadd.f32 %v3268_v8, %v3267_v7  ;;  %v3274_v18 = vsel %vm3196_vm2, %v3228_v14, 0.0 }
 0x1e1   :  { %v3270_v13 = vsel %vm3196_vm2, %v3226_v10, 0.0 }
 0x1e2   :  { %v3271_v15 = vadd.f32 %v3270_v13, %v3269_v12 }
 0x1e4   :  { %v3273_v17 = vadd.f32 %v3272_v16, %v3271_v15 }
 0x1e6   :  { %v3275_v19 = vadd.f32 %v3274_v18, %v3273_v17 }
 0x1e8   :  { %v3276_v20 = vrot.slane %v3275_v19, 4 }
 0x1ea   :  { %v3277_v21 = vadd.f32 %v3276_v20, %v3275_v19 }
 0x1ec   :  { %v3278_v22 = vrot.slane %v3277_v21, 2 }
 0x1ee   :  { %v3279_v23 = vadd.f32 %v3278_v22, %v3277_v21 }
 0x1f0   :  { %v3280_v24 = vrot.slane %v3279_v23, 1 }
 0x1f2   :  { %v3281_v26 = vadd.f32 %v3280_v24, %v3279_v23 }
 0x1f4   :  { %v3282_v27 = vmul.f32 0.0078125, %v3281_v26 }
 0x1f6   :  { %v5597_v28 = vsub.f32 %v5453_v63, %v3282_v27  ;;  %v5600_v29 = vsub.f32 %v5473_v3, %v3282_v27  ;;  %v5603_v32 = vsub.f32 %v5468_v2, %v3282_v27  ;;  %v5606_v34 = vsub.f32 %v5490_v9, %v3282_v27 }
 0x1f7   :  { %v5613_v37 = vsub.f32 %v5501_v25, %v3282_v27  ;;  %v5618_v3 = vsub.f32 %v5523_v31, %v3282_v27  ;;  %v5625_v40 = vsub.f32 %v5518_v30, %v3282_v27  ;;  %v5631_v31 = vsub.f32 %v5538_v41, %v3282_v27 }
 0x1f8   :  { %v3299_v35 = vmul.f32 %v5597_v28, %v5597_v28  ;;  %v3300_v36 = vmul.f32 %v5600_v29, %v5600_v29  ;;  %v3301_v63 = vmul.f32 %v5603_v32, %v5603_v32  ;;  %v3302_v2 = vmul.f32 %v5606_v34, %v5606_v34 }
 0x1f9   :  { %v3303_v25 = vmul.f32 %v5613_v37, %v5613_v37  ;;  %v3304_v44 = vmul.f32 %v5618_v3, %v5618_v3  ;;  %v5636_v47 = vsub.f32 %v3221_v55, %v3282_v27  ;;  %v3305_v30 = vmul.f32 %v5625_v40, %v5625_v40 }
 0x1fa   :  { %v3331_v9 = vsel %vm3196_vm2, %v3299_v35, 0.0  ;;  %v3332_v38 = vsel %vm3196_vm2, %v3300_v36, 0.0  ;;  %v3334_v42 = vsel %vm3196_vm2, %v3301_v63, 0.0  ;;  %v3336_v45 = vsel %vm3196_vm2, %v3302_v2, 0.0 }
 0x1fb   :  { %v3333_v39 = vadd.f32 %v3332_v38, %v3331_v9  ;;  %v3338_v48 = vsel %vm3196_vm2, %v3303_v25, 0.0  ;;  %v3292_v50 = vsub.f32 %v3222_v59, %v3282_v27  ;;  %v3306_v51 = vmul.f32 %v5631_v31, %v5631_v31 }
 0x1fc   :  { %v3340_v41 = vsel %vm3196_vm2, %v3304_v44, 0.0  ;;  %v3293_v53 = vsub.f32 %v3223_v60, %v3282_v27  ;;  %v3307_v54 = vmul.f32 %v5636_v47, %v5636_v47  ;;  %v3342_v55 = vsel %vm3196_vm2, %v3305_v30, 0.0 }
 0x1fd   :  { %v3335_v43 = vadd.f32 %v3334_v42, %v3333_v39  ;;  %v3294_v57 = vsub.f32 %v3224_v62, %v3282_v27  ;;  %v3308_v58 = vmul.f32 %v3292_v50, %v3292_v50  ;;  %v3344_v61 = vsel %vm3196_vm2, %v3306_v51, 0.0  ;;  %v3981_v51 = vld [vmem:[%s5739_s3] ss:$0 sm:$0xff] }
 0x1fe   :  { %v3295_v0 = vsub.f32 %v3225_v6, %v3282_v27  ;;  %v3309_v59 = vmul.f32 %v3293_v53, %v3293_v53  ;;  %v3346_v1 = vsel %vm3196_vm2, %v3307_v54, 0.0  ;;  %v3296_v5 = vsub.f32 %v3226_v10, %v3282_v27 }
 0x1ff   :  { %v3337_v46 = vadd.f32 %v3336_v45, %v3335_v43  ;;  %v3310_v7 = vmul.f32 %v3294_v57, %v3294_v57  ;;  %v3348_v60 = vsel %vm3196_vm2, %v3308_v58, 0.0  ;;  %v3297_v12 = vsub.f32 %v3227_v11, %v3282_v27 }
 0x200   :  { %v3311_v13 = vmul.f32 %v3295_v0, %v3295_v0  ;;  %v3350_v15 = vsel %vm3196_vm2, %v3309_v59, 0.0  ;;  %v3298_v62 = vsub.f32 %v3228_v14, %v3282_v27  ;;  %v3312_v17 = vmul.f32 %v3296_v5, %v3296_v5  ;;  %v3982_v59 = vld [vmem:[%s5740_s4] ss:$0 sm:$0xff] }
 0x201   :  { %v3339_v49 = vadd.f32 %v3338_v48, %v3337_v46  ;;  %v3352_v18 = vsel %vm3196_vm2, %v3310_v7, 0.0  ;;  %v3313_v6 = vmul.f32 %v3297_v12, %v3297_v12 }
 0x202   :  { %v3354_v20 = vsel %vm3196_vm2, %v3311_v13, 0.0  ;;  %v3314_v22 = vmul.f32 %v3298_v62, %v3298_v62  ;;  %v3356_v10 = vsel %vm3196_vm2, %v3312_v17, 0.0 }
 0x203   :  { %v3341_v52 = vadd.f32 %v3340_v41, %v3339_v49  ;;  %v3358_v24 = vsel %vm3196_vm2, %v3313_v6, 0.0 }
 0x204   :  { %v3360_v26 = vsel %vm3196_vm2, %v3314_v22, 0.0 }
 0x205   :  { %v3343_v56 = vadd.f32 %v3342_v55, %v3341_v52 }
 0x207   :  { %v3345_v33 = vadd.f32 %v3344_v61, %v3343_v56 }
 0x209   :  { %v3347_v4 = vadd.f32 %v3346_v1, %v3345_v33 }
 0x20b   :  { %v3349_v8 = vadd.f32 %v3348_v60, %v3347_v4 }
 0x20d   :  { %v3351_v16 = vadd.f32 %v3350_v15, %v3349_v8 }
 0x20f   :  { %v3353_v19 = vadd.f32 %v3352_v18, %v3351_v16 }
 0x211   :  { %v3355_v21 = vadd.f32 %v3354_v20, %v3353_v19 }
 0x213   :  { %v3357_v23 = vadd.f32 %v3356_v10, %v3355_v21 }
 0x215   :  { %v3359_v11 = vadd.f32 %v3358_v24, %v3357_v23 }
 0x217   :  { %v3361_v35 = vadd.f32 %v3360_v26, %v3359_v11 }
 0x219   :  { %v3362_v36 = vrot.slane %v3361_v35, 4 }
 0x21b   :  { %v3363_v14 = vadd.f32 %v3362_v36, %v3361_v35 }
 0x21d   :  { %v3364_v27 = vrot.slane %v3363_v14, 2 }
 0x21f   :  { %v3365_v63 = vadd.f32 %v3364_v27, %v3363_v14 }
 0x221   :  { %v3366_v2 = vrot.slane %v3365_v63, 1 }
 0x223   :  { %v3367_v9 = vadd.f32 %v3366_v2, %v3365_v63 }
 0x225   :  { %v3368_v38 = vmul.f32 0.0078125, %v3367_v9 }
 0x227   :  { %v3369_v39 = vadd.f32 1e-05, %v3368_v38 }
 0x229   :  { %4799 = vrsqrt.f32 %v3369_v39 }
 0x233   :  { %v4800_v25 = vpop.eup %4799 }
 0x234   :  { %v3371_v42 = vmul.f32 %v4800_v25, %v5597_v28  ;;  %v3372_v43 = vmul.f32 %v4800_v25, %v5600_v29  ;;  %v3373_v44 = vmul.f32 %v4800_v25, %v5603_v32  ;;  %v3374_v45 = vmul.f32 %v4800_v25, %v5606_v34 }
 0x235   :  { %v3375_v46 = vmul.f32 %v4800_v25, %v5613_v37  ;;  %v3376_v30 = vmul.f32 %v4800_v25, %v5618_v3  ;;  %v3377_v48 = vmul.f32 %v4800_v25, %v5625_v40  ;;  %v3378_v49 = vmul.f32 %v4800_v25, %v5631_v31 }
 0x236   :  { %v3379_v28 = vmul.f32 %v4800_v25, %v5636_v47  ;;  %v3380_v41 = vmul.f32 %v4800_v25, %v3292_v50  ;;  %v3381_v29 = vmul.f32 %v4800_v25, %v3293_v53  ;;  %v3382_v52 = vmul.f32 %v4800_v25, %v3294_v57 }
 0x237   :  { %v3383_v32 = vmul.f32 %v4800_v25, %v3295_v0  ;;  %v3384_v54 = vmul.f32 %v4800_v25, %v3296_v5  ;;  %v3385_v34 = vmul.f32 %v4800_v25, %v3297_v12  ;;  %v3386_v55 = vmul.f32 %v4800_v25, %v3298_v62 }
 0x238   :  { %v3394_v37 = vmul.f32 %v3981_v51, %v3371_v42  ;;  %v3395_v56 = vmul.f32 %v3981_v51, %v3372_v43  ;;  %v3396_v3 = vmul.f32 %v3981_v51, %v3373_v44  ;;  %v3397_v58 = vmul.f32 %v3981_v51, %v3374_v45 }
 0x239   :  { %v3398_v40 = vmul.f32 %v3981_v51, %v3375_v46  ;;  %v3399_v61 = vmul.f32 %v3981_v51, %v3376_v30  ;;  %v3400_v31 = vmul.f32 %v3981_v51, %v3377_v48  ;;  %v3401_v33 = vmul.f32 %v3981_v51, %v3378_v49 }
 0x23a   :  { %v3402_v47 = vmul.f32 %v3981_v51, %v3379_v28  ;;  %v3403_v50 = vmul.f32 %v3981_v51, %v3380_v41  ;;  %v3404_v53 = vmul.f32 %v3981_v51, %v3381_v29  ;;  %v3405_v57 = vmul.f32 %v3981_v51, %v3382_v52 }
 0x23b   :  { %v3406_v0 = vmul.f32 %v3981_v51, %v3383_v32  ;;  %v3407_v1 = vmul.f32 %v3981_v51, %v3384_v54  ;;  %v3408_v4 = vmul.f32 %v3981_v51, %v3385_v34  ;;  %v3409_v5 = vmul.f32 %v3981_v51, %v3386_v55 }
 0x23c   :  { %v3417_v7 = vadd.f32 %v3982_v59, %v3394_v37  ;;  %v3418_v60 = vadd.f32 %v3982_v59, %v3395_v56  ;;  %v3419_v8 = vadd.f32 %v3982_v59, %v3396_v3  ;;  %v3420_v12 = vadd.f32 %v3982_v59, %v3397_v58 }
 0x23d   :  { %v3421_v13 = vadd.f32 %v3982_v59, %v3398_v40  ;;  %v3422_v15 = vadd.f32 %v3982_v59, %v3399_v61  ;;  %v3423_v16 = vadd.f32 %v3982_v59, %v3400_v31  ;;  %v3424_v62 = vadd.f32 %v3982_v59, %v3401_v33 }
 0x23e   :  { %v3425_v17 = vadd.f32 %v3982_v59, %v3402_v47  ;;  %v3426_v18 = vadd.f32 %v3982_v59, %v3403_v50  ;;  %v3427_v19 = vadd.f32 %v3982_v59, %v3404_v53  ;;  %v3428_v6 = vadd.f32 %v3982_v59, %v3405_v57 }
 0x23f   :  { %v3429_v20 = vadd.f32 %v3982_v59, %v3406_v0  ;;  %v3430_v21 = vadd.f32 %v3982_v59, %v3407_v1  ;;  %v3431_v22 = vadd.f32 %v3982_v59, %v3408_v4  ;;  %v3432_v10 = vadd.f32 %v3982_v59, %v3409_v5 }
 0x240   :  { %v3433_v23 = vmax.f32 %v3417_v7, 0.0  ;;  %v3434_v24 = vmax.f32 %v3418_v60, 0.0  ;;  %v3435_v11 = vmax.f32 %v3419_v8, 0.0  ;;  %v3436_v26 = vmax.f32 %v3420_v12, 0.0 }
 0x241   :  { %v3437_v35 = vmax.f32 %v3421_v13, 0.0  ;;  %v3438_v36 = vmax.f32 %v3422_v15, 0.0  ;;  %v3439_v14 = vmax.f32 %v3423_v16, 0.0  ;;  %v3440_v27 = vmax.f32 %v3424_v62, 0.0 }
 0x242   :  { %v3441_v63 = vmax.f32 %v3425_v17, 0.0  ;;  %v3442_v2 = vmax.f32 %v3426_v18, 0.0  ;;  %v3443_v9 = vmax.f32 %v3427_v19, 0.0  ;;  %v3444_v38 = vmax.f32 %v3428_v6, 0.0  ;;  %3449 = vst.msk [vmem:[%s5738_s5] sm:$0xff] %vm3196_vm2, %v3433_v23  ;;  %3450 = vst.msk [vmem:[%s5738_s5 + $0x8] sm:$0xff] %vm3196_vm2, %v3434_v24 }
 0x243   :  { %3451 = vst.msk [vmem:[%s5738_s5 + $0x10] sm:$0xff] %vm3196_vm2, %v3435_v11  ;;  %3452 = vst.msk [vmem:[%s5738_s5 + $0x18] sm:$0xff] %vm3196_vm2, %v3436_v26  ;;  %v3445_v39 = vmax.f32 %v3429_v20, 0.0  ;;  %v3446_v25 = vmax.f32 %v3430_v21, 0.0  ;;  %v3447_v42 = vmax.f32 %v3431_v22, 0.0  ;;  %v3448_v43 = vmax.f32 %v3432_v10, 0.0 }
 0x244   :  { %3453 = vst.msk [vmem:[%s5738_s5 + $0x20] sm:$0xff] %vm3196_vm2, %v3437_v35  ;;  %3454 = vst.msk [vmem:[%s5738_s5 + $0x28] sm:$0xff] %vm3196_vm2, %v3438_v36 }
 0x245   :  { %3455 = vst.msk [vmem:[%s5738_s5 + $0x30] sm:$0xff] %vm3196_vm2, %v3439_v14  ;;  %3456 = vst.msk [vmem:[%s5738_s5 + $0x38] sm:$0xff] %vm3196_vm2, %v3440_v27 }
 0x246   :  { %3457 = vst.msk [vmem:[%s5738_s5 + $0x40] sm:$0xff] %vm3196_vm2, %v3441_v63  ;;  %3458 = vst.msk [vmem:[%s5738_s5 + $0x48] sm:$0xff] %vm3196_vm2, %v3442_v2 }
 0x247   :  { %3459 = vst.msk [vmem:[%s5738_s5 + $0x50] sm:$0xff] %vm3196_vm2, %v3443_v9  ;;  %3460 = vst.msk [vmem:[%s5738_s5 + $0x58] sm:$0xff] %vm3196_vm2, %v3444_v38 }
 0x248   :  { %3461 = vst.msk [vmem:[%s5738_s5 + $0x60] sm:$0xff] %vm3196_vm2, %v3445_v39  ;;  %3462 = vst.msk [vmem:[%s5738_s5 + $0x68] sm:$0xff] %vm3196_vm2, %v3446_v25 }
 0x249   :  { %3463 = vst.msk [vmem:[%s5738_s5 + $0x70] sm:$0xff] %vm3196_vm2, %v3447_v42  ;;  %3464 = vst.msk [vmem:[%s5738_s5 + $0x78] sm:$0xff] %vm3196_vm2, %v3448_v43 }

// kernel: vae_forward.10
= control target key start
LH: loop header
LB: loop body
LE: loop exit
PB: predicated region body
PF: predicated region fallthrough
CT: control target
= control target key end

     0   :  { %14 = vsyncpa [#allocation3], 0  ;;  %v359_v1 = vmov 0.0   ;;  %vm360_vm0 = vmmov 0   ;;  %s477_s0 = inlined_call_operand.vmem [shape: bf16[2,128], index: 0, kind: input, shape index: {}]   ;;  %s478_s1 = inlined_call_operand.vmem [shape: bf16[128,16], index: 1, kind: input, shape index: {}]   ;;  %s479_s2 = inlined_call_operand.vmem [shape: f32[1,16], index: 2, kind: input, shape index: {}]   ;;  %s480_s3 = inlined_call_operand.vmem [shape: bf16[8,128], index: 3, kind: input, shape index: {}]   ;;  %s481_s4 = inlined_call_operand.vmem [shape: f32[1,128], index: 4, kind: input, shape index: {}]   ;;  %s482_s5 = inlined_call_operand.vmem [shape: f32[2,8], index: 5, kind: input, shape index: {}]   ;;  %s483_s6 = inlined_call_operand.hbm [shape: f32[2,8], index: 6, kind: output, shape index: {0}]   ;;  %s484_s7 = inlined_call_operand.hbm [shape: f32[2,8], index: 7, kind: output, shape index: {1}]   ;;  %s485_s8 = inlined_call_operand.vmem [shape: f32[2,128], index: 8, kind: output, shape index: {2}]  }
   0x1   :  { %v301_v0 = vld [vmem:[%s478_s1] sm:$0xff]   ;;  %270 = vmatprep.subr.bf16.mxu0 %v359_v1  ;;  %290 = vmatprep.subr.bf16.mxu1 %v359_v1  ;;  %v302_v2 = vld [vmem:[%s478_s1 + $0x8] sm:$0xff]   ;;  %v303_v3 = vld [vmem:[%s478_s1 + $0x10] sm:$0xff]  }
   0x2   :  { %271 = vmatpush3.bf16.msra.mxu0 %v301_v0  ;;  %286 = vmatprep.mubr.msk.bf16.mxu0 %vm360_vm0, %v359_v1 }
   0x3   :  { %272 = vmatprep.subr.bf16.mxu0 %v359_v1  ;;  %292 = vmatprep.mubr.msk.bf16.mxu1 %vm360_vm0, %v359_v1 }
   0x6   :  { %273 = vmatpush3.bf16.msra.mxu0 %v302_v2 }
   0x7   :  { %274 = vmatprep.subr.bf16.mxu0 %v359_v1 }
   0x8   :  { %15 = vsyncpa [#allocation5], 0  ;;  %v304_v4 = vld [vmem:[%s478_s1 + $0x18] sm:$0xff]   ;;  %v305_v5 = vld [vmem:[%s478_s1 + $0x20] sm:$0xff]   ;;  %vm208_vm1 = vcmask 58368   ;;  %vm164_vm2 = vcmask 1043456  }
   0x9   :  { %v306_v6 = vld [vmem:[%s478_s1 + $0x28] sm:$0xff]   ;;  %v307_v7 = vld [vmem:[%s478_s1 + $0x30] sm:$0xff]   ;;  %v308_v8 = vld [vmem:[%s478_s1 + $0x38] sm:$0xff]   ;;  %vm160_vm3 = vcmask 64512   ;;  %s363_s28 = smov [#allocation4]  }
   0xa   :  { %275 = vmatpush3.bf16.msra.mxu0 %v303_v3  ;;  %v29_v9 = vld [vmem:[%s477_s0] sm:$0x1]  ;;  %s361_s0 = smov 120   ;;  %s232_s29 = sshll.u32 %s363_s28, 4  ;;  %s233_s29 = int_to_ptr.vmem [resolvable:$true] %s232_s29 }
   0xb   :  { %276 = vmatprep.subr.bf16.mxu0 %v359_v1  ;;  %v248_v10 = vld [vmem:[%s479_s2] ss:$0 sm:$0xff] }
   0xc   :  { %v152_v18 = vld [vmem:[%s480_s3] sm:$0xf]  ;;  %s362_s3 = smov [#allocation2]  }
   0xd   :  { %v166_v19 = vsel %vm164_vm2, %v152_v18, 0  ;;  %v141_v21 = vld [vmem:[%s482_s5] sm:$0x3]  ;;  %s222_s27 = sshll.u32 %s362_s3, 4  ;;  %s223_s27 = int_to_ptr.vmem [resolvable:$true] %s222_s27 }
   0xe   :  { %277 = vmatpush3.bf16.msra.mxu0 %v304_v4  ;;  %291 = vmatpush3.bf16.msra.mxu1 %v166_v19  ;;  %s311_s30 = scalar_lea.vmem %s223_s27, 32  ;;  %p316_p1 = scmp.lt.s32.totalorder %s223_s27, %s223_s27 }
   0xf   :  { %278 = vmatprep.subr.bf16.mxu0 %v359_v1  ;;  %p312_p0 = scmp.ne.s32.totalorder %s223_s27, %s311_s30  ;;  %p317_p2 = scmp.lt.s32.totalorder %s311_s30, %s311_s30 }
  0x11   :  { %p318_p3 = por %p317_p2, %p316_p1 }
  0x12   :  { %279 = vmatpush3.bf16.msra.mxu0 %v305_v5 }
  0x13   :  { %280 = vmatprep.subr.bf16.mxu0 %v359_v1  ;;  %p319_p4 = pnand %p318_p3, %p312_p0 }
  0x16   :  { %281 = vmatpush3.bf16.msra.mxu0 %v306_v6 }
  0x17   :  { %282 = vmatprep.subr.bf16.mxu0 %v359_v1 }
  0x1a   :  { %283 = vmatpush3.bf16.msra.mxu0 %v307_v7 }
  0x1b   :  { %284 = vmatprep.subr.bf16.mxu0 %v359_v1 }
  0x1e   :  { %285 = vmatpush3.bf16.msra.mxu0 %v308_v8 }
  0x21   :  { %287 = vmatmul.mubr.bf16.vlgmr.msra.gmra.mrb[0].mxu0 %v29_v9 }
  0xf4   :  { %v135_v11 = vpop.f32.mrb[0].mxu0 }
  0xf5   :  { %v136_v12 = vadd.f32 %v248_v10, %v135_v11  ;;  %v288_v13 = vpop.f32.mrb[1].mxu0 }
  0xf6   :  { %v138_v14 = vpop.f32.mrb[2].mxu0 }
  0xf7   :  { %v142_v15 = vmul.f32 0.5, %v136_v12  ;;  %v289_v16 = vpop.f32.mrb[3].mxu0  ;;  %209 = vst.msk [vmem:[#allocation2] sm:$0x3] %vm208_vm1, %v136_v12 }
  0xf9   :  { %v143_v17 = vmul.f32 1.442695, %v142_v15 }
  0xfb   :  { %309 = vpow2.f32 %v143_v17 }
 0x105   :  { %v310_v20 = vpop.eup %309 }
 0x106   :  { %146 = vrot.lane.b32.xlu0 %v310_v20, %s361_s0 }
 0x10a   :  { %211 = vrot.lane.b32.xlu0 %v136_v12, %s361_s0 }
 0x178   :  { %v147_v22 = vpop.permute.xlu0 %146 }
 0x179   :  { %v149_v23 = vmul.f32 %v147_v22, %v141_v21 }
 0x17b   :  { %v150_v24 = vadd.f32 %v149_v23, %v136_v12 }
 0x17c   :  { %v212_v25 = vpop.permute.xlu0 %211 }
 0x17d   :  { %v151_v26 = vpack.c.bf16 %v150_v24, %v150_v24  ;;  %214 = vst.msk [vmem:[#allocation4] sm:$0x3] %vm208_vm1, %v212_v25 }
 0x17f   :  { %293 = vmatmul.mubr.msk.bf16.vlgmr.msra.gmra.mrb[0].mxu1 %vm160_vm3, %v151_v26 }
 0x180   :  { %322 = shalt.err (!%p319_p4)
}
 0x181   :  { %s323_s10 = scalar_lea.hbm %s483_s6, 32 }
 0x182   :  { %p324_p5 = scmp.ne.s32.totalorder %s483_s6, %s323_s10  ;;  %p327_p6 = scmp.lt.u32.totalorder %s323_s10, %s483_s6 }
 0x184   :  { %p329_p7 = pnand %p327_p6, %p324_p5 }
 0x186   :  { %332 = shalt.err (!%p329_p7)
}
 0x187   :  { %225 = dma.vmem_to_hbm [thread:$0]  %s223_s27, 32, %s483_s6, [#allocation3]  }
 0x188   :  { %s333_s17 = scalar_lea.vmem %s233_s29, 32  ;;  %p338_p9 = scmp.lt.s32.totalorder %s233_s29, %s233_s29 }
 0x189   :  { %p334_p8 = scmp.ne.s32.totalorder %s233_s29, %s333_s17  ;;  %p339_p10 = scmp.lt.s32.totalorder %s333_s17, %s333_s17 }
 0x18b   :  { %p340_p11 = por %p339_p10, %p338_p9 }
 0x18d   :  { %p341_p12 = pnand %p340_p11, %p334_p8 }
 0x18f   :  { %344 = shalt.err (!%p341_p12)
}
 0x190   :  { %s345_s20 = scalar_lea.hbm %s484_s7, 32 }
 0x191   :  { %p346_p13 = scmp.ne.s32.totalorder %s484_s7, %s345_s20  ;;  %p349_p0 = scmp.lt.u32.totalorder %s345_s20, %s484_s7 }
 0x193   :  { %p351_p1 = pnand %p349_p0, %p346_p13 }
 0x195   :  { %354 = shalt.err (!%p351_p1)
}
 0x196   :  { %235 = dma.vmem_to_hbm [thread:$0]  %s233_s29, 32, %s484_s7, [#allocation5]   ;;  %v257_v27 = vld [vmem:[%s481_s4] ss:$0 sm:$0xff] }
 0x252   :  { %v202_v28 = vpop.f32.mrb[0].mxu1 }
 0x253   :  { %v203_v29 = vadd.f32 %v257_v27, %v202_v28  ;;  %v294_v30 = vpop.f32.mrb[1].mxu1 }
 0x254   :  { %v205_v31 = vpop.f32.mrb[2].mxu1 }
 0x255   :  { %215 = vst [vmem:[%s485_s8] sm:$0x3] %v203_v29  ;;  %v295_v32 = vpop.f32.mrb[3].mxu1 }
 0x256   :  { %355 = dma.done.wait [#allocation3], 32  }
 0x257   :  { %356 = vsyncadd [#allocation3], 4294967264 }
 0x258   :  { %357 = dma.done.wait [#allocation5], 32  }
 0x259   :  { %358 = vsyncadd [#allocation5], 4294967264 }
 0x25a   :  { %246 = vsyncpa [#allocation3], 1 }
 0x25b   :  { %247 = vsyncpa [#allocation5], 1 }

// kernel: vae_forward.11
= control target key start
LH: loop header
LB: loop body
LE: loop exit
PB: predicated region body
PF: predicated region fallthrough
CT: control target
= control target key end

     0   :  { %v1462_v0 = vmov 0.0   ;;  %vm1463_vm0 = vmmov 0   ;;  %vm46_vm1 = vcmask 261120   ;;  %vm278_vm2 = vcmask 130048   ;;  %s1787_s1 = inlined_call_operand.vmem [shape: bf16[16,32,16], index: 1, kind: input, shape index: {}]   ;;  %s1788_s0 = inlined_call_operand.vmem [shape: bf16[16,8,32], index: 0, kind: input, shape index: {}]   ;;  %s1789_s2 = inlined_call_operand.vmem [shape: f32[1,16], index: 2, kind: input, shape index: {}]   ;;  %s1790_s5 = inlined_call_operand.vmem [shape: f32[4,8,16], index: 5, kind: output, shape index: {}]   ;;  %s1791_s3 = inlined_call_operand.vmem [shape: f32[1,16], index: 3, kind: input, shape index: {}]   ;;  %s1792_s4 = inlined_call_operand.vmem [shape: f32[1,16], index: 4, kind: input, shape index: {}]  }
   0x1   :  { %1298 = vmatprep.subr.bf16.mxu0 %v1462_v0  ;;  %1306 = vmatprep.subr.bf16.mxu1 %v1462_v0  ;;  %v1428_v1 = vld [vmem:[%s1787_s1 + $0x10] sm:$0xff]   ;;  %v1429_v2 = vld [vmem:[%s1787_s1] sm:$0xff]   ;;  %v1430_v3 = vld [vmem:[%s1787_s1 + $0x18] sm:$0xff]  }
   0x2   :  { %1302 = vmatprep.mubr.msk.bf16.mxu0 %vm1463_vm0, %v1462_v0  ;;  %1310 = vmatprep.mubr.msk.bf16.mxu1 %vm1463_vm0, %v1462_v0  ;;  %v1431_v4 = vld [vmem:[%s1787_s1 + $0x8] sm:$0xff]   ;;  %v1121_v5 = vld [vmem:[%s1788_s0 + $0x4] sm:$0xf]  ;;  %v22_v6 = vld [vmem:[%s1788_s0] sm:$0xf] }
   0x3   :  { %1299 = vmatpush3.bf16.msra.mxu0 %v1428_v1  ;;  %1307 = vmatpush3.bf16.msra.mxu1 %v1429_v2  ;;  %v1432_v7 = vld [vmem:[%s1787_s1 + $0x20] sm:$0xff]   ;;  %v1433_v8 = vld [vmem:[%s1787_s1 + $0x30] sm:$0xff]   ;;  %v1434_v9 = vld [vmem:[%s1787_s1 + $0x28] sm:$0xff]  }
   0x4   :  { %1300 = vmatprep.subr.bf16.mxu0 %v1462_v0  ;;  %1308 = vmatprep.subr.bf16.mxu1 %v1462_v0  ;;  %v1435_v10 = vld [vmem:[%s1787_s1 + $0x38] sm:$0xff]   ;;  %v1132_v11 = vld [vmem:[%s1788_s0 + $0x8] sm:$0xf]  ;;  %v1140_v12 = vld [vmem:[%s1788_s0 + $0xc] sm:$0xf] }
   0x5   :  { %v1436_v13 = vld [vmem:[%s1787_s1 + $0x50] sm:$0xff]   ;;  %v1437_v14 = vld [vmem:[%s1787_s1 + $0x40] sm:$0xff]   ;;  %v1438_v15 = vld [vmem:[%s1787_s1 + $0x58] sm:$0xff]  }
   0x6   :  { %v1439_v16 = vld [vmem:[%s1787_s1 + $0x48] sm:$0xff]   ;;  %v1154_v17 = vld [vmem:[%s1788_s0 + $0x14] sm:$0xf]  ;;  %v1149_v18 = vld [vmem:[%s1788_s0 + $0x10] sm:$0xf] }
   0x7   :  { %1301 = vmatpush3.bf16.msra.mxu0 %v1430_v3  ;;  %1309 = vmatpush3.bf16.msra.mxu1 %v1431_v4  ;;  %v1440_v19 = vld [vmem:[%s1787_s1 + $0x60] sm:$0xff]   ;;  %v1441_v20 = vld [vmem:[%s1787_s1 + $0x70] sm:$0xff]   ;;  %v1442_v21 = vld [vmem:[%s1787_s1 + $0x68] sm:$0xff]  }
   0x8   :  { %1314 = vmatprep.subr.bf16.mxu0 %v1462_v0  ;;  %1322 = vmatprep.subr.bf16.mxu1 %v1462_v0  ;;  %v1443_v22 = vld [vmem:[%s1787_s1 + $0x78] sm:$0xff]   ;;  %v1444_v25 = vld [vmem:[%s1787_s1 + $0x90] sm:$0xff]   ;;  %v1445_v26 = vld [vmem:[%s1787_s1 + $0x80] sm:$0xff]  }
   0x9   :  { %v1165_v23 = vld [vmem:[%s1788_s0 + $0x18] sm:$0xf]  ;;  %v1173_v24 = vld [vmem:[%s1788_s0 + $0x1c] sm:$0xf]  ;;  %v1447_v28 = vld [vmem:[%s1787_s1 + $0x88] sm:$0xff]  }
   0xa   :  { %1303 = vmatmul.mubr.msk.bf16.vlgmr.msra.gmra.mrb[0].mxu0 %vm46_vm1, %v1121_v5  ;;  %1311 = vmatmul.mubr.msk.bf16.vlgmr.msra.gmra.mrb[0].mxu1 %vm46_vm1, %v22_v6  ;;  %v1446_v27 = vld [vmem:[%s1787_s1 + $0x98] sm:$0xff]   ;;  %v1187_v29 = vld [vmem:[%s1788_s0 + $0x24] sm:$0xf]  ;;  %v1182_v31 = vld [vmem:[%s1788_s0 + $0x20] sm:$0xf] }
   0xb   :  { %1315 = vmatpush3.bf16.msra.mxu0 %v1432_v7  ;;  %1323 = vmatpush3.bf16.msra.mxu1 %v1433_v8  ;;  %v1448_v30 = vld [vmem:[%s1787_s1 + $0xa0] sm:$0xff]   ;;  %v1449_v32 = vld [vmem:[%s1787_s1 + $0xb0] sm:$0xff]   ;;  %v1450_v33 = vld [vmem:[%s1787_s1 + $0xa8] sm:$0xff]  }
   0xc   :  { %1316 = vmatprep.subr.bf16.mxu0 %v1462_v0  ;;  %1324 = vmatprep.subr.bf16.mxu1 %v1462_v0  ;;  %v1451_v34 = vld [vmem:[%s1787_s1 + $0xb8] sm:$0xff]   ;;  %v1198_v35 = vld [vmem:[%s1788_s0 + $0x28] sm:$0xf]  ;;  %v1452_v36 = vld [vmem:[%s1787_s1 + $0xd0] sm:$0xff]  }
   0xd   :  { %1318 = vmatprep.mubr.msk.bf16.mxu0 %vm1463_vm0, %v1462_v0  ;;  %1326 = vmatprep.mubr.msk.bf16.mxu1 %vm1463_vm0, %v1462_v0  ;;  %v1206_v37 = vld [vmem:[%s1788_s0 + $0x2c] sm:$0xf]  ;;  %v1453_v38 = vld [vmem:[%s1787_s1 + $0xc0] sm:$0xff]   ;;  %v1454_v39 = vld [vmem:[%s1787_s1 + $0xd8] sm:$0xff]  }
   0xe   :  { %v1455_v40 = vld [vmem:[%s1787_s1 + $0xc8] sm:$0xff]   ;;  %v1220_v41 = vld [vmem:[%s1788_s0 + $0x34] sm:$0xf]  ;;  %v1456_v42 = vld [vmem:[%s1787_s1 + $0xe0] sm:$0xff]  }
   0xf   :  { %1317 = vmatpush3.bf16.msra.mxu0 %v1434_v9  ;;  %1325 = vmatpush3.bf16.msra.mxu1 %v1435_v10  ;;  %v1215_v43 = vld [vmem:[%s1788_s0 + $0x30] sm:$0xf]  ;;  %v1458_v45 = vld [vmem:[%s1787_s1 + $0xe8] sm:$0xff]   ;;  %v1459_v46 = vld [vmem:[%s1787_s1 + $0xf8] sm:$0xff]  }
  0x10   :  { %1330 = vmatprep.subr.bf16.mxu0 %v1462_v0  ;;  %1338 = vmatprep.subr.bf16.mxu1 %v1462_v0  ;;  %v1457_v44 = vld [vmem:[%s1787_s1 + $0xf0] sm:$0xff]   ;;  %v1231_v47 = vld [vmem:[%s1788_s0 + $0x38] sm:$0xf]  ;;  %v1239_v48 = vld [vmem:[%s1788_s0 + $0x3c] sm:$0xf] }
  0x11   :  { %v1721_v62 = vld [vmem:[%s1789_s2] ss:$0 sm:$0xff] }
  0x12   :  { %1319 = vmatmul.mubr.msk.bf16.vlgmr.msra.gmra.mrb[4].mxu0 %vm46_vm1, %v1132_v11  ;;  %1327 = vmatmul.mubr.msk.bf16.vlgmr.msra.gmra.mrb[4].mxu1 %vm46_vm1, %v1140_v12 }
  0x13   :  { %1331 = vmatpush3.bf16.msra.mxu0 %v1436_v13  ;;  %1339 = vmatpush3.bf16.msra.mxu1 %v1437_v14 }
  0x14   :  { %1332 = vmatprep.subr.bf16.mxu0 %v1462_v0  ;;  %1340 = vmatprep.subr.bf16.mxu1 %v1462_v0 }
  0x15   :  { %1334 = vmatprep.mubr.msk.bf16.mxu0 %vm1463_vm0, %v1462_v0  ;;  %1342 = vmatprep.mubr.msk.bf16.mxu1 %vm1463_vm0, %v1462_v0 }
  0x17   :  { %1333 = vmatpush3.bf16.msra.mxu0 %v1438_v15  ;;  %1341 = vmatpush3.bf16.msra.mxu1 %v1439_v16 }
  0x18   :  { %1346 = vmatprep.subr.bf16.mxu0 %v1462_v0  ;;  %1354 = vmatprep.subr.bf16.mxu1 %v1462_v0 }
  0x1a   :  { %1335 = vmatmul.mubr.msk.bf16.vlgmr.msra.gmra.mrb[8].mxu0 %vm46_vm1, %v1154_v17  ;;  %1343 = vmatmul.mubr.msk.bf16.vlgmr.msra.gmra.mrb[8].mxu1 %vm46_vm1, %v1149_v18 }
  0x1b   :  { %1347 = vmatpush3.bf16.msra.mxu0 %v1440_v19  ;;  %1355 = vmatpush3.bf16.msra.mxu1 %v1441_v20 }
  0x1c   :  { %1348 = vmatprep.subr.bf16.mxu0 %v1462_v0  ;;  %1356 = vmatprep.subr.bf16.mxu1 %v1462_v0 }
  0x1d   :  { %1350 = vmatprep.mubr.msk.bf16.mxu0 %vm1463_vm0, %v1462_v0  ;;  %1358 = vmatprep.mubr.msk.bf16.mxu1 %vm1463_vm0, %v1462_v0 }
  0x1f   :  { %1349 = vmatpush3.bf16.msra.mxu0 %v1442_v21  ;;  %1357 = vmatpush3.bf16.msra.mxu1 %v1443_v22 }
  0x20   :  { %1362 = vmatprep.subr.bf16.mxu0 %v1462_v0  ;;  %1370 = vmatprep.subr.bf16.mxu1 %v1462_v0 }
  0x22   :  { %1351 = vmatmul.mubr.msk.bf16.vlgmr.msra.gmra.mrb[12].mxu0 %vm46_vm1, %v1165_v23  ;;  %1359 = vmatmul.mubr.msk.bf16.vlgmr.msra.gmra.mrb[12].mxu1 %vm46_vm1, %v1173_v24 }
  0x23   :  { %1363 = vmatpush3.bf16.msra.mxu0 %v1444_v25  ;;  %1371 = vmatpush3.bf16.msra.mxu1 %v1445_v26 }
  0x24   :  { %1364 = vmatprep.subr.bf16.mxu0 %v1462_v0  ;;  %1372 = vmatprep.subr.bf16.mxu1 %v1462_v0 }
  0x25   :  { %1366 = vmatprep.mubr.msk.bf16.mxu0 %vm1463_vm0, %v1462_v0  ;;  %1374 = vmatprep.mubr.msk.bf16.mxu1 %vm1463_vm0, %v1462_v0 }
  0x27   :  { %1365 = vmatpush3.bf16.msra.mxu0 %v1446_v27  ;;  %1373 = vmatpush3.bf16.msra.mxu1 %v1447_v28 }
  0x28   :  { %1378 = vmatprep.subr.bf16.mxu0 %v1462_v0  ;;  %1386 = vmatprep.subr.bf16.mxu1 %v1462_v0 }
  0x2a   :  { %1367 = vmatmul.mubr.msk.bf16.vlgmr.msra.gmra.mrb[16].mxu0 %vm46_vm1, %v1187_v29  ;;  %1375 = vmatmul.mubr.msk.bf16.vlgmr.msra.gmra.mrb[16].mxu1 %vm46_vm1, %v1182_v31 }
  0x2b   :  { %1379 = vmatpush3.bf16.msra.mxu0 %v1448_v30  ;;  %1387 = vmatpush3.bf16.msra.mxu1 %v1449_v32 }
  0x2c   :  { %1380 = vmatprep.subr.bf16.mxu0 %v1462_v0  ;;  %1388 = vmatprep.subr.bf16.mxu1 %v1462_v0 }
  0x2d   :  { %1382 = vmatprep.mubr.msk.bf16.mxu0 %vm1463_vm0, %v1462_v0  ;;  %1390 = vmatprep.mubr.msk.bf16.mxu1 %vm1463_vm0, %v1462_v0 }
  0x2f   :  { %1381 = vmatpush3.bf16.msra.mxu0 %v1450_v33  ;;  %1389 = vmatpush3.bf16.msra.mxu1 %v1451_v34 }
  0x30   :  { %1394 = vmatprep.subr.bf16.mxu0 %v1462_v0  ;;  %1402 = vmatprep.subr.bf16.mxu1 %v1462_v0 }
  0x32   :  { %1383 = vmatmul.mubr.msk.bf16.vlgmr.msra.gmra.mrb[20].mxu0 %vm46_vm1, %v1198_v35  ;;  %1391 = vmatmul.mubr.msk.bf16.vlgmr.msra.gmra.mrb[20].mxu1 %vm46_vm1, %v1206_v37 }
  0x33   :  { %1395 = vmatpush3.bf16.msra.mxu0 %v1452_v36  ;;  %1403 = vmatpush3.bf16.msra.mxu1 %v1453_v38 }
  0x34   :  { %1396 = vmatprep.subr.bf16.mxu0 %v1462_v0  ;;  %1404 = vmatprep.subr.bf16.mxu1 %v1462_v0 }
  0x35   :  { %1398 = vmatprep.mubr.msk.bf16.mxu0 %vm1463_vm0, %v1462_v0  ;;  %1406 = vmatprep.mubr.msk.bf16.mxu1 %vm1463_vm0, %v1462_v0 }
  0x37   :  { %1397 = vmatpush3.bf16.msra.mxu0 %v1454_v39  ;;  %1405 = vmatpush3.bf16.msra.mxu1 %v1455_v40 }
  0x38   :  { %1410 = vmatprep.subr.bf16.mxu0 %v1462_v0  ;;  %1418 = vmatprep.subr.bf16.mxu1 %v1462_v0 }
  0x3a   :  { %1399 = vmatmul.mubr.msk.bf16.vlgmr.msra.gmra.mrb[24].mxu0 %vm46_vm1, %v1220_v41  ;;  %1407 = vmatmul.mubr.msk.bf16.vlgmr.msra.gmra.mrb[24].mxu1 %vm46_vm1, %v1215_v43 }
  0x3b   :  { %1411 = vmatpush3.bf16.msra.mxu0 %v1456_v42  ;;  %1419 = vmatpush3.bf16.msra.mxu1 %v1457_v44 }
  0x3c   :  { %1412 = vmatprep.subr.bf16.mxu0 %v1462_v0  ;;  %1420 = vmatprep.subr.bf16.mxu1 %v1462_v0 }
  0x3d   :  { %1414 = vmatprep.mubr.msk.bf16.mxu0 %vm1463_vm0, %v1462_v0  ;;  %1422 = vmatprep.mubr.msk.bf16.mxu1 %vm1463_vm0, %v1462_v0 }
  0x3f   :  { %1413 = vmatpush3.bf16.msra.mxu0 %v1458_v45  ;;  %1421 = vmatpush3.bf16.msra.mxu1 %v1459_v46 }
  0x42   :  { %1415 = vmatmul.mubr.msk.bf16.vlgmr.msra.gmra.mrb[28].mxu0 %vm46_vm1, %v1231_v47  ;;  %1423 = vmatmul.mubr.msk.bf16.vlgmr.msra.gmra.mrb[28].mxu1 %vm46_vm1, %v1239_v48 }
  0xdd   :  { %v84_v49 = vpop.f32.mrb[0].mxu0  ;;  %v139_v50 = vpop.f32.mrb[0].mxu1 }
  0xde   :  { %v1304_v51 = vpop.f32.mrb[1].mxu0  ;;  %v140_v52 = vadd.f32 %v139_v50, %v84_v49  ;;  %v1312_v53 = vpop.f32.mrb[1].mxu1 }
  0xdf   :  { %v87_v54 = vpop.f32.mrb[2].mxu0  ;;  %v142_v55 = vpop.f32.mrb[2].mxu1 }
  0xe0   :  { %v1305_v56 = vpop.f32.mrb[3].mxu0  ;;  %v1313_v57 = vpop.f32.mrb[3].mxu1 }
  0xe5   :  { %v201_v58 = vpop.f32.mrb[4].mxu0  ;;  %v264_v60 = vpop.f32.mrb[4].mxu1 }
  0xe6   :  { %v207_v59 = vadd.f32 %v201_v58, %v140_v52  ;;  %v1320_v61 = vpop.f32.mrb[5].mxu0  ;;  %v1328_v63 = vpop.f32.mrb[5].mxu1 }
  0xe7   :  { %v204_v0 = vpop.f32.mrb[6].mxu0  ;;  %v267_v2 = vpop.f32.mrb[6].mxu1 }
  0xe8   :  { %v270_v1 = vadd.f32 %v264_v60, %v207_v59  ;;  %v1321_v3 = vpop.f32.mrb[7].mxu0  ;;  %v1329_v4 = vpop.f32.mrb[7].mxu1 }
  0xea   :  { %v277_v5 = vadd.f32 %v1721_v62, %v270_v1 }
  0xec   :  { %279 = vst.msk [vmem:[%s1790_s5] sm:$0xff] %vm278_vm2, %v277_v5 }
  0xed   :  { %v343_v6 = vpop.f32.mrb[8].mxu0  ;;  %v398_v7 = vpop.f32.mrb[8].mxu1 }
  0xee   :  { %v1336_v8 = vpop.f32.mrb[9].mxu0  ;;  %v399_v9 = vadd.f32 %v398_v7, %v343_v6  ;;  %v1344_v10 = vpop.f32.mrb[9].mxu1 }
  0xef   :  { %v346_v11 = vpop.f32.mrb[10].mxu0  ;;  %v401_v12 = vpop.f32.mrb[10].mxu1 }
  0xf0   :  { %v1337_v13 = vpop.f32.mrb[11].mxu0  ;;  %v1345_v14 = vpop.f32.mrb[11].mxu1 }
  0xf3   :  { %v1039_v4 = vld [vmem:[%s1790_s5] sm:$0xff] }
  0xf5   :  { %v460_v15 = vpop.f32.mrb[12].mxu0  ;;  %v523_v17 = vpop.f32.mrb[12].mxu1 }
  0xf6   :  { %v466_v16 = vadd.f32 %v460_v15, %v399_v9  ;;  %v1352_v18 = vpop.f32.mrb[13].mxu0  ;;  %v1360_v19 = vpop.f32.mrb[13].mxu1 }
  0xf7   :  { %v463_v20 = vpop.f32.mrb[14].mxu0  ;;  %v526_v22 = vpop.f32.mrb[14].mxu1 }
  0xf8   :  { %v529_v21 = vadd.f32 %v523_v17, %v466_v16  ;;  %v1353_v23 = vpop.f32.mrb[15].mxu0  ;;  %v1361_v24 = vpop.f32.mrb[15].mxu1 }
  0xfa   :  { %v530_v25 = vadd.f32 %v1721_v62, %v529_v21 }
  0xfc   :  { %1181 = vst.msk [vmem:[%s1790_s5 + $0x8] sm:$0xff] %vm278_vm2, %v530_v25 }
  0xfd   :  { %v596_v26 = vpop.f32.mrb[16].mxu0  ;;  %v651_v27 = vpop.f32.mrb[16].mxu1 }
  0xfe   :  { %v1368_v28 = vpop.f32.mrb[17].mxu0  ;;  %v652_v29 = vadd.f32 %v651_v27, %v596_v26  ;;  %v1376_v30 = vpop.f32.mrb[17].mxu1 }
  0xff   :  { %v599_v31 = vpop.f32.mrb[18].mxu0  ;;  %v654_v32 = vpop.f32.mrb[18].mxu1 }
 0x100   :  { %v1369_v33 = vpop.f32.mrb[19].mxu0  ;;  %v1377_v34 = vpop.f32.mrb[19].mxu1 }
 0x103   :  { %v1040_v3 = vld [vmem:[%s1790_s5 + $0x8] sm:$0xff] }
 0x104   :  { %v1044_v6 = vsel %vm278_vm2, %v1040_v3, 0.0 }
 0x105   :  { %v713_v35 = vpop.f32.mrb[20].mxu0  ;;  %v776_v37 = vpop.f32.mrb[20].mxu1 }
 0x106   :  { %v719_v36 = vadd.f32 %v713_v35, %v652_v29  ;;  %v1384_v38 = vpop.f32.mrb[21].mxu0  ;;  %v1392_v39 = vpop.f32.mrb[21].mxu1 }
 0x107   :  { %v716_v40 = vpop.f32.mrb[22].mxu0  ;;  %v779_v42 = vpop.f32.mrb[22].mxu1 }
 0x108   :  { %v782_v41 = vadd.f32 %v776_v37, %v719_v36  ;;  %v1385_v43 = vpop.f32.mrb[23].mxu0  ;;  %v1393_v44 = vpop.f32.mrb[23].mxu1 }
 0x10a   :  { %v783_v45 = vadd.f32 %v1721_v62, %v782_v41 }
 0x10c   :  { %1214 = vst.msk [vmem:[%s1790_s5 + $0x10] sm:$0xff] %vm278_vm2, %v783_v45 }
 0x10d   :  { %v849_v46 = vpop.f32.mrb[24].mxu0  ;;  %v904_v47 = vpop.f32.mrb[24].mxu1 }
 0x10e   :  { %v1400_v48 = vpop.f32.mrb[25].mxu0  ;;  %v905_v49 = vadd.f32 %v904_v47, %v849_v46  ;;  %v1408_v50 = vpop.f32.mrb[25].mxu1  ;;  %v1248_v46 = vld [vmem:[%s1791_s3] ss:$0 sm:$0xff] }
 0x10f   :  { %v852_v51 = vpop.f32.mrb[26].mxu0  ;;  %v907_v52 = vpop.f32.mrb[26].mxu1 }
 0x110   :  { %v1401_v53 = vpop.f32.mrb[27].mxu0  ;;  %v1409_v54 = vpop.f32.mrb[27].mxu1  ;;  %v1249_v51 = vld [vmem:[%s1792_s4] ss:$0 sm:$0xff] }
 0x113   :  { %v1041_v5 = vld [vmem:[%s1790_s5 + $0x10] sm:$0xff] }
 0x114   :  { %v1046_v7 = vsel %vm278_vm2, %v1041_v5, 0.0 }
 0x115   :  { %v966_v55 = vpop.f32.mrb[28].mxu0  ;;  %v1029_v57 = vpop.f32.mrb[28].mxu1 }
 0x116   :  { %v972_v56 = vadd.f32 %v966_v55, %v905_v49  ;;  %v1416_v58 = vpop.f32.mrb[29].mxu0  ;;  %v1424_v59 = vpop.f32.mrb[29].mxu1 }
 0x117   :  { %v969_v60 = vpop.f32.mrb[30].mxu0  ;;  %v1032_v63 = vpop.f32.mrb[30].mxu1 }
 0x118   :  { %v1035_v61 = vadd.f32 %v1029_v57, %v972_v56  ;;  %v1417_v0 = vpop.f32.mrb[31].mxu0  ;;  %v1425_v1 = vpop.f32.mrb[31].mxu1 }
 0x11a   :  { %v1036_v2 = vadd.f32 %v1721_v62, %v1035_v61  ;;  %v1043_v62 = vsel %vm278_vm2, %v1039_v4, 0.0 }
 0x11b   :  { %v1045_v8 = vadd.f32 %v1044_v6, %v1043_v62 }
 0x11c   :  { %1247 = vst.msk [vmem:[%s1790_s5 + $0x18] sm:$0xff] %vm278_vm2, %v1036_v2 }
 0x11d   :  { %v1047_v10 = vadd.f32 %v1046_v7, %v1045_v8 }
 0x123   :  { %v1042_v9 = vld [vmem:[%s1790_s5 + $0x18] sm:$0xff] }
 0x124   :  { %v1048_v11 = vsel %vm278_vm2, %v1042_v9, 0.0 }
 0x125   :  { %v1049_v12 = vadd.f32 %v1048_v11, %v1047_v10 }
 0x127   :  { %v1050_v13 = vsel %vm278_vm2, %v1049_v12, 0.0 }
 0x128   :  { %v1051_v14 = vrot.slane %v1050_v13, 4 }
 0x12a   :  { %v1052_v15 = vadd.f32 %v1051_v14, %v1050_v13 }
 0x12c   :  { %v1053_v16 = vrot.slane %v1052_v15, 2 }
 0x12e   :  { %v1054_v17 = vadd.f32 %v1053_v16, %v1052_v15 }
 0x130   :  { %v1055_v18 = vrot.slane %v1054_v17, 1 }
 0x132   :  { %v1056_v19 = vadd.f32 %v1055_v18, %v1054_v17 }
 0x134   :  { %v1057_v20 = vmul.f32 0.03125, %v1056_v19 }
 0x136   :  { %v1058_v21 = vsub.f32 %v1039_v4, %v1057_v20  ;;  %v1059_v22 = vsub.f32 %v1040_v3, %v1057_v20  ;;  %v1060_v23 = vsub.f32 %v1041_v5, %v1057_v20  ;;  %v1061_v24 = vsub.f32 %v1042_v9, %v1057_v20 }
 0x138   :  { %v1062_v25 = vmul.f32 %v1058_v21, %v1058_v21  ;;  %v1063_v26 = vmul.f32 %v1059_v22, %v1059_v22  ;;  %v1064_v27 = vmul.f32 %v1060_v23, %v1060_v23  ;;  %v1065_v28 = vmul.f32 %v1061_v24, %v1061_v24 }
 0x13a   :  { %v1066_v29 = vsel %vm278_vm2, %v1062_v25, 0.0  ;;  %v1067_v30 = vsel %vm278_vm2, %v1063_v26, 0.0  ;;  %v1069_v32 = vsel %vm278_vm2, %v1064_v27, 0.0  ;;  %v1071_v34 = vsel %vm278_vm2, %v1065_v28, 0.0 }
 0x13b   :  { %v1068_v31 = vadd.f32 %v1067_v30, %v1066_v29 }
 0x13d   :  { %v1070_v33 = vadd.f32 %v1069_v32, %v1068_v31 }
 0x13f   :  { %v1072_v35 = vadd.f32 %v1071_v34, %v1070_v33 }
 0x141   :  { %v1073_v36 = vsel %vm278_vm2, %v1072_v35, 0.0 }
 0x142   :  { %v1074_v37 = vrot.slane %v1073_v36, 4 }
 0x144   :  { %v1075_v38 = vadd.f32 %v1074_v37, %v1073_v36 }
 0x146   :  { %v1076_v39 = vrot.slane %v1075_v38, 2 }
 0x148   :  { %v1077_v40 = vadd.f32 %v1076_v39, %v1075_v38 }
 0x14a   :  { %v1078_v41 = vrot.slane %v1077_v40, 1 }
 0x14c   :  { %v1079_v42 = vadd.f32 %v1078_v41, %v1077_v40 }
 0x14e   :  { %v1080_v43 = vmul.f32 0.03125, %v1079_v42 }
 0x150   :  { %v1081_v44 = vadd.f32 1e-05, %v1080_v43 }
 0x152   :  { %1460 = vrsqrt.f32 %v1081_v44 }
 0x15c   :  { %v1461_v45 = vpop.eup %1460 }
 0x15d   :  { %v1083_v47 = vmul.f32 %v1461_v45, %v1058_v21  ;;  %v1084_v48 = vmul.f32 %v1461_v45, %v1059_v22  ;;  %v1085_v49 = vmul.f32 %v1461_v45, %v1060_v23  ;;  %v1086_v50 = vmul.f32 %v1461_v45, %v1061_v24 }
 0x15f   :  { %v1094_v52 = vmul.f32 %v1248_v46, %v1083_v47  ;;  %v1095_v53 = vmul.f32 %v1248_v46, %v1084_v48  ;;  %v1096_v54 = vmul.f32 %v1248_v46, %v1085_v49  ;;  %v1097_v55 = vmul.f32 %v1248_v46, %v1086_v50 }
 0x161   :  { %v1105_v56 = vadd.f32 %v1249_v51, %v1094_v52  ;;  %v1106_v57 = vadd.f32 %v1249_v51, %v1095_v53  ;;  %v1107_v58 = vadd.f32 %v1249_v51, %v1096_v54  ;;  %v1108_v59 = vadd.f32 %v1249_v51, %v1097_v55 }
 0x163   :  { %v1109_v60 = vmax.f32 %v1105_v56, 0.0  ;;  %v1110_v61 = vmax.f32 %v1106_v57, 0.0  ;;  %v1111_v63 = vmax.f32 %v1107_v58, 0.0  ;;  %v1112_v0 = vmax.f32 %v1108_v59, 0.0 }
 0x165   :  { %1113 = vst.msk [vmem:[%s1790_s5] sm:$0xff] %vm278_vm2, %v1109_v60  ;;  %1114 = vst.msk [vmem:[%s1790_s5 + $0x8] sm:$0xff] %vm278_vm2, %v1110_v61 }
 0x166   :  { %1115 = vst.msk [vmem:[%s1790_s5 + $0x10] sm:$0xff] %vm278_vm2, %v1111_v63  ;;  %1116 = vst.msk [vmem:[%s1790_s5 + $0x18] sm:$0xff] %vm278_vm2, %v1112_v0 }

// kernel: vae_forward.12
= control target key start
LH: loop header
LB: loop body
LE: loop exit
PB: predicated region body
PF: predicated region fallthrough
CT: control target
= control target key end

     0   :  { %vm52_vm0 = vcmask 130048   ;;  %vm355_vm1 = vcmask 64512   ;;  %s2549_s1 = inlined_call_operand.vmem [shape: bf16[16,16,8], index: 1, kind: input, shape index: {}]   ;;  %s2550_s0 = inlined_call_operand.vmem [shape: bf16[16,32,16], index: 0, kind: input, shape index: {}]   ;;  %s2551_s2 = inlined_call_operand.vmem [shape: f32[1,8], index: 2, kind: input, shape index: {}]   ;;  %s2552_s5 = inlined_call_operand.vmem [shape: f32[4,32,8], index: 5, kind: output, shape index: {}]   ;;  %s2553_s3 = inlined_call_operand.vmem [shape: f32[1,8], index: 3, kind: input, shape index: {}]   ;;  %s2554_s4 = inlined_call_operand.vmem [shape: f32[1,8], index: 4, kind: input, shape index: {}]  }
   0x1   :  { %v1968_v0 = vld [vmem:[%s2549_s1 + $0x8] sm:$0xff]   ;;  %v1970_v2 = vld [vmem:[%s2550_s0 + $0x10] sm:$0xff]   ;;  %v1972_v4 = vld [vmem:[%s2550_s0 + $0x18] sm:$0xff]  }
   0x2   :  { %v1969_v1 = vld [vmem:[%s2549_s1 + $0x28] sm:$0xff]   ;;  %1824 = vmatprep.subr.bf16.mxu0 %v1968_v0  ;;  %v1971_v3 = vld [vmem:[%s2550_s0 + $0x50] sm:$0xff]   ;;  %1826 = vmatprep.mubr.msk.bf16.mxu0 %vm52_vm0, %v1970_v2  ;;  %v1973_v5 = vld [vmem:[%s2549_s1] sm:$0xff]  }
   0x3   :  { %1848 = vmatprep.subr.bf16.mxu1 %v1969_v1  ;;  %1825 = vmatpush3.bf16.msra.mxu0 %v1968_v0  ;;  %v1974_v6 = vld [vmem:[%s2550_s0 + $0x58] sm:$0xff]   ;;  %v1975_v7 = vld [vmem:[%s2549_s1 + $0x20] sm:$0xff]   ;;  %v1979_v10 = vld [vmem:[%s2549_s1 + $0x10] sm:$0xff]  }
   0x4   :  { %1849 = vmatpush3.bf16.msra.mxu1 %v1969_v1  ;;  %1850 = vmatprep.mubr.msk.bf16.mxu1 %vm52_vm0, %v1971_v3  ;;  %v1976_v8 = vld [vmem:[%s2550_s0] sm:$0xff]   ;;  %v1978_v11 = vld [vmem:[%s2550_s0 + $0x8] sm:$0xff]   ;;  %v1981_v12 = vld [vmem:[%s2549_s1 + $0x30] sm:$0xff]  }
   0x5   :  { %1830 = vmatprep.subr.bf16.mxu0 %v1973_v5  ;;  %1854 = vmatprep.subr.bf16.mxu1 %v1975_v7  ;;  %v1977_v9 = vld [vmem:[%s2550_s0 + $0x40] sm:$0xff]   ;;  %v1980_v13 = vld [vmem:[%s2550_s0 + $0x48] sm:$0xff]   ;;  %v1985_v16 = vld [vmem:[%s2549_s1 + $0x18] sm:$0xff]  }
   0x6   :  { %1827 = vmatmul.mubr.msk.bf16.vlgmr.msra.gmra.mrb[0].mxu0 %vm52_vm0, %v1972_v4  ;;  %v1982_v14 = vld [vmem:[%s2550_s0 + $0x20] sm:$0xff]   ;;  %v1987_v17 = vld [vmem:[%s2549_s1 + $0x38] sm:$0xff]   ;;  %v1984_v18 = vld [vmem:[%s2550_s0 + $0x28] sm:$0xff]  }
   0x7   :  { %1851 = vmatmul.mubr.msk.bf16.vlgmr.msra.gmra.mrb[0].mxu1 %vm52_vm0, %v1974_v6  ;;  %1831 = vmatpush3.bf16.msra.mxu0 %v1973_v5  ;;  %v1983_v15 = vld [vmem:[%s2550_s0 + $0x60] sm:$0xff]   ;;  %v1986_v19 = vld [vmem:[%s2550_s0 + $0x68] sm:$0xff]   ;;  %v1988_v20 = vld [vmem:[%s2550_s0 + $0x30] sm:$0xff]  }
   0x8   :  { %1855 = vmatpush3.bf16.msra.mxu1 %v1975_v7  ;;  %1832 = vmatprep.mubr.msk.bf16.mxu0 %vm52_vm0, %v1976_v8  ;;  %v1992_v21 = vld [vmem:[%s2549_s1 + $0x48] sm:$0xff]   ;;  %v1989_v22 = vld [vmem:[%s2550_s0 + $0x70] sm:$0xff]   ;;  %v1990_v24 = vld [vmem:[%s2550_s0 + $0x38] sm:$0xff]  }
   0x9   :  { %1856 = vmatprep.mubr.msk.bf16.mxu1 %vm52_vm0, %v1977_v9  ;;  %1836 = vmatprep.subr.bf16.mxu0 %v1979_v10  ;;  %v1993_v23 = vld [vmem:[%s2549_s1 + $0x68] sm:$0xff]   ;;  %v1991_v25 = vld [vmem:[%s2550_s0 + $0x78] sm:$0xff]   ;;  %v1994_v26 = vld [vmem:[%s2550_s0 + $0x90] sm:$0xff]  }
   0xa   :  { %1860 = vmatprep.subr.bf16.mxu1 %v1981_v12  ;;  %v1997_v27 = vld [vmem:[%s2549_s1 + $0x40] sm:$0xff]   ;;  %v1995_v28 = vld [vmem:[%s2550_s0 + $0xd0] sm:$0xff]   ;;  %v1996_v30 = vld [vmem:[%s2550_s0 + $0x98] sm:$0xff]  }
   0xb   :  { %v1999_v29 = vld [vmem:[%s2549_s1 + $0x60] sm:$0xff]   ;;  %v1998_v32 = vld [vmem:[%s2550_s0 + $0xd8] sm:$0xff]   ;;  %v2003_v33 = vld [vmem:[%s2549_s1 + $0x50] sm:$0xff]  }
   0xc   :  { %v2000_v31 = vld [vmem:[%s2550_s0 + $0x80] sm:$0xff]   ;;  %v2005_v35 = vld [vmem:[%s2549_s1 + $0x70] sm:$0xff]   ;;  %v2002_v36 = vld [vmem:[%s2550_s0 + $0x88] sm:$0xff]  }
   0xd   :  { %v2001_v34 = vld [vmem:[%s2550_s0 + $0xc0] sm:$0xff]   ;;  %v2004_v38 = vld [vmem:[%s2550_s0 + $0xc8] sm:$0xff]   ;;  %v2009_v39 = vld [vmem:[%s2549_s1 + $0x58] sm:$0xff]  }
   0xe   :  { %v2006_v37 = vld [vmem:[%s2550_s0 + $0xa0] sm:$0xff]   ;;  %v2011_v41 = vld [vmem:[%s2549_s1 + $0x78] sm:$0xff]   ;;  %v2008_v42 = vld [vmem:[%s2550_s0 + $0xa8] sm:$0xff]  }
   0xf   :  { %v2007_v40 = vld [vmem:[%s2550_s0 + $0xe0] sm:$0xff]   ;;  %v2012_v43 = vld [vmem:[%s2550_s0 + $0xb0] sm:$0xff]   ;;  %v2010_v44 = vld [vmem:[%s2550_s0 + $0xe8] sm:$0xff]  }
  0x10   :  { %v2013_v45 = vld [vmem:[%s2550_s0 + $0xf0] sm:$0xff]   ;;  %v2014_v46 = vld [vmem:[%s2550_s0 + $0xb8] sm:$0xff]   ;;  %v1629_v48 = vld [vmem:[%s2551_s2] ss:$0 sm:$0xff] }
  0x11   :  { %v2015_v47 = vld [vmem:[%s2550_s0 + $0xf8] sm:$0xff]  }
  0x12   :  { %1833 = vmatmul.mubr.msk.bf16.vlgmr.msra.gmra.mrb[0].mxu0 %vm52_vm0, %v1978_v11 }
  0x13   :  { %1837 = vmatpush3.bf16.msra.mxu0 %v1979_v10  ;;  %1838 = vmatprep.mubr.msk.bf16.mxu0 %vm52_vm0, %v1982_v14 }
  0x14   :  { %1857 = vmatmul.mubr.msk.bf16.vlgmr.msra.gmra.mrb[0].mxu1 %vm52_vm0, %v1980_v13  ;;  %1842 = vmatprep.subr.bf16.mxu0 %v1985_v16 }
  0x15   :  { %1861 = vmatpush3.bf16.msra.mxu1 %v1981_v12  ;;  %1862 = vmatprep.mubr.msk.bf16.mxu1 %vm52_vm0, %v1983_v15 }
  0x16   :  { %1866 = vmatprep.subr.bf16.mxu1 %v1987_v17 }
  0x1e   :  { %1839 = vmatmul.mubr.msk.bf16.vlgmr.msra.gmra.mrb[0].mxu0 %vm52_vm0, %v1984_v18 }
  0x1f   :  { %1843 = vmatpush3.bf16.msra.mxu0 %v1985_v16  ;;  %1844 = vmatprep.mubr.msk.bf16.mxu0 %vm52_vm0, %v1988_v20 }
  0x20   :  { %1863 = vmatmul.mubr.msk.bf16.vlgmr.msra.gmra.mrb[0].mxu1 %vm52_vm0, %v1986_v19  ;;  %1872 = vmatprep.subr.bf16.mxu0 %v1992_v21 }
  0x21   :  { %1867 = vmatpush3.bf16.msra.mxu1 %v1987_v17  ;;  %1868 = vmatprep.mubr.msk.bf16.mxu1 %vm52_vm0, %v1989_v22 }
  0x22   :  { %1896 = vmatprep.subr.bf16.mxu1 %v1993_v23 }
  0x2a   :  { %1845 = vmatmul.mubr.msk.bf16.vlgmr.msra.gmra.mrb[0].mxu0 %vm52_vm0, %v1990_v24 }
  0x2b   :  { %1873 = vmatpush3.bf16.msra.mxu0 %v1992_v21  ;;  %1874 = vmatprep.mubr.msk.bf16.mxu0 %vm52_vm0, %v1994_v26 }
  0x2c   :  { %1869 = vmatmul.mubr.msk.bf16.vlgmr.msra.gmra.mrb[0].mxu1 %vm52_vm0, %v1991_v25  ;;  %1878 = vmatprep.subr.bf16.mxu0 %v1997_v27 }
  0x2d   :  { %1897 = vmatpush3.bf16.msra.mxu1 %v1993_v23  ;;  %1898 = vmatprep.mubr.msk.bf16.mxu1 %vm52_vm0, %v1995_v28 }
  0x2e   :  { %1902 = vmatprep.subr.bf16.mxu1 %v1999_v29 }
  0x32   :  { %1875 = vmatmul.mubr.msk.bf16.vlgmr.msra.gmra.mrb[4].mxu0 %vm52_vm0, %v1996_v30 }
  0x33   :  { %1879 = vmatpush3.bf16.msra.mxu0 %v1997_v27  ;;  %1880 = vmatprep.mubr.msk.bf16.mxu0 %vm52_vm0, %v2000_v31 }
  0x34   :  { %1899 = vmatmul.mubr.msk.bf16.vlgmr.msra.gmra.mrb[4].mxu1 %vm52_vm0, %v1998_v32  ;;  %1884 = vmatprep.subr.bf16.mxu0 %v2003_v33 }
  0x35   :  { %1903 = vmatpush3.bf16.msra.mxu1 %v1999_v29  ;;  %1904 = vmatprep.mubr.msk.bf16.mxu1 %vm52_vm0, %v2001_v34 }
  0x36   :  { %1908 = vmatprep.subr.bf16.mxu1 %v2005_v35 }
  0x3e   :  { %1881 = vmatmul.mubr.msk.bf16.vlgmr.msra.gmra.mrb[4].mxu0 %vm52_vm0, %v2002_v36 }
  0x3f   :  { %1885 = vmatpush3.bf16.msra.mxu0 %v2003_v33  ;;  %1886 = vmatprep.mubr.msk.bf16.mxu0 %vm52_vm0, %v2006_v37 }
  0x40   :  { %1905 = vmatmul.mubr.msk.bf16.vlgmr.msra.gmra.mrb[4].mxu1 %vm52_vm0, %v2004_v38  ;;  %1890 = vmatprep.subr.bf16.mxu0 %v2009_v39 }
  0x41   :  { %1909 = vmatpush3.bf16.msra.mxu1 %v2005_v35  ;;  %1910 = vmatprep.mubr.msk.bf16.mxu1 %vm52_vm0, %v2007_v40 }
  0x42   :  { %1914 = vmatprep.subr.bf16.mxu1 %v2011_v41 }
  0x4a   :  { %1887 = vmatmul.mubr.msk.bf16.vlgmr.msra.gmra.mrb[4].mxu0 %vm52_vm0, %v2008_v42 }
  0x4b   :  { %1891 = vmatpush3.bf16.msra.mxu0 %v2009_v39  ;;  %1892 = vmatprep.mubr.msk.bf16.mxu0 %vm52_vm0, %v2012_v43 }
  0x4c   :  { %1911 = vmatmul.mubr.msk.bf16.vlgmr.msra.gmra.mrb[4].mxu1 %vm52_vm0, %v2010_v44 }
  0x4d   :  { %1915 = vmatpush3.bf16.msra.mxu1 %v2011_v41  ;;  %1916 = vmatprep.mubr.msk.bf16.mxu1 %vm52_vm0, %v2013_v45 }
  0x56   :  { %1893 = vmatmul.mubr.msk.bf16.vlgmr.msra.gmra.mrb[4].mxu0 %vm52_vm0, %v2014_v46 }
  0x58   :  { %1917 = vmatmul.mubr.msk.bf16.vlgmr.msra.gmra.mrb[4].mxu1 %vm52_vm0, %v2015_v47 }
  0xfd   :  { %v1846_v49 = vpop.f32.mrb[0].mxu0 }
  0xfe   :  { %v353_v50 = vadd.f32 %v1846_v49, %v1629_v48  ;;  %v326_v51 = vpop.f32.mrb[1].mxu0 }
  0xff   :  { %v1870_v52 = vpop.f32.mrb[0].mxu1  ;;  %v351_v53 = vadd.f32 %v1629_v48, %v326_v51  ;;  %v1847_v54 = vpop.f32.mrb[2].mxu0 }
 0x100   :  { %358 = vst.msk [vmem:[%s2552_s5 + $0x10] sm:$0xff] %vm355_vm1, %v353_v50  ;;  %v686_v55 = vadd.f32 %v1870_v52, %v1629_v48  ;;  %v665_v56 = vpop.f32.mrb[1].mxu1  ;;  %v354_v57 = vadd.f32 %v1847_v54, %v1629_v48  ;;  %v329_v58 = vpop.f32.mrb[3].mxu0 }
 0x101   :  { %356 = vst.msk [vmem:[%s2552_s5] sm:$0xff] %vm355_vm1, %v351_v53  ;;  %v684_v59 = vadd.f32 %v1629_v48, %v665_v56  ;;  %v1871_v60 = vpop.f32.mrb[2].mxu1  ;;  %v352_v61 = vadd.f32 %v1629_v48, %v329_v58 }
 0x102   :  { %1676 = vst.msk [vmem:[%s2552_s5 + $0x30] sm:$0xff] %vm355_vm1, %v686_v55  ;;  %359 = vst.msk [vmem:[%s2552_s5 + $0x18] sm:$0xff] %vm355_vm1, %v354_v57  ;;  %v687_v62 = vadd.f32 %v1871_v60, %v1629_v48  ;;  %v668_v63 = vpop.f32.mrb[3].mxu1 }
 0x103   :  { %1674 = vst.msk [vmem:[%s2552_s5 + $0x20] sm:$0xff] %vm355_vm1, %v684_v59  ;;  %357 = vst.msk [vmem:[%s2552_s5 + $0x8] sm:$0xff] %vm355_vm1, %v352_v61  ;;  %v685_v0 = vadd.f32 %v1629_v48, %v668_v63 }
 0x104   :  { %1677 = vst.msk [vmem:[%s2552_s5 + $0x38] sm:$0xff] %vm355_vm1, %v687_v62 }
 0x105   :  { %1675 = vst.msk [vmem:[%s2552_s5 + $0x28] sm:$0xff] %vm355_vm1, %v685_v0 }
 0x107   :  { %v2270_v14 = vld [vmem:[%s2552_s5 + $0x10] sm:$0xff] }
 0x108   :  { %v1359_v17 = vld [vmem:[%s2552_s5] sm:$0xff]  ;;  %v1389_v27 = vsel %vm355_vm1, %v2270_v14, 0.0 }
 0x109   :  { %v2291_v19 = vld [vmem:[%s2552_s5 + $0x30] sm:$0xff]  ;;  %v2296_v20 = vld [vmem:[%s2552_s5 + $0x18] sm:$0xff]  ;;  %v1375_v25 = vsel %vm355_vm1, %v1359_v17, 0.0 }
 0x10a   :  { %v2286_v18 = vld [vmem:[%s2552_s5 + $0x20] sm:$0xff]  ;;  %v1360_v23 = vld [vmem:[%s2552_s5 + $0x8] sm:$0xff]  ;;  %v1390_v28 = vsel %vm355_vm1, %v2291_v19, 0.0  ;;  %v1396_v29 = vsel %vm355_vm1, %v2296_v20, 0.0 }
 0x10b   :  { %v2301_v21 = vld [vmem:[%s2552_s5 + $0x38] sm:$0xff]  ;;  %v1376_v26 = vsel %vm355_vm1, %v2286_v18, 0.0  ;;  %v1382_v32 = vsel %vm355_vm1, %v1360_v23, 0.0  ;;  %v1391_v36 = vadd.f32 %v1390_v28, %v1389_v27 }
 0x10c   :  { %v1364_v24 = vld [vmem:[%s2552_s5 + $0x28] sm:$0xff]  ;;  %v1397_v30 = vsel %vm355_vm1, %v2301_v21, 0.0  ;;  %v1377_v35 = vadd.f32 %v1376_v26, %v1375_v25 }
 0x10d   :  { %v1383_v33 = vsel %vm355_vm1, %v1364_v24, 0.0  ;;  %v1398_v40 = vadd.f32 %v1397_v30, %v1396_v29 }
 0x10e   :  { %v1384_v45 = vadd.f32 %v1383_v33, %v1382_v32 }
 0x129   :  { %v1894_v1 = vpop.f32.mrb[4].mxu0 }
 0x12a   :  { %v1019_v2 = vadd.f32 %v1894_v1, %v1629_v48  ;;  %v998_v3 = vpop.f32.mrb[5].mxu0 }
 0x12b   :  { %v1918_v4 = vpop.f32.mrb[4].mxu1  ;;  %v1017_v5 = vadd.f32 %v1629_v48, %v998_v3  ;;  %v1895_v6 = vpop.f32.mrb[6].mxu0 }
 0x12c   :  { %1724 = vst.msk [vmem:[%s2552_s5 + $0x50] sm:$0xff] %vm355_vm1, %v1019_v2  ;;  %v1352_v7 = vadd.f32 %v1918_v4, %v1629_v48  ;;  %v1331_v8 = vpop.f32.mrb[5].mxu1  ;;  %v1020_v9 = vadd.f32 %v1895_v6, %v1629_v48  ;;  %v1001_v10 = vpop.f32.mrb[7].mxu0 }
 0x12d   :  { %1722 = vst.msk [vmem:[%s2552_s5 + $0x40] sm:$0xff] %vm355_vm1, %v1017_v5  ;;  %v1350_v11 = vadd.f32 %v1629_v48, %v1331_v8  ;;  %v1919_v12 = vpop.f32.mrb[6].mxu1  ;;  %v1018_v13 = vadd.f32 %v1629_v48, %v1001_v10 }
 0x12e   :  { %1772 = vst.msk [vmem:[%s2552_s5 + $0x70] sm:$0xff] %vm355_vm1, %v1352_v7  ;;  %1725 = vst.msk [vmem:[%s2552_s5 + $0x58] sm:$0xff] %vm355_vm1, %v1020_v9  ;;  %v1353_v15 = vadd.f32 %v1919_v12, %v1629_v48  ;;  %v1334_v16 = vpop.f32.mrb[7].mxu1 }
 0x12f   :  { %1770 = vst.msk [vmem:[%s2552_s5 + $0x60] sm:$0xff] %vm355_vm1, %v1350_v11  ;;  %1723 = vst.msk [vmem:[%s2552_s5 + $0x48] sm:$0xff] %vm355_vm1, %v1018_v13  ;;  %v1351_v22 = vadd.f32 %v1629_v48, %v1334_v16 }
 0x130   :  { %1773 = vst.msk [vmem:[%s2552_s5 + $0x78] sm:$0xff] %vm355_vm1, %v1353_v15 }
 0x131   :  { %1771 = vst.msk [vmem:[%s2552_s5 + $0x68] sm:$0xff] %vm355_vm1, %v1351_v22 }
 0x133   :  { %v1369_v31 = vld [vmem:[%s2552_s5 + $0x50] sm:$0xff] }
 0x134   :  { %v1367_v34 = vld [vmem:[%s2552_s5 + $0x40] sm:$0xff]  ;;  %v1392_v37 = vsel %vm355_vm1, %v1369_v31, 0.0 }
 0x135   :  { %v1370_v38 = vld [vmem:[%s2552_s5 + $0x58] sm:$0xff]  ;;  %v1378_v39 = vsel %vm355_vm1, %v1367_v34, 0.0  ;;  %v1373_v43 = vld [vmem:[%s2552_s5 + $0x70] sm:$0xff]  ;;  %v1393_v46 = vadd.f32 %v1392_v37, %v1391_v36 }
 0x136   :  { %v1368_v41 = vld [vmem:[%s2552_s5 + $0x48] sm:$0xff]  ;;  %v1371_v42 = vld [vmem:[%s2552_s5 + $0x60] sm:$0xff]  ;;  %v1379_v44 = vadd.f32 %v1378_v39, %v1377_v35  ;;  %v1399_v47 = vsel %vm355_vm1, %v1370_v38, 0.0  ;;  %v1394_v56 = vsel %vm355_vm1, %v1373_v43, 0.0 }
 0x137   :  { %v1380_v48 = vsel %vm355_vm1, %v1371_v42, 0.0  ;;  %v1385_v49 = vsel %vm355_vm1, %v1368_v41, 0.0  ;;  %v1374_v51 = vld [vmem:[%s2552_s5 + $0x78] sm:$0xff]  ;;  %v1400_v54 = vadd.f32 %v1399_v47, %v1398_v40  ;;  %v1395_v58 = vadd.f32 %v1394_v56, %v1393_v46 }
 0x138   :  { %v1372_v50 = vld [vmem:[%s2552_s5 + $0x68] sm:$0xff]  ;;  %v1381_v52 = vadd.f32 %v1380_v48, %v1379_v44  ;;  %v1386_v53 = vadd.f32 %v1385_v49, %v1384_v45  ;;  %v1401_v59 = vsel %vm355_vm1, %v1374_v51, 0.0 }
 0x139   :  { %v1387_v55 = vsel %vm355_vm1, %v1372_v50, 0.0  ;;  %v1402_v60 = vadd.f32 %v1401_v59, %v1400_v54  ;;  %v1406_v0 = vsel %vm355_vm1, %v1395_v58, 0.0 }
 0x13a   :  { %v1388_v57 = vadd.f32 %v1387_v55, %v1386_v53  ;;  %v1403_v61 = vsel %vm355_vm1, %v1381_v52, 0.0 }
 0x13b   :  { %v1408_v2 = vsel %vm355_vm1, %v1402_v60, 0.0 }
 0x13c   :  { %v1404_v62 = vsel %vm355_vm1, %v1388_v57, 0.0 }
 0x13d   :  { %v1405_v63 = vadd.f32 %v1404_v62, %v1403_v61 }
 0x13f   :  { %v1407_v1 = vadd.f32 %v1406_v0, %v1405_v63 }
 0x141   :  { %v1409_v3 = vadd.f32 %v1408_v2, %v1407_v1 }
 0x143   :  { %v1410_v4 = vrot.slane %v1409_v3, 4 }
 0x145   :  { %v1411_v5 = vadd.f32 %v1410_v4, %v1409_v3 }
 0x147   :  { %v1412_v6 = vrot.slane %v1411_v5, 2 }
 0x149   :  { %v1413_v7 = vadd.f32 %v1412_v6, %v1411_v5 }
 0x14b   :  { %v1414_v8 = vrot.slane %v1413_v7, 1 }
 0x14d   :  { %v1415_v9 = vadd.f32 %v1414_v8, %v1413_v7 }
 0x14f   :  { %v1416_v10 = vmul.f32 0.0078125, %v1415_v9 }
 0x151   :  { %v2374_v11 = vsub.f32 %v1359_v17, %v1416_v10  ;;  %v2376_v12 = vsub.f32 %v1360_v23, %v1416_v10  ;;  %v2379_v13 = vsub.f32 %v2270_v14, %v1416_v10  ;;  %v2382_v15 = vsub.f32 %v2286_v18, %v1416_v10 }
 0x152   :  { %v2384_v16 = vsub.f32 %v1364_v24, %v1416_v10  ;;  %v2387_v22 = vsub.f32 %v2296_v20, %v1416_v10  ;;  %v2390_v25 = vsub.f32 %v2291_v19, %v1416_v10  ;;  %v2393_v26 = vsub.f32 %v2301_v21, %v1416_v10 }
 0x153   :  { %v2395_v17 = vsub.f32 %v1367_v34, %v1416_v10  ;;  %v2397_v23 = vsub.f32 %v1368_v41, %v1416_v10  ;;  %v2399_v14 = vsub.f32 %v1369_v31, %v1416_v10  ;;  %v2401_v27 = vsub.f32 %v1370_v38, %v1416_v10 }
 0x154   :  { %v2403_v18 = vsub.f32 %v1371_v42, %v1416_v10  ;;  %v2405_v24 = vsub.f32 %v1372_v50, %v1416_v10  ;;  %v2407_v20 = vsub.f32 %v1373_v43, %v1416_v10  ;;  %v1433_v19 = vmul.f32 %v2374_v11, %v2374_v11 }
 0x155   :  { %v1434_v21 = vmul.f32 %v2376_v12, %v2376_v12  ;;  %v2413_v28 = vsub.f32 %v1374_v51, %v1416_v10  ;;  %v1435_v29 = vmul.f32 %v2379_v13, %v2379_v13  ;;  %v1437_v30 = vmul.f32 %v2382_v15, %v2382_v15 }
 0x156   :  { %v1438_v31 = vmul.f32 %v2384_v16, %v2384_v16  ;;  %v1436_v32 = vmul.f32 %v2387_v22, %v2387_v22  ;;  %v1439_v33 = vmul.f32 %v2390_v25, %v2390_v25  ;;  %v1440_v34 = vmul.f32 %v2393_v26, %v2393_v26 }
 0x157   :  { %v1441_v35 = vmul.f32 %v2395_v17, %v2395_v17  ;;  %v1442_v36 = vmul.f32 %v2397_v23, %v2397_v23  ;;  %v1443_v37 = vmul.f32 %v2399_v14, %v2399_v14  ;;  %v1444_v38 = vmul.f32 %v2401_v27, %v2401_v27 }
 0x158   :  { %v1445_v39 = vmul.f32 %v2403_v18, %v2403_v18  ;;  %v1446_v40 = vmul.f32 %v2405_v24, %v2405_v24  ;;  %v1449_v41 = vsel %vm355_vm1, %v1433_v19, 0.0  ;;  %v1450_v42 = vsel %vm355_vm1, %v1437_v30, 0.0 }
 0x159   :  { %v1456_v43 = vsel %vm355_vm1, %v1434_v21, 0.0  ;;  %v1447_v44 = vmul.f32 %v2407_v20, %v2407_v20  ;;  %v1448_v45 = vmul.f32 %v2413_v28, %v2413_v28  ;;  %v1451_v46 = vadd.f32 %v1450_v42, %v1449_v41 }
 0x15a   :  { %v1457_v47 = vsel %vm355_vm1, %v1438_v31, 0.0  ;;  %v1452_v48 = vsel %vm355_vm1, %v1441_v35, 0.0  ;;  %v1463_v50 = vsel %vm355_vm1, %v1435_v29, 0.0  ;;  %v1464_v51 = vsel %vm355_vm1, %v1439_v33, 0.0 }
 0x15b   :  { %v1458_v49 = vadd.f32 %v1457_v47, %v1456_v43  ;;  %v1453_v52 = vadd.f32 %v1452_v48, %v1451_v46  ;;  %v1454_v53 = vsel %vm355_vm1, %v1445_v39, 0.0  ;;  %v1459_v54 = vsel %vm355_vm1, %v1442_v36, 0.0  ;;  %v1774_v47 = vld [vmem:[%s2553_s3] ss:$0 sm:$0xff] }
 0x15c   :  { %v1465_v55 = vadd.f32 %v1464_v51, %v1463_v50  ;;  %v1466_v57 = vsel %vm355_vm1, %v1443_v37, 0.0  ;;  %v1470_v58 = vsel %vm355_vm1, %v1436_v32, 0.0  ;;  %v1471_v59 = vsel %vm355_vm1, %v1440_v34, 0.0 }
 0x15d   :  { %v1460_v56 = vadd.f32 %v1459_v54, %v1458_v49  ;;  %v1455_v60 = vadd.f32 %v1454_v53, %v1453_v52  ;;  %v1461_v61 = vsel %vm355_vm1, %v1446_v40, 0.0  ;;  %v1472_v63 = vadd.f32 %v1471_v59, %v1470_v58 }
 0x15e   :  { %v1467_v62 = vadd.f32 %v1466_v57, %v1465_v55  ;;  %v1468_v1 = vsel %vm355_vm1, %v1447_v44, 0.0  ;;  %v1473_v2 = vsel %vm355_vm1, %v1444_v38, 0.0  ;;  %v1475_v6 = vsel %vm355_vm1, %v1448_v45, 0.0 }
 0x15f   :  { %v1462_v0 = vadd.f32 %v1461_v61, %v1460_v56  ;;  %v1474_v4 = vadd.f32 %v1473_v2, %v1472_v63  ;;  %v1477_v5 = vsel %vm355_vm1, %v1455_v60, 0.0 }
 0x160   :  { %v1469_v3 = vadd.f32 %v1468_v1, %v1467_v62 }
 0x161   :  { %v1478_v7 = vsel %vm355_vm1, %v1462_v0, 0.0  ;;  %v1476_v8 = vadd.f32 %v1475_v6, %v1474_v4 }
 0x162   :  { %v1479_v9 = vadd.f32 %v1478_v7, %v1477_v5  ;;  %v1480_v10 = vsel %vm355_vm1, %v1469_v3, 0.0 }
 0x163   :  { %v1482_v21 = vsel %vm355_vm1, %v1476_v8, 0.0 }
 0x164   :  { %v1481_v19 = vadd.f32 %v1480_v10, %v1479_v9 }
 0x166   :  { %v1483_v29 = vadd.f32 %v1482_v21, %v1481_v19 }
 0x168   :  { %v1484_v30 = vrot.slane %v1483_v29, 4 }
 0x16a   :  { %v1485_v31 = vadd.f32 %v1484_v30, %v1483_v29 }
 0x16c   :  { %v1486_v32 = vrot.slane %v1485_v31, 2 }
 0x16e   :  { %v1487_v33 = vadd.f32 %v1486_v32, %v1485_v31 }
 0x170   :  { %v1488_v34 = vrot.slane %v1487_v33, 1 }
 0x172   :  { %v1489_v35 = vadd.f32 %v1488_v34, %v1487_v33 }
 0x174   :  { %v1490_v36 = vmul.f32 0.0078125, %v1489_v35 }
 0x176   :  { %v1491_v37 = vadd.f32 1e-05, %v1490_v36 }
 0x178   :  { %2016 = vrsqrt.f32 %v1491_v37 }
 0x182   :  { %v2017_v38 = vpop.eup %2016 }
 0x183   :  { %v1493_v39 = vmul.f32 %v2017_v38, %v2374_v11  ;;  %v1494_v40 = vmul.f32 %v2017_v38, %v2376_v12  ;;  %v1495_v41 = vmul.f32 %v2017_v38, %v2379_v13  ;;  %v1496_v42 = vmul.f32 %v2017_v38, %v2387_v22 }
 0x184   :  { %v1497_v43 = vmul.f32 %v2017_v38, %v2382_v15  ;;  %v1498_v44 = vmul.f32 %v2017_v38, %v2384_v16  ;;  %v1499_v45 = vmul.f32 %v2017_v38, %v2390_v25  ;;  %v1500_v46 = vmul.f32 %v2017_v38, %v2393_v26 }
 0x185   :  { %v1501_v11 = vmul.f32 %v2017_v38, %v2395_v17  ;;  %v1502_v12 = vmul.f32 %v2017_v38, %v2397_v23  ;;  %v1503_v13 = vmul.f32 %v2017_v38, %v2399_v14  ;;  %v1504_v22 = vmul.f32 %v2017_v38, %v2401_v27  ;;  %v1775_v14 = vld [vmem:[%s2554_s4] ss:$0 sm:$0xff] }
 0x186   :  { %v1505_v15 = vmul.f32 %v2017_v38, %v2403_v18  ;;  %v1506_v16 = vmul.f32 %v2017_v38, %v2405_v24  ;;  %v1507_v25 = vmul.f32 %v2017_v38, %v2407_v20  ;;  %v1508_v26 = vmul.f32 %v2017_v38, %v2413_v28 }
 0x187   :  { %v1516_v48 = vmul.f32 %v1774_v47, %v1493_v39  ;;  %v1517_v49 = vmul.f32 %v1774_v47, %v1494_v40  ;;  %v1518_v50 = vmul.f32 %v1774_v47, %v1495_v41  ;;  %v1519_v51 = vmul.f32 %v1774_v47, %v1496_v42 }
 0x188   :  { %v1520_v52 = vmul.f32 %v1774_v47, %v1497_v43  ;;  %v1521_v17 = vmul.f32 %v1774_v47, %v1498_v44  ;;  %v1522_v53 = vmul.f32 %v1774_v47, %v1499_v45  ;;  %v1523_v23 = vmul.f32 %v1774_v47, %v1500_v46 }
 0x189   :  { %v1524_v27 = vmul.f32 %v1774_v47, %v1501_v11  ;;  %v1525_v18 = vmul.f32 %v1774_v47, %v1502_v12  ;;  %v1526_v54 = vmul.f32 %v1774_v47, %v1503_v13  ;;  %v1527_v24 = vmul.f32 %v1774_v47, %v1504_v22 }
 0x18a   :  { %v1528_v55 = vmul.f32 %v1774_v47, %v1505_v15  ;;  %v1529_v20 = vmul.f32 %v1774_v47, %v1506_v16  ;;  %v1530_v56 = vmul.f32 %v1774_v47, %v1507_v25  ;;  %v1531_v28 = vmul.f32 %v1774_v47, %v1508_v26 }
 0x18b   :  { %v1539_v57 = vadd.f32 %v1775_v14, %v1516_v48  ;;  %v1540_v58 = vadd.f32 %v1775_v14, %v1517_v49  ;;  %v1541_v59 = vadd.f32 %v1775_v14, %v1518_v50  ;;  %v1542_v60 = vadd.f32 %v1775_v14, %v1519_v51 }
 0x18c   :  { %v1543_v61 = vadd.f32 %v1775_v14, %v1520_v52  ;;  %v1544_v62 = vadd.f32 %v1775_v14, %v1521_v17  ;;  %v1545_v63 = vadd.f32 %v1775_v14, %v1522_v53  ;;  %v1546_v0 = vadd.f32 %v1775_v14, %v1523_v23 }
 0x18d   :  { %v1547_v1 = vadd.f32 %v1775_v14, %v1524_v27  ;;  %v1548_v2 = vadd.f32 %v1775_v14, %v1525_v18  ;;  %v1549_v3 = vadd.f32 %v1775_v14, %v1526_v54  ;;  %v1550_v4 = vadd.f32 %v1775_v14, %v1527_v24 }
 0x18e   :  { %v1551_v5 = vadd.f32 %v1775_v14, %v1528_v55  ;;  %v1552_v6 = vadd.f32 %v1775_v14, %v1529_v20  ;;  %v1553_v7 = vadd.f32 %v1775_v14, %v1530_v56  ;;  %v1554_v8 = vadd.f32 %v1775_v14, %v1531_v28 }
 0x18f   :  { %v1555_v9 = vmax.f32 %v1539_v57, 0.0  ;;  %v1556_v10 = vmax.f32 %v1540_v58, 0.0  ;;  %v1557_v19 = vmax.f32 %v1541_v59, 0.0  ;;  %v1558_v21 = vmax.f32 %v1542_v60, 0.0 }
 0x190   :  { %v1559_v29 = vmax.f32 %v1543_v61, 0.0  ;;  %v1560_v30 = vmax.f32 %v1544_v62, 0.0  ;;  %v1561_v31 = vmax.f32 %v1545_v63, 0.0  ;;  %v1562_v32 = vmax.f32 %v1546_v0, 0.0 }
 0x191   :  { %v1563_v33 = vmax.f32 %v1547_v1, 0.0  ;;  %v1564_v34 = vmax.f32 %v1548_v2, 0.0  ;;  %v1565_v35 = vmax.f32 %v1549_v3, 0.0  ;;  %v1566_v36 = vmax.f32 %v1550_v4, 0.0  ;;  %1571 = vst.msk [vmem:[%s2552_s5] sm:$0xff] %vm355_vm1, %v1555_v9  ;;  %1572 = vst.msk [vmem:[%s2552_s5 + $0x8] sm:$0xff] %vm355_vm1, %v1556_v10 }
 0x192   :  { %1573 = vst.msk [vmem:[%s2552_s5 + $0x10] sm:$0xff] %vm355_vm1, %v1557_v19  ;;  %1574 = vst.msk [vmem:[%s2552_s5 + $0x18] sm:$0xff] %vm355_vm1, %v1558_v21  ;;  %v1567_v37 = vmax.f32 %v1551_v5, 0.0  ;;  %v1568_v38 = vmax.f32 %v1552_v6, 0.0  ;;  %v1569_v39 = vmax.f32 %v1553_v7, 0.0  ;;  %v1570_v40 = vmax.f32 %v1554_v8, 0.0 }
 0x193   :  { %1575 = vst.msk [vmem:[%s2552_s5 + $0x20] sm:$0xff] %vm355_vm1, %v1559_v29  ;;  %1576 = vst.msk [vmem:[%s2552_s5 + $0x28] sm:$0xff] %vm355_vm1, %v1560_v30 }
 0x194   :  { %1577 = vst.msk [vmem:[%s2552_s5 + $0x30] sm:$0xff] %vm355_vm1, %v1561_v31  ;;  %1578 = vst.msk [vmem:[%s2552_s5 + $0x38] sm:$0xff] %vm355_vm1, %v1562_v32 }
 0x195   :  { %1579 = vst.msk [vmem:[%s2552_s5 + $0x40] sm:$0xff] %vm355_vm1, %v1563_v33  ;;  %1580 = vst.msk [vmem:[%s2552_s5 + $0x48] sm:$0xff] %vm355_vm1, %v1564_v34 }
 0x196   :  { %1581 = vst.msk [vmem:[%s2552_s5 + $0x50] sm:$0xff] %vm355_vm1, %v1565_v35  ;;  %1582 = vst.msk [vmem:[%s2552_s5 + $0x58] sm:$0xff] %vm355_vm1, %v1566_v36 }
 0x197   :  { %1583 = vst.msk [vmem:[%s2552_s5 + $0x60] sm:$0xff] %vm355_vm1, %v1567_v37  ;;  %1584 = vst.msk [vmem:[%s2552_s5 + $0x68] sm:$0xff] %vm355_vm1, %v1568_v38 }
 0x198   :  { %1585 = vst.msk [vmem:[%s2552_s5 + $0x70] sm:$0xff] %vm355_vm1, %v1569_v39  ;;  %1586 = vst.msk [vmem:[%s2552_s5 + $0x78] sm:$0xff] %vm355_vm1, %v1570_v40 }

// kernel: vae_forward.13
= control target key start
LH: loop header
LB: loop body
LE: loop exit
PB: predicated region body
PF: predicated region fallthrough
CT: control target
= control target key end

     0   :  { %vm117_vm0 = vcmask 1043456   ;;  %vm92_vm1 = vcmask 64512   ;;  %vm898_vm2 = vcmask 31744   ;;  %s6231_s1 = inlined_call_operand.vmem [shape: bf16[16,8,4], index: 1, kind: input, shape index: {}]   ;;  %s6232_s0 = inlined_call_operand.vmem [shape: bf16[16,128,8], index: 0, kind: input, shape index: {}]   ;;  %s6233_s2 = inlined_call_operand.vmem [shape: f32[1,4], index: 2, kind: input, shape index: {}]   ;;  %s6234_s3 = inlined_call_operand.vmem [shape: f32[4,128,4], index: 3, kind: output, shape index: {}]  }
   0x1   :  { %v3614_v0 = vld [vmem:[%s6231_s1 + $0x4] sm:$0xf]  ;;  %v3763_v1 = vld [vmem:[%s6231_s1 + $0x14] sm:$0xf]  ;;  %v4864_v6 = vld [vmem:[%s6232_s0 + $0x48] sm:$0xff]  }
   0x2   :  { %4846 = vmatprep.subr.msk.bf16.mxu0 %vm117_vm0, %v3614_v0  ;;  %4850 = vmatprep.subr.msk.bf16.mxu1 %vm117_vm0, %v3763_v1  ;;  %v119_v2 = vsel %vm117_vm0, %v3614_v0, 0  ;;  %v1018_v3 = vsel %vm117_vm0, %v3763_v1, 0  ;;  %v4862_v4 = vld [vmem:[%s6232_s0 + $0x40] sm:$0xff]   ;;  %v4865_v8 = vld [vmem:[%s6232_s0 + $0x148] sm:$0xff]   ;;  %v3746_v10 = vld [vmem:[%s6231_s1 + $0x10] sm:$0xf] }
   0x3   :  { %v4863_v5 = vld [vmem:[%s6232_s0 + $0x140] sm:$0xff]   ;;  %4367 = vmatpush3.bf16.msra.mxu0 %v119_v2  ;;  %4439 = vmatpush3.bf16.msra.mxu1 %v1018_v3  ;;  %v1182_v11 = vsel %vm117_vm0, %v3746_v10, 0  ;;  %v4866_v12 = vld [vmem:[%s6232_s0 + $0x50] sm:$0xff]   ;;  %v4868_v14 = vld [vmem:[%s6232_s0 + $0x58] sm:$0xff]  }
   0x4   :  { %4368 = vmatprep.mubr.msk.bf16.mxu0 %vm92_vm1, %v4862_v4  ;;  %4440 = vmatprep.mubr.msk.bf16.mxu1 %vm92_vm1, %v4863_v5  ;;  %v32_v7 = vld [vmem:[%s6231_s1] sm:$0xf]  ;;  %v4867_v13 = vld [vmem:[%s6232_s0 + $0x150] sm:$0xff]   ;;  %v4869_v15 = vld [vmem:[%s6232_s0 + $0x158] sm:$0xff]  }
   0x5   :  { %4847 = vmatprep.subr.msk.bf16.mxu0 %vm117_vm0, %v32_v7  ;;  %v283_v9 = vsel %vm117_vm0, %v32_v7, 0  ;;  %4851 = vmatprep.subr.msk.bf16.mxu1 %vm117_vm0, %v3746_v10  ;;  %v4870_v16 = vld [vmem:[%s6232_s0 + $0x60] sm:$0xff]   ;;  %v4872_v18 = vld [vmem:[%s6232_s0 + $0x68] sm:$0xff]   ;;  %v4874_v20 = vld [vmem:[%s6232_s0 + $0x70] sm:$0xff]  }
   0x6   :  { %4369 = vmatmul.mubr.msk.bf16.vlgmr.msra.gmra.mrb[0].mxu0 %vm92_vm1, %v4864_v6  ;;  %4441 = vmatmul.mubr.msk.bf16.vlgmr.msra.gmra.mrb[0].mxu1 %vm92_vm1, %v4865_v8  ;;  %v4871_v17 = vld [vmem:[%s6232_s0 + $0x160] sm:$0xff]   ;;  %v4873_v19 = vld [vmem:[%s6232_s0 + $0x168] sm:$0xff]   ;;  %v4875_v21 = vld [vmem:[%s6232_s0 + $0x170] sm:$0xff]  }
   0x7   :  { %4385 = vmatpush3.bf16.msra.mxu0 %v283_v9  ;;  %4457 = vmatpush3.bf16.msra.mxu1 %v1182_v11  ;;  %v3663_v22 = vld [vmem:[%s6231_s1 + $0x8] sm:$0xf]  ;;  %v3812_v23 = vld [vmem:[%s6231_s1 + $0x18] sm:$0xf]  ;;  %v4878_v26 = vld [vmem:[%s6232_s0] sm:$0xff]  }
   0x8   :  { %4372 = vmatprep.mubr.msk.bf16.mxu0 %vm92_vm1, %v4866_v12  ;;  %4444 = vmatprep.mubr.msk.bf16.mxu1 %vm92_vm1, %v4867_v13  ;;  %v4876_v24 = vld [vmem:[%s6232_s0 + $0x78] sm:$0xff]   ;;  %v4879_v27 = vld [vmem:[%s6232_s0 + $0x100] sm:$0xff]   ;;  %v4880_v28 = vld [vmem:[%s6232_s0 + $0x8] sm:$0xff]   ;;  %v466_v30 = vsel %vm117_vm0, %v3663_v22, 0  ;;  %v1365_v32 = vsel %vm117_vm0, %v3812_v23, 0 }
   0x9   :  { %4848 = vmatprep.subr.msk.bf16.mxu0 %vm117_vm0, %v3663_v22  ;;  %4852 = vmatprep.subr.msk.bf16.mxu1 %vm117_vm0, %v3812_v23  ;;  %v4877_v25 = vld [vmem:[%s6232_s0 + $0x178] sm:$0xff]   ;;  %v4881_v29 = vld [vmem:[%s6232_s0 + $0x108] sm:$0xff]   ;;  %v4882_v31 = vld [vmem:[%s6232_s0 + $0x10] sm:$0xff]  }
   0xa   :  { %v4883_v33 = vld [vmem:[%s6232_s0 + $0x110] sm:$0xff]   ;;  %v3696_v34 = vld [vmem:[%s6231_s1 + $0xc] sm:$0xf]  ;;  %v3845_v35 = vld [vmem:[%s6231_s1 + $0x1c] sm:$0xf] }
   0xb   :  { %v4884_v36 = vld [vmem:[%s6232_s0 + $0x18] sm:$0xff]   ;;  %v4886_v38 = vld [vmem:[%s6232_s0 + $0x20] sm:$0xff]   ;;  %v4888_v40 = vld [vmem:[%s6232_s0 + $0x28] sm:$0xff]   ;;  %v665_v50 = vsel %vm117_vm0, %v3696_v34, 0  ;;  %v1564_v52 = vsel %vm117_vm0, %v3845_v35, 0 }
   0xc   :  { %v4885_v37 = vld [vmem:[%s6232_s0 + $0x118] sm:$0xff]   ;;  %v4887_v39 = vld [vmem:[%s6232_s0 + $0x120] sm:$0xff]   ;;  %v4889_v41 = vld [vmem:[%s6232_s0 + $0x128] sm:$0xff]  }
   0xd   :  { %v4890_v42 = vld [vmem:[%s6232_s0 + $0x30] sm:$0xff]   ;;  %v4892_v44 = vld [vmem:[%s6232_s0 + $0x38] sm:$0xff]   ;;  %v4894_v46 = vld [vmem:[%s6232_s0 + $0x80] sm:$0xff]  }
   0xe   :  { %4373 = vmatmul.mubr.msk.bf16.gmra.mrb[4].mxu0 %vm92_vm1, %v4868_v14  ;;  %4445 = vmatmul.mubr.msk.bf16.gmra.mrb[4].mxu1 %vm92_vm1, %v4869_v15  ;;  %v4891_v43 = vld [vmem:[%s6232_s0 + $0x130] sm:$0xff]   ;;  %v4893_v45 = vld [vmem:[%s6232_s0 + $0x138] sm:$0xff]   ;;  %v4895_v47 = vld [vmem:[%s6232_s0 + $0x180] sm:$0xff]  }
   0xf   :  { %4376 = vmatprep.mubr.msk.bf16.mxu0 %vm92_vm1, %v4870_v16  ;;  %4448 = vmatprep.mubr.msk.bf16.mxu1 %vm92_vm1, %v4871_v17  ;;  %v4896_v48 = vld [vmem:[%s6232_s0 + $0x88] sm:$0xff]   ;;  %v4898_v51 = vld [vmem:[%s6232_s0 + $0x90] sm:$0xff]   ;;  %v3927_v54 = vld [vmem:[%s6231_s1 + $0x24] sm:$0xf] }
  0x10   :  { %v4897_v49 = vld [vmem:[%s6232_s0 + $0x188] sm:$0xff]   ;;  %v4899_v53 = vld [vmem:[%s6232_s0 + $0x190] sm:$0xff]   ;;  %v4900_v56 = vld [vmem:[%s6232_s0 + $0x98] sm:$0xff]   ;;  %v1911_v6 = vsel %vm117_vm0, %v3927_v54, 0 }
  0x11   :  { %v4091_v55 = vld [vmem:[%s6231_s1 + $0x34] sm:$0xf]  ;;  %v4901_v57 = vld [vmem:[%s6232_s0 + $0x198] sm:$0xff]   ;;  %v4902_v58 = vld [vmem:[%s6232_s0 + $0xa0] sm:$0xff]  }
  0x12   :  { %v4903_v59 = vld [vmem:[%s6232_s0 + $0x1a0] sm:$0xff]   ;;  %v4904_v60 = vld [vmem:[%s6232_s0 + $0xa8] sm:$0xff]   ;;  %v4906_v62 = vld [vmem:[%s6232_s0 + $0xb0] sm:$0xff]   ;;  %v2804_v8 = vsel %vm117_vm0, %v4091_v55, 0 }
  0x13   :  { %v4905_v61 = vld [vmem:[%s6232_s0 + $0x1a8] sm:$0xff]   ;;  %v4907_v63 = vld [vmem:[%s6232_s0 + $0x1b0] sm:$0xff]   ;;  %v4908_v0 = vld [vmem:[%s6232_s0 + $0xb8] sm:$0xff]  }
  0x14   :  { %v4909_v1 = vld [vmem:[%s6232_s0 + $0x1b8] sm:$0xff]   ;;  %v4910_v2 = vld [vmem:[%s6232_s0 + $0xc0] sm:$0xff]   ;;  %v4912_v4 = vld [vmem:[%s6232_s0 + $0xc8] sm:$0xff]  }
  0x15   :  { %v4911_v3 = vld [vmem:[%s6232_s0 + $0x1c0] sm:$0xff]   ;;  %v4913_v5 = vld [vmem:[%s6232_s0 + $0x1c8] sm:$0xff]   ;;  %v4914_v7 = vld [vmem:[%s6232_s0 + $0xd0] sm:$0xff]  }
  0x16   :  { %4377 = vmatmul.mubr.msk.bf16.gmra.mrb[8].mxu0 %vm92_vm1, %v4872_v18  ;;  %4449 = vmatmul.mubr.msk.bf16.gmra.mrb[8].mxu1 %vm92_vm1, %v4873_v19  ;;  %v4915_v9 = vld [vmem:[%s6232_s0 + $0x1d0] sm:$0xff]   ;;  %v3910_v10 = vld [vmem:[%s6231_s1 + $0x20] sm:$0xf]  ;;  %v4916_v12 = vld [vmem:[%s6232_s0 + $0xd8] sm:$0xff]  }
  0x17   :  { %4380 = vmatprep.mubr.msk.bf16.mxu0 %vm92_vm1, %v4874_v20  ;;  %4452 = vmatprep.mubr.msk.bf16.mxu1 %vm92_vm1, %v4875_v21  ;;  %v4074_v11 = vld [vmem:[%s6231_s1 + $0x30] sm:$0xf]  ;;  %v4917_v13 = vld [vmem:[%s6232_s0 + $0x1d8] sm:$0xff]   ;;  %v4918_v14 = vld [vmem:[%s6232_s0 + $0xe0] sm:$0xff]  }
  0x18   :  { %v4919_v15 = vld [vmem:[%s6232_s0 + $0x1e0] sm:$0xff]   ;;  %v4920_v16 = vld [vmem:[%s6232_s0 + $0xe8] sm:$0xff]   ;;  %v4922_v18 = vld [vmem:[%s6232_s0 + $0xf0] sm:$0xff]  }
  0x19   :  { %v4921_v17 = vld [vmem:[%s6232_s0 + $0x1e8] sm:$0xff]   ;;  %v4923_v19 = vld [vmem:[%s6232_s0 + $0x1f0] sm:$0xff]   ;;  %v4924_v20 = vld [vmem:[%s6232_s0 + $0xf8] sm:$0xff]  }
  0x1a   :  { %v4925_v21 = vld [vmem:[%s6232_s0 + $0x1f8] sm:$0xff]   ;;  %v4926_v22 = vld [vmem:[%s6232_s0 + $0x240] sm:$0xff]  }
  0x1b   :  { %v4927_v23 = vld [vmem:[%s6232_s0 + $0x340] sm:$0xff]  }
  0x1e   :  { %4381 = vmatmul.mubr.msk.bf16.gmra.mrb[12].mxu0 %vm92_vm1, %v4876_v24  ;;  %4453 = vmatmul.mubr.msk.bf16.gmra.mrb[12].mxu1 %vm92_vm1, %v4877_v25  ;;  %v4928_v24 = vld [vmem:[%s6232_s0 + $0x248] sm:$0xff]  }
  0x1f   :  { %4386 = vmatprep.mubr.msk.bf16.mxu0 %vm92_vm1, %v4878_v26  ;;  %4458 = vmatprep.mubr.msk.bf16.mxu1 %vm92_vm1, %v4879_v27  ;;  %v4929_v25 = vld [vmem:[%s6232_s0 + $0x348] sm:$0xff]   ;;  %v2075_v26 = vsel %vm117_vm0, %v3910_v10, 0  ;;  %v4930_v27 = vld [vmem:[%s6232_s0 + $0x250] sm:$0xff]  }
  0x26   :  { %4387 = vmatmul.mubr.msk.bf16.vlgmr.msra.gmra.mrb[0].mxu0 %vm92_vm1, %v4880_v28  ;;  %4459 = vmatmul.mubr.msk.bf16.vlgmr.msra.gmra.mrb[0].mxu1 %vm92_vm1, %v4881_v29  ;;  %v2968_v28 = vsel %vm117_vm0, %v4074_v11, 0  ;;  %v4931_v29 = vld [vmem:[%s6232_s0 + $0x350] sm:$0xff]  }
  0x27   :  { %4403 = vmatpush3.bf16.msra.mxu0 %v466_v30  ;;  %4475 = vmatpush3.bf16.msra.mxu1 %v1365_v32  ;;  %v3976_v30 = vld [vmem:[%s6231_s1 + $0x28] sm:$0xf]  ;;  %v4932_v32 = vld [vmem:[%s6232_s0 + $0x258] sm:$0xff]  }
  0x28   :  { %4390 = vmatprep.mubr.msk.bf16.mxu0 %vm92_vm1, %v4882_v31  ;;  %4462 = vmatprep.mubr.msk.bf16.mxu1 %vm92_vm1, %v4883_v33  ;;  %v4140_v31 = vld [vmem:[%s6231_s1 + $0x38] sm:$0xf] }
  0x29   :  { %4849 = vmatprep.subr.msk.bf16.mxu0 %vm117_vm0, %v3696_v34  ;;  %4853 = vmatprep.subr.msk.bf16.mxu1 %vm117_vm0, %v3845_v35  ;;  %v4933_v33 = vld [vmem:[%s6232_s0 + $0x358] sm:$0xff]   ;;  %v4934_v34 = vld [vmem:[%s6232_s0 + $0x260] sm:$0xff]  }
  0x2a   :  { %v4935_v35 = vld [vmem:[%s6232_s0 + $0x360] sm:$0xff]  }
  0x2e   :  { %4391 = vmatmul.mubr.msk.bf16.gmra.mrb[4].mxu0 %vm92_vm1, %v4884_v36  ;;  %4463 = vmatmul.mubr.msk.bf16.gmra.mrb[4].mxu1 %vm92_vm1, %v4885_v37  ;;  %v4936_v36 = vld [vmem:[%s6232_s0 + $0x268] sm:$0xff]  }
  0x2f   :  { %4394 = vmatprep.mubr.msk.bf16.mxu0 %vm92_vm1, %v4886_v38  ;;  %4466 = vmatprep.mubr.msk.bf16.mxu1 %vm92_vm1, %v4887_v39  ;;  %v4937_v37 = vld [vmem:[%s6232_s0 + $0x368] sm:$0xff]   ;;  %v4938_v38 = vld [vmem:[%s6232_s0 + $0x270] sm:$0xff]  }
  0x30   :  { %v4939_v39 = vld [vmem:[%s6232_s0 + $0x370] sm:$0xff]  }
  0x36   :  { %4395 = vmatmul.mubr.msk.bf16.gmra.mrb[8].mxu0 %vm92_vm1, %v4888_v40  ;;  %4467 = vmatmul.mubr.msk.bf16.gmra.mrb[8].mxu1 %vm92_vm1, %v4889_v41  ;;  %v4940_v40 = vld [vmem:[%s6232_s0 + $0x278] sm:$0xff]  }
  0x37   :  { %4398 = vmatprep.mubr.msk.bf16.mxu0 %vm92_vm1, %v4890_v42  ;;  %4470 = vmatprep.mubr.msk.bf16.mxu1 %vm92_vm1, %v4891_v43  ;;  %v4941_v41 = vld [vmem:[%s6232_s0 + $0x378] sm:$0xff]   ;;  %v4942_v42 = vld [vmem:[%s6232_s0 + $0x200] sm:$0xff]  }
  0x38   :  { %v4943_v43 = vld [vmem:[%s6232_s0 + $0x300] sm:$0xff]  }
  0x3e   :  { %4399 = vmatmul.mubr.msk.bf16.gmra.mrb[12].mxu0 %vm92_vm1, %v4892_v44  ;;  %4471 = vmatmul.mubr.msk.bf16.gmra.mrb[12].mxu1 %vm92_vm1, %v4893_v45  ;;  %v4944_v44 = vld [vmem:[%s6232_s0 + $0x208] sm:$0xff]  }
  0x3f   :  { %4404 = vmatprep.mubr.msk.bf16.mxu0 %vm92_vm1, %v4894_v46  ;;  %4476 = vmatprep.mubr.msk.bf16.mxu1 %vm92_vm1, %v4895_v47  ;;  %v4945_v45 = vld [vmem:[%s6232_s0 + $0x308] sm:$0xff]   ;;  %v2258_v46 = vsel %vm117_vm0, %v3976_v30, 0  ;;  %v4946_v47 = vld [vmem:[%s6232_s0 + $0x210] sm:$0xff]  }
  0x46   :  { %4405 = vmatmul.mubr.msk.bf16.vlgmr.msra.gmra.mrb[0].mxu0 %vm92_vm1, %v4896_v48  ;;  %4477 = vmatmul.mubr.msk.bf16.vlgmr.msra.gmra.mrb[0].mxu1 %vm92_vm1, %v4897_v49  ;;  %v3151_v48 = vsel %vm117_vm0, %v4140_v31, 0  ;;  %v4947_v49 = vld [vmem:[%s6232_s0 + $0x310] sm:$0xff]  }
  0x47   :  { %4421 = vmatpush3.bf16.msra.mxu0 %v665_v50  ;;  %4493 = vmatpush3.bf16.msra.mxu1 %v1564_v52  ;;  %v4009_v50 = vld [vmem:[%s6231_s1 + $0x2c] sm:$0xf]  ;;  %v4948_v52 = vld [vmem:[%s6232_s0 + $0x218] sm:$0xff]  }
  0x48   :  { %4408 = vmatprep.mubr.msk.bf16.mxu0 %vm92_vm1, %v4898_v51  ;;  %4480 = vmatprep.mubr.msk.bf16.mxu1 %vm92_vm1, %v4899_v53  ;;  %v4173_v51 = vld [vmem:[%s6231_s1 + $0x3c] sm:$0xf] }
  0x49   :  { %4854 = vmatprep.subr.msk.bf16.mxu0 %vm117_vm0, %v3927_v54  ;;  %4858 = vmatprep.subr.msk.bf16.mxu1 %vm117_vm0, %v4091_v55  ;;  %v4949_v53 = vld [vmem:[%s6232_s0 + $0x318] sm:$0xff]   ;;  %v4950_v54 = vld [vmem:[%s6232_s0 + $0x220] sm:$0xff]  }
  0x4a   :  { %v4951_v55 = vld [vmem:[%s6232_s0 + $0x320] sm:$0xff]  }
  0x4e   :  { %4409 = vmatmul.mubr.msk.bf16.gmra.mrb[4].mxu0 %vm92_vm1, %v4900_v56  ;;  %4481 = vmatmul.mubr.msk.bf16.gmra.mrb[4].mxu1 %vm92_vm1, %v4901_v57  ;;  %v4952_v56 = vld [vmem:[%s6232_s0 + $0x228] sm:$0xff]  }
  0x4f   :  { %4412 = vmatprep.mubr.msk.bf16.mxu0 %vm92_vm1, %v4902_v58  ;;  %4484 = vmatprep.mubr.msk.bf16.mxu1 %vm92_vm1, %v4903_v59  ;;  %v4953_v57 = vld [vmem:[%s6232_s0 + $0x328] sm:$0xff]   ;;  %v4954_v58 = vld [vmem:[%s6232_s0 + $0x230] sm:$0xff]  }
  0x50   :  { %v4955_v59 = vld [vmem:[%s6232_s0 + $0x330] sm:$0xff]  }
  0x56   :  { %4413 = vmatmul.mubr.msk.bf16.gmra.mrb[8].mxu0 %vm92_vm1, %v4904_v60  ;;  %4485 = vmatmul.mubr.msk.bf16.gmra.mrb[8].mxu1 %vm92_vm1, %v4905_v61  ;;  %v4956_v60 = vld [vmem:[%s6232_s0 + $0x238] sm:$0xff]  }
  0x57   :  { %4416 = vmatprep.mubr.msk.bf16.mxu0 %vm92_vm1, %v4906_v62  ;;  %4488 = vmatprep.mubr.msk.bf16.mxu1 %vm92_vm1, %v4907_v63  ;;  %v4957_v61 = vld [vmem:[%s6232_s0 + $0x338] sm:$0xff]   ;;  %v4958_v62 = vld [vmem:[%s6232_s0 + $0x280] sm:$0xff]  }
  0x58   :  { %v4959_v63 = vld [vmem:[%s6232_s0 + $0x380] sm:$0xff]  }
  0x5e   :  { %4417 = vmatmul.mubr.msk.bf16.gmra.mrb[12].mxu0 %vm92_vm1, %v4908_v0  ;;  %4489 = vmatmul.mubr.msk.bf16.gmra.mrb[12].mxu1 %vm92_vm1, %v4909_v1  ;;  %v4960_v0 = vld [vmem:[%s6232_s0 + $0x288] sm:$0xff]  }
  0x5f   :  { %4422 = vmatprep.mubr.msk.bf16.mxu0 %vm92_vm1, %v4910_v2  ;;  %4494 = vmatprep.mubr.msk.bf16.mxu1 %vm92_vm1, %v4911_v3  ;;  %v4961_v1 = vld [vmem:[%s6232_s0 + $0x388] sm:$0xff]   ;;  %v2457_v2 = vsel %vm117_vm0, %v4009_v50, 0  ;;  %v4962_v3 = vld [vmem:[%s6232_s0 + $0x290] sm:$0xff]  }
  0x66   :  { %4423 = vmatmul.mubr.msk.bf16.vlgmr.msra.gmra.mrb[0].mxu0 %vm92_vm1, %v4912_v4  ;;  %4495 = vmatmul.mubr.msk.bf16.vlgmr.msra.gmra.mrb[0].mxu1 %vm92_vm1, %v4913_v5  ;;  %v3350_v4 = vsel %vm117_vm0, %v4173_v51, 0  ;;  %v4963_v5 = vld [vmem:[%s6232_s0 + $0x390] sm:$0xff]  }
  0x67   :  { %4511 = vmatpush3.bf16.msra.mxu0 %v1911_v6  ;;  %4583 = vmatpush3.bf16.msra.mxu1 %v2804_v8  ;;  %v4964_v6 = vld [vmem:[%s6232_s0 + $0x298] sm:$0xff]   ;;  %v4966_v8 = vld [vmem:[%s6232_s0 + $0x2a0] sm:$0xff]  }
  0x68   :  { %4426 = vmatprep.mubr.msk.bf16.mxu0 %vm92_vm1, %v4914_v7  ;;  %4498 = vmatprep.mubr.msk.bf16.mxu1 %vm92_vm1, %v4915_v9  ;;  %v4965_v7 = vld [vmem:[%s6232_s0 + $0x398] sm:$0xff]   ;;  %v4967_v9 = vld [vmem:[%s6232_s0 + $0x3a0] sm:$0xff]  }
  0x69   :  { %4855 = vmatprep.subr.msk.bf16.mxu0 %vm117_vm0, %v3910_v10  ;;  %4859 = vmatprep.subr.msk.bf16.mxu1 %vm117_vm0, %v4074_v11  ;;  %v4968_v10 = vld [vmem:[%s6232_s0 + $0x2a8] sm:$0xff]  }
  0x6a   :  { %v4969_v11 = vld [vmem:[%s6232_s0 + $0x3a8] sm:$0xff]  }
  0x6e   :  { %4427 = vmatmul.mubr.msk.bf16.gmra.mrb[4].mxu0 %vm92_vm1, %v4916_v12  ;;  %4499 = vmatmul.mubr.msk.bf16.gmra.mrb[4].mxu1 %vm92_vm1, %v4917_v13  ;;  %v4970_v12 = vld [vmem:[%s6232_s0 + $0x2b0] sm:$0xff]  }
  0x6f   :  { %4430 = vmatprep.mubr.msk.bf16.mxu0 %vm92_vm1, %v4918_v14  ;;  %4502 = vmatprep.mubr.msk.bf16.mxu1 %vm92_vm1, %v4919_v15  ;;  %v4971_v13 = vld [vmem:[%s6232_s0 + $0x3b0] sm:$0xff]   ;;  %v4972_v14 = vld [vmem:[%s6232_s0 + $0x2b8] sm:$0xff]  }
  0x70   :  { %v4973_v15 = vld [vmem:[%s6232_s0 + $0x3b8] sm:$0xff]  }
  0x76   :  { %4431 = vmatmul.mubr.msk.bf16.gmra.mrb[8].mxu0 %vm92_vm1, %v4920_v16  ;;  %4503 = vmatmul.mubr.msk.bf16.gmra.mrb[8].mxu1 %vm92_vm1, %v4921_v17  ;;  %v4974_v16 = vld [vmem:[%s6232_s0 + $0x2c0] sm:$0xff]  }
  0x77   :  { %4434 = vmatprep.mubr.msk.bf16.mxu0 %vm92_vm1, %v4922_v18  ;;  %4506 = vmatprep.mubr.msk.bf16.mxu1 %vm92_vm1, %v4923_v19  ;;  %v4975_v17 = vld [vmem:[%s6232_s0 + $0x3c0] sm:$0xff]   ;;  %v4976_v18 = vld [vmem:[%s6232_s0 + $0x2c8] sm:$0xff]  }
  0x78   :  { %v4977_v19 = vld [vmem:[%s6232_s0 + $0x3c8] sm:$0xff]  }
  0x7e   :  { %4435 = vmatmul.mubr.msk.bf16.gmra.mrb[12].mxu0 %vm92_vm1, %v4924_v20  ;;  %4507 = vmatmul.mubr.msk.bf16.gmra.mrb[12].mxu1 %vm92_vm1, %v4925_v21  ;;  %v4978_v20 = vld [vmem:[%s6232_s0 + $0x2d0] sm:$0xff]  }
  0x7f   :  { %4512 = vmatprep.mubr.msk.bf16.mxu0 %vm92_vm1, %v4926_v22  ;;  %4584 = vmatprep.mubr.msk.bf16.mxu1 %vm92_vm1, %v4927_v23  ;;  %v4979_v21 = vld [vmem:[%s6232_s0 + $0x3d0] sm:$0xff]   ;;  %v4980_v22 = vld [vmem:[%s6232_s0 + $0x2d8] sm:$0xff]  }
  0x80   :  { %v4981_v23 = vld [vmem:[%s6232_s0 + $0x3d8] sm:$0xff]  }
  0x86   :  { %4513 = vmatmul.mubr.msk.bf16.vlgmr.msra.gmra.mrb[16].mxu0 %vm92_vm1, %v4928_v24  ;;  %4585 = vmatmul.mubr.msk.bf16.vlgmr.msra.gmra.mrb[16].mxu1 %vm92_vm1, %v4929_v25  ;;  %v4982_v24 = vld [vmem:[%s6232_s0 + $0x2e0] sm:$0xff]  }
  0x87   :  { %4529 = vmatpush3.bf16.msra.mxu0 %v2075_v26  ;;  %4601 = vmatpush3.bf16.msra.mxu1 %v2968_v28  ;;  %v4983_v25 = vld [vmem:[%s6232_s0 + $0x3e0] sm:$0xff]   ;;  %v4984_v26 = vld [vmem:[%s6232_s0 + $0x2e8] sm:$0xff]   ;;  %v4986_v28 = vld [vmem:[%s6232_s0 + $0x2f0] sm:$0xff]  }
  0x88   :  { %4516 = vmatprep.mubr.msk.bf16.mxu0 %vm92_vm1, %v4930_v27  ;;  %4588 = vmatprep.mubr.msk.bf16.mxu1 %vm92_vm1, %v4931_v29  ;;  %v4985_v27 = vld [vmem:[%s6232_s0 + $0x3e8] sm:$0xff]   ;;  %v4987_v29 = vld [vmem:[%s6232_s0 + $0x3f0] sm:$0xff]  }
  0x89   :  { %4856 = vmatprep.subr.msk.bf16.mxu0 %vm117_vm0, %v3976_v30  ;;  %4860 = vmatprep.subr.msk.bf16.mxu1 %vm117_vm0, %v4140_v31  ;;  %v4988_v30 = vld [vmem:[%s6232_s0 + $0x2f8] sm:$0xff]  }
  0x8a   :  { %v4989_v31 = vld [vmem:[%s6232_s0 + $0x3f8] sm:$0xff]  }
  0x8e   :  { %4517 = vmatmul.mubr.msk.bf16.gmra.mrb[20].mxu0 %vm92_vm1, %v4932_v32  ;;  %4589 = vmatmul.mubr.msk.bf16.gmra.mrb[20].mxu1 %vm92_vm1, %v4933_v33  ;;  %v5861_v32 = vld [vmem:[%s6233_s2] ss:$0 sm:$0xff] }
  0x8f   :  { %4520 = vmatprep.mubr.msk.bf16.mxu0 %vm92_vm1, %v4934_v34  ;;  %4592 = vmatprep.mubr.msk.bf16.mxu1 %vm92_vm1, %v4935_v35 }
  0x96   :  { %4521 = vmatmul.mubr.msk.bf16.gmra.mrb[24].mxu0 %vm92_vm1, %v4936_v36  ;;  %4593 = vmatmul.mubr.msk.bf16.gmra.mrb[24].mxu1 %vm92_vm1, %v4937_v37 }
  0x97   :  { %4524 = vmatprep.mubr.msk.bf16.mxu0 %vm92_vm1, %v4938_v38  ;;  %4596 = vmatprep.mubr.msk.bf16.mxu1 %vm92_vm1, %v4939_v39 }
  0x9e   :  { %4525 = vmatmul.mubr.msk.bf16.gmra.mrb[28].mxu0 %vm92_vm1, %v4940_v40  ;;  %4597 = vmatmul.mubr.msk.bf16.gmra.mrb[28].mxu1 %vm92_vm1, %v4941_v41 }
  0x9f   :  { %4530 = vmatprep.mubr.msk.bf16.mxu0 %vm92_vm1, %v4942_v42  ;;  %4602 = vmatprep.mubr.msk.bf16.mxu1 %vm92_vm1, %v4943_v43 }
  0xa6   :  { %4531 = vmatmul.mubr.msk.bf16.vlgmr.msra.gmra.mrb[16].mxu0 %vm92_vm1, %v4944_v44  ;;  %4603 = vmatmul.mubr.msk.bf16.vlgmr.msra.gmra.mrb[16].mxu1 %vm92_vm1, %v4945_v45 }
  0xa7   :  { %4547 = vmatpush3.bf16.msra.mxu0 %v2258_v46  ;;  %4619 = vmatpush3.bf16.msra.mxu1 %v3151_v48 }
  0xa8   :  { %4534 = vmatprep.mubr.msk.bf16.mxu0 %vm92_vm1, %v4946_v47  ;;  %4606 = vmatprep.mubr.msk.bf16.mxu1 %vm92_vm1, %v4947_v49 }
  0xa9   :  { %4857 = vmatprep.subr.msk.bf16.mxu0 %vm117_vm0, %v4009_v50  ;;  %4861 = vmatprep.subr.msk.bf16.mxu1 %vm117_vm0, %v4173_v51 }
  0xae   :  { %4535 = vmatmul.mubr.msk.bf16.gmra.mrb[20].mxu0 %vm92_vm1, %v4948_v52  ;;  %4607 = vmatmul.mubr.msk.bf16.gmra.mrb[20].mxu1 %vm92_vm1, %v4949_v53 }
  0xaf   :  { %4538 = vmatprep.mubr.msk.bf16.mxu0 %vm92_vm1, %v4950_v54  ;;  %4610 = vmatprep.mubr.msk.bf16.mxu1 %vm92_vm1, %v4951_v55 }
  0xb6   :  { %4539 = vmatmul.mubr.msk.bf16.gmra.mrb[24].mxu0 %vm92_vm1, %v4952_v56  ;;  %4611 = vmatmul.mubr.msk.bf16.gmra.mrb[24].mxu1 %vm92_vm1, %v4953_v57 }
  0xb7   :  { %4542 = vmatprep.mubr.msk.bf16.mxu0 %vm92_vm1, %v4954_v58  ;;  %4614 = vmatprep.mubr.msk.bf16.mxu1 %vm92_vm1, %v4955_v59 }
  0xbe   :  { %4543 = vmatmul.mubr.msk.bf16.gmra.mrb[28].mxu0 %vm92_vm1, %v4956_v60  ;;  %4615 = vmatmul.mubr.msk.bf16.gmra.mrb[28].mxu1 %vm92_vm1, %v4957_v61 }
  0xbf   :  { %4548 = vmatprep.mubr.msk.bf16.mxu0 %vm92_vm1, %v4958_v62  ;;  %4620 = vmatprep.mubr.msk.bf16.mxu1 %vm92_vm1, %v4959_v63 }
  0xc6   :  { %4549 = vmatmul.mubr.msk.bf16.vlgmr.msra.gmra.mrb[16].mxu0 %vm92_vm1, %v4960_v0  ;;  %4621 = vmatmul.mubr.msk.bf16.vlgmr.msra.gmra.mrb[16].mxu1 %vm92_vm1, %v4961_v1 }
  0xc7   :  { %4565 = vmatpush3.bf16.msra.mxu0 %v2457_v2  ;;  %4637 = vmatpush3.bf16.msra.mxu1 %v3350_v4 }
  0xc8   :  { %4552 = vmatprep.mubr.msk.bf16.mxu0 %vm92_vm1, %v4962_v3  ;;  %4624 = vmatprep.mubr.msk.bf16.mxu1 %vm92_vm1, %v4963_v5 }
  0xce   :  { %4553 = vmatmul.mubr.msk.bf16.gmra.mrb[20].mxu0 %vm92_vm1, %v4964_v6  ;;  %4625 = vmatmul.mubr.msk.bf16.gmra.mrb[20].mxu1 %vm92_vm1, %v4965_v7 }
  0xcf   :  { %4556 = vmatprep.mubr.msk.bf16.mxu0 %vm92_vm1, %v4966_v8  ;;  %4628 = vmatprep.mubr.msk.bf16.mxu1 %vm92_vm1, %v4967_v9 }
  0xd6   :  { %4557 = vmatmul.mubr.msk.bf16.gmra.mrb[24].mxu0 %vm92_vm1, %v4968_v10  ;;  %4629 = vmatmul.mubr.msk.bf16.gmra.mrb[24].mxu1 %vm92_vm1, %v4969_v11 }
  0xd7   :  { %4560 = vmatprep.mubr.msk.bf16.mxu0 %vm92_vm1, %v4970_v12  ;;  %4632 = vmatprep.mubr.msk.bf16.mxu1 %vm92_vm1, %v4971_v13 }
  0xde   :  { %4561 = vmatmul.mubr.msk.bf16.gmra.mrb[28].mxu0 %vm92_vm1, %v4972_v14  ;;  %4633 = vmatmul.mubr.msk.bf16.gmra.mrb[28].mxu1 %vm92_vm1, %v4973_v15 }
  0xdf   :  { %4566 = vmatprep.mubr.msk.bf16.mxu0 %vm92_vm1, %v4974_v16  ;;  %4638 = vmatprep.mubr.msk.bf16.mxu1 %vm92_vm1, %v4975_v17 }
  0xe6   :  { %4567 = vmatmul.mubr.msk.bf16.vlgmr.msra.gmra.mrb[16].mxu0 %vm92_vm1, %v4976_v18  ;;  %4639 = vmatmul.mubr.msk.bf16.vlgmr.msra.gmra.mrb[16].mxu1 %vm92_vm1, %v4977_v19 }
  0xe7   :  { %4570 = vmatprep.mubr.msk.bf16.mxu0 %vm92_vm1, %v4978_v20  ;;  %4642 = vmatprep.mubr.msk.bf16.mxu1 %vm92_vm1, %v4979_v21 }
  0xee   :  { %4571 = vmatmul.mubr.msk.bf16.gmra.mrb[20].mxu0 %vm92_vm1, %v4980_v22  ;;  %4643 = vmatmul.mubr.msk.bf16.gmra.mrb[20].mxu1 %vm92_vm1, %v4981_v23 }
  0xef   :  { %4574 = vmatprep.mubr.msk.bf16.mxu0 %vm92_vm1, %v4982_v24  ;;  %4646 = vmatprep.mubr.msk.bf16.mxu1 %vm92_vm1, %v4983_v25 }
  0xf6   :  { %4575 = vmatmul.mubr.msk.bf16.gmra.mrb[24].mxu0 %vm92_vm1, %v4984_v26  ;;  %4647 = vmatmul.mubr.msk.bf16.gmra.mrb[24].mxu1 %vm92_vm1, %v4985_v27 }
  0xf7   :  { %4578 = vmatprep.mubr.msk.bf16.mxu0 %vm92_vm1, %v4986_v28  ;;  %4650 = vmatprep.mubr.msk.bf16.mxu1 %vm92_vm1, %v4987_v29 }
  0xfe   :  { %4579 = vmatmul.mubr.msk.bf16.gmra.mrb[28].mxu0 %vm92_vm1, %v4988_v30  ;;  %4651 = vmatmul.mubr.msk.bf16.gmra.mrb[28].mxu1 %vm92_vm1, %v4989_v31 }
 0x139   :  { %v4424_v33 = vpop.f32.mrb[0].mxu0  ;;  %v4496_v35 = vpop.f32.mrb[0].mxu1 }
 0x13a   :  { %v788_v34 = vadd.f32 %v4424_v33, %v5861_v32  ;;  %v701_v36 = vpop.f32.mrb[1].mxu0  ;;  %v1681_v37 = vadd.f32 %v4496_v35, %v5861_v32  ;;  %v1600_v39 = vpop.f32.mrb[1].mxu1 }
 0x13b   :  { %v786_v38 = vadd.f32 %v5861_v32, %v701_v36  ;;  %v4425_v40 = vpop.f32.mrb[2].mxu0  ;;  %v1679_v42 = vadd.f32 %v5861_v32, %v1600_v39  ;;  %v4497_v44 = vpop.f32.mrb[2].mxu1 }
 0x13c   :  { %v3716_v41 = vmul.f32 -1.442695, %v788_v34  ;;  %v789_v43 = vadd.f32 %v4425_v40, %v5861_v32  ;;  %v704_v45 = vpop.f32.mrb[3].mxu0  ;;  %v3864_v46 = vmul.f32 -1.442695, %v1681_v37  ;;  %v1682_v48 = vadd.f32 %v4497_v44, %v5861_v32  ;;  %v1603_v50 = vpop.f32.mrb[3].mxu1 }
 0x13d   :  { %v3714_v47 = vmul.f32 -1.442695, %v786_v38  ;;  %v787_v49 = vadd.f32 %v5861_v32, %v704_v45  ;;  %v3862_v51 = vmul.f32 -1.442695, %v1679_v42  ;;  %v1680_v53 = vadd.f32 %v5861_v32, %v1603_v50 }
 0x13e   :  { %4990 = vpow2.f32 %v3716_v41  ;;  %v3717_v52 = vmul.f32 -1.442695, %v789_v43  ;;  %v3865_v54 = vmul.f32 -1.442695, %v1682_v48 }
 0x13f   :  { %4992 = vpow2.f32 %v3864_v46  ;;  %v3715_v55 = vmul.f32 -1.442695, %v787_v49  ;;  %v3863_v56 = vmul.f32 -1.442695, %v1680_v53 }
 0x140   :  { %4994 = vpow2.f32 %v3714_v47 }
 0x141   :  { %4996 = vpow2.f32 %v3862_v51  ;;  %v4428_v57 = vpop.f32.mrb[4].mxu0  ;;  %v4500_v59 = vpop.f32.mrb[4].mxu1 }
 0x142   :  { %4998 = vpow2.f32 %v3717_v52  ;;  %v792_v58 = vadd.f32 %v4428_v57, %v5861_v32  ;;  %v717_v60 = vpop.f32.mrb[5].mxu0  ;;  %v1685_v61 = vadd.f32 %v4500_v59, %v5861_v32  ;;  %v1616_v63 = vpop.f32.mrb[5].mxu1 }
 0x143   :  { %5000 = vpow2.f32 %v3865_v54  ;;  %v790_v62 = vadd.f32 %v5861_v32, %v717_v60  ;;  %v4429_v0 = vpop.f32.mrb[6].mxu0  ;;  %v1683_v2 = vadd.f32 %v5861_v32, %v1616_v63  ;;  %v4501_v4 = vpop.f32.mrb[6].mxu1 }
 0x144   :  { %5002 = vpow2.f32 %v3715_v55  ;;  %v3720_v1 = vmul.f32 -1.442695, %v792_v58  ;;  %v793_v3 = vadd.f32 %v4429_v0, %v5861_v32  ;;  %v720_v5 = vpop.f32.mrb[7].mxu0  ;;  %v3868_v6 = vmul.f32 -1.442695, %v1685_v61  ;;  %v1619_v8 = vpop.f32.mrb[7].mxu1 }
 0x145   :  { %5004 = vpow2.f32 %v3863_v56  ;;  %v3718_v7 = vmul.f32 -1.442695, %v790_v62  ;;  %v3866_v9 = vmul.f32 -1.442695, %v1683_v2  ;;  %v1686_v37 = vadd.f32 %v4501_v4, %v5861_v32 }
 0x146   :  { %5006 = vpow2.f32 %v3720_v1  ;;  %v3721_v10 = vmul.f32 -1.442695, %v793_v3  ;;  %v791_v40 = vadd.f32 %v5861_v32, %v720_v5  ;;  %v1684_v44 = vadd.f32 %v5861_v32, %v1619_v8 }
 0x147   :  { %5008 = vpow2.f32 %v3868_v6  ;;  %v3869_v54 = vmul.f32 -1.442695, %v1686_v37 }
 0x148   :  { %v4991_v11 = vpop.eup %4990  ;;  %5010 = vpow2.f32 %v3718_v7  ;;  %v3719_v60 = vmul.f32 -1.442695, %v791_v40  ;;  %v3867_v0 = vmul.f32 -1.442695, %v1684_v44 }
 0x149   :  { %v4993_v12 = vpop.eup %4992  ;;  %v852_v13 = vadd.f32 1.0, %v4991_v11  ;;  %5012 = vpow2.f32 %v3866_v9  ;;  %v4432_v14 = vpop.f32.mrb[8].mxu0 }
 0x14a   :  { %v4995_v15 = vpop.eup %4994  ;;  %v1745_v16 = vadd.f32 1.0, %v4993_v12  ;;  %5014 = vpow2.f32 %v3721_v10  ;;  %v4504_v17 = vpop.f32.mrb[8].mxu1  ;;  %v796_v49 = vadd.f32 %v4432_v14, %v5861_v32 }
 0x14b   :  { %v733_v18 = vpop.f32.mrb[9].mxu0  ;;  %v4997_v19 = vpop.eup %4996  ;;  %5016 = vrcp.f32 %v852_v13  ;;  %v850_v20 = vadd.f32 1.0, %v4995_v15  ;;  %v1689_v55 = vadd.f32 %v4504_v17, %v5861_v32 }
 0x14c   :  { %v1632_v21 = vpop.f32.mrb[9].mxu1  ;;  %v4433_v22 = vpop.f32.mrb[10].mxu0  ;;  %5018 = vrcp.f32 %v1745_v16  ;;  %v1743_v24 = vadd.f32 1.0, %v4997_v19  ;;  %v794_v61 = vadd.f32 %v5861_v32, %v733_v18  ;;  %v3724_v3 = vmul.f32 -1.442695, %v796_v49 }
 0x14d   :  { %v4999_v23 = vpop.eup %4998  ;;  %v4505_v25 = vpop.f32.mrb[10].mxu1  ;;  %5020 = vrcp.f32 %v850_v20  ;;  %v1687_v1 = vadd.f32 %v5861_v32, %v1632_v21  ;;  %v797_v4 = vadd.f32 %v4433_v22, %v5861_v32  ;;  %v3872_v6 = vmul.f32 -1.442695, %v1689_v55 }
 0x14e   :  { %v5876_v26 = vpop.f32.mrb[11].mxu0  ;;  %v5001_v27 = vpop.eup %5000  ;;  %v853_v28 = vadd.f32 1.0, %v4999_v23  ;;  %5022 = vrcp.f32 %v1743_v24  ;;  %v1690_v7 = vadd.f32 %v4505_v25, %v5861_v32  ;;  %v3722_v9 = vmul.f32 -1.442695, %v794_v61 }
 0x14f   :  { %v5878_v29 = vpop.f32.mrb[11].mxu1  ;;  %v5003_v30 = vpop.eup %5002  ;;  %v1746_v31 = vadd.f32 1.0, %v5001_v27  ;;  %v795_v10 = vadd.f32 %v5861_v32, %v5876_v26  ;;  %v3870_v12 = vmul.f32 -1.442695, %v1687_v1  ;;  %v3725_v15 = vmul.f32 -1.442695, %v797_v4 }
 0x150   :  { %v5005_v33 = vpop.eup %5004  ;;  %5024 = vrcp.f32 %v853_v28  ;;  %v851_v34 = vadd.f32 1.0, %v5003_v30  ;;  %v1688_v13 = vadd.f32 %v5861_v32, %v5878_v29  ;;  %v3873_v18 = vmul.f32 -1.442695, %v1690_v7 }
 0x151   :  { %v5007_v35 = vpop.eup %5006  ;;  %5026 = vrcp.f32 %v1746_v31  ;;  %v1744_v36 = vadd.f32 1.0, %v5005_v33  ;;  %v4436_v41 = vpop.f32.mrb[12].mxu0  ;;  %v3723_v21 = vmul.f32 -1.442695, %v795_v10 }
 0x152   :  { %v5009_v38 = vpop.eup %5008  ;;  %5028 = vrcp.f32 %v851_v34  ;;  %v856_v39 = vadd.f32 1.0, %v5007_v35  ;;  %v4508_v45 = vpop.f32.mrb[12].mxu1  ;;  %v800_v16 = vadd.f32 %v4436_v41, %v5861_v32  ;;  %v3871_v23 = vmul.f32 -1.442695, %v1688_v13 }
 0x153   :  { %v5011_v42 = vpop.eup %5010  ;;  %5030 = vrcp.f32 %v1744_v36  ;;  %v1749_v43 = vadd.f32 1.0, %v5009_v38  ;;  %v5883_v46 = vpop.f32.mrb[13].mxu0  ;;  %v1693_v19 = vadd.f32 %v4508_v45, %v5861_v32 }
 0x154   :  { %v5013_v47 = vpop.eup %5012  ;;  %5032 = vrcp.f32 %v856_v39  ;;  %v854_v48 = vadd.f32 1.0, %v5011_v42  ;;  %v5886_v50 = vpop.f32.mrb[13].mxu1  ;;  %v3728_v25 = vmul.f32 -1.442695, %v800_v16 }
 0x155   :  { %v5888_v51 = vpop.f32.mrb[14].mxu0  ;;  %v5015_v52 = vpop.eup %5014  ;;  %5034 = vrcp.f32 %v1749_v43  ;;  %v1747_v53 = vadd.f32 1.0, %v5013_v47  ;;  %v3876_v27 = vmul.f32 -1.442695, %v1693_v19 }
 0x156   :  { %v5891_v56 = vpop.f32.mrb[14].mxu1  ;;  %v5893_v57 = vpop.f32.mrb[15].mxu0  ;;  %5036 = vrcp.f32 %v854_v48  ;;  %v857_v59 = vadd.f32 1.0, %v5015_v52  ;;  %v798_v48 = vadd.f32 %v5861_v32, %v5883_v46 }
 0x157   :  { %v5017_v58 = vpop.eup %5016  ;;  %v5896_v62 = vpop.f32.mrb[15].mxu1  ;;  %5038 = vrcp.f32 %v1747_v53  ;;  %v1691_v53 = vadd.f32 %v5861_v32, %v5886_v50  ;;  %v1694_v61 = vadd.f32 %v5891_v56, %v5861_v32  ;;  %v799_v1 = vadd.f32 %v5861_v32, %v5893_v57 }
 0x158   :  { %v5019_v63 = vpop.eup %5018  ;;  %901 = vst.msk [vmem:[%s6234_s3 + $0x10] sm:$0xff] %vm898_vm2, %v5017_v58  ;;  %5040 = vrcp.f32 %v857_v59  ;;  %v801_v58 = vadd.f32 %v5888_v51, %v5861_v32  ;;  %v1692_v51 = vadd.f32 %v5861_v32, %v5896_v62 }
 0x159   :  { %v5021_v2 = vpop.eup %5020  ;;  %3880 = vst.msk [vmem:[%s6234_s3 + $0x90] sm:$0xff] %vm898_vm2, %v5019_v63  ;;  %5042 = vpow2.f32 %v3869_v54  ;;  %v3877_v57 = vmul.f32 -1.442695, %v1694_v61  ;;  %v3727_v62 = vmul.f32 -1.442695, %v799_v1 }
 0x15a   :  { %v5023_v5 = vpop.eup %5022  ;;  %899 = vst.msk [vmem:[%s6234_s3] sm:$0xff] %vm898_vm2, %v5021_v2  ;;  %5044 = vpow2.f32 %v3719_v60  ;;  %v3729_v56 = vmul.f32 -1.442695, %v801_v58 }
 0x15b   :  { %v5025_v8 = vpop.eup %5024  ;;  %3878 = vst.msk [vmem:[%s6234_s3 + $0x80] sm:$0xff] %vm898_vm2, %v5023_v5  ;;  %5046 = vpow2.f32 %v3867_v0  ;;  %v3726_v0 = vmul.f32 -1.442695, %v798_v48 }
 0x15c   :  { %v5027_v11 = vpop.eup %5026  ;;  %902 = vst.msk [vmem:[%s6234_s3 + $0x18] sm:$0xff] %vm898_vm2, %v5025_v8  ;;  %5048 = vpow2.f32 %v3724_v3  ;;  %v3874_v3 = vmul.f32 -1.442695, %v1691_v53  ;;  %v3875_v8 = vmul.f32 -1.442695, %v1692_v51 }
 0x15d   :  { %v5029_v14 = vpop.eup %5028  ;;  %3881 = vst.msk [vmem:[%s6234_s3 + $0x98] sm:$0xff] %vm898_vm2, %v5027_v11  ;;  %5050 = vpow2.f32 %v3872_v6 }
 0x15e   :  { %v5031_v17 = vpop.eup %5030  ;;  %900 = vst.msk [vmem:[%s6234_s3 + $0x8] sm:$0xff] %vm898_vm2, %v5029_v14  ;;  %5052 = vpow2.f32 %v3722_v9 }
 0x15f   :  { %v5033_v20 = vpop.eup %5032  ;;  %3879 = vst.msk [vmem:[%s6234_s3 + $0x88] sm:$0xff] %vm898_vm2, %v5031_v17  ;;  %5054 = vpow2.f32 %v3870_v12 }
 0x160   :  { %v5035_v22 = vpop.eup %5034  ;;  %905 = vst.msk [vmem:[%s6234_s3 + $0x30] sm:$0xff] %vm898_vm2, %v5033_v20  ;;  %5056 = vpow2.f32 %v3725_v15 }
 0x161   :  { %v5037_v24 = vpop.eup %5036  ;;  %3884 = vst.msk [vmem:[%s6234_s3 + $0xb0] sm:$0xff] %vm898_vm2, %v5035_v22  ;;  %5058 = vpow2.f32 %v3873_v18 }
 0x162   :  { %v5039_v26 = vpop.eup %5038  ;;  %903 = vst.msk [vmem:[%s6234_s3 + $0x20] sm:$0xff] %vm898_vm2, %v5037_v24  ;;  %5060 = vpow2.f32 %v3723_v21 }
 0x163   :  { %v5041_v28 = vpop.eup %5040  ;;  %3882 = vst.msk [vmem:[%s6234_s3 + $0xa0] sm:$0xff] %vm898_vm2, %v5039_v26  ;;  %5062 = vpow2.f32 %v3871_v23 }
 0x164   :  { %v5043_v29 = vpop.eup %5042  ;;  %906 = vst.msk [vmem:[%s6234_s3 + $0x38] sm:$0xff] %vm898_vm2, %v5041_v28  ;;  %5064 = vpow2.f32 %v3728_v25 }
 0x165   :  { %v5045_v30 = vpop.eup %5044  ;;  %v1750_v31 = vadd.f32 1.0, %v5043_v29  ;;  %5066 = vpow2.f32 %v3876_v27 }
 0x166   :  { %v5047_v33 = vpop.eup %5046  ;;  %v855_v34 = vadd.f32 1.0, %v5045_v30 }
 0x167   :  { %v5049_v35 = vpop.eup %5048  ;;  %5068 = vrcp.f32 %v1750_v31  ;;  %v1748_v36 = vadd.f32 1.0, %v5047_v33 }
 0x168   :  { %v5051_v37 = vpop.eup %5050  ;;  %5070 = vrcp.f32 %v855_v34  ;;  %v860_v38 = vadd.f32 1.0, %v5049_v35 }
 0x169   :  { %v5053_v39 = vpop.eup %5052  ;;  %5072 = vrcp.f32 %v1748_v36  ;;  %v1753_v40 = vadd.f32 1.0, %v5051_v37 }
 0x16a   :  { %v5055_v41 = vpop.eup %5054  ;;  %5074 = vrcp.f32 %v860_v38  ;;  %v858_v42 = vadd.f32 1.0, %v5053_v39 }
 0x16b   :  { %v5057_v43 = vpop.eup %5056  ;;  %5076 = vrcp.f32 %v1753_v40  ;;  %v1751_v44 = vadd.f32 1.0, %v5055_v41 }
 0x16c   :  { %v5059_v45 = vpop.eup %5058  ;;  %5078 = vrcp.f32 %v858_v42  ;;  %v861_v47 = vadd.f32 1.0, %v5057_v43 }
 0x16d   :  { %v5061_v49 = vpop.eup %5060  ;;  %5080 = vrcp.f32 %v1751_v44  ;;  %v1754_v52 = vadd.f32 1.0, %v5059_v45 }
 0x16e   :  { %v5063_v54 = vpop.eup %5062  ;;  %5082 = vrcp.f32 %v861_v47  ;;  %v859_v55 = vadd.f32 1.0, %v5061_v49 }
 0x16f   :  { %v5065_v59 = vpop.eup %5064  ;;  %5084 = vrcp.f32 %v1754_v52  ;;  %v1752_v60 = vadd.f32 1.0, %v5063_v54 }
 0x170   :  { %v5067_v63 = vpop.eup %5066  ;;  %5086 = vrcp.f32 %v859_v55  ;;  %v864_v46 = vadd.f32 1.0, %v5065_v59 }
 0x171   :  { %v5069_v50 = vpop.eup %5068  ;;  %5088 = vrcp.f32 %v1752_v60  ;;  %v1757_v2 = vadd.f32 1.0, %v5067_v63 }
 0x172   :  { %v5071_v4 = vpop.eup %5070  ;;  %3885 = vst.msk [vmem:[%s6234_s3 + $0xb8] sm:$0xff] %vm898_vm2, %v5069_v50  ;;  %5090 = vrcp.f32 %v864_v46 }
 0x173   :  { %v5073_v5 = vpop.eup %5072  ;;  %904 = vst.msk [vmem:[%s6234_s3 + $0x28] sm:$0xff] %vm898_vm2, %v5071_v4  ;;  %5092 = vrcp.f32 %v1757_v2 }
 0x174   :  { %v5075_v6 = vpop.eup %5074  ;;  %3883 = vst.msk [vmem:[%s6234_s3 + $0xa8] sm:$0xff] %vm898_vm2, %v5073_v5  ;;  %5094 = vpow2.f32 %v3726_v0 }
 0x175   :  { %v5077_v7 = vpop.eup %5076  ;;  %909 = vst.msk [vmem:[%s6234_s3 + $0x50] sm:$0xff] %vm898_vm2, %v5075_v6  ;;  %5096 = vpow2.f32 %v3874_v3 }
 0x176   :  { %v5079_v9 = vpop.eup %5078  ;;  %3888 = vst.msk [vmem:[%s6234_s3 + $0xd0] sm:$0xff] %vm898_vm2, %v5077_v7  ;;  %5098 = vpow2.f32 %v3729_v56 }
 0x177   :  { %v5081_v10 = vpop.eup %5080  ;;  %907 = vst.msk [vmem:[%s6234_s3 + $0x40] sm:$0xff] %vm898_vm2, %v5079_v9  ;;  %5100 = vpow2.f32 %v3877_v57 }
 0x178   :  { %v5083_v11 = vpop.eup %5082  ;;  %3886 = vst.msk [vmem:[%s6234_s3 + $0xc0] sm:$0xff] %vm898_vm2, %v5081_v10  ;;  %5102 = vpow2.f32 %v3727_v62 }
 0x179   :  { %v5085_v12 = vpop.eup %5084  ;;  %910 = vst.msk [vmem:[%s6234_s3 + $0x58] sm:$0xff] %vm898_vm2, %v5083_v11  ;;  %5104 = vpow2.f32 %v3875_v8 }
 0x17a   :  { %v5087_v13 = vpop.eup %5086  ;;  %3889 = vst.msk [vmem:[%s6234_s3 + $0xd8] sm:$0xff] %vm898_vm2, %v5085_v12 }
 0x17b   :  { %v5089_v14 = vpop.eup %5088  ;;  %908 = vst.msk [vmem:[%s6234_s3 + $0x48] sm:$0xff] %vm898_vm2, %v5087_v13 }
 0x17c   :  { %v5091_v15 = vpop.eup %5090  ;;  %3887 = vst.msk [vmem:[%s6234_s3 + $0xc8] sm:$0xff] %vm898_vm2, %v5089_v14 }
 0x17d   :  { %v5093_v16 = vpop.eup %5092  ;;  %913 = vst.msk [vmem:[%s6234_s3 + $0x70] sm:$0xff] %vm898_vm2, %v5091_v15 }
 0x17e   :  { %v5095_v17 = vpop.eup %5094  ;;  %3892 = vst.msk [vmem:[%s6234_s3 + $0xf0] sm:$0xff] %vm898_vm2, %v5093_v16 }
 0x17f   :  { %v5097_v18 = vpop.eup %5096  ;;  %v862_v19 = vadd.f32 1.0, %v5095_v17 }
 0x180   :  { %v5099_v20 = vpop.eup %5098  ;;  %v1755_v21 = vadd.f32 1.0, %v5097_v18 }
 0x181   :  { %v5101_v22 = vpop.eup %5100  ;;  %5106 = vrcp.f32 %v862_v19  ;;  %v865_v23 = vadd.f32 1.0, %v5099_v20 }
 0x182   :  { %v5103_v24 = vpop.eup %5102  ;;  %5108 = vrcp.f32 %v1755_v21  ;;  %v1758_v25 = vadd.f32 1.0, %v5101_v22 }
 0x183   :  { %v5105_v26 = vpop.eup %5104  ;;  %5110 = vrcp.f32 %v865_v23  ;;  %v863_v27 = vadd.f32 1.0, %v5103_v24 }
 0x184   :  { %5112 = vrcp.f32 %v1758_v25  ;;  %v1756_v28 = vadd.f32 1.0, %v5105_v26 }
 0x185   :  { %5114 = vrcp.f32 %v863_v27 }
 0x186   :  { %5116 = vrcp.f32 %v1756_v28 }
 0x18b   :  { %v5107_v29 = vpop.eup %5106 }
 0x18c   :  { %v5109_v30 = vpop.eup %5108  ;;  %911 = vst.msk [vmem:[%s6234_s3 + $0x60] sm:$0xff] %vm898_vm2, %v5107_v29 }
 0x18d   :  { %v5111_v31 = vpop.eup %5110  ;;  %3890 = vst.msk [vmem:[%s6234_s3 + $0xe0] sm:$0xff] %vm898_vm2, %v5109_v30 }
 0x18e   :  { %v5113_v33 = vpop.eup %5112  ;;  %914 = vst.msk [vmem:[%s6234_s3 + $0x78] sm:$0xff] %vm898_vm2, %v5111_v31 }
 0x18f   :  { %v5115_v34 = vpop.eup %5114  ;;  %3893 = vst.msk [vmem:[%s6234_s3 + $0xf8] sm:$0xff] %vm898_vm2, %v5113_v33 }
 0x190   :  { %v5117_v35 = vpop.eup %5116  ;;  %912 = vst.msk [vmem:[%s6234_s3 + $0x68] sm:$0xff] %vm898_vm2, %v5115_v34 }
 0x191   :  { %3891 = vst.msk [vmem:[%s6234_s3 + $0xe8] sm:$0xff] %vm898_vm2, %v5117_v35 }
 0x1b9   :  { %v4568_v36 = vpop.f32.mrb[16].mxu0  ;;  %v4640_v38 = vpop.f32.mrb[16].mxu1 }
 0x1ba   :  { %v2574_v37 = vadd.f32 %v4568_v36, %v5861_v32  ;;  %v2493_v39 = vpop.f32.mrb[17].mxu0  ;;  %v3467_v40 = vadd.f32 %v4640_v38, %v5861_v32  ;;  %v3386_v42 = vpop.f32.mrb[17].mxu1 }
 0x1bb   :  { %v2572_v41 = vadd.f32 %v5861_v32, %v2493_v39  ;;  %v4569_v43 = vpop.f32.mrb[18].mxu0  ;;  %v3465_v45 = vadd.f32 %v5861_v32, %v3386_v42  ;;  %v4641_v48 = vpop.f32.mrb[18].mxu1 }
 0x1bc   :  { %v4028_v44 = vmul.f32 -1.442695, %v2574_v37  ;;  %v2575_v47 = vadd.f32 %v4569_v43, %v5861_v32  ;;  %v2496_v49 = vpop.f32.mrb[19].mxu0  ;;  %v4192_v52 = vmul.f32 -1.442695, %v3467_v40  ;;  %v3468_v54 = vadd.f32 %v4641_v48, %v5861_v32  ;;  %v3389_v58 = vpop.f32.mrb[19].mxu1 }
 0x1bd   :  { %v4026_v53 = vmul.f32 -1.442695, %v2572_v41  ;;  %v2573_v55 = vadd.f32 %v5861_v32, %v2496_v49  ;;  %v4190_v59 = vmul.f32 -1.442695, %v3465_v45  ;;  %v3466_v61 = vadd.f32 %v5861_v32, %v3389_v58 }
 0x1be   :  { %5118 = vpow2.f32 %v4028_v44  ;;  %v4029_v60 = vmul.f32 -1.442695, %v2575_v47  ;;  %v4193_v63 = vmul.f32 -1.442695, %v3468_v54 }
 0x1bf   :  { %5120 = vpow2.f32 %v4192_v52  ;;  %v4027_v46 = vmul.f32 -1.442695, %v2573_v55  ;;  %v4191_v0 = vmul.f32 -1.442695, %v3466_v61 }
 0x1c0   :  { %5122 = vpow2.f32 %v4026_v53 }
 0x1c1   :  { %5124 = vpow2.f32 %v4190_v59  ;;  %v4572_v1 = vpop.f32.mrb[20].mxu0  ;;  %v4644_v2 = vpop.f32.mrb[20].mxu1 }
 0x1c2   :  { %5126 = vpow2.f32 %v4029_v60  ;;  %v2578_v50 = vadd.f32 %v4572_v1, %v5861_v32  ;;  %v2509_v3 = vpop.f32.mrb[21].mxu0  ;;  %v3471_v51 = vadd.f32 %v4644_v2, %v5861_v32  ;;  %v3402_v56 = vpop.f32.mrb[21].mxu1 }
 0x1c3   :  { %5128 = vpow2.f32 %v4193_v63  ;;  %v2576_v4 = vadd.f32 %v5861_v32, %v2509_v3  ;;  %v4573_v5 = vpop.f32.mrb[22].mxu0  ;;  %v3469_v6 = vadd.f32 %v5861_v32, %v3402_v56  ;;  %v4645_v7 = vpop.f32.mrb[22].mxu1 }
 0x1c4   :  { %5130 = vpow2.f32 %v4027_v46  ;;  %v4032_v57 = vmul.f32 -1.442695, %v2578_v50  ;;  %v2579_v62 = vadd.f32 %v4573_v5, %v5861_v32  ;;  %v2512_v8 = vpop.f32.mrb[23].mxu0  ;;  %v4196_v9 = vmul.f32 -1.442695, %v3471_v51  ;;  %v3405_v11 = vpop.f32.mrb[23].mxu1 }
 0x1c5   :  { %5132 = vpow2.f32 %v4191_v0  ;;  %v4030_v10 = vmul.f32 -1.442695, %v2576_v4  ;;  %v4194_v12 = vmul.f32 -1.442695, %v3469_v6  ;;  %v3472_v40 = vadd.f32 %v4645_v7, %v5861_v32 }
 0x1c6   :  { %5134 = vpow2.f32 %v4032_v57  ;;  %v4033_v13 = vmul.f32 -1.442695, %v2579_v62  ;;  %v2577_v43 = vadd.f32 %v5861_v32, %v2512_v8  ;;  %v3470_v48 = vadd.f32 %v5861_v32, %v3405_v11 }
 0x1c7   :  { %5136 = vpow2.f32 %v4196_v9  ;;  %v4197_v63 = vmul.f32 -1.442695, %v3472_v40 }
 0x1c8   :  { %v5119_v14 = vpop.eup %5118  ;;  %5138 = vpow2.f32 %v4030_v10  ;;  %v4031_v3 = vmul.f32 -1.442695, %v2577_v43  ;;  %v4195_v5 = vmul.f32 -1.442695, %v3470_v48 }
 0x1c9   :  { %v5121_v15 = vpop.eup %5120  ;;  %v2638_v16 = vadd.f32 1.0, %v5119_v14  ;;  %5140 = vpow2.f32 %v4194_v12  ;;  %v4576_v17 = vpop.f32.mrb[24].mxu0 }
 0x1ca   :  { %v5123_v18 = vpop.eup %5122  ;;  %v3531_v19 = vadd.f32 1.0, %v5121_v15  ;;  %5142 = vpow2.f32 %v4033_v13  ;;  %v4648_v20 = vpop.f32.mrb[24].mxu1  ;;  %v2582_v55 = vadd.f32 %v4576_v17, %v5861_v32 }
 0x1cb   :  { %v2525_v21 = vpop.f32.mrb[25].mxu0  ;;  %v5125_v22 = vpop.eup %5124  ;;  %5144 = vrcp.f32 %v2638_v16  ;;  %v2636_v23 = vadd.f32 1.0, %v5123_v18  ;;  %v3475_v46 = vadd.f32 %v4648_v20, %v5861_v32 }
 0x1cc   :  { %v3418_v24 = vpop.f32.mrb[25].mxu1  ;;  %v4577_v25 = vpop.f32.mrb[26].mxu0  ;;  %5146 = vrcp.f32 %v3531_v19  ;;  %v3529_v27 = vadd.f32 1.0, %v5125_v22  ;;  %v2580_v51 = vadd.f32 %v5861_v32, %v2525_v21  ;;  %v4036_v62 = vmul.f32 -1.442695, %v2582_v55 }
 0x1cd   :  { %v5127_v26 = vpop.eup %5126  ;;  %v4649_v28 = vpop.f32.mrb[26].mxu1  ;;  %5148 = vrcp.f32 %v2636_v23  ;;  %v3473_v57 = vadd.f32 %v5861_v32, %v3418_v24  ;;  %v2583_v7 = vadd.f32 %v4577_v25, %v5861_v32  ;;  %v4200_v9 = vmul.f32 -1.442695, %v3475_v46 }
 0x1ce   :  { %v6060_v29 = vpop.f32.mrb[27].mxu0  ;;  %v5129_v30 = vpop.eup %5128  ;;  %v2639_v31 = vadd.f32 1.0, %v5127_v26  ;;  %5150 = vrcp.f32 %v3529_v27  ;;  %v3476_v10 = vadd.f32 %v4649_v28, %v5861_v32  ;;  %v4034_v12 = vmul.f32 -1.442695, %v2580_v51 }
 0x1cf   :  { %v6062_v33 = vpop.f32.mrb[27].mxu1  ;;  %v5131_v34 = vpop.eup %5130  ;;  %v3532_v35 = vadd.f32 1.0, %v5129_v30  ;;  %v2581_v13 = vadd.f32 %v5861_v32, %v6060_v29  ;;  %v4198_v15 = vmul.f32 -1.442695, %v3473_v57  ;;  %v4037_v18 = vmul.f32 -1.442695, %v2583_v7 }
 0x1d0   :  { %v5133_v36 = vpop.eup %5132  ;;  %5152 = vrcp.f32 %v2639_v31  ;;  %v2637_v37 = vadd.f32 1.0, %v5131_v34  ;;  %v3474_v16 = vadd.f32 %v5861_v32, %v6062_v33  ;;  %v4201_v21 = vmul.f32 -1.442695, %v3476_v10 }
 0x1d1   :  { %v5135_v38 = vpop.eup %5134  ;;  %5154 = vrcp.f32 %v3532_v35  ;;  %v3530_v39 = vadd.f32 1.0, %v5133_v36  ;;  %v4580_v44 = vpop.f32.mrb[28].mxu0  ;;  %v4035_v24 = vmul.f32 -1.442695, %v2581_v13 }
 0x1d2   :  { %v5137_v41 = vpop.eup %5136  ;;  %5156 = vrcp.f32 %v2637_v37  ;;  %v2642_v42 = vadd.f32 1.0, %v5135_v38  ;;  %v4652_v49 = vpop.f32.mrb[28].mxu1  ;;  %v2586_v19 = vadd.f32 %v4580_v44, %v5861_v32  ;;  %v4199_v26 = vmul.f32 -1.442695, %v3474_v16 }
 0x1d3   :  { %v5139_v45 = vpop.eup %5138  ;;  %5158 = vrcp.f32 %v3530_v39  ;;  %v3535_v47 = vadd.f32 1.0, %v5137_v41  ;;  %v6067_v52 = vpop.f32.mrb[29].mxu0  ;;  %v3479_v22 = vadd.f32 %v4652_v49, %v5861_v32 }
 0x1d4   :  { %v5141_v53 = vpop.eup %5140  ;;  %5160 = vrcp.f32 %v2642_v42  ;;  %v2640_v54 = vadd.f32 1.0, %v5139_v45  ;;  %v6070_v58 = vpop.f32.mrb[29].mxu1  ;;  %v4040_v28 = vmul.f32 -1.442695, %v2586_v19 }
 0x1d5   :  { %v6072_v59 = vpop.f32.mrb[30].mxu0  ;;  %v5143_v60 = vpop.eup %5142  ;;  %5162 = vrcp.f32 %v3535_v47  ;;  %v3533_v61 = vadd.f32 1.0, %v5141_v53  ;;  %v4204_v30 = vmul.f32 -1.442695, %v3479_v22 }
 0x1d6   :  { %v6075_v0 = vpop.f32.mrb[30].mxu1  ;;  %v6077_v1 = vpop.f32.mrb[31].mxu0  ;;  %5164 = vrcp.f32 %v2640_v54  ;;  %v2643_v2 = vadd.f32 1.0, %v5143_v60  ;;  %v2584_v54 = vadd.f32 %v5861_v32, %v6067_v52 }
 0x1d7   :  { %v5145_v50 = vpop.eup %5144  ;;  %v6080_v4 = vpop.f32.mrb[31].mxu1  ;;  %5166 = vrcp.f32 %v3533_v61  ;;  %v3477_v61 = vadd.f32 %v5861_v32, %v6070_v58  ;;  %v3480_v51 = vadd.f32 %v6075_v0, %v5861_v32  ;;  %v2585_v57 = vadd.f32 %v5861_v32, %v6077_v1 }
 0x1d8   :  { %v5147_v56 = vpop.eup %5146  ;;  %4044 = vst.msk [vmem:[%s6234_s3 + $0x110] sm:$0xff] %vm898_vm2, %v5145_v50  ;;  %5168 = vrcp.f32 %v2643_v2  ;;  %v2587_v50 = vadd.f32 %v6072_v59, %v5861_v32  ;;  %v3478_v59 = vadd.f32 %v5861_v32, %v6080_v4 }
 0x1d9   :  { %v5149_v6 = vpop.eup %5148  ;;  %4208 = vst.msk [vmem:[%s6234_s3 + $0x190] sm:$0xff] %vm898_vm2, %v5147_v56  ;;  %5170 = vpow2.f32 %v4197_v63  ;;  %v4205_v1 = vmul.f32 -1.442695, %v3480_v51  ;;  %v4039_v32 = vmul.f32 -1.442695, %v2585_v57 }
 0x1da   :  { %v5151_v8 = vpop.eup %5150  ;;  %4042 = vst.msk [vmem:[%s6234_s3 + $0x100] sm:$0xff] %vm898_vm2, %v5149_v6  ;;  %5172 = vpow2.f32 %v4031_v3  ;;  %v4041_v0 = vmul.f32 -1.442695, %v2587_v50  ;;  %v4203_v10 = vmul.f32 -1.442695, %v3478_v59 }
 0x1db   :  { %v5153_v11 = vpop.eup %5152  ;;  %4206 = vst.msk [vmem:[%s6234_s3 + $0x180] sm:$0xff] %vm898_vm2, %v5151_v8  ;;  %5174 = vpow2.f32 %v4195_v5  ;;  %v4038_v5 = vmul.f32 -1.442695, %v2584_v54 }
 0x1dc   :  { %v5155_v14 = vpop.eup %5154  ;;  %4045 = vst.msk [vmem:[%s6234_s3 + $0x118] sm:$0xff] %vm898_vm2, %v5153_v11  ;;  %5176 = vpow2.f32 %v4036_v62  ;;  %v4202_v62 = vmul.f32 -1.442695, %v3477_v61 }
 0x1dd   :  { %v5157_v17 = vpop.eup %5156  ;;  %4209 = vst.msk [vmem:[%s6234_s3 + $0x198] sm:$0xff] %vm898_vm2, %v5155_v14  ;;  %5178 = vpow2.f32 %v4200_v9 }
 0x1de   :  { %v5159_v20 = vpop.eup %5158  ;;  %4043 = vst.msk [vmem:[%s6234_s3 + $0x108] sm:$0xff] %vm898_vm2, %v5157_v17  ;;  %5180 = vpow2.f32 %v4034_v12 }
 0x1df   :  { %v5161_v23 = vpop.eup %5160  ;;  %4207 = vst.msk [vmem:[%s6234_s3 + $0x188] sm:$0xff] %vm898_vm2, %v5159_v20  ;;  %5182 = vpow2.f32 %v4198_v15 }
 0x1e0   :  { %v5163_v25 = vpop.eup %5162  ;;  %4048 = vst.msk [vmem:[%s6234_s3 + $0x130] sm:$0xff] %vm898_vm2, %v5161_v23  ;;  %5184 = vpow2.f32 %v4037_v18 }
 0x1e1   :  { %v5165_v27 = vpop.eup %5164  ;;  %4212 = vst.msk [vmem:[%s6234_s3 + $0x1b0] sm:$0xff] %vm898_vm2, %v5163_v25  ;;  %5186 = vpow2.f32 %v4201_v21 }
 0x1e2   :  { %v5167_v29 = vpop.eup %5166  ;;  %4046 = vst.msk [vmem:[%s6234_s3 + $0x120] sm:$0xff] %vm898_vm2, %v5165_v27  ;;  %5188 = vpow2.f32 %v4035_v24 }
 0x1e3   :  { %v5169_v31 = vpop.eup %5168  ;;  %4210 = vst.msk [vmem:[%s6234_s3 + $0x1a0] sm:$0xff] %vm898_vm2, %v5167_v29  ;;  %5190 = vpow2.f32 %v4199_v26 }
 0x1e4   :  { %v5171_v33 = vpop.eup %5170  ;;  %4049 = vst.msk [vmem:[%s6234_s3 + $0x138] sm:$0xff] %vm898_vm2, %v5169_v31  ;;  %5192 = vpow2.f32 %v4040_v28 }
 0x1e5   :  { %v5173_v34 = vpop.eup %5172  ;;  %v3536_v35 = vadd.f32 1.0, %v5171_v33  ;;  %5194 = vpow2.f32 %v4204_v30 }
 0x1e6   :  { %v5175_v36 = vpop.eup %5174  ;;  %v2641_v37 = vadd.f32 1.0, %v5173_v34 }
 0x1e7   :  { %v5177_v38 = vpop.eup %5176  ;;  %5196 = vrcp.f32 %v3536_v35  ;;  %v3534_v39 = vadd.f32 1.0, %v5175_v36 }
 0x1e8   :  { %v5179_v40 = vpop.eup %5178  ;;  %5198 = vrcp.f32 %v2641_v37  ;;  %v2646_v41 = vadd.f32 1.0, %v5177_v38 }
 0x1e9   :  { %v5181_v42 = vpop.eup %5180  ;;  %5200 = vrcp.f32 %v3534_v39  ;;  %v3539_v43 = vadd.f32 1.0, %v5179_v40 }
 0x1ea   :  { %v5183_v44 = vpop.eup %5182  ;;  %5202 = vrcp.f32 %v2646_v41  ;;  %v2644_v45 = vadd.f32 1.0, %v5181_v42 }
 0x1eb   :  { %v5185_v47 = vpop.eup %5184  ;;  %5204 = vrcp.f32 %v3539_v43  ;;  %v3537_v48 = vadd.f32 1.0, %v5183_v44 }
 0x1ec   :  { %v5187_v49 = vpop.eup %5186  ;;  %5206 = vrcp.f32 %v2644_v45  ;;  %v2647_v53 = vadd.f32 1.0, %v5185_v47 }
 0x1ed   :  { %v5189_v55 = vpop.eup %5188  ;;  %5208 = vrcp.f32 %v3537_v48  ;;  %v3540_v60 = vadd.f32 1.0, %v5187_v49 }
 0x1ee   :  { %v5191_v63 = vpop.eup %5190  ;;  %5210 = vrcp.f32 %v2647_v53  ;;  %v2645_v46 = vadd.f32 1.0, %v5189_v55 }
 0x1ef   :  { %v5193_v2 = vpop.eup %5192  ;;  %5212 = vrcp.f32 %v3540_v60  ;;  %v3538_v3 = vadd.f32 1.0, %v5191_v63 }
 0x1f0   :  { %v5195_v56 = vpop.eup %5194  ;;  %5214 = vrcp.f32 %v2645_v46  ;;  %v2650_v52 = vadd.f32 1.0, %v5193_v2 }
 0x1f1   :  { %v5197_v58 = vpop.eup %5196  ;;  %5216 = vrcp.f32 %v3538_v3  ;;  %v3543_v6 = vadd.f32 1.0, %v5195_v56 }
 0x1f2   :  { %v5199_v7 = vpop.eup %5198  ;;  %4213 = vst.msk [vmem:[%s6234_s3 + $0x1b8] sm:$0xff] %vm898_vm2, %v5197_v58  ;;  %5218 = vrcp.f32 %v2650_v52 }
 0x1f3   :  { %v5201_v8 = vpop.eup %5200  ;;  %4047 = vst.msk [vmem:[%s6234_s3 + $0x128] sm:$0xff] %vm898_vm2, %v5199_v7  ;;  %5220 = vrcp.f32 %v3543_v6 }
 0x1f4   :  { %v5203_v9 = vpop.eup %5202  ;;  %4211 = vst.msk [vmem:[%s6234_s3 + $0x1a8] sm:$0xff] %vm898_vm2, %v5201_v8  ;;  %5222 = vpow2.f32 %v4038_v5 }
 0x1f5   :  { %v5205_v4 = vpop.eup %5204  ;;  %4052 = vst.msk [vmem:[%s6234_s3 + $0x150] sm:$0xff] %vm898_vm2, %v5203_v9  ;;  %5224 = vpow2.f32 %v4202_v62 }
 0x1f6   :  { %v5207_v11 = vpop.eup %5206  ;;  %4216 = vst.msk [vmem:[%s6234_s3 + $0x1d0] sm:$0xff] %vm898_vm2, %v5205_v4  ;;  %5226 = vpow2.f32 %v4041_v0 }
 0x1f7   :  { %v5209_v12 = vpop.eup %5208  ;;  %4050 = vst.msk [vmem:[%s6234_s3 + $0x140] sm:$0xff] %vm898_vm2, %v5207_v11  ;;  %5228 = vpow2.f32 %v4205_v1 }
 0x1f8   :  { %v5211_v13 = vpop.eup %5210  ;;  %4214 = vst.msk [vmem:[%s6234_s3 + $0x1c0] sm:$0xff] %vm898_vm2, %v5209_v12  ;;  %5230 = vpow2.f32 %v4039_v32 }
 0x1f9   :  { %v5213_v14 = vpop.eup %5212  ;;  %4053 = vst.msk [vmem:[%s6234_s3 + $0x158] sm:$0xff] %vm898_vm2, %v5211_v13  ;;  %5232 = vpow2.f32 %v4203_v10 }
 0x1fa   :  { %v5215_v15 = vpop.eup %5214  ;;  %4217 = vst.msk [vmem:[%s6234_s3 + $0x1d8] sm:$0xff] %vm898_vm2, %v5213_v14 }
 0x1fb   :  { %v5217_v16 = vpop.eup %5216  ;;  %4051 = vst.msk [vmem:[%s6234_s3 + $0x148] sm:$0xff] %vm898_vm2, %v5215_v15 }
 0x1fc   :  { %v5219_v17 = vpop.eup %5218  ;;  %4215 = vst.msk [vmem:[%s6234_s3 + $0x1c8] sm:$0xff] %vm898_vm2, %v5217_v16 }
 0x1fd   :  { %v5221_v18 = vpop.eup %5220  ;;  %4056 = vst.msk [vmem:[%s6234_s3 + $0x170] sm:$0xff] %vm898_vm2, %v5219_v17 }
 0x1fe   :  { %v5223_v19 = vpop.eup %5222  ;;  %4220 = vst.msk [vmem:[%s6234_s3 + $0x1f0] sm:$0xff] %vm898_vm2, %v5221_v18 }
 0x1ff   :  { %v5225_v20 = vpop.eup %5224  ;;  %v2648_v21 = vadd.f32 1.0, %v5223_v19 }
 0x200   :  { %v5227_v22 = vpop.eup %5226  ;;  %v3541_v23 = vadd.f32 1.0, %v5225_v20 }
 0x201   :  { %v5229_v24 = vpop.eup %5228  ;;  %5234 = vrcp.f32 %v2648_v21  ;;  %v2651_v25 = vadd.f32 1.0, %v5227_v22 }
 0x202   :  { %v5231_v26 = vpop.eup %5230  ;;  %5236 = vrcp.f32 %v3541_v23  ;;  %v3544_v27 = vadd.f32 1.0, %v5229_v24 }
 0x203   :  { %v5233_v28 = vpop.eup %5232  ;;  %5238 = vrcp.f32 %v2651_v25  ;;  %v2649_v29 = vadd.f32 1.0, %v5231_v26 }
 0x204   :  { %5240 = vrcp.f32 %v3544_v27  ;;  %v3542_v30 = vadd.f32 1.0, %v5233_v28 }
 0x205   :  { %5242 = vrcp.f32 %v2649_v29 }
 0x206   :  { %5244 = vrcp.f32 %v3542_v30 }
 0x20b   :  { %v5235_v31 = vpop.eup %5234 }
 0x20c   :  { %v5237_v33 = vpop.eup %5236  ;;  %4054 = vst.msk [vmem:[%s6234_s3 + $0x160] sm:$0xff] %vm898_vm2, %v5235_v31 }
 0x20d   :  { %v5239_v34 = vpop.eup %5238  ;;  %4218 = vst.msk [vmem:[%s6234_s3 + $0x1e0] sm:$0xff] %vm898_vm2, %v5237_v33 }
 0x20e   :  { %v5241_v35 = vpop.eup %5240  ;;  %4057 = vst.msk [vmem:[%s6234_s3 + $0x178] sm:$0xff] %vm898_vm2, %v5239_v34 }
 0x20f   :  { %v5243_v36 = vpop.eup %5242  ;;  %4221 = vst.msk [vmem:[%s6234_s3 + $0x1f8] sm:$0xff] %vm898_vm2, %v5241_v35 }
 0x210   :  { %v5245_v37 = vpop.eup %5244  ;;  %4055 = vst.msk [vmem:[%s6234_s3 + $0x168] sm:$0xff] %vm898_vm2, %v5243_v36 }
 0x211   :  { %4219 = vst.msk [vmem:[%s6234_s3 + $0x1e8] sm:$0xff] %vm898_vm2, %v5245_v37 }

</bundles_post_ra>
